<compile_context>
chip_gen: v5e
topology: v5e:2x2
jax: 0.10.0
libtpu: 0.0.40
codegen_flags: <defaults>
</compile_context>

<pallas_src>
import functools
import math

import jax
import jax.numpy as jnp
from jax.experimental import pallas as pl
from jax.experimental.pallas import tpu as pltpu


_LANES = 128  # lane width of both parameter slabs


def _round_up(x, m):
    return (x + m - 1) // m * m


# ----------------------------------------------------------------------------
# BlockSpec helper: whole-array block, trivial grid.
# ----------------------------------------------------------------------------
def _full_spec(shape):
    nd = len(shape)
    return pl.BlockSpec(shape, lambda i, _nd=nd: (0,) * _nd)


# ----------------------------------------------------------------------------
# In-kernel math helpers
# ----------------------------------------------------------------------------
def _layernorm(y, gamma, beta):
    mu = jnp.mean(y, axis=-1, keepdims=True)
    var = jnp.mean(jnp.square(y - mu), axis=-1, keepdims=True)
    return (y - mu) * jax.lax.rsqrt(var + 1e-5) * gamma + beta


def _silu(y):
    return y * jax.nn.sigmoid(y)


# ----------------------------------------------------------------------------
# Fused forward kernel: whole network in one invocation.
#   adj : (N, N)      dense masked adjacency incl. self loops (0/1 f32)
#   sel : (N, N*N)    block-diagonal selector, sel[i, i*N+j] = adj[i, j]
#   ef  : (N*N, 1)    normalized edge lengths, edge e = i*N + j
#   h   : (N, dn0)    node embeddings
#   w_ref : packed 2D weights slab   (rows, 128)
#   v_ref : packed 1D vectors slab   (rows, 128)
# cfg is a static (Python) description of layer structure + slab offsets.
# ----------------------------------------------------------------------------
def _fused_forward_kernel(adj_ref, sel_ref, ef_ref, h_ref, w_ref, v_ref,
                          out_ref, *, cfg):
    adj = adj_ref[...]
    sel = sel_ref[...]
    ef = ef_ref[...]
    h = h_ref[...]

    def W(off, rin, rout):               # static slab slice -> (rin, rout)
        return w_ref[off:off + rin, 0:rout]

    def V(row, dim):                     # static slab slice -> (1, dim)
        return v_ref[row:row + 1, 0:dim]

    for conv_cfg in cfg:
        # ---------------- edge MLP over all N*N ordered pairs ----------------
        ea = ef
        for (w_off, din, dout, b_row, ln, use_act) in conv_cfg["edge_layers"]:
            w = W(w_off, din, dout)
            b = V(b_row, dout)
            if din == 1:
                # K=1 linear layer == outer product: keep it on the VPU.
                ea = ea * w + b
            else:
                ea = jnp.dot(ea, w, preferred_element_type=jnp.float32) + b
            if ln is not None:
                ea = _layernorm(ea, V(ln[0], dout), V(ln[1], dout))
            if use_act:
                ea = _silu(ea)
        de = ea.shape[-1]

        # ------- message aggregation (sum over sources, incl. self loops) ----
        # hn[i] = sum_j adj[i,j] * x[j]              (MXU, K=N)
        # he[i] = sum_j adj[i,j] * ea[i*N+j, :]      (MXU via selector, K=N*N)
        hn = jnp.dot(adj, h, preferred_element_type=jnp.float32)   # (N, dn0)
        he = jnp.dot(sel, ea, preferred_element_type=jnp.float32)  # (N, de)

        # ---------------- residual projector (single matmul + in-tile split) -
        p_off, p_in, p_out, pb_row = conv_cfg["proj"]
        dn0 = p_in
        proj = (jnp.dot(h, W(p_off, p_in, p_out),
                        preferred_element_type=jnp.float32) + V(pb_row, p_out))
        h0n = hn + proj[:, :dn0]
        h0e = he + proj[:, dn0:p_out]

        # ---------------- node MLP --------------------------------------------
        # layer 0 consumes the (node, edge) halves separately -> no concat.
        (wn_off, we_off, d1, b_row, ln, use_act) = conv_cfg["node0"]
        y = (jnp.dot(h0n, W(wn_off, dn0, d1), preferred_element_type=jnp.float32)
             + jnp.dot(h0e, W(we_off, de, d1), preferred_element_type=jnp.float32)
             + V(b_row, d1))
        if ln is not None:
            y = _layernorm(y, V(ln[0], d1), V(ln[1], d1))
        if use_act:
            y = _silu(y)

        for (w_off, din, dout, b_row, ln, use_act) in conv_cfg["node_rest"]:
            y = (jnp.dot(y, W(w_off, din, dout),
                         preferred_element_type=jnp.float32) + V(b_row, dout))
            if ln is not None:
                y = _layernorm(y, V(ln[0], dout), V(ln[1], dout))
            if use_act:
                y = _silu(y)

        # ---------------- GraphNorm + SiLU between conv blocks ----------------
        gn = conv_cfg["graphnorm"]
        if gn is not None:
            dlast = y.shape[-1]
            gw = V(gn[0], dlast)
            gb = V(gn[1], dlast)
            gms = V(gn[2], dlast)
            mean = jnp.mean(y, axis=0, keepdims=True)
            centered = y - mean * gms
            var = jnp.mean(centered * centered, axis=0, keepdims=True)
            y = gw * centered * jax.lax.rsqrt(var + 1e-5) + gb
            y = _silu(y)

        h = y

    # data.batch is None -> h.mean((-2, -1))
    out_ref[...] = jnp.mean(h, axis=(0, 1), keepdims=True)


# ----------------------------------------------------------------------------
# Parameter initialization (deterministic, mirrors the PyTorch module init)
# ----------------------------------------------------------------------------
def _xavier(key, fan_in, fan_out):
    bound = math.sqrt(6.0 / (fan_in + fan_out))
    return jax.random.uniform(key, (fan_in, fan_out), jnp.float32, -bound, bound)


def _init_mlp(key, input_dim, hidden_dims, output_dim, final_ln, final_act):
    dims = [input_dim] + list(hidden_dims) + [output_dim]
    nlayers = len(dims) - 1
    keys = jax.random.split(key, nlayers)
    layers = []
    for i in range(nlayers):
        last = (i == nlayers - 1)
        layers.append(dict(
            w=_xavier(keys[i], dims[i], dims[i + 1]),          # stored (in, out)
            b=jnp.zeros((dims[i + 1],), jnp.float32),
            gamma=jnp.ones((dims[i + 1],), jnp.float32),
            beta=jnp.zeros((dims[i + 1],), jnp.float32),
            use_ln=(not last) or final_ln,
            use_act=(not last) or final_act,
        ))
    return layers


def _init_conv(key, node_dims, edge_dims, is_last):
    k1, k2, k3, k4 = jax.random.split(key, 4)
    node_in, edge_out = node_dims[0], edge_dims[-1]
    edge_mlp = _init_mlp(k1, edge_dims[0], edge_dims[1:-1], edge_dims[-1],
                         final_ln=False, final_act=False)
    node_mlp = _init_mlp(k2, node_in + edge_out, node_dims[1:-1], node_dims[-1],
                         final_ln=not is_last, final_act=not is_last)
    proj_w = _xavier(k3, node_in, node_in + edge_out)
    lim = 1.0 / math.sqrt(node_in)   # projector bias keeps default Linear init
    proj_b = jax.random.uniform(k4, (node_in + edge_out,), jnp.float32, -lim, lim)
    return dict(edge_mlp=edge_mlp, node_mlp=node_mlp, proj_w=proj_w, proj_b=proj_b)


def init_params(key, node_dimses, edge_dimses):
    n_convs = len(node_dimses)
    keys = jax.random.split(key, n_convs + 1)
    convs, gns = [], []
    for i, (nd, ed) in enumerate(zip(node_dimses, edge_dimses)):
        convs.append(_init_conv(keys[i], nd, ed, is_last=(i == n_convs - 1)))
        gns.append(dict(w=jnp.ones((nd[-1],), jnp.float32),
                        b=jnp.zeros((nd[-1],), jnp.float32),
                        ms=jnp.ones((nd[-1],), jnp.float32)))
    emb = jax.random.normal(keys[-1], (200, node_dimses[0][0]), jnp.float32)
    # self.alpha exists in the PyTorch module but is unused in forward.
    return dict(convs=convs, graphnorms=gns, emb=emb)


# ----------------------------------------------------------------------------
# Pack all parameters into two contiguous slabs (one DMA each):
#   wslab: 2D weights row-stacked, each block 8-row aligned, 128 lanes wide.
#   vslab: 1D vectors (biases / LN gamma,beta / GraphNorm), one row each.
# Returns (wslab, vslab, cfg) where cfg holds static slab offsets/dims.
# ----------------------------------------------------------------------------
def _pack_params(params):
    w_blocks, v_rows = [], []
    w_off = [0]

    def add_w(w):
        rin, rout = int(w.shape[0]), int(w.shape[1])
        assert rout <= _LANES
        rows_padded = _round_up(max(rin, 1), 8)
        blk = jnp.zeros((rows_padded, _LANES), jnp.float32).at[:rin, :rout].set(w)
        w_blocks.append(blk)
        off = w_off[0]
        w_off[0] += rows_padded
        return off, rin, rout

    def add_v(v):
        dim = int(v.shape[0])
        assert dim <= _LANES
        row = len(v_rows)
        v_rows.append(jnp.zeros((_LANES,), jnp.float32).at[:dim].set(v))
        return row

    cfg = []
    n_convs = len(params["convs"])
    for ci, conv in enumerate(params["convs"]):
        is_last = (ci == n_convs - 1)
        dn0 = int(conv["proj_w"].shape[0])

        edge_layers = []
        for layer in conv["edge_mlp"]:
            off, din, dout = add_w(layer["w"])
            b_row = add_v(layer["b"])
            ln = (add_v(layer["gamma"]), add_v(layer["beta"])) if layer["use_ln"] else None
            edge_layers.append((off, din, dout, b_row, ln, layer["use_act"]))

        p_off, p_in, p_out = add_w(conv["proj_w"])
        pb_row = add_v(conv["proj_b"])

        node0 = None
        node_rest = []
        for li, layer in enumerate(conv["node_mlp"]):
            b_row = add_v(layer["b"])
            ln = (add_v(layer["gamma"]), add_v(layer["beta"])) if layer["use_ln"] else None
            if li == 0:
                # split into node-feature rows / edge-feature rows (avoids concat)
                wn_off, _, d1 = add_w(layer["w"][:dn0])
                we_off, _, _ = add_w(layer["w"][dn0:])
                node0 = (wn_off, we_off, d1, b_row, ln, layer["use_act"])
            else:
                off, din, dout = add_w(layer["w"])
                node_rest.append((off, din, dout, b_row, ln, layer["use_act"]))

        gn = None
        if not is_last:
            g = params["graphnorms"][ci]
            gn = (add_v(g["w"]), add_v(g["b"]), add_v(g["ms"]))

        cfg.append(dict(edge_layers=tuple(edge_layers),
                        proj=(p_off, p_in, p_out, pb_row),
                        node0=node0,
                        node_rest=tuple(node_rest),
                        graphnorm=gn))

    wslab = jnp.concatenate(w_blocks, axis=0)
    vslab = jnp.stack(v_rows, axis=0)
    pad = _round_up(vslab.shape[0], 8) - vslab.shape[0]
    if pad:
        vslab = jnp.concatenate(
            [vslab, jnp.zeros((pad, _LANES), jnp.float32)], axis=0)
    return wslab, vslab, tuple(cfg)


# ----------------------------------------------------------------------------
# Forward builder: graph construction + embedding lookup are plain-JAX glue,
# everything else is the single fused pallas_call (6 operands total).
# ----------------------------------------------------------------------------
def make_m304b_forward(params, cutoff=10.0):
    wslab, vslab, cfg = _pack_params(params)
    emb = params["emb"]
    kern = functools.partial(_fused_forward_kernel, cfg=cfg)

    @jax.jit
    def forward(pos, atom_type):
        n = pos.shape[0]
        # dense all-pairs radius graph + self loops (glue, outside the kernel)
        diff = pos[:, None, :] - pos[None, :, :]
        dist = jnp.sqrt(jnp.sum(diff * diff, axis=-1))
        eye = jnp.eye(n, dtype=bool)
        mask = jnp.where(eye, True, dist < cutoff)
        # TODO(synk): radius_graph's max_num_neighbors truncation is not applied
        # (N <= max_neighbors and all pairs within cutoff at these sizes).
        adj = mask.astype(jnp.float32)
        # block-diagonal selector so he = sel @ ea runs on the MXU in-kernel
        sel = (jnp.eye(n, dtype=jnp.float32)[:, :, None]
               * adj[:, None, :]).reshape(n, n * n)
        ef = ((dist - 2.7554) / 1.1664).reshape(n * n, 1)   # normalized edge length
        h = emb[atom_type]                                  # embedding lookup (glue)

        inputs = [adj, sel, ef, h, wslab, vslab]
        out = pl.pallas_call(
            kern,
            grid=(1,),
            in_specs=[_full_spec(a.shape) for a in inputs],
            out_specs=_full_spec((1, 1)),
            out_shape=jax.ShapeDtypeStruct((1, 1), jnp.float32),
            compiler_params=pltpu.CompilerParams(
                dimension_semantics=("arbitrary",)),
        )(*inputs)
        return out[0, 0]

    return forward


# ----------------------------------------------------------------------------
if __name__ == "__main__":
    node_dimses = [[32, 64, 32], [32, 64, 32]]
    edge_dimses = [[1, 16, 16], [1, 16, 16]]
    N = 16

    root = jax.random.PRNGKey(0)
    k_params, k_pos, k_atom = jax.random.split(root, 3)
    params = init_params(k_params, node_dimses, edge_dimses)

    pos = jax.random.normal(k_pos, (N, 3), jnp.float32) * 2.0
    atom_type = jax.random.randint(k_atom, (N,), 0, 200)

    forward = make_m304b_forward(params, cutoff=10.0)
    out = forward(pos, atom_type)
    jax.block_until_ready(out)
    assert out.shape == () and jnp.isfinite(out)
    print("KERNEL_OK")
</pallas_src>

<mosaic_0001>
module attributes {stable_mosaic.version = 11 : i64} {
  func.func @_fused_forward_kernel(%arg0: i32, %arg1: memref<16x16xf32, #tpu.memory_space<vmem>>, %arg2: memref<16x256xf32, #tpu.memory_space<vmem>>, %arg3: memref<256x1xf32, #tpu.memory_space<vmem>>, %arg4: memref<16x32xf32, #tpu.memory_space<vmem>>, %arg5: memref<336x128xf32, #tpu.memory_space<vmem>>, %arg6: memref<24x128xf32, #tpu.memory_space<vmem>>, %arg7: memref<1x1xf32, #tpu.memory_space<vmem>>) attributes {dimension_semantics = [#tpu.dimension_semantics<arbitrary>], iteration_bounds = array<i64: 1>, scalar_prefetch = 0 : i64, scratch_operands = 0 : i64, tpu.core_type = #tpu.core_type<tc>, window_params = [{pipeline_mode = #tpu.pipeline_mode<synchronous>, transform_indices = @transform_0, window_bounds = array<i64: 16, 16>}, {pipeline_mode = #tpu.pipeline_mode<synchronous>, transform_indices = @transform_1, window_bounds = array<i64: 16, 256>}, {pipeline_mode = #tpu.pipeline_mode<synchronous>, transform_indices = @transform_2, window_bounds = array<i64: 256, 1>}, {pipeline_mode = #tpu.pipeline_mode<synchronous>, transform_indices = @transform_3, window_bounds = array<i64: 16, 32>}, {pipeline_mode = #tpu.pipeline_mode<synchronous>, transform_indices = @transform_4, window_bounds = array<i64: 336, 128>}, {pipeline_mode = #tpu.pipeline_mode<synchronous>, transform_indices = @transform_5, window_bounds = array<i64: 24, 128>}, {pipeline_mode = #tpu.pipeline_mode<synchronous>, transform_indices = @transform_6, window_bounds = array<i64: 1, 1>}]} {
    %c0 = arith.constant 0 : index
    %c0_0 = arith.constant 0 : index
    %0 = vector.load %arg1[%c0, %c0_0] : memref<16x16xf32, #tpu.memory_space<vmem>>, vector<16x16xf32>
    %c0_1 = arith.constant 0 : index
    %c0_2 = arith.constant 0 : index
    %1 = vector.load %arg2[%c0_1, %c0_2] : memref<16x256xf32, #tpu.memory_space<vmem>>, vector<16x256xf32>
    %c0_3 = arith.constant 0 : index
    %c0_4 = arith.constant 0 : index
    %2 = vector.load %arg3[%c0_3, %c0_4] : memref<256x1xf32, #tpu.memory_space<vmem>>, vector<256x1xf32>
    %c0_5 = arith.constant 0 : index
    %c0_6 = arith.constant 0 : index
    %3 = vector.load %arg4[%c0_5, %c0_6] : memref<16x32xf32, #tpu.memory_space<vmem>>, vector<16x32xf32>
    %c0_7 = arith.constant 0 : index
    %c0_8 = arith.constant 0 : index
    %4 = vector.load %arg5[%c0_7, %c0_8] : memref<336x128xf32, #tpu.memory_space<vmem>>, vector<1x16xf32>
    %c0_9 = arith.constant 0 : index
    %c0_10 = arith.constant 0 : index
    %5 = vector.load %arg6[%c0_9, %c0_10] : memref<24x128xf32, #tpu.memory_space<vmem>>, vector<1x16xf32>
    %6 = vector.broadcast %2 : vector<256x1xf32> to vector<256x16xf32>
    %7 = vector.broadcast %4 : vector<1x16xf32> to vector<256x16xf32>
    %8 = arith.mulf %6, %7 : vector<256x16xf32>
    %9 = vector.broadcast %5 : vector<1x16xf32> to vector<256x16xf32>
    %10 = arith.addf %8, %9 : vector<256x16xf32>
    %c1 = arith.constant 1 : index
    %c0_11 = arith.constant 0 : index
    %11 = vector.load %arg6[%c1, %c0_11] : memref<24x128xf32, #tpu.memory_space<vmem>>, vector<1x16xf32>
    %c2 = arith.constant 2 : index
    %c0_12 = arith.constant 0 : index
    %12 = vector.load %arg6[%c2, %c0_12] : memref<24x128xf32, #tpu.memory_space<vmem>>, vector<1x16xf32>
    %cst = arith.constant dense<0.000000e+00> : vector<256xf32>
    %13 = vector.multi_reduction <add>, %10, %cst [1] : vector<256x16xf32> to vector<256xf32>
    %14 = vector.shape_cast %13 : vector<256xf32> to vector<256x1xf32>
    %cst_13 = arith.constant 1.600000e+01 : f32
    %15 = vector.broadcast %cst_13 : f32 to vector<256x1xf32>
    %16 = arith.divf %14, %15 : vector<256x1xf32>
    %17 = vector.broadcast %16 : vector<256x1xf32> to vector<256x16xf32>
    %18 = arith.subf %10, %17 : vector<256x16xf32>
    %19 = arith.mulf %18, %18 : vector<256x16xf32>
    %cst_14 = arith.constant dense<0.000000e+00> : vector<256xf32>
    %20 = vector.multi_reduction <add>, %19, %cst_14 [1] : vector<256x16xf32> to vector<256xf32>
    %21 = vector.shape_cast %20 : vector<256xf32> to vector<256x1xf32>
    %cst_15 = arith.constant 1.600000e+01 : f32
    %22 = vector.broadcast %cst_15 : f32 to vector<256x1xf32>
    %23 = arith.divf %21, %22 : vector<256x1xf32>
    %24 = vector.broadcast %16 : vector<256x1xf32> to vector<256x16xf32>
    %25 = arith.subf %10, %24 : vector<256x16xf32>
    %cst_16 = arith.constant 9.99999974E-6 : f32
    %26 = vector.broadcast %cst_16 : f32 to vector<256x1xf32>
    %27 = arith.addf %23, %26 : vector<256x1xf32>
    %28 = math.rsqrt %27 : vector<256x1xf32>
    %29 = vector.broadcast %28 : vector<256x1xf32> to vector<256x16xf32>
    %30 = arith.mulf %25, %29 : vector<256x16xf32>
    %31 = vector.broadcast %11 : vector<1x16xf32> to vector<256x16xf32>
    %32 = arith.mulf %30, %31 : vector<256x16xf32>
    %33 = vector.broadcast %12 : vector<1x16xf32> to vector<256x16xf32>
    %34 = arith.addf %32, %33 : vector<256x16xf32>
    %35 = arith.negf %34 : vector<256x16xf32>
    %36 = math.exp %35 : vector<256x16xf32>
    %cst_17 = arith.constant 1.000000e+00 : f32
    %37 = vector.broadcast %cst_17 : f32 to vector<256x16xf32>
    %38 = arith.addf %37, %36 : vector<256x16xf32>
    %39 = arith.divf %37, %38 : vector<256x16xf32>
    %40 = arith.mulf %34, %39 : vector<256x16xf32>
    %c8 = arith.constant 8 : index
    %c0_18 = arith.constant 0 : index
    %41 = vector.load %arg5[%c8, %c0_18] : memref<336x128xf32, #tpu.memory_space<vmem>>, vector<16x16xf32>
    %c3 = arith.constant 3 : index
    %c0_19 = arith.constant 0 : index
    %42 = vector.load %arg6[%c3, %c0_19] : memref<24x128xf32, #tpu.memory_space<vmem>>, vector<1x16xf32>
    %cst_20 = arith.constant dense<0.000000e+00> : vector<256x16xf32>
    %43 = tpu.matmul %40, %41, %cst_20 {dimension_numbers = #tpu.dot_dimension_numbers<[1], [0], [0], [1], [0, 0, 1, 1], [], []>} : vector<256x16xf32>, vector<16x16xf32>, vector<256x16xf32> -> vector<256x16xf32>
    %44 = vector.broadcast %42 : vector<1x16xf32> to vector<256x16xf32>
    %45 = arith.addf %43, %44 : vector<256x16xf32>
    %cst_21 = arith.constant dense<0.000000e+00> : vector<16x32xf32>
    %46 = tpu.matmul %0, %3, %cst_21 {dimension_numbers = #tpu.dot_dimension_numbers<[1], [0], [0], [1], [0, 0, 1, 1], [], []>} : vector<16x16xf32>, vector<16x32xf32>, vector<16x32xf32> -> vector<16x32xf32>
    %cst_22 = arith.constant dense<0.000000e+00> : vector<16x16xf32>
    %47 = tpu.matmul %1, %45, %cst_22 {dimension_numbers = #tpu.dot_dimension_numbers<[1], [0], [0], [1], [0, 0, 1, 1], [], []>} : vector<16x256xf32>, vector<256x16xf32>, vector<16x16xf32> -> vector<16x16xf32>
    %c24 = arith.constant 24 : index
    %c0_23 = arith.constant 0 : index
    %48 = vector.load %arg5[%c24, %c0_23] : memref<336x128xf32, #tpu.memory_space<vmem>>, vector<32x48xf32>
    %cst_24 = arith.constant dense<0.000000e+00> : vector<16x48xf32>
    %49 = tpu.matmul %3, %48, %cst_24 {dimension_numbers = #tpu.dot_dimension_numbers<[1], [0], [0], [1], [0, 0, 1, 1], [], []>} : vector<16x32xf32>, vector<32x48xf32>, vector<16x48xf32> -> vector<16x48xf32>
    %c4 = arith.constant 4 : index
    %c0_25 = arith.constant 0 : index
    %50 = vector.load %arg6[%c4, %c0_25] : memref<24x128xf32, #tpu.memory_space<vmem>>, vector<1x48xf32>
    %51 = vector.broadcast %50 : vector<1x48xf32> to vector<16x48xf32>
    %52 = arith.addf %49, %51 : vector<16x48xf32>
    %53 = vector.extract_strided_slice %52 {offsets = [0, 0], sizes = [16, 32], strides = [1, 1]} : vector<16x48xf32> to vector<16x32xf32>
    %54 = arith.addf %46, %53 : vector<16x32xf32>
    %55 = vector.extract_strided_slice %52 {offsets = [0, 32], sizes = [16, 16], strides = [1, 1]} : vector<16x48xf32> to vector<16x16xf32>
    %56 = arith.addf %47, %55 : vector<16x16xf32>
    %c56 = arith.constant 56 : index
    %c0_26 = arith.constant 0 : index
    %57 = vector.load %arg5[%c56, %c0_26] : memref<336x128xf32, #tpu.memory_space<vmem>>, vector<32x64xf32>
    %cst_27 = arith.constant dense<0.000000e+00> : vector<16x64xf32>
    %58 = tpu.matmul %54, %57, %cst_27 {dimension_numbers = #tpu.dot_dimension_numbers<[1], [0], [0], [1], [0, 0, 1, 1], [], []>} : vector<16x32xf32>, vector<32x64xf32>, vector<16x64xf32> -> vector<16x64xf32>
    %c88 = arith.constant 88 : index
    %c0_28 = arith.constant 0 : index
    %59 = vector.load %arg5[%c88, %c0_28] : memref<336x128xf32, #tpu.memory_space<vmem>>, vector<16x64xf32>
    %cst_29 = arith.constant dense<0.000000e+00> : vector<16x64xf32>
    %60 = tpu.matmul %56, %59, %cst_29 {dimension_numbers = #tpu.dot_dimension_numbers<[1], [0], [0], [1], [0, 0, 1, 1], [], []>} : vector<16x16xf32>, vector<16x64xf32>, vector<16x64xf32> -> vector<16x64xf32>
    %61 = arith.addf %58, %60 : vector<16x64xf32>
    %c5 = arith.constant 5 : index
    %c0_30 = arith.constant 0 : index
    %62 = vector.load %arg6[%c5, %c0_30] : memref<24x128xf32, #tpu.memory_space<vmem>>, vector<1x64xf32>
    %63 = vector.broadcast %62 : vector<1x64xf32> to vector<16x64xf32>
    %64 = arith.addf %61, %63 : vector<16x64xf32>
    %c6 = arith.constant 6 : index
    %c0_31 = arith.constant 0 : index
    %65 = vector.load %arg6[%c6, %c0_31] : memref<24x128xf32, #tpu.memory_space<vmem>>, vector<1x64xf32>
    %c7 = arith.constant 7 : index
    %c0_32 = arith.constant 0 : index
    %66 = vector.load %arg6[%c7, %c0_32] : memref<24x128xf32, #tpu.memory_space<vmem>>, vector<1x64xf32>
    %cst_33 = arith.constant dense<0.000000e+00> : vector<16xf32>
    %67 = vector.multi_reduction <add>, %64, %cst_33 [1] : vector<16x64xf32> to vector<16xf32>
    %68 = vector.shape_cast %67 : vector<16xf32> to vector<16x1xf32>
    %cst_34 = arith.constant 6.400000e+01 : f32
    %69 = vector.broadcast %cst_34 : f32 to vector<16x1xf32>
    %70 = arith.divf %68, %69 : vector<16x1xf32>
    %71 = vector.broadcast %70 : vector<16x1xf32> to vector<16x64xf32>
    %72 = arith.subf %64, %71 : vector<16x64xf32>
    %73 = arith.mulf %72, %72 : vector<16x64xf32>
    %cst_35 = arith.constant dense<0.000000e+00> : vector<16xf32>
    %74 = vector.multi_reduction <add>, %73, %cst_35 [1] : vector<16x64xf32> to vector<16xf32>
    %75 = vector.shape_cast %74 : vector<16xf32> to vector<16x1xf32>
    %cst_36 = arith.constant 6.400000e+01 : f32
    %76 = vector.broadcast %cst_36 : f32 to vector<16x1xf32>
    %77 = arith.divf %75, %76 : vector<16x1xf32>
    %78 = vector.broadcast %70 : vector<16x1xf32> to vector<16x64xf32>
    %79 = arith.subf %64, %78 : vector<16x64xf32>
    %cst_37 = arith.constant 9.99999974E-6 : f32
    %80 = vector.broadcast %cst_37 : f32 to vector<16x1xf32>
    %81 = arith.addf %77, %80 : vector<16x1xf32>
    %82 = math.rsqrt %81 : vector<16x1xf32>
    %83 = vector.broadcast %82 : vector<16x1xf32> to vector<16x64xf32>
    %84 = arith.mulf %79, %83 : vector<16x64xf32>
    %85 = vector.broadcast %65 : vector<1x64xf32> to vector<16x64xf32>
    %86 = arith.mulf %84, %85 : vector<16x64xf32>
    %87 = vector.broadcast %66 : vector<1x64xf32> to vector<16x64xf32>
    %88 = arith.addf %86, %87 : vector<16x64xf32>
    %89 = arith.negf %88 : vector<16x64xf32>
    %90 = math.exp %89 : vector<16x64xf32>
    %cst_38 = arith.constant 1.000000e+00 : f32
    %91 = vector.broadcast %cst_38 : f32 to vector<16x64xf32>
    %92 = arith.addf %91, %90 : vector<16x64xf32>
    %93 = arith.divf %91, %92 : vector<16x64xf32>
    %94 = arith.mulf %88, %93 : vector<16x64xf32>
    %c104 = arith.constant 104 : index
    %c0_39 = arith.constant 0 : index
    %95 = vector.load %arg5[%c104, %c0_39] : memref<336x128xf32, #tpu.memory_space<vmem>>, vector<64x32xf32>
    %cst_40 = arith.constant dense<0.000000e+00> : vector<16x32xf32>
    %96 = tpu.matmul %94, %95, %cst_40 {dimension_numbers = #tpu.dot_dimension_numbers<[1], [0], [0], [1], [0, 0, 1, 1], [], []>} : vector<16x64xf32>, vector<64x32xf32>, vector<16x32xf32> -> vector<16x32xf32>
    %c8_41 = arith.constant 8 : index
    %c0_42 = arith.constant 0 : index
    %97 = vector.load %arg6[%c8_41, %c0_42] : memref<24x128xf32, #tpu.memory_space<vmem>>, vector<1x32xf32>
    %98 = vector.broadcast %97 : vector<1x32xf32> to vector<16x32xf32>
    %99 = arith.addf %96, %98 : vector<16x32xf32>
    %c9 = arith.constant 9 : index
    %c0_43 = arith.constant 0 : index
    %100 = vector.load %arg6[%c9, %c0_43] : memref<24x128xf32, #tpu.memory_space<vmem>>, vector<1x32xf32>
    %c10 = arith.constant 10 : index
    %c0_44 = arith.constant 0 : index
    %101 = vector.load %arg6[%c10, %c0_44] : memref<24x128xf32, #tpu.memory_space<vmem>>, vector<1x32xf32>
    %cst_45 = arith.constant dense<0.000000e+00> : vector<16xf32>
    %102 = vector.multi_reduction <add>, %99, %cst_45 [1] : vector<16x32xf32> to vector<16xf32>
    %103 = vector.shape_cast %102 : vector<16xf32> to vector<16x1xf32>
    %cst_46 = arith.constant 3.200000e+01 : f32
    %104 = vector.broadcast %cst_46 : f32 to vector<16x1xf32>
    %105 = arith.divf %103, %104 : vector<16x1xf32>
    %106 = vector.broadcast %105 : vector<16x1xf32> to vector<16x32xf32>
    %107 = arith.subf %99, %106 : vector<16x32xf32>
    %108 = arith.mulf %107, %107 : vector<16x32xf32>
    %cst_47 = arith.constant dense<0.000000e+00> : vector<16xf32>
    %109 = vector.multi_reduction <add>, %108, %cst_47 [1] : vector<16x32xf32> to vector<16xf32>
    %110 = vector.shape_cast %109 : vector<16xf32> to vector<16x1xf32>
    %cst_48 = arith.constant 3.200000e+01 : f32
    %111 = vector.broadcast %cst_48 : f32 to vector<16x1xf32>
    %112 = arith.divf %110, %111 : vector<16x1xf32>
    %113 = vector.broadcast %105 : vector<16x1xf32> to vector<16x32xf32>
    %114 = arith.subf %99, %113 : vector<16x32xf32>
    %cst_49 = arith.constant 9.99999974E-6 : f32
    %115 = vector.broadcast %cst_49 : f32 to vector<16x1xf32>
    %116 = arith.addf %112, %115 : vector<16x1xf32>
    %117 = math.rsqrt %116 : vector<16x1xf32>
    %118 = vector.broadcast %117 : vector<16x1xf32> to vector<16x32xf32>
    %119 = arith.mulf %114, %118 : vector<16x32xf32>
    %120 = vector.broadcast %100 : vector<1x32xf32> to vector<16x32xf32>
    %121 = arith.mulf %119, %120 : vector<16x32xf32>
    %122 = vector.broadcast %101 : vector<1x32xf32> to vector<16x32xf32>
    %123 = arith.addf %121, %122 : vector<16x32xf32>
    %124 = arith.negf %123 : vector<16x32xf32>
    %125 = math.exp %124 : vector<16x32xf32>
    %cst_50 = arith.constant 1.000000e+00 : f32
    %126 = vector.broadcast %cst_50 : f32 to vector<16x32xf32>
    %127 = arith.addf %126, %125 : vector<16x32xf32>
    %128 = arith.divf %126, %127 : vector<16x32xf32>
    %129 = arith.mulf %123, %128 : vector<16x32xf32>
    %c11 = arith.constant 11 : index
    %c0_51 = arith.constant 0 : index
    %130 = vector.load %arg6[%c11, %c0_51] : memref<24x128xf32, #tpu.memory_space<vmem>>, vector<1x32xf32>
    %c12 = arith.constant 12 : index
    %c0_52 = arith.constant 0 : index
    %131 = vector.load %arg6[%c12, %c0_52] : memref<24x128xf32, #tpu.memory_space<vmem>>, vector<1x32xf32>
    %c13 = arith.constant 13 : index
    %c0_53 = arith.constant 0 : index
    %132 = vector.load %arg6[%c13, %c0_53] : memref<24x128xf32, #tpu.memory_space<vmem>>, vector<1x32xf32>
    %cst_54 = arith.constant dense<0.000000e+00> : vector<32xf32>
    %133 = vector.multi_reduction <add>, %129, %cst_54 [0] : vector<16x32xf32> to vector<32xf32>
    %134 = vector.shape_cast %133 : vector<32xf32> to vector<1x32xf32>
    %cst_55 = arith.constant 1.600000e+01 : f32
    %135 = vector.broadcast %cst_55 : f32 to vector<1x32xf32>
    %136 = arith.divf %134, %135 : vector<1x32xf32>
    %137 = arith.mulf %136, %132 : vector<1x32xf32>
    %138 = vector.broadcast %137 : vector<1x32xf32> to vector<16x32xf32>
    %139 = arith.subf %129, %138 : vector<16x32xf32>
    %140 = arith.mulf %139, %139 : vector<16x32xf32>
    %cst_56 = arith.constant dense<0.000000e+00> : vector<32xf32>
    %141 = vector.multi_reduction <add>, %140, %cst_56 [0] : vector<16x32xf32> to vector<32xf32>
    %142 = vector.shape_cast %141 : vector<32xf32> to vector<1x32xf32>
    %cst_57 = arith.constant 1.600000e+01 : f32
    %143 = vector.broadcast %cst_57 : f32 to vector<1x32xf32>
    %144 = arith.divf %142, %143 : vector<1x32xf32>
    %145 = vector.broadcast %130 : vector<1x32xf32> to vector<16x32xf32>
    %146 = arith.mulf %145, %139 : vector<16x32xf32>
    %cst_58 = arith.constant 9.99999974E-6 : f32
    %147 = vector.broadcast %cst_58 : f32 to vector<1x32xf32>
    %148 = arith.addf %144, %147 : vector<1x32xf32>
    %149 = math.rsqrt %148 : vector<1x32xf32>
    %150 = vector.broadcast %149 : vector<1x32xf32> to vector<16x32xf32>
    %151 = arith.mulf %146, %150 : vector<16x32xf32>
    %152 = vector.broadcast %131 : vector<1x32xf32> to vector<16x32xf32>
    %153 = arith.addf %151, %152 : vector<16x32xf32>
    %154 = arith.negf %153 : vector<16x32xf32>
    %155 = math.exp %154 : vector<16x32xf32>
    %cst_59 = arith.constant 1.000000e+00 : f32
    %156 = vector.broadcast %cst_59 : f32 to vector<16x32xf32>
    %157 = arith.addf %156, %155 : vector<16x32xf32>
    %158 = arith.divf %156, %157 : vector<16x32xf32>
    %159 = arith.mulf %153, %158 : vector<16x32xf32>
    %c168 = arith.constant 168 : index
    %c0_60 = arith.constant 0 : index
    %160 = vector.load %arg5[%c168, %c0_60] : memref<336x128xf32, #tpu.memory_space<vmem>>, vector<1x16xf32>
    %c14 = arith.constant 14 : index
    %c0_61 = arith.constant 0 : index
    %161 = vector.load %arg6[%c14, %c0_61] : memref<24x128xf32, #tpu.memory_space<vmem>>, vector<1x16xf32>
    %162 = vector.broadcast %2 : vector<256x1xf32> to vector<256x16xf32>
    %163 = vector.broadcast %160 : vector<1x16xf32> to vector<256x16xf32>
    %164 = arith.mulf %162, %163 : vector<256x16xf32>
    %165 = vector.broadcast %161 : vector<1x16xf32> to vector<256x16xf32>
    %166 = arith.addf %164, %165 : vector<256x16xf32>
    %c15 = arith.constant 15 : index
    %c0_62 = arith.constant 0 : index
    %167 = vector.load %arg6[%c15, %c0_62] : memref<24x128xf32, #tpu.memory_space<vmem>>, vector<1x16xf32>
    %c16 = arith.constant 16 : index
    %c0_63 = arith.constant 0 : index
    %168 = vector.load %arg6[%c16, %c0_63] : memref<24x128xf32, #tpu.memory_space<vmem>>, vector<1x16xf32>
    %cst_64 = arith.constant dense<0.000000e+00> : vector<256xf32>
    %169 = vector.multi_reduction <add>, %166, %cst_64 [1] : vector<256x16xf32> to vector<256xf32>
    %170 = vector.shape_cast %169 : vector<256xf32> to vector<256x1xf32>
    %cst_65 = arith.constant 1.600000e+01 : f32
    %171 = vector.broadcast %cst_65 : f32 to vector<256x1xf32>
    %172 = arith.divf %170, %171 : vector<256x1xf32>
    %173 = vector.broadcast %172 : vector<256x1xf32> to vector<256x16xf32>
    %174 = arith.subf %166, %173 : vector<256x16xf32>
    %175 = arith.mulf %174, %174 : vector<256x16xf32>
    %cst_66 = arith.constant dense<0.000000e+00> : vector<256xf32>
    %176 = vector.multi_reduction <add>, %175, %cst_66 [1] : vector<256x16xf32> to vector<256xf32>
    %177 = vector.shape_cast %176 : vector<256xf32> to vector<256x1xf32>
    %cst_67 = arith.constant 1.600000e+01 : f32
    %178 = vector.broadcast %cst_67 : f32 to vector<256x1xf32>
    %179 = arith.divf %177, %178 : vector<256x1xf32>
    %180 = vector.broadcast %172 : vector<256x1xf32> to vector<256x16xf32>
    %181 = arith.subf %166, %180 : vector<256x16xf32>
    %cst_68 = arith.constant 9.99999974E-6 : f32
    %182 = vector.broadcast %cst_68 : f32 to vector<256x1xf32>
    %183 = arith.addf %179, %182 : vector<256x1xf32>
    %184 = math.rsqrt %183 : vector<256x1xf32>
    %185 = vector.broadcast %184 : vector<256x1xf32> to vector<256x16xf32>
    %186 = arith.mulf %181, %185 : vector<256x16xf32>
    %187 = vector.broadcast %167 : vector<1x16xf32> to vector<256x16xf32>
    %188 = arith.mulf %186, %187 : vector<256x16xf32>
    %189 = vector.broadcast %168 : vector<1x16xf32> to vector<256x16xf32>
    %190 = arith.addf %188, %189 : vector<256x16xf32>
    %191 = arith.negf %190 : vector<256x16xf32>
    %192 = math.exp %191 : vector<256x16xf32>
    %cst_69 = arith.constant 1.000000e+00 : f32
    %193 = vector.broadcast %cst_69 : f32 to vector<256x16xf32>
    %194 = arith.addf %193, %192 : vector<256x16xf32>
    %195 = arith.divf %193, %194 : vector<256x16xf32>
    %196 = arith.mulf %190, %195 : vector<256x16xf32>
    %c176 = arith.constant 176 : index
    %c0_70 = arith.constant 0 : index
    %197 = vector.load %arg5[%c176, %c0_70] : memref<336x128xf32, #tpu.memory_space<vmem>>, vector<16x16xf32>
    %c17 = arith.constant 17 : index
    %c0_71 = arith.constant 0 : index
    %198 = vector.load %arg6[%c17, %c0_71] : memref<24x128xf32, #tpu.memory_space<vmem>>, vector<1x16xf32>
    %cst_72 = arith.constant dense<0.000000e+00> : vector<256x16xf32>
    %199 = tpu.matmul %196, %197, %cst_72 {dimension_numbers = #tpu.dot_dimension_numbers<[1], [0], [0], [1], [0, 0, 1, 1], [], []>} : vector<256x16xf32>, vector<16x16xf32>, vector<256x16xf32> -> vector<256x16xf32>
    %200 = vector.broadcast %198 : vector<1x16xf32> to vector<256x16xf32>
    %201 = arith.addf %199, %200 : vector<256x16xf32>
    %cst_73 = arith.constant dense<0.000000e+00> : vector<16x32xf32>
    %202 = tpu.matmul %0, %159, %cst_73 {dimension_numbers = #tpu.dot_dimension_numbers<[1], [0], [0], [1], [0, 0, 1, 1], [], []>} : vector<16x16xf32>, vector<16x32xf32>, vector<16x32xf32> -> vector<16x32xf32>
    %cst_74 = arith.constant dense<0.000000e+00> : vector<16x16xf32>
    %203 = tpu.matmul %1, %201, %cst_74 {dimension_numbers = #tpu.dot_dimension_numbers<[1], [0], [0], [1], [0, 0, 1, 1], [], []>} : vector<16x256xf32>, vector<256x16xf32>, vector<16x16xf32> -> vector<16x16xf32>
    %c192 = arith.constant 192 : index
    %c0_75 = arith.constant 0 : index
    %204 = vector.load %arg5[%c192, %c0_75] : memref<336x128xf32, #tpu.memory_space<vmem>>, vector<32x48xf32>
    %cst_76 = arith.constant dense<0.000000e+00> : vector<16x48xf32>
    %205 = tpu.matmul %159, %204, %cst_76 {dimension_numbers = #tpu.dot_dimension_numbers<[1], [0], [0], [1], [0, 0, 1, 1], [], []>} : vector<16x32xf32>, vector<32x48xf32>, vector<16x48xf32> -> vector<16x48xf32>
    %c18 = arith.constant 18 : index
    %c0_77 = arith.constant 0 : index
    %206 = vector.load %arg6[%c18, %c0_77] : memref<24x128xf32, #tpu.memory_space<vmem>>, vector<1x48xf32>
    %207 = vector.broadcast %206 : vector<1x48xf32> to vector<16x48xf32>
    %208 = arith.addf %205, %207 : vector<16x48xf32>
    %209 = vector.extract_strided_slice %208 {offsets = [0, 0], sizes = [16, 32], strides = [1, 1]} : vector<16x48xf32> to vector<16x32xf32>
    %210 = arith.addf %202, %209 : vector<16x32xf32>
    %211 = vector.extract_strided_slice %208 {offsets = [0, 32], sizes = [16, 16], strides = [1, 1]} : vector<16x48xf32> to vector<16x16xf32>
    %212 = arith.addf %203, %211 : vector<16x16xf32>
    %c224 = arith.constant 224 : index
    %c0_78 = arith.constant 0 : index
    %213 = vector.load %arg5[%c224, %c0_78] : memref<336x128xf32, #tpu.memory_space<vmem>>, vector<32x64xf32>
    %cst_79 = arith.constant dense<0.000000e+00> : vector<16x64xf32>
    %214 = tpu.matmul %210, %213, %cst_79 {dimension_numbers = #tpu.dot_dimension_numbers<[1], [0], [0], [1], [0, 0, 1, 1], [], []>} : vector<16x32xf32>, vector<32x64xf32>, vector<16x64xf32> -> vector<16x64xf32>
    %c256 = arith.constant 256 : index
    %c0_80 = arith.constant 0 : index
    %215 = vector.load %arg5[%c256, %c0_80] : memref<336x128xf32, #tpu.memory_space<vmem>>, vector<16x64xf32>
    %cst_81 = arith.constant dense<0.000000e+00> : vector<16x64xf32>
    %216 = tpu.matmul %212, %215, %cst_81 {dimension_numbers = #tpu.dot_dimension_numbers<[1], [0], [0], [1], [0, 0, 1, 1], [], []>} : vector<16x16xf32>, vector<16x64xf32>, vector<16x64xf32> -> vector<16x64xf32>
    %217 = arith.addf %214, %216 : vector<16x64xf32>
    %c19 = arith.constant 19 : index
    %c0_82 = arith.constant 0 : index
    %218 = vector.load %arg6[%c19, %c0_82] : memref<24x128xf32, #tpu.memory_space<vmem>>, vector<1x64xf32>
    %219 = vector.broadcast %218 : vector<1x64xf32> to vector<16x64xf32>
    %220 = arith.addf %217, %219 : vector<16x64xf32>
    %c20 = arith.constant 20 : index
    %c0_83 = arith.constant 0 : index
    %221 = vector.load %arg6[%c20, %c0_83] : memref<24x128xf32, #tpu.memory_space<vmem>>, vector<1x64xf32>
    %c21 = arith.constant 21 : index
    %c0_84 = arith.constant 0 : index
    %222 = vector.load %arg6[%c21, %c0_84] : memref<24x128xf32, #tpu.memory_space<vmem>>, vector<1x64xf32>
    %cst_85 = arith.constant dense<0.000000e+00> : vector<16xf32>
    %223 = vector.multi_reduction <add>, %220, %cst_85 [1] : vector<16x64xf32> to vector<16xf32>
    %224 = vector.shape_cast %223 : vector<16xf32> to vector<16x1xf32>
    %cst_86 = arith.constant 6.400000e+01 : f32
    %225 = vector.broadcast %cst_86 : f32 to vector<16x1xf32>
    %226 = arith.divf %224, %225 : vector<16x1xf32>
    %227 = vector.broadcast %226 : vector<16x1xf32> to vector<16x64xf32>
    %228 = arith.subf %220, %227 : vector<16x64xf32>
    %229 = arith.mulf %228, %228 : vector<16x64xf32>
    %cst_87 = arith.constant dense<0.000000e+00> : vector<16xf32>
    %230 = vector.multi_reduction <add>, %229, %cst_87 [1] : vector<16x64xf32> to vector<16xf32>
    %231 = vector.shape_cast %230 : vector<16xf32> to vector<16x1xf32>
    %cst_88 = arith.constant 6.400000e+01 : f32
    %232 = vector.broadcast %cst_88 : f32 to vector<16x1xf32>
    %233 = arith.divf %231, %232 : vector<16x1xf32>
    %234 = vector.broadcast %226 : vector<16x1xf32> to vector<16x64xf32>
    %235 = arith.subf %220, %234 : vector<16x64xf32>
    %cst_89 = arith.constant 9.99999974E-6 : f32
    %236 = vector.broadcast %cst_89 : f32 to vector<16x1xf32>
    %237 = arith.addf %233, %236 : vector<16x1xf32>
    %238 = math.rsqrt %237 : vector<16x1xf32>
    %239 = vector.broadcast %238 : vector<16x1xf32> to vector<16x64xf32>
    %240 = arith.mulf %235, %239 : vector<16x64xf32>
    %241 = vector.broadcast %221 : vector<1x64xf32> to vector<16x64xf32>
    %242 = arith.mulf %240, %241 : vector<16x64xf32>
    %243 = vector.broadcast %222 : vector<1x64xf32> to vector<16x64xf32>
    %244 = arith.addf %242, %243 : vector<16x64xf32>
    %245 = arith.negf %244 : vector<16x64xf32>
    %246 = math.exp %245 : vector<16x64xf32>
    %cst_90 = arith.constant 1.000000e+00 : f32
    %247 = vector.broadcast %cst_90 : f32 to vector<16x64xf32>
    %248 = arith.addf %247, %246 : vector<16x64xf32>
    %249 = arith.divf %247, %248 : vector<16x64xf32>
    %250 = arith.mulf %244, %249 : vector<16x64xf32>
    %c272 = arith.constant 272 : index
    %c0_91 = arith.constant 0 : index
    %251 = vector.load %arg5[%c272, %c0_91] : memref<336x128xf32, #tpu.memory_space<vmem>>, vector<64x32xf32>
    %cst_92 = arith.constant dense<0.000000e+00> : vector<16x32xf32>
    %252 = tpu.matmul %250, %251, %cst_92 {dimension_numbers = #tpu.dot_dimension_numbers<[1], [0], [0], [1], [0, 0, 1, 1], [], []>} : vector<16x64xf32>, vector<64x32xf32>, vector<16x32xf32> -> vector<16x32xf32>
    %c22 = arith.constant 22 : index
    %c0_93 = arith.constant 0 : index
    %253 = vector.load %arg6[%c22, %c0_93] : memref<24x128xf32, #tpu.memory_space<vmem>>, vector<1x32xf32>
    %254 = vector.broadcast %253 : vector<1x32xf32> to vector<16x32xf32>
    %255 = arith.addf %252, %254 : vector<16x32xf32>
    %256 = vector.shape_cast %255 : vector<16x32xf32> to vector<1x16x32xf32>
    %cst_94 = arith.constant dense<0.000000e+00> : vector<1xf32>
    %257 = vector.multi_reduction <add>, %256, %cst_94 [1, 2] : vector<1x16x32xf32> to vector<1xf32>
    %258 = vector.shape_cast %257 : vector<1xf32> to vector<1x1x1xf32>
    %259 = vector.extract %258[0, 0, 0] : f32 from vector<1x1x1xf32>
    %260 = vector.broadcast %259 : f32 to vector<1x1xf32>
    %cst_95 = arith.constant 5.120000e+02 : f32
    %261 = vector.broadcast %cst_95 : f32 to vector<1x1xf32>
    %262 = arith.divf %260, %261 : vector<1x1xf32>
    %c0_96 = arith.constant 0 : index
    %c0_97 = arith.constant 0 : index
    %263 = vector.load %arg7[%c0_96, %c0_97] : memref<1x1xf32, #tpu.memory_space<vmem>>, vector<1x1xf32>
    tpu.vector_store %arg7[%c0_96, %c0_97], %262 {strides = array<i32>} : memref<1x1xf32, #tpu.memory_space<vmem>>, vector<1x1xf32>,
    return
  }
  func.func @transform_0(%arg0: i32) -> (i32, i32) {
    %c0_i32 = arith.constant 0 : i32
    %c0_i32_0 = arith.constant 0 : i32
    %c0_i32_1 = arith.constant 0 : i32
    return %c0_i32, %c0_i32_0 : i32, i32
  }
  func.func @transform_1(%arg0: i32) -> (i32, i32) {
    %c0_i32 = arith.constant 0 : i32
    %c0_i32_0 = arith.constant 0 : i32
    %c0_i32_1 = arith.constant 0 : i32
    return %c0_i32, %c0_i32_0 : i32, i32
  }
  func.func @transform_2(%arg0: i32) -> (i32, i32) {
    %c0_i32 = arith.constant 0 : i32
    %c0_i32_0 = arith.constant 0 : i32
    %c0_i32_1 = arith.constant 0 : i32
    return %c0_i32, %c0_i32_0 : i32, i32
  }
  func.func @transform_3(%arg0: i32) -> (i32, i32) {
    %c0_i32 = arith.constant 0 : i32
    %c0_i32_0 = arith.constant 0 : i32
    %c0_i32_1 = arith.constant 0 : i32
    return %c0_i32, %c0_i32_0 : i32, i32
  }
  func.func @transform_4(%arg0: i32) -> (i32, i32) {
    %c0_i32 = arith.constant 0 : i32
    %c0_i32_0 = arith.constant 0 : i32
    %c0_i32_1 = arith.constant 0 : i32
    return %c0_i32, %c0_i32_0 : i32, i32
  }
  func.func @transform_5(%arg0: i32) -> (i32, i32) {
    %c0_i32 = arith.constant 0 : i32
    %c0_i32_0 = arith.constant 0 : i32
    %c0_i32_1 = arith.constant 0 : i32
    return %c0_i32, %c0_i32_0 : i32, i32
  }
  func.func @transform_6(%arg0: i32) -> (i32, i32) {
    %c0_i32 = arith.constant 0 : i32
    %c0_i32_0 = arith.constant 0 : i32
    %c0_i32_1 = arith.constant 0 : i32
    return %c0_i32, %c0_i32_0 : i32, i32
  }
}

</mosaic_0001>

<bundles_post_ra>
// kernel: forward.1
= control target key start
LH: loop header
LB: loop body
LE: loop exit
PB: predicated region body
PF: predicated region fallthrough
CT: control target
= control target key end

     0   :  { %v5158_v2 = vmov 0   ;;  %s9062_s0 = inlined_call_operand.vmem [shape: f32[16,16], index: 0, kind: input, shape index: {}]   ;;  %s9063_s1 = inlined_call_operand.vmem [shape: f32[16,256], index: 1, kind: input, shape index: {}]   ;;  %s9064_s2 = inlined_call_operand.vmem [shape: f32[256,1], index: 2, kind: input, shape index: {}]   ;;  %s9065_s3 = inlined_call_operand.vmem [shape: f32[16,32], index: 3, kind: input, shape index: {}]   ;;  %s9066_s4 = inlined_call_operand.vmem [shape: f32[336,128], index: 4, kind: input, shape index: {}]   ;;  %s9067_s5 = inlined_call_operand.vmem [shape: f32[24,128], index: 5, kind: input, shape index: {}]   ;;  %s9068_s6 = inlined_call_operand.hbm [shape: f32[1,1], index: 6, kind: output, shape index: {}]  }
   0x1   :  { %v32_v0 = vld [vmem:[%s9064_s2 + $0x10] sm:$0xff]  ;;  %v30_v1 = vld [vmem:[%s9064_s2] sm:$0xff]  ;;  %4651 = vset.pattern.permute.xlu1 %v5158_v2  ;;  %4650 = vset.pattern.permute.xlu0 %v5158_v2  ;;  %v33_v4 = vld [vmem:[%s9064_s2 + $0x18] sm:$0xff] }
   0x2   :  { %78 = vperm.xlu1 %4651, %v32_v0   ;;  %68 = vperm.xlu0 %4650, %v30_v1   ;;  %v34_v3 = vld [vmem:[%s9064_s2 + $0x20] sm:$0xff]  ;;  %v31_v5 = vld [vmem:[%s9064_s2 + $0x8] sm:$0xff] }
   0x3   :  { %4652 = vset.pattern.permute.xlu2 %v5158_v2  ;;  %v35_v6 = vld [vmem:[%s9064_s2 + $0x28] sm:$0xff] }
   0x4   :  { %88 = vperm.xlu2 %4652, %v34_v3  }
   0xa   :  { %83 = vperm.xlu1 %4651, %v33_v4   ;;  %73 = vperm.xlu0 %4650, %v31_v5  }
   0xc   :  { %93 = vperm.xlu2 %4652, %v35_v6  }
   0xd   :  { %11 = vsyncpa [#allocation3], 0  ;;  %v36_v7 = vld [vmem:[%s9064_s2 + $0x30] sm:$0xff]  ;;  %v39_v8 = vld [vmem:[%s9064_s2 + $0x48] sm:$0xff]  ;;  %vm294_vm0 = vcmask 130048   ;;  %v5159_v0 = vmov 16.0  }
   0xe   :  { %v38_v9 = vld [vmem:[%s9064_s2 + $0x40] sm:$0xff]  ;;  %v37_v10 = vld [vmem:[%s9064_s2 + $0x38] sm:$0xff]  ;;  %v40_v11 = vld [vmem:[%s9064_s2 + $0x50] sm:$0xff]  ;;  %4677 = vrcp.f32 %v5159_v0  ;;  %s5160_s12 = smov 96   ;;  %s4472_s15 = sshll.u32 %s9068_s6, 4  ;;  %s4473_s15 = int_to_ptr.hbm [resolvable:$true] %s4472_s15 }
   0xf   :  { %v43_v12 = vld [vmem:[%s9064_s2 + $0x68] sm:$0xff]  ;;  %v5239_v13 = vld [vmem:[%s9066_s4] ss:$0 sm:$0xff]  ;;  %v44_v56 = vld [vmem:[%s9064_s2 + $0x70] sm:$0xff] }
  0x10   :  { %v5246_v15 = vld [vmem:[%s9067_s5] ss:$0 sm:$0xff]  ;;  %v41_v60 = vld [vmem:[%s9064_s2 + $0x58] sm:$0xff] }
  0x11   :  { %v42_v61 = vld [vmem:[%s9064_s2 + $0x60] sm:$0xff]  ;;  %v45_v62 = vld [vmem:[%s9064_s2 + $0x78] sm:$0xff] }
  0x12   :  { %98 = vperm.xlu1 %4651, %v36_v7   ;;  %113 = vperm.xlu0 %4650, %v39_v8   ;;  %v46_v63 = vld [vmem:[%s9064_s2 + $0x80] sm:$0xff] }
  0x14   :  { %108 = vperm.xlu2 %4652, %v38_v9   ;;  %v4678_v1 = vpop.eup %4677 }
  0x15   :  { %v392_v3 = vmul.f32 16.0, %v4678_v1  ;;  %vm396_vm1 = vweird.f32 %v4678_v1 }
  0x17   :  { %v393_v4 = vsub.f32 1.0, %v392_v3 }
  0x19   :  { %v394_v6 = vmul.f32 %v4678_v1, %v393_v4 }
  0x1a   :  { %103 = vperm.xlu1 %4651, %v37_v10  }
  0x1b   :  { %v395_v7 = vadd.f32 %v4678_v1, %v394_v6 }
  0x1c   :  { %118 = vperm.xlu2 %4652, %v40_v11  }
  0x1d   :  { %v5355_v9 = vsel %vm396_vm1, %v4678_v1, %v395_v7 }
  0x22   :  { %133 = vperm.xlu1 %4651, %v43_v12  }
  0x5e   :  { %v5241_v14 = vpop.permute.xlu2 %88 }
  0x5f   :  { %v231_v22 = vmul.f32 %v5239_v13, %v5241_v14 }
  0x61   :  { %v5269_v25 = vadd.f32 %v5246_v15, %v231_v22 }
  0x63   :  { %v307_v31 = vsel %vm294_vm0, %v5269_v25, 0.0 }
  0x66   :  { %v5271_v26 = vpop.permute.xlu2 %93 }
  0x67   :  { %v232_v34 = vmul.f32 %v5239_v13, %v5271_v26 }
  0x69   :  { %v265_v37 = vadd.f32 %v5246_v15, %v232_v34 }
  0x6b   :  { %v310_v39 = vsel %vm294_vm0, %v265_v37, 0.0 }
  0x6e   :  { %v5298_v41 = vpop.permute.xlu2 %108 }
  0x6f   :  { %v235_v47 = vmul.f32 %v5239_v13, %v5298_v41 }
  0x71   :  { %v268_v51 = vadd.f32 %v5246_v15, %v235_v47 }
  0x73   :  { %v319_v54 = vsel %vm294_vm0, %v268_v51, 0.0 }
  0x74   :  { %v5248_v16 = vpop.permute.xlu1 %78  ;;  %v5250_v17 = vpop.permute.xlu0 %68 }
  0x75   :  { %v229_v18 = vmul.f32 %v5239_v13, %v5248_v16  ;;  %v227_v19 = vmul.f32 %v5239_v13, %v5250_v17 }
  0x76   :  { %v5321_v52 = vpop.permute.xlu2 %118 }
  0x77   :  { %v5257_v20 = vadd.f32 %v5246_v15, %v229_v18  ;;  %v5260_v21 = vadd.f32 %v5246_v15, %v227_v19  ;;  %9099 = vst [vmem:[#allocation5_spill] sm:$0xff] %v5321_v52  ;;  %v237_v55 = vmul.f32 %v5239_v13, %v5321_v52 }
  0x79   :  { %v301_v23 = vsel %vm294_vm0, %v5257_v20, 0.0  ;;  %v295_v24 = vsel %vm294_vm0, %v5260_v21, 0.0  ;;  %v5335_v58 = vadd.f32 %v5246_v15, %v237_v55 }
  0x7a   :  { %302 = vadd.xlane.f32.xlu1 %v301_v23  ;;  %296 = vadd.xlane.f32.xlu0 %v295_v24 }
  0x7b   :  { %v325_v59 = vsel %vm294_vm0, %v5335_v58, 0.0 }
  0x7c   :  { %v5273_v27 = vpop.permute.xlu1 %83  ;;  %v5275_v28 = vpop.permute.xlu0 %73 }
  0x7d   :  { %v230_v29 = vmul.f32 %v5239_v13, %v5273_v27  ;;  %v228_v30 = vmul.f32 %v5239_v13, %v5275_v28 }
  0x7f   :  { %v5284_v32 = vadd.f32 %v5246_v15, %v230_v29  ;;  %v261_v33 = vadd.f32 %v5246_v15, %v228_v30 }
  0x81   :  { %v304_v35 = vsel %vm294_vm0, %v5284_v32, 0.0  ;;  %v298_v36 = vsel %vm294_vm0, %v261_v33, 0.0 }
  0x82   :  { %308 = vadd.xlane.f32.xlu1 %v307_v31  ;;  %305 = vadd.xlane.f32.xlu0 %v304_v35 }
  0x83   :  { %299 = vadd.xlane.f32.xlu2 %v298_v36 }
  0x84   :  { %v5293_v38 = vpop.permute.xlu1 %98  ;;  %v5307_v45 = vpop.permute.xlu0 %113 }
  0x85   :  { %v233_v40 = vmul.f32 %v5239_v13, %v5293_v38  ;;  %v236_v48 = vmul.f32 %v5239_v13, %v5307_v45 }
  0x87   :  { %v5305_v44 = vadd.f32 %v5246_v15, %v233_v40  ;;  %v5324_v53 = vadd.f32 %v5246_v15, %v236_v48 }
  0x89   :  { %v313_v49 = vsel %vm294_vm0, %v5305_v44, 0.0  ;;  %v322_v57 = vsel %vm294_vm0, %v5324_v53, 0.0 }
  0x8a   :  { %311 = vadd.xlane.f32.xlu1 %v310_v39 }
  0x8c   :  { %v5300_v42 = vpop.permute.xlu1 %103 }
  0x8d   :  { %v234_v43 = vmul.f32 %v5239_v13, %v5300_v42 }
  0x8f   :  { %v5310_v46 = vadd.f32 %v5246_v15, %v234_v43 }
  0x91   :  { %v316_v50 = vsel %vm294_vm0, %v5310_v46, 0.0 }
  0x92   :  { %314 = vadd.xlane.f32.xlu1 %v313_v49  ;;  %317 = vadd.xlane.f32.xlu0 %v316_v50 }
  0x94   :  { %v5351_v2 = vpop.permute.xlu1 %133 }
  0x95   :  { %9100 = vst [vmem:[#allocation6_spill] sm:$0xff] %v5351_v2 }
  0x9a   :  { %320 = vadd.xlane.f32.xlu1 %v319_v54  ;;  %323 = vadd.xlane.f32.xlu0 %v322_v57 }
  0x9b   :  { %138 = vperm.xlu2 %4652, %v44_v56  }
  0xa2   :  { %326 = vadd.xlane.f32.xlu1 %v325_v59 }
  0xae   :  { %123 = vperm.xlu0 %4650, %v41_v60  }
  0xb6   :  { %128 = vperm.xlu0 %4650, %v42_v61  }
  0xbe   :  { %143 = vperm.xlu0 %4650, %v45_v62  }
  0xc6   :  { %148 = vperm.xlu0 %4650, %v46_v63  }
  0xed   :  { %v303_v5 = vpop.xlane.xlu1 %302  ;;  %v297_v19 = vpop.xlane.xlu0 %296 }
  0xee   :  { %v398_v1 = vmul.f32 %v5355_v9, %v297_v19 }
  0xf0   :  { %v5420_v7 = vsub.f32 %v5260_v21, %v398_v1 }
  0xf2   :  { %v462_v21 = vmul.f32 %v5420_v7, %v5420_v7 }
  0xf5   :  { %v5353_v8 = vpop.xlane.xlu1 %308 }
  0xf6   :  { %v300_v10 = vpop.xlane.xlu2 %299 }
  0xf7   :  { %v399_v11 = vmul.f32 %v5355_v9, %v300_v10 }
  0xf9   :  { %v5358_v12 = vsub.f32 %v261_v33, %v399_v11  ;;  %v306_v33 = vpop.xlane.xlu0 %305 }
  0xfa   :  { %v401_v49 = vmul.f32 %v5355_v9, %v306_v33  ;;  %v494_v33 = vsel %vm294_vm0, %v462_v21, 0.0 }
  0xfb   :  { %v463_v18 = vmul.f32 %v5358_v12, %v5358_v12 }
  0xfd   :  { %v312_v22 = vpop.xlane.xlu1 %311  ;;  %v497_v23 = vsel %vm294_vm0, %v463_v18, 0.0 }
  0xfe   :  { %v403_v24 = vmul.f32 %v5355_v9, %v312_v22  ;;  %498 = vadd.xlane.f32.xlu1 %v497_v23  ;;  %v5398_v60 = vpop.permute.xlu2 %138  ;;  %v400_v22 = vmul.f32 %v5355_v9, %v303_v5  ;;  %v402_v5 = vmul.f32 %v5355_v9, %v5353_v8 }
  0xff   :  { %9102 = vst [vmem:[#allocation8_spill] sm:$0xff] %v5398_v60  ;;  %v241_v62 = vmul.f32 %v5239_v13, %v5398_v60 }
 0x100   :  { %v5364_v29 = vsub.f32 %v265_v37, %v403_v24 }
 0x101   :  { %v5412_v3 = vadd.f32 %v5246_v15, %v241_v62 }
 0x102   :  { %v467_v30 = vmul.f32 %v5364_v29, %v5364_v29 }
 0x103   :  { %v337_v11 = vsel %vm294_vm0, %v5412_v3, 0.0 }
 0x104   :  { %v509_v31 = vsel %vm294_vm0, %v467_v30, 0.0  ;;  %v5436_v30 = vsub.f32 %v5257_v20, %v400_v22 }
 0x105   :  { %v315_v34 = vpop.xlane.xlu1 %314  ;;  %v5369_v36 = vpop.xlane.xlu0 %317 }
 0x106   :  { %510 = vadd.xlane.f32.xlu1 %v509_v31  ;;  %v404_v8 = vmul.f32 %v5355_v9, %v315_v34  ;;  %v405_v62 = vmul.f32 %v5355_v9, %v5369_v36  ;;  %v60_v36 = vld [vmem:[%s9064_s2 + $0xf0] sm:$0xff] }
 0x10d   :  { %v321_v35 = vpop.xlane.xlu1 %320  ;;  %v5377_v47 = vpop.xlane.xlu0 %323 }
 0x10e   :  { %v406_v39 = vmul.f32 %v5355_v9, %v321_v35 }
 0x110   :  { %v5372_v40 = vsub.f32 %v268_v51, %v406_v39  ;;  %v5388_v51 = vsub.f32 %v5284_v32, %v401_v49  ;;  %v240_v32 = vmul.f32 %v5239_v13, %v5351_v2  ;;  %v464_v39 = vmul.f32 %v5436_v30, %v5436_v30 }
 0x112   :  { %v470_v43 = vmul.f32 %v5372_v40, %v5372_v40  ;;  %v465_v59 = vmul.f32 %v5388_v51, %v5388_v51  ;;  %v5415_v4 = vadd.f32 %v5246_v15, %v240_v32  ;;  %v500_v49 = vsel %vm294_vm0, %v464_v39, 0.0 }
 0x114   :  { %v518_v37 = vsel %vm294_vm0, %v470_v43, 0.0  ;;  %v503_v63 = vsel %vm294_vm0, %v465_v59, 0.0  ;;  %v334_v18 = vsel %vm294_vm0, %v5415_v4, 0.0 }
 0x115   :  { %519 = vadd.xlane.f32.xlu1 %v518_v37  ;;  %v327_v19 = vpop.xlane.xlu1 %326 }
 0x116   :  { %v408_v23 = vmul.f32 %v5355_v9, %v327_v19 }
 0x118   :  { %v5439_v31 = vsub.f32 %v5335_v58, %v408_v23  ;;  %v5453_v58 = vsub.f32 %v5269_v25, %v402_v5  ;;  %v5466_v25 = vsub.f32 %v5305_v44, %v404_v8 }
 0x11a   :  { %v472_v20 = vmul.f32 %v5439_v31, %v5439_v31  ;;  %v468_v34 = vmul.f32 %v5466_v25, %v5466_v25 }
 0x120   :  { %v5379_v48 = vpop.permute.xlu0 %123 }
 0x121   :  { %v238_v50 = vmul.f32 %v5239_v13, %v5379_v48 }
 0x123   :  { %v5385_v54 = vadd.f32 %v5246_v15, %v238_v50  ;;  %v524_v50 = vsel %vm294_vm0, %v472_v20, 0.0 }
 0x125   :  { %v328_v55 = vsel %vm294_vm0, %v5385_v54, 0.0 }
 0x126   :  { %329 = vadd.xlane.f32.xlu0 %v328_v55  ;;  %v466_v55 = vmul.f32 %v5453_v58, %v5453_v58 }
 0x128   :  { %v5392_v56 = vpop.permute.xlu0 %128  ;;  %v506_v59 = vsel %vm294_vm0, %v466_v55, 0.0 }
 0x129   :  { %9101 = vst [vmem:[#allocation7_spill] sm:$0xff] %v5392_v56  ;;  %v239_v57 = vmul.f32 %v5239_v13, %v5392_v56 }
 0x12b   :  { %v5401_v61 = vadd.f32 %v5246_v15, %v239_v57 }
 0x12d   :  { %v331_v0 = vsel %vm294_vm0, %v5401_v61, 0.0 }
 0x12e   :  { %504 = vadd.xlane.f32.xlu0 %v503_v63  ;;  %332 = vadd.xlane.f32.xlu2 %v331_v0  ;;  %v5476_v63 = vsub.f32 %v5310_v46, %v405_v62  ;;  %v512_v0 = vsel %vm294_vm0, %v468_v34, 0.0  ;;  %v53_v46 = vld [vmem:[%s9064_s2 + $0xb8] sm:$0xff] }
 0x130   :  { %v5417_v6 = vpop.permute.xlu0 %143  ;;  %v469_v44 = vmul.f32 %v5476_v63, %v5476_v63 }
 0x131   :  { %9103 = vst [vmem:[#allocation9_spill] sm:$0xff] %v5417_v6  ;;  %v242_v10 = vmul.f32 %v5239_v13, %v5417_v6 }
 0x132   :  { %v515_v1 = vsel %vm294_vm0, %v469_v44, 0.0 }
 0x133   :  { %v5433_v24 = vadd.f32 %v5246_v15, %v242_v10  ;;  %v49_v10 = vld [vmem:[%s9064_s2 + $0x98] sm:$0xff] }
 0x135   :  { %v340_v35 = vsel %vm294_vm0, %v5433_v24, 0.0 }
 0x136   :  { %338 = vadd.xlane.f32.xlu0 %v337_v11  ;;  %335 = vadd.xlane.f32.xlu2 %v334_v18  ;;  %v57_v11 = vld [vmem:[%s9064_s2 + $0xd8] sm:$0xff]  ;;  %v50_v18 = vld [vmem:[%s9064_s2 + $0xa0] sm:$0xff] }
 0x138   :  { %v5450_v43 = vpop.permute.xlu0 %148 }
 0x139   :  { %9104 = vst [vmem:[#allocation10_spill] sm:$0xff] %v5450_v43  ;;  %v243_v37 = vmul.f32 %v5239_v13, %v5450_v43 }
 0x13b   :  { %v5463_v57 = vadd.f32 %v5246_v15, %v243_v37 }
 0x13d   :  { %v343_v32 = vsel %vm294_vm0, %v5463_v57, 0.0 }
 0x13e   :  { %495 = vadd.xlane.f32.xlu2 %v494_v33  ;;  %341 = vadd.xlane.f32.xlu0 %v340_v35  ;;  %v407_v35 = vmul.f32 %v5355_v9, %v5377_v47 }
 0x146   :  { %501 = vadd.xlane.f32.xlu2 %v500_v49  ;;  %525 = vadd.xlane.f32.xlu0 %v524_v50  ;;  %v5505_v49 = vsub.f32 %v5324_v53, %v407_v35 }
 0x148   :  { %v471_v62 = vmul.f32 %v5505_v49, %v5505_v49 }
 0x14e   :  { %507 = vadd.xlane.f32.xlu2 %v506_v59  ;;  %344 = vadd.xlane.f32.xlu0 %v343_v32 }
 0x156   :  { %513 = vadd.xlane.f32.xlu2 %v512_v0 }
 0x15e   :  { %516 = vadd.xlane.f32.xlu2 %v515_v1 }
 0x162   :  { %163 = vperm.xlu0 %4650, %v49_v10   ;;  %v521_v10 = vsel %vm294_vm0, %v471_v62, 0.0 }
 0x16a   :  { %218 = vperm.xlu0 %4650, %v60_v36  }
 0x171   :  { %v499_v19 = vpop.xlane.xlu1 %498 }
 0x172   :  { %183 = vperm.xlu0 %4650, %v53_v46   ;;  %v591_v22 = vmul.f32 %v499_v19, %v5355_v9 }
 0x174   :  { %v623_v23 = vadd.f32 1e-05, %v591_v22 }
 0x176   :  { %203 = vperm.xlu2 %4652, %v57_v11   ;;  %4679 = vrsqrt.f32 %v623_v23  ;;  %vm670_vm3 = vweird.f32 %v623_v23 }
 0x179   :  { %v511_v55 = vpop.xlane.xlu1 %510 }
 0x17a   :  { %v595_v53 = vmul.f32 %v511_v55, %v5355_v9 }
 0x17c   :  { %v4680_v21 = vpop.eup %4679  ;;  %v5521_v11 = vadd.f32 1e-05, %v595_v53 }
 0x17d   :  { %v665_v33 = vmul.f32 %v4680_v21, %v623_v23  ;;  %vm671_vm2 = vweird.f32 %v4680_v21  ;;  %v5533_v23 = vld [vmem:[%s9067_s5 + $0x1] ss:$0 sm:$0xff] }
 0x17e   :  { %168 = vperm.xlu2 %4652, %v50_v18   ;;  %vm672_vm4 = vmor %vm670_vm3, %vm671_vm2  ;;  %vm710_vm11 = vweird.f32 %v5521_v11 }
 0x17f   :  { %v666_v39 = vmul.f32 %v4680_v21, %v665_v33 }
 0x181   :  { %v667_v50 = vmul.f32 0.5, %v666_v39 }
 0x183   :  { %v668_v34 = vsub.f32 1.5, %v667_v50 }
 0x185   :  { %v669_v36 = vmul.f32 %v4680_v21, %v668_v34 }
 0x199   :  { %v330_v5 = vpop.xlane.xlu0 %329 }
 0x19a   :  { %v409_v20 = vmul.f32 %v5355_v9, %v330_v5 }
 0x19c   :  { %v5502_v37 = vsub.f32 %v5385_v54, %v409_v20 }
 0x19e   :  { %v473_v8 = vmul.f32 %v5502_v37, %v5502_v37 }
 0x1a0   :  { %v527_v59 = vsel %vm294_vm0, %v473_v8, 0.0 }
 0x1a1   :  { %v333_v32 = vpop.xlane.xlu2 %332  ;;  %528 = vadd.xlane.f32.xlu1 %v527_v59  ;;  %v505_v47 = vpop.xlane.xlu0 %504 }
 0x1a2   :  { %v410_v54 = vmul.f32 %v5355_v9, %v333_v32  ;;  %v593_v0 = vmul.f32 %v505_v47, %v5355_v9 }
 0x1a4   :  { %v5516_v44 = vsub.f32 %v5401_v61, %v410_v54  ;;  %v625_v1 = vadd.f32 1e-05, %v593_v0  ;;  %v673_v61 = vsel %vm672_vm4, %v4680_v21, %v669_v36  ;;  %v47_v54 = vld [vmem:[%s9064_s2 + $0x88] sm:$0xff] }
 0x1a5   :  { %v975_v5 = vmul.f32 %v673_v61, %v5358_v12  ;;  %v520_v61 = vpop.xlane.xlu1 %519 }
 0x1a6   :  { %4681 = vrsqrt.f32 %v625_v1  ;;  %v474_v46 = vmul.f32 %v5516_v44, %v5516_v44  ;;  %vm690_vm6 = vweird.f32 %v625_v1 }
 0x1a7   :  { %522 = vadd.xlane.f32.xlu2 %v521_v10  ;;  %4683 = vrsqrt.f32 %v5521_v11  ;;  %v1008_v12 = vmul.f32 %v5533_v23, %v975_v5 }
 0x1a8   :  { %v530_v18 = vsel %vm294_vm0, %v474_v46, 0.0 }
 0x1a9   :  { %v336_v19 = vpop.xlane.xlu2 %335  ;;  %531 = vadd.xlane.f32.xlu0 %v530_v18 }
 0x1aa   :  { %v411_v22 = vmul.f32 %v5355_v9, %v336_v19 }
 0x1ac   :  { %v4682_v33 = vpop.eup %4681  ;;  %v5527_v35 = vsub.f32 %v5415_v4, %v411_v22  ;;  %v5543_v4 = vld [vmem:[%s9067_s5 + $0x2] ss:$0 sm:$0xff] }
 0x1ad   :  { %v685_v39 = vmul.f32 %v4682_v33, %v625_v1  ;;  %v5538_v50 = vpop.eup %4683  ;;  %v5550_v62 = vadd.f32 %v5543_v4, %v1008_v12  ;;  %vm691_vm5 = vweird.f32 %v4682_v33 }
 0x1ae   :  { %v475_v20 = vmul.f32 %v5527_v35, %v5527_v35  ;;  %v705_v32 = vmul.f32 %v5538_v50, %v5521_v11  ;;  %vm692_vm7 = vmor %vm690_vm6, %vm691_vm5  ;;  %vm711_vm9 = vweird.f32 %v5538_v50 }
 0x1af   :  { %v686_v55 = vmul.f32 %v4682_v33, %v685_v39  ;;  %v4482_v10 = vmul.f32 -1.442695, %v5550_v62  ;;  %vm5576_vm13 = vmor %vm710_vm11, %vm711_vm9 }
 0x1b0   :  { %v533_v21 = vsel %vm294_vm0, %v475_v20, 0.0  ;;  %v706_v0 = vmul.f32 %v5538_v50, %v705_v32  ;;  %v598_v20 = vmul.f32 %v520_v61, %v5355_v9 }
 0x1b1   :  { %v496_v8 = vpop.xlane.xlu2 %495  ;;  %534 = vadd.xlane.f32.xlu0 %v533_v21  ;;  %v687_v34 = vmul.f32 0.5, %v686_v55 }
 0x1b2   :  { %v590_v59 = vmul.f32 %v496_v8, %v5355_v9  ;;  %v707_v19 = vmul.f32 0.5, %v706_v0  ;;  %v48_v8 = vld [vmem:[%s9064_s2 + $0x90] sm:$0xff]  ;;  %v5566_v0 = vadd.f32 1e-05, %v598_v20 }
 0x1b3   :  { %v688_v36 = vsub.f32 1.5, %v687_v34  ;;  %v1713_v20 = vld [vmem:[%s9066_s4 + $0x10] sm:$0xff] }
 0x1b4   :  { %v622_v47 = vadd.f32 1e-05, %v590_v59  ;;  %v708_v12 = vsub.f32 1.5, %v707_v19  ;;  %1826 = vmatpush.msra.mxu0 %v1713_v20  ;;  %4637 = vmatpush.msra.mxu1 %v1713_v20  ;;  %vm740_vm5 = vweird.f32 %v5566_v0 }
 0x1b5   :  { %v689_v39 = vmul.f32 %v4682_v33, %v688_v36 }
 0x1b6   :  { %4685 = vrsqrt.f32 %v622_v47  ;;  %v709_v36 = vmul.f32 %v5538_v50, %v708_v12  ;;  %vm660_vm10 = vweird.f32 %v622_v47 }
 0x1b7   :  { %4687 = vpow2.f32 %v4482_v10  ;;  %v693_v32 = vsel %vm692_vm7, %v4682_v33, %v689_v39 }
 0x1b8   :  { %v977_v1 = vmul.f32 %v693_v32, %v5388_v51  ;;  %v56_v51 = vld [vmem:[%s9064_s2 + $0xd0] sm:$0xff]  ;;  %v713_v11 = vsel %vm5576_vm13, %v5538_v50, %v709_v36 }
 0x1b9   :  { %v502_v53 = vpop.xlane.xlu2 %501  ;;  %v979_v32 = vmul.f32 %v713_v11, %v5364_v29 }
 0x1ba   :  { %v592_v46 = vmul.f32 %v502_v53, %v5355_v9  ;;  %153 = vperm.xlu1 %4651, %v47_v54  }
 0x1bc   :  { %v4686_v18 = vpop.eup %4685  ;;  %v5558_v22 = vadd.f32 1e-05, %v592_v46 }
 0x1bd   :  { %v655_v5 = vmul.f32 %v4686_v18, %v622_v47  ;;  %v4688_v54 = vpop.eup %4687  ;;  %vm661_vm8 = vweird.f32 %v4686_v18 }
 0x1be   :  { %4689 = vrsqrt.f32 %v5558_v22  ;;  %vm662_vm12 = vmor %vm660_vm10, %vm661_vm8  ;;  %v5584_v47 = vadd.f32 1.0, %v4688_v54  ;;  %vm680_vm15 = vweird.f32 %v5558_v22 }
 0x1bf   :  { %v656_v21 = vmul.f32 %v4686_v18, %v655_v5 }
 0x1c0   :  { %vm1220_vm10 = vweird.f32 %v5584_v47 }
 0x1c1   :  { %v657_v55 = vmul.f32 0.5, %v656_v21  ;;  %v508_v59 = vpop.xlane.xlu2 %507 }
 0x1c2   :  { %v594_v34 = vmul.f32 %v508_v59, %v5355_v9  ;;  %158 = vperm.xlu1 %4651, %v48_v8   ;;  %v1712_v59 = vld [vmem:[%s9066_s4 + $0x8] sm:$0xff] }
 0x1c3   :  { %v658_v53 = vsub.f32 1.5, %v657_v55  ;;  %1827 = vmatpush.msra.mxu0 %v1712_v59  ;;  %4638 = vmatpush.msra.mxu1 %v1712_v59 }
 0x1c4   :  { %v4690_v10 = vpop.eup %4689  ;;  %v5570_v46 = vadd.f32 1e-05, %v594_v34 }
 0x1c5   :  { %v659_v19 = vmul.f32 %v4686_v18, %v658_v53  ;;  %v675_v33 = vmul.f32 %v4690_v10, %v5558_v22  ;;  %vm681_vm14 = vweird.f32 %v4690_v10 }
 0x1c6   :  { %4691 = vrsqrt.f32 %v5570_v46  ;;  %vm682_vm1 = vmor %vm680_vm15, %vm681_vm14  ;;  %vm700_vm3 = vweird.f32 %v5570_v46 }
 0x1c7   :  { %4693 = vrsqrt.f32 %v5566_v0  ;;  %v663_v5 = vsel %vm662_vm12, %v4686_v18, %v659_v19  ;;  %v676_v39 = vmul.f32 %v4690_v10, %v675_v33  ;;  %v1010_v18 = vmul.f32 %v5533_v23, %v977_v1 }
 0x1c8   :  { %v974_v21 = vmul.f32 %v663_v5, %v5420_v7  ;;  %4695 = vrcp.f32 %v5584_v47 }
 0x1c9   :  { %v677_v8 = vmul.f32 0.5, %v676_v39  ;;  %v514_v12 = vpop.xlane.xlu2 %513  ;;  %v5611_v29 = vadd.f32 %v5543_v4, %v1010_v18  ;;  %v58_v39 = vld [vmem:[%s9064_s2 + $0xe0] sm:$0xff] }
 0x1ca   :  { %v596_v55 = vmul.f32 %v514_v12, %v5355_v9  ;;  %198 = vperm.xlu1 %4651, %v56_v51   ;;  %v1007_v50 = vmul.f32 %v5533_v23, %v974_v21  ;;  %v1012_v51 = vmul.f32 %v5533_v23, %v979_v32 }
 0x1cb   :  { %v678_v34 = vsub.f32 1.5, %v677_v8  ;;  %v4484_v12 = vmul.f32 -1.442695, %v5611_v29 }
 0x1cc   :  { %v4692_v7 = vpop.eup %4691  ;;  %v5601_v54 = vadd.f32 1e-05, %v596_v55  ;;  %v5604_v53 = vadd.f32 %v5543_v4, %v1007_v50  ;;  %v5628_v59 = vadd.f32 %v5543_v4, %v1012_v51 }
 0x1cd   :  { %v5606_v36 = vpop.eup %4693  ;;  %v679_v1 = vmul.f32 %v4690_v10, %v678_v34  ;;  %v695_v19 = vmul.f32 %v4692_v7, %v5570_v46  ;;  %vm701_vm2 = vweird.f32 %v4692_v7 }
 0x1ce   :  { %4697 = vrsqrt.f32 %v5601_v54  ;;  %v4481_v33 = vmul.f32 -1.442695, %v5604_v53  ;;  %v735_v22 = vmul.f32 %v5606_v36, %v5566_v0  ;;  %v5622_v20 = vpop.eup %4695  ;;  %vm702_vm4 = vmor %vm700_vm3, %vm701_vm2  ;;  %vm741_vm7 = vweird.f32 %v5606_v36 }
 0x1cf   :  { %v683_v61 = vsel %vm682_vm1, %v4690_v10, %v679_v1  ;;  %v696_v5 = vmul.f32 %v4692_v7, %v695_v19  ;;  %v1216_v34 = vmul.f32 %v5622_v20, %v5584_v47  ;;  %vm720_vm8 = vweird.f32 %v5601_v54  ;;  %vm5707_vm13 = vmor %vm740_vm5, %vm741_vm7 }
 0x1d0   :  { %4699 = vpow2.f32 %v4481_v33  ;;  %v976_v11 = vmul.f32 %v683_v61, %v5436_v30  ;;  %v736_v32 = vmul.f32 %v5606_v36, %v735_v22  ;;  %vm1221_vm11 = vweird.f32 %v5622_v20 }
 0x1d1   :  { %v697_v21 = vmul.f32 0.5, %v696_v5  ;;  %v517_v8 = vpop.xlane.xlu2 %516  ;;  %4701 = vpow2.f32 %v4484_v12  ;;  %v4486_v12 = vmul.f32 -1.442695, %v5628_v59  ;;  %vm5721_vm1 = vmor %vm1220_vm10, %vm1221_vm11 }
 0x1d2   :  { %v597_v10 = vmul.f32 %v517_v8, %v5355_v9  ;;  %208 = vperm.xlu1 %4651, %v58_v39   ;;  %v1009_v18 = vmul.f32 %v5533_v23, %v976_v11  ;;  %v339_v39 = vpop.xlane.xlu0 %338  ;;  %v51_v11 = vld [vmem:[%s9064_s2 + $0xa8] sm:$0xff]  ;;  %v737_v8 = vmul.f32 0.5, %v736_v32 }
 0x1d3   :  { %v698_v55 = vsub.f32 1.5, %v697_v21 }
 0x1d4   :  { %v4698_v50 = vpop.eup %4697  ;;  %v5631_v30 = vadd.f32 1e-05, %v597_v10  ;;  %v5636_v1 = vadd.f32 %v5543_v4, %v1009_v18 }
 0x1d5   :  { %v699_v19 = vmul.f32 %v4692_v7, %v698_v55  ;;  %v715_v33 = vmul.f32 %v4698_v50, %v5601_v54  ;;  %v1217_v55 = vsub.f32 1.0, %v1216_v34  ;;  %vm721_vm6 = vweird.f32 %v4698_v50 }
 0x1d6   :  { %v4700_v61 = vpop.eup %4699  ;;  %4703 = vrsqrt.f32 %v5631_v30  ;;  %v4483_v5 = vmul.f32 -1.442695, %v5636_v1  ;;  %vm722_vm9 = vmor %vm720_vm8, %vm721_vm6  ;;  %vm730_vm15 = vweird.f32 %v5631_v30 }
 0x1d7   :  { %v703_v51 = vsel %vm702_vm4, %v4692_v7, %v699_v19  ;;  %v716_v22 = vmul.f32 %v4698_v50, %v715_v33  ;;  %v5645_v21 = vadd.f32 1.0, %v4700_v61  ;;  %v412_v7 = vmul.f32 %v5355_v9, %v339_v39  ;;  %v4702_v33 = vpop.eup %4701 }
 0x1d8   :  { %4705 = vpow2.f32 %v4483_v5  ;;  %v978_v46 = vmul.f32 %v703_v51, %v5453_v58  ;;  %v738_v5 = vsub.f32 1.5, %v737_v8 }
 0x1d9   :  { %v717_v10 = vmul.f32 0.5, %v716_v22  ;;  %v5649_v18 = vpop.permute.xlu2 %203  ;;  %4707 = vrcp.f32 %v5645_v21  ;;  %v1218_v22 = vmul.f32 %v5622_v20, %v1217_v55  ;;  %v59_v55 = vld [vmem:[%s9064_s2 + $0xe8] sm:$0xff]  ;;  %v1209_v56 = vand.u32 2147483647, %v5645_v21 }
 0x1da   :  { %9107 = vst [vmem:[#allocation11_spill] sm:$0xff] %v5649_v18  ;;  %v254_v19 = vmul.f32 %v5239_v13, %v5649_v18  ;;  %173 = vperm.xlu1 %4651, %v51_v11   ;;  %v1011_v58 = vmul.f32 %v5533_v23, %v978_v46  ;;  %4709 = vpow2.f32 %v4486_v12  ;;  %v5668_v46 = vsub.f32 %v5412_v3, %v412_v7  ;;  %v342_v6 = vpop.xlane.xlu0 %341 }
 0x1db   :  { %v718_v32 = vsub.f32 1.5, %v717_v10  ;;  %v5672_v10 = vadd.f32 1.0, %v4702_v33  ;;  %v5685_v7 = vmul.f32 %v5606_v36, %v738_v5  ;;  %vm1205_vm3 = vweird.f32 %v5645_v21 }
 0x1dc   :  { %v5657_v61 = vpop.eup %4703  ;;  %v5661_v34 = vadd.f32 %v5246_v15, %v254_v19  ;;  %v5675_v12 = vadd.f32 %v5543_v4, %v1011_v58  ;;  %v476_v5 = vmul.f32 %v5668_v46, %v5668_v46  ;;  %vm1210_vm5 = vcmp.eq.f32.partialorder %v1209_v56, 8.507059e+37 }
 0x1dd   :  { %v719_v39 = vmul.f32 %v4698_v50, %v718_v32  ;;  %v725_v51 = vmul.f32 %v5657_v61, %v5631_v30  ;;  %vm731_vm12 = vweird.f32 %v5657_v61  ;;  %v1226_v30 = vand.u32 2147483648, %v5584_v47 }
 0x1de   :  { %v4706_v11 = vpop.eup %4705  ;;  %v376_v8 = vsel %vm294_vm0, %v5661_v34, 0.0  ;;  %vm732_vm2 = vmor %vm730_vm15, %vm731_vm12  ;;  %v743_v60 = vsel %vm5707_vm13, %v5606_v36, %v5685_v7  ;;  %vm1250_vm12 = vweird.f32 %v5672_v10 }
 0x1df   :  { %v4708_v19 = vpop.eup %4707  ;;  %v723_v54 = vsel %vm722_vm9, %v4698_v50, %v719_v39  ;;  %v726_v32 = vmul.f32 %v5657_v61, %v725_v51  ;;  %377 = vadd.xlane.f32.xlu0 %v376_v8  ;;  %v5682_v3 = vadd.f32 1.0, %v4706_v11  ;;  %v4485_v50 = vmul.f32 -1.442695, %v5675_v12 }
 0x1e0   :  { %v980_v33 = vmul.f32 %v723_v54, %v5466_v25  ;;  %v1201_v58 = vmul.f32 %v4708_v19, %v5645_v21  ;;  %v1219_v51 = vadd.f32 %v5622_v20, %v1218_v22  ;;  %v5693_v8 = vpop.eup %4709  ;;  %v1211_v54 = vand.u32 2147483648, %v5645_v21 }
 0x1e1   :  { %v727_v39 = vmul.f32 0.5, %v726_v32  ;;  %4711 = vrcp.f32 %v5682_v3  ;;  %v5695_v11 = vpop.permute.xlu2 %168  ;;  %vm1206_vm14 = vweird.f32 %v4708_v19  ;;  %v1227_v56 = vor.u32 1.1754944e-38, %v1226_v30  ;;  %v54_v30 = vld [vmem:[%s9064_s2 + $0xc0] sm:$0xff] }
 0x1e2   :  { %213 = vperm.xlu1 %4651, %v59_v55   ;;  %v1202_v25 = vsub.f32 1.0, %v1201_v58  ;;  %4713 = vrcp.f32 %v5672_v10  ;;  %v1013_v22 = vmul.f32 %v5533_v23, %v980_v33  ;;  %v247_v33 = vmul.f32 %v5239_v13, %v5695_v11  ;;  %vm1207_vm4 = vmor %vm1205_vm3, %vm1206_vm14 }
 0x1e3   :  { %v728_v32 = vsub.f32 1.5, %v727_v39  ;;  %4715 = vpow2.f32 %v4485_v50  ;;  %v1224_v39 = vand.u32 2147483647, %v5584_v47  ;;  %v1223_v47 = vsel %vm5721_vm1, %v5622_v20, %v1219_v51 }
 0x1e4   :  { %v1203_v58 = vmul.f32 %v4708_v19, %v1202_v25  ;;  %v5726_v50 = vadd.f32 %v5543_v4, %v1013_v22  ;;  %v536_v25 = vsel %vm294_vm0, %v476_v5, 0.0  ;;  %v61_v22 = vld [vmem:[%s9064_s2 + $0xf8] sm:$0xff]  ;;  %v1212_v5 = vor.u32 1.1754944e-38, %v1211_v54 }
 0x1e5   :  { %v729_v43 = vmul.f32 %v5657_v61, %v728_v32  ;;  %vm1225_vm6 = vcmp.eq.f32.partialorder %v1224_v39, 8.507059e+37  ;;  %vm1235_vm8 = vweird.f32 %v5682_v3 }
 0x1e6   :  { %v1204_v32 = vadd.f32 %v4708_v19, %v1203_v58  ;;  %v4487_v54 = vmul.f32 -1.442695, %v5726_v50 }
 0x1e7   :  { %v5731_v13 = vpop.eup %4711  ;;  %v733_v2 = vsel %vm732_vm2, %v5657_v61, %v729_v43  ;;  %537 = vadd.xlane.f32.xlu0 %v536_v25  ;;  %v413_v61 = vmul.f32 %v5355_v9, %v342_v6  ;;  %v5752_v25 = vadd.f32 %v5246_v15, %v247_v33  ;;  %v526_v33 = vpop.xlane.xlu0 %525 }
 0x1e8   :  { %v5745_v21 = vpop.eup %4713  ;;  %v981_v58 = vmul.f32 %v733_v2, %v5476_v63  ;;  %v1208_v55 = vsel %vm1207_vm4, %v4708_v19, %v1204_v32  ;;  %v1231_v43 = vmul.f32 %v5731_v13, %v5682_v3  ;;  %v982_v63 = vmul.f32 %v743_v60, %v5372_v40 }
 0x1e9   :  { %v4716_v36 = vpop.eup %4715  ;;  %v1213_v7 = vsel %vm1210_vm5, %v1212_v5, %v1208_v55  ;;  %v1246_v15 = vmul.f32 %v5745_v21, %v5672_v10  ;;  %v1228_v19 = vsel %vm1225_vm6, %v1227_v56, %v1223_v47  ;;  %v355_v32 = vsel %vm294_vm0, %v5752_v25, 0.0 }
 0x1ea   :  { %223 = vperm.xlu1 %4651, %v61_v22   ;;  %v1680_v20 = vmul.f32 %v1213_v7, %v5604_v53  ;;  %v1232_v51 = vsub.f32 1.0, %v1231_v43  ;;  %v5756_v0 = vadd.f32 1.0, %v4716_v36  ;;  %v1014_v2 = vmul.f32 %v5533_v23, %v981_v58 }
 0x1eb   :  { %v5766_v53 = vsub.f32 %v5433_v24, %v413_v61  ;;  %v5777_v22 = vadd.f32 1.0, %v5693_v8  ;;  %vm1236_vm7 = vweird.f32 %v5731_v13  ;;  %v1247_v60 = vsub.f32 1.0, %v1246_v15 }
 0x1ec   :  { %4513 = vmatmul.msk.f32.vlgmr.msra.gmra.mxu0 %vm294_vm0, %v1680_v20  ;;  %v1233_v6 = vmul.f32 %v5731_v13, %v1232_v51  ;;  %4717 = vrcp.f32 %v5756_v0  ;;  %v5771_v39 = vadd.f32 %v5543_v4, %v1014_v2  ;;  %v1681_v24 = vmul.f32 %v1228_v19, %v5550_v62  ;;  %vm1237_vm9 = vmor %vm1235_vm8, %vm1236_vm7 }
 0x1ed   :  { %4719 = vpow2.f32 %v4487_v54  ;;  %v1241_v5 = vand.u32 2147483648, %v5682_v3  ;;  %v1015_v47 = vmul.f32 %v5533_v23, %v982_v63  ;;  %v477_v55 = vmul.f32 %v5766_v53, %v5766_v53 }
 0x1ee   :  { %v1234_v40 = vadd.f32 %v5731_v13, %v1233_v6  ;;  %v1239_v8 = vand.u32 2147483647, %v5682_v3  ;;  %v4488_v43 = vmul.f32 -1.442695, %v5771_v39  ;;  %4721 = vrcp.f32 %v5777_v22 }
 0x1ef   :  { %356 = vadd.xlane.f32.xlu0 %v355_v32  ;;  %v1248_v61 = vmul.f32 %v5745_v21, %v1247_v60  ;;  %v600_v54 = vmul.f32 %v526_v33, %v5355_v9  ;;  %v1242_v20 = vor.u32 1.1754944e-38, %v1241_v5  ;;  %v539_v3 = vsel %vm294_vm0, %v477_v55, 0.0 }
 0x1f0   :  { %v1238_v36 = vsel %vm1237_vm9, %v5731_v13, %v1234_v40  ;;  %vm1240_vm10 = vcmp.eq.f32.partialorder %v1239_v8, 8.507059e+37  ;;  %4723 = vpow2.f32 %v4488_v43  ;;  %v5800_v51 = vadd.f32 %v5543_v4, %v1015_v47  ;;  %v5804_v13 = vpop.xlane.xlu0 %344 }
 0x1f1   :  { %v1243_v2 = vsel %vm1240_vm10, %v1242_v20, %v1238_v36  ;;  %v1249_v6 = vadd.f32 %v5745_v21, %v1248_v61  ;;  %vm1251_vm11 = vweird.f32 %v5745_v21  ;;  %v5810_v19 = vadd.f32 1e-05, %v600_v54 }
 0x1f2   :  { %v5784_v58 = vpop.eup %4717  ;;  %188 = vperm.xlu1 %4651, %v54_v30   ;;  %v1256_v33 = vand.u32 2147483648, %v5672_v10  ;;  %v1682_v32 = vmul.f32 %v1243_v2, %v5636_v1  ;;  %v1254_v30 = vand.u32 2147483647, %v5672_v10  ;;  %v4489_v40 = vmul.f32 -1.442695, %v5800_v51  ;;  %vm1252_vm13 = vmor %vm1250_vm12, %vm1251_vm11 }
 0x1f3   :  { %v4720_v62 = vpop.eup %4719  ;;  %v1261_v7 = vmul.f32 %v5784_v58, %v5756_v0  ;;  %vm1266_vm15 = vweird.f32 %v5784_v58  ;;  %v1271_v36 = vand.u32 2147483648, %v5756_v0  ;;  %vm1265_vm1 = vweird.f32 %v5756_v0 }
 0x1f4   :  { %4514 = vmatmul.msk.f32.gmra.mxu0 %vm294_vm0, %v1681_v24  ;;  %v5802_v56 = vadd.f32 1.0, %v4720_v62  ;;  %v5808_v63 = vpop.eup %4721  ;;  %v1253_v24 = vsel %vm1252_vm13, %v5745_v21, %v1249_v6  ;;  %v1257_v1 = vor.u32 1.1754944e-38, %v1256_v33  ;;  %vm1255_vm14 = vcmp.eq.f32.partialorder %v1254_v30, 8.507059e+37  ;;  %vm1267_vm2 = vmor %vm1265_vm1, %vm1266_vm15 }
 0x1f5   :  { %v1262_v15 = vsub.f32 1.0, %v1261_v7  ;;  %v1276_v47 = vmul.f32 %v5808_v63, %v5777_v22  ;;  %v1269_v7 = vand.u32 2147483647, %v5756_v0  ;;  %vm1281_vm4 = vweird.f32 %v5808_v63 }
 0x1f6   :  { %4725 = vrcp.f32 %v5802_v56  ;;  %v4724_v60 = vpop.eup %4723  ;;  %v1258_v10 = vsel %vm1255_vm14, %v1257_v1, %v1253_v24  ;;  %vm1280_vm5 = vweird.f32 %v5777_v22  ;;  %vm1295_vm9 = vweird.f32 %v5802_v56 }
 0x1f7   :  { %540 = vadd.xlane.f32.xlu0 %v539_v3  ;;  %v1263_v5 = vmul.f32 %v5784_v58, %v1262_v15  ;;  %4727 = vrsqrt.f32 %v5810_v19  ;;  %v5824_v55 = vadd.f32 1.0, %v4724_v60  ;;  %v1277_v21 = vsub.f32 1.0, %v1276_v47  ;;  %vm1282_vm6 = vmor %vm1280_vm5, %vm1281_vm4 }
 0x1f8   :  { %4729 = vpow2.f32 %v4489_v40  ;;  %v5826_v8 = vpop.permute.xlu0 %163  ;;  %v1683_v61 = vmul.f32 %v1258_v10, %v5611_v29  ;;  %v1272_v29 = vor.u32 1.1754944e-38, %v1271_v36  ;;  %vm1270_vm3 = vcmp.eq.f32.partialorder %v1269_v7, 8.507059e+37 }
 0x1f9   :  { %9112 = vst [vmem:[#allocation12_spill] sm:$0xff] %v5826_v8  ;;  %v1264_v43 = vadd.f32 %v5784_v58, %v1263_v5  ;;  %4731 = vrcp.f32 %v5824_v55  ;;  %v1278_v2 = vmul.f32 %v5808_v63, %v1277_v21  ;;  %v1284_v47 = vand.u32 2147483647, %v5777_v22 }
 0x1fa   :  { %vm760_vm13 = vweird.f32 %v5810_v19  ;;  %vm1310_vm1 = vweird.f32 %v5824_v55 }
 0x1fb   :  { %v1268_v3 = vsel %vm1267_vm2, %v5784_v58, %v1264_v43  ;;  %v1286_v58 = vand.u32 2147483648, %v5777_v22  ;;  %vm1285_vm7 = vcmp.eq.f32.partialorder %v1284_v47, 8.507059e+37 }
 0x1fc   :  { %4515 = vmatmul.msk.f32.gmra.mxu0 %vm294_vm0, %v1682_v32  ;;  %v5830_v62 = vpop.eup %4725  ;;  %v1273_v0 = vsel %vm1270_vm3, %v1272_v29, %v1268_v3  ;;  %v1279_v32 = vadd.f32 %v5808_v63, %v1278_v2  ;;  %v1299_v2 = vand.u32 2147483647, %v5802_v56 }
 0x1fd   :  { %v5836_v54 = vpop.eup %4727  ;;  %v1291_v6 = vmul.f32 %v5830_v62, %v5802_v56  ;;  %v1684_v5 = vmul.f32 %v1273_v0, %v5675_v12  ;;  %v1287_v21 = vor.u32 1.1754944e-38, %v1286_v58  ;;  %vm1296_vm8 = vweird.f32 %v5830_v62 }
 0x1fe   :  { %v4730_v20 = vpop.eup %4729  ;;  %v755_v15 = vmul.f32 %v5836_v54, %v5810_v19  ;;  %v1283_v1 = vsel %vm1282_vm6, %v5808_v63, %v1279_v32  ;;  %vm1297_vm10 = vmor %vm1295_vm9, %vm1296_vm8  ;;  %vm761_vm11 = vweird.f32 %v5836_v54  ;;  %vm1300_vm12 = vcmp.eq.f32.partialorder %v1299_v2, 8.507059e+37 }
 0x1ff   :  { %v5846_v33 = vadd.f32 1.0, %v4730_v20  ;;  %v1292_v30 = vsub.f32 1.0, %v1291_v6  ;;  %v5850_v40 = vpop.eup %4731  ;;  %v1288_v12 = vsel %vm1285_vm7, %v1287_v21, %v1283_v1  ;;  %v1301_v20 = vand.u32 2147483648, %v5802_v56  ;;  %v5876_v6 = vld [vmem:[%s9066_s4] ss:$0 sm:$0xff]  ;;  %vm5903_vm15 = vmor %vm760_vm13, %vm761_vm11 }
 0x200   :  { %v756_v60 = vmul.f32 %v5836_v54, %v755_v15  ;;  %v5854_v24 = vpop.permute.xlu0 %218  ;;  %v1306_v43 = vmul.f32 %v5850_v40, %v5824_v55  ;;  %v1685_v63 = vmul.f32 %v1288_v12, %v5628_v59  ;;  %v246_v29 = vmul.f32 %v5876_v6, %v5826_v8 }
 0x201   :  { %9113 = vst [vmem:[#allocation13_spill] sm:$0xff] %v5854_v24  ;;  %4733 = vrcp.f32 %v5846_v33  ;;  %v1293_v10 = vmul.f32 %v5830_v62, %v1292_v30  ;;  %v1302_v58 = vor.u32 1.1754944e-38, %v1301_v20  ;;  %vm1311_vm14 = vweird.f32 %v5850_v40 }
 0x202   :  { %v757_v36 = vmul.f32 0.5, %v756_v60  ;;  %v1307_v22 = vsub.f32 1.0, %v1306_v43  ;;  %vm1312_vm2 = vmor %vm1310_vm1, %vm1311_vm14  ;;  %vm1325_vm5 = vweird.f32 %v5846_v33 }
 0x204   :  { %4516 = vmatmul.msk.f32.gmra.mxu0 %vm294_vm0, %v1683_v61  ;;  %v1294_v61 = vadd.f32 %v5830_v62, %v1293_v10  ;;  %v758_v3 = vsub.f32 1.5, %v757_v36  ;;  %v1308_v32 = vmul.f32 %v5850_v40, %v1307_v22  ;;  %v1316_v36 = vand.u32 2147483648, %v5824_v55 }
 0x205   :  { %v1314_v22 = vand.u32 2147483647, %v5824_v55 }
 0x206   :  { %v1298_v59 = vsel %vm1297_vm10, %v5830_v62, %v1294_v61  ;;  %v759_v60 = vmul.f32 %v5836_v54, %v758_v3  ;;  %v5895_v62 = vld [vmem:[%s9067_s5] ss:$0 sm:$0xff]  ;;  %v1309_v10 = vadd.f32 %v5850_v40, %v1308_v32  ;;  %v1317_v55 = vor.u32 1.1754944e-38, %v1316_v36 }
 0x207   :  { %v5867_v7 = vpop.eup %4733  ;;  %v1303_v47 = vsel %vm1300_vm12, %v1302_v58, %v1298_v59  ;;  %v5898_v1 = vadd.f32 %v5895_v62, %v246_v29  ;;  %vm1315_vm3 = vcmp.eq.f32.partialorder %v1314_v22, 8.507059e+37 }
 0x208   :  { %v5880_v15 = vpop.permute.xlu0 %183  ;;  %v1321_v56 = vmul.f32 %v5867_v7, %v5846_v33  ;;  %v763_v12 = vsel %vm5903_vm15, %v5836_v54, %v759_v60  ;;  %v1686_v19 = vmul.f32 %v1303_v47, %v5726_v50  ;;  %v1313_v2 = vsel %vm1312_vm2, %v5850_v40, %v1309_v10 }
 0x209   :  { %v352_v3 = vsel %vm294_vm0, %v5898_v1, 0.0  ;;  %v984_v50 = vmul.f32 %v763_v12, %v5439_v31  ;;  %vm1326_vm4 = vweird.f32 %v5867_v7  ;;  %v1331_v40 = vand.u32 2147483648, %v5846_v33 }
 0x20a   :  { %v1322_v43 = vsub.f32 1.0, %v1321_v56  ;;  %v1318_v56 = vsel %vm1315_vm3, %v1317_v55, %v1313_v2  ;;  %v1329_v10 = vand.u32 2147483647, %v5846_v33  ;;  %vm5931_vm6 = vmor %vm1325_vm5, %vm1326_vm4 }
 0x20b   :  { %v1017_v31 = vmul.f32 %v5533_v23, %v984_v50  ;;  %v1687_v47 = vmul.f32 %v1318_v56, %v5771_v39  ;;  %v1332_v39 = vor.u32 1.1754944e-38, %v1331_v40 }
 0x20c   :  { %4517 = vmatmul.msk.f32.gmra.mxu0 %vm294_vm0, %v1684_v5  ;;  %v1323_v54 = vmul.f32 %v5867_v7, %v1322_v43  ;;  %vm1330_vm8 = vcmp.eq.f32.partialorder %v1329_v10, 8.507059e+37 }
 0x20d   :  { %v5941_v22 = vadd.f32 %v5543_v4, %v1017_v31 }
 0x20e   :  { %v1324_v58 = vadd.f32 %v5867_v7, %v1323_v54 }
 0x210   :  { %v1328_v12 = vsel %vm5931_vm6, %v5867_v7, %v1324_v58  ;;  %v4491_v7 = vmul.f32 -1.442695, %v5941_v22 }
 0x211   :  { %v1333_v2 = vsel %vm1330_vm8, %v1332_v39, %v1328_v12 }
 0x212   :  { %v1688_v58 = vmul.f32 %v1333_v2, %v5800_v51 }
 0x214   :  { %v529_v0 = vpop.xlane.xlu1 %528  ;;  %4518 = vmatmul.msk.f32.gmra.mxu0 %vm294_vm0, %v1685_v63 }
 0x215   :  { %v601_v30 = vmul.f32 %v529_v0, %v5355_v9 }
 0x217   :  { %v5890_v5 = vadd.f32 1e-05, %v601_v30 }
 0x219   :  { %4735 = vrsqrt.f32 %v5890_v5  ;;  %vm770_vm9 = vweird.f32 %v5890_v5 }
 0x21a   :  { %v523_v61 = vpop.xlane.xlu2 %522 }
 0x21b   :  { %v599_v20 = vmul.f32 %v523_v61, %v5355_v9 }
 0x21c   :  { %4519 = vmatmul.msk.f32.gmra.mxu0 %vm294_vm0, %v1686_v19  ;;  %353 = vadd.xlane.f32.xlu1 %v352_v3  ;;  %v532_v63 = vpop.xlane.xlu0 %531 }
 0x21d   :  { %v631_v29 = vadd.f32 1e-05, %v599_v20  ;;  %v602_v0 = vmul.f32 %v532_v63, %v5355_v9 }
 0x21f   :  { %v4736_v59 = vpop.eup %4735  ;;  %4737 = vrsqrt.f32 %v631_v29  ;;  %v634_v32 = vadd.f32 1e-05, %v602_v0  ;;  %vm750_vm12 = vweird.f32 %v631_v29 }
 0x220   :  { %v765_v30 = vmul.f32 %v4736_v59, %v5890_v5  ;;  %vm771_vm7 = vweird.f32 %v4736_v59 }
 0x221   :  { %4739 = vrsqrt.f32 %v634_v32  ;;  %vm772_vm10 = vmor %vm770_vm9, %vm771_vm7  ;;  %vm780_vm15 = vweird.f32 %v634_v32 }
 0x222   :  { %v766_v60 = vmul.f32 %v4736_v59, %v765_v30 }
 0x224   :  { %v767_v21 = vmul.f32 0.5, %v766_v60  ;;  %4520 = vmatmul.msk.f32.gmra.mxu0 %vm294_vm0, %v1687_v47  ;;  %v535_v36 = vpop.xlane.xlu0 %534 }
 0x225   :  { %v4738_v61 = vpop.eup %4737  ;;  %v603_v19 = vmul.f32 %v535_v36, %v5355_v9 }
 0x226   :  { %v768_v33 = vsub.f32 1.5, %v767_v21  ;;  %v745_v20 = vmul.f32 %v4738_v61, %v631_v29  ;;  %vm751_vm11 = vweird.f32 %v4738_v61 }
 0x227   :  { %v4740_v3 = vpop.eup %4739  ;;  %v635_v63 = vadd.f32 1e-05, %v603_v19  ;;  %vm752_vm14 = vmor %vm750_vm12, %vm751_vm11 }
 0x228   :  { %v769_v54 = vmul.f32 %v4736_v59, %v768_v33  ;;  %v746_v50 = vmul.f32 %v4738_v61, %v745_v20  ;;  %v775_v0 = vmul.f32 %v4740_v3, %v634_v32  ;;  %vm781_vm13 = vweird.f32 %v4740_v3 }
 0x229   :  { %4741 = vrsqrt.f32 %v635_v63  ;;  %vm782_vm1 = vmor %vm780_vm15, %vm781_vm13  ;;  %vm790_vm3 = vweird.f32 %v635_v63 }
 0x22a   :  { %v773_v55 = vsel %vm772_vm10, %v4736_v59, %v769_v54  ;;  %v747_v56 = vmul.f32 0.5, %v746_v50  ;;  %v776_v30 = vmul.f32 %v4740_v3, %v775_v0  ;;  %4743 = vpow2.f32 %v4491_v7 }
 0x22b   :  { %v985_v40 = vmul.f32 %v773_v55, %v5502_v37 }
 0x22c   :  { %v748_v31 = vsub.f32 1.5, %v747_v56  ;;  %v777_v60 = vmul.f32 0.5, %v776_v30  ;;  %v5947_v47 = vpop.permute.xlu1 %153  ;;  %4521 = vmatmul.msk.f32.gmra.mxu0 %vm294_vm0, %v1688_v58 }
 0x22d   :  { %9118 = vst [vmem:[#allocation14_spill] sm:$0xff] %v5947_v47  ;;  %v244_v5 = vmul.f32 %v5876_v6, %v5947_v47  ;;  %v1018_v10 = vmul.f32 %v5533_v23, %v985_v40 }
 0x22e   :  { %v749_v59 = vmul.f32 %v4738_v61, %v748_v31  ;;  %v778_v43 = vsub.f32 1.5, %v777_v60 }
 0x22f   :  { %v4742_v51 = vpop.eup %4741  ;;  %v5954_v37 = vadd.f32 %v5895_v62, %v244_v5  ;;  %v5957_v21 = vadd.f32 %v5543_v4, %v1018_v10 }
 0x230   :  { %v753_v36 = vsel %vm752_vm14, %v4738_v61, %v749_v59  ;;  %v779_v12 = vmul.f32 %v4740_v3, %v778_v43  ;;  %v785_v19 = vmul.f32 %v4742_v51, %v635_v63  ;;  %v4744_v2 = vpop.eup %4743  ;;  %vm791_vm2 = vweird.f32 %v4742_v51 }
 0x231   :  { %v983_v39 = vmul.f32 %v753_v36, %v5505_v49  ;;  %v346_v29 = vsel %vm294_vm0, %v5954_v37, 0.0  ;;  %v4492_v0 = vmul.f32 -1.442695, %v5957_v21  ;;  %v5973_v56 = vadd.f32 1.0, %v4744_v2  ;;  %vm792_vm4 = vmor %vm790_vm3, %vm791_vm2 }
 0x232   :  { %v783_v33 = vsel %vm782_vm1, %v4740_v3, %v779_v12  ;;  %v786_v20 = vmul.f32 %v4742_v51, %v785_v19  ;;  %347 = vadd.xlane.f32.xlu2 %v346_v29 }
 0x233   :  { %v986_v54 = vmul.f32 %v783_v33, %v5516_v44  ;;  %v1016_v50 = vmul.f32 %v5533_v23, %v983_v39  ;;  %4745 = vpow2.f32 %v4492_v0  ;;  %vm1355_vm10 = vweird.f32 %v5973_v56 }
 0x234   :  { %v787_v61 = vmul.f32 0.5, %v786_v20  ;;  %v5965_v7 = vpop.permute.xlu1 %158 }
 0x235   :  { %9119 = vst [vmem:[#allocation15_spill] sm:$0xff] %v5965_v7  ;;  %v245_v49 = vmul.f32 %v5876_v6, %v5965_v7  ;;  %v5970_v32 = vadd.f32 %v5543_v4, %v1016_v50  ;;  %v1019_v3 = vmul.f32 %v5533_v23, %v986_v54 }
 0x236   :  { %v788_v55 = vsub.f32 1.5, %v787_v61 }
 0x237   :  { %v5976_v44 = vadd.f32 %v5895_v62, %v245_v49  ;;  %v4490_v30 = vmul.f32 -1.442695, %v5970_v32  ;;  %v5980_v58 = vadd.f32 %v5543_v4, %v1019_v3  ;;  %v414_v3 = vmul.f32 %v5355_v9, %v5804_v13 }
 0x238   :  { %v789_v40 = vmul.f32 %v4742_v51, %v788_v55 }
 0x239   :  { %v349_v31 = vsel %vm294_vm0, %v5976_v44, 0.0  ;;  %4747 = vpow2.f32 %v4490_v30  ;;  %v4493_v10 = vmul.f32 -1.442695, %v5980_v58  ;;  %v4746_v43 = vpop.eup %4745  ;;  %v6025_v13 = vsub.f32 %v5463_v57, %v414_v3 }
 0x23a   :  { %v793_v60 = vsel %vm792_vm4, %v4742_v51, %v789_v40  ;;  %350 = vadd.xlane.f32.xlu2 %v349_v31  ;;  %4749 = vrcp.f32 %v5973_v56  ;;  %v5998_v39 = vadd.f32 1.0, %v4746_v43 }
 0x23b   :  { %v987_v5 = vmul.f32 %v793_v60, %v5527_v35  ;;  %4751 = vpow2.f32 %v4493_v10 }
 0x23c   :  { %v5987_v59 = vpop.permute.xlu1 %198  ;;  %vm1370_vm14 = vweird.f32 %v5998_v39 }
 0x23d   :  { %9120 = vst [vmem:[#allocation16_spill] sm:$0xff] %v5987_v59  ;;  %v253_v36 = vmul.f32 %v5876_v6, %v5987_v59  ;;  %v1020_v63 = vmul.f32 %v5533_v23, %v987_v5 }
 0x23f   :  { %v4748_v12 = vpop.eup %4747  ;;  %v5993_v19 = vadd.f32 %v5895_v62, %v253_v36  ;;  %v5996_v51 = vadd.f32 %v5543_v4, %v1020_v63 }
 0x240   :  { %v1177_v35 = vadd.f32 1.0, %v4748_v12  ;;  %v6000_v29 = vpop.eup %4749 }
 0x241   :  { %v373_v33 = vsel %vm294_vm0, %v5993_v19, 0.0  ;;  %v4494_v23 = vmul.f32 -1.442695, %v5996_v51  ;;  %v1351_v2 = vmul.f32 %v6000_v29, %v5973_v56  ;;  %v4752_v4 = vpop.eup %4751  ;;  %vm1356_vm8 = vweird.f32 %v6000_v29 }
 0x242   :  { %374 = vadd.xlane.f32.xlu2 %v373_v33  ;;  %4753 = vrcp.f32 %v1177_v35  ;;  %v6010_v0 = vadd.f32 1.0, %v4752_v4  ;;  %v1344_v40 = vand.u32 2147483647, %v1177_v35  ;;  %v1346_v31 = vand.u32 2147483648, %v1177_v35  ;;  %vm1357_vm11 = vmor %vm1355_vm10, %vm1356_vm8 }
 0x243   :  { %4755 = vrcp.f32 %v5998_v39  ;;  %v1352_v50 = vsub.f32 1.0, %v1351_v2  ;;  %vm1340_vm6 = vweird.f32 %v1177_v35 }
 0x244   :  { %v6005_v20 = vpop.permute.xlu1 %208  ;;  %4757 = vpow2.f32 %v4494_v23  ;;  %v1347_v33 = vor.u32 1.1754944e-38, %v1346_v31  ;;  %vm1345_vm9 = vcmp.eq.f32.partialorder %v1344_v40, 8.507059e+37  ;;  %vm1385_vm3 = vweird.f32 %v6010_v0 }
 0x245   :  { %9121 = vst [vmem:[#allocation17_spill] sm:$0xff] %v6005_v20  ;;  %v1353_v60 = vmul.f32 %v6000_v29, %v1352_v50  ;;  %4759 = vrcp.f32 %v6010_v0 }
 0x247   :  { %v1354_v23 = vadd.f32 %v6000_v29, %v1353_v60  ;;  %v1359_v60 = vand.u32 2147483647, %v5973_v56 }
 0x248   :  { %v4754_v54 = vpop.eup %4753 }
 0x249   :  { %v1336_v61 = vmul.f32 %v4754_v54, %v1177_v35  ;;  %v6012_v49 = vpop.eup %4755  ;;  %vm1341_vm5 = vweird.f32 %v4754_v54  ;;  %vm1360_vm12 = vcmp.eq.f32.partialorder %v1359_v60, 8.507059e+37 }
 0x24a   :  { %v4758_v5 = vpop.eup %4757  ;;  %v1366_v36 = vmul.f32 %v6012_v49, %v5998_v39  ;;  %vm1342_vm7 = vmor %vm1340_vm6, %vm1341_vm5  ;;  %vm1371_vm13 = vweird.f32 %v6012_v49 }
 0x24b   :  { %v1337_v55 = vsub.f32 1.0, %v1336_v61  ;;  %v6032_v2 = vadd.f32 1.0, %v4758_v5  ;;  %v6036_v61 = vpop.eup %4759  ;;  %vm1372_vm15 = vmor %vm1370_vm14, %vm1371_vm13 }
 0x24c   :  { %v6016_v30 = vpop.permute.xlu1 %173  ;;  %v1367_v57 = vsub.f32 1.0, %v1366_v36  ;;  %v52_v36 = vld [vmem:[%s9064_s2 + $0xb0] sm:$0xff]  ;;  %vm1386_vm2 = vweird.f32 %v6036_v61 }
 0x24d   :  { %v248_v10 = vmul.f32 %v5876_v6, %v6016_v30  ;;  %v1338_v43 = vmul.f32 %v4754_v54, %v1337_v55  ;;  %v1361_v55 = vand.u32 2147483648, %v5973_v56  ;;  %4761 = vrcp.f32 %v6032_v2  ;;  %vm1387_vm4 = vmor %vm1385_vm3, %vm1386_vm2 }
 0x24e   :  { %v1381_v56 = vmul.f32 %v6036_v61, %v6010_v0 }
 0x24f   :  { %v6028_v63 = vadd.f32 %v5895_v62, %v248_v10  ;;  %v1339_v12 = vadd.f32 %v4754_v54, %v1338_v43  ;;  %v1368_v10 = vmul.f32 %v6012_v49, %v1367_v57  ;;  %v1362_v43 = vor.u32 1.1754944e-38, %v1361_v55 }
 0x250   :  { %v1382_v57 = vsub.f32 1.0, %v1381_v56 }
 0x251   :  { %v358_v4 = vsel %vm294_vm0, %v6028_v63, 0.0  ;;  %v1343_v50 = vsel %vm1342_vm7, %v4754_v54, %v1339_v12  ;;  %v478_v54 = vmul.f32 %v6025_v13, %v6025_v13  ;;  %vm1400_vm7 = vweird.f32 %v6032_v2 }
 0x252   :  { %359 = vadd.xlane.f32.xlu0 %v358_v4  ;;  %v6038_v3 = vpop.xlane.xlu0 %377  ;;  %v1348_v35 = vsel %vm1345_vm9, %v1347_v33, %v1343_v50  ;;  %v257_v33 = vmul.f32 %v5876_v6, %v5854_v24  ;;  %v1369_v50 = vadd.f32 %v6012_v49, %v1368_v10 }
 0x253   :  { %v1689_v31 = vmul.f32 %v1348_v35, %v5970_v32  ;;  %v1358_v32 = vsel %vm1357_vm11, %v6000_v29, %v1354_v23  ;;  %v542_v4 = vsel %vm294_vm0, %v478_v54, 0.0  ;;  %v6071_v35 = vpop.eup %4761 }
 0x254   :  { %v6044_v5 = vpop.permute.xlu1 %213  ;;  %v1363_v29 = vsel %vm1360_vm12, %v1362_v43, %v1358_v32  ;;  %v6081_v10 = vadd.f32 %v5895_v62, %v257_v33  ;;  %v1373_v43 = vsel %vm1372_vm15, %v6012_v49, %v1369_v50  ;;  %v250_v33 = vmul.f32 %v5876_v6, %v5880_v15 }
 0x255   :  { %9122 = vst [vmem:[#allocation18_spill] sm:$0xff] %v6044_v5  ;;  %v256_v40 = vmul.f32 %v5876_v6, %v6044_v5  ;;  %4522 = vmatmul.msk.f32.gmra.mxu0 %vm294_vm0, %v1689_v31  ;;  %v1376_v31 = vand.u32 2147483648, %v5998_v39  ;;  %v1690_v54 = vmul.f32 %v1363_v29, %v5941_v22  ;;  %v1396_v22 = vmul.f32 %v6071_v35, %v6032_v2 }
 0x256   :  { %vm1401_vm6 = vweird.f32 %v6071_v35 }
 0x257   :  { %v6062_v12 = vadd.f32 %v5895_v62, %v256_v40  ;;  %v1374_v40 = vand.u32 2147483647, %v5998_v39  ;;  %v55_v39 = vld [vmem:[%s9064_s2 + $0xc8] sm:$0xff]  ;;  %v1397_v50 = vsub.f32 1.0, %v1396_v22  ;;  %vm1402_vm9 = vmor %vm1400_vm7, %vm1401_vm6 }
 0x259   :  { %v382_v23 = vsel %vm294_vm0, %v6062_v12, 0.0  ;;  %vm1375_vm1 = vcmp.eq.f32.partialorder %v1374_v40, 8.507059e+37  ;;  %v6105_v40 = vadd.f32 %v5895_v62, %v250_v33 }
 0x25a   :  { %178 = vperm.xlu2 %4652, %v52_v36   ;;  %543 = vadd.xlane.f32.xlu0 %v542_v4  ;;  %v538_v55 = vpop.xlane.xlu0 %537  ;;  %v1383_v36 = vmul.f32 %v6036_v61, %v1382_v57  ;;  %v1377_v4 = vor.u32 1.1754944e-38, %v1376_v31 }
 0x25b   :  { %383 = vadd.xlane.f32.xlu1 %v382_v23  ;;  %v604_v60 = vmul.f32 %v538_v55, %v5355_v9  ;;  %v385_v23 = vsel %vm294_vm0, %v6081_v10, 0.0  ;;  %v1391_v55 = vand.u32 2147483648, %v6010_v0 }
 0x25c   :  { %v6078_v32 = vpop.permute.xlu1 %223  ;;  %v1378_v29 = vsel %vm1375_vm1, %v1377_v4, %v1373_v43  ;;  %v1384_v49 = vadd.f32 %v6036_v61, %v1383_v36  ;;  %v1398_v36 = vmul.f32 %v6071_v35, %v1397_v50  ;;  %v1406_v50 = vand.u32 2147483648, %v6032_v2 }
 0x25d   :  { %9123 = vst [vmem:[#allocation19_spill] sm:$0xff] %v6078_v32  ;;  %v636_v56 = vadd.f32 1e-05, %v604_v60  ;;  %4523 = vmatmul.msk.f32.gmra.mxu0 %vm294_vm0, %v1690_v54  ;;  %v1691_v31 = vmul.f32 %v1378_v29, %v5957_v21  ;;  %v1389_v60 = vand.u32 2147483647, %v6010_v0 }
 0x25e   :  { %v1388_v43 = vsel %vm1387_vm4, %v6036_v61, %v1384_v49  ;;  %v1399_v33 = vadd.f32 %v6071_v35, %v1398_v36 }
 0x25f   :  { %4763 = vrsqrt.f32 %v636_v56  ;;  %vm1390_vm5 = vcmp.eq.f32.partialorder %v1389_v60, 8.507059e+37  ;;  %v1404_v60 = vand.u32 2147483647, %v6032_v2  ;;  %vm800_vm10 = vweird.f32 %v636_v56 }
 0x261   :  { %vm1405_vm12 = vcmp.eq.f32.partialorder %v1404_v60, 8.507059e+37 }
 0x262   :  { %193 = vperm.xlu2 %4652, %v55_v39   ;;  %386 = vadd.xlane.f32.xlu0 %v385_v23  ;;  %v6097_v57 = vpop.xlane.xlu0 %356  ;;  %v1392_v39 = vor.u32 1.1754944e-38, %v1391_v55  ;;  %v364_v23 = vsel %vm294_vm0, %v6105_v40, 0.0 }
 0x264   :  { %v6109_v4 = vpop.permute.xlu1 %188  ;;  %v1393_v29 = vsel %vm1390_vm5, %v1392_v39, %v1388_v43  ;;  %v1403_v39 = vsel %vm1402_vm9, %v6071_v35, %v1399_v33  ;;  %v6134_v35 = vld [vmem:[%s9067_s5 + $0x1] ss:$0 sm:$0xff] }
 0x265   :  { %v4764_v54 = vpop.eup %4763  ;;  %4524 = vmatmul.msk.f32.gmra.mxu0 %vm294_vm0, %v1691_v31  ;;  %v251_v0 = vmul.f32 %v5876_v6, %v6109_v4  ;;  %v1692_v31 = vmul.f32 %v1393_v29, %v5980_v58 }
 0x266   :  { %v795_v22 = vmul.f32 %v4764_v54, %v636_v56  ;;  %vm801_vm8 = vweird.f32 %v4764_v54 }
 0x267   :  { %v6124_v36 = vadd.f32 %v5895_v62, %v251_v0  ;;  %vm802_vm11 = vmor %vm800_vm10, %vm801_vm8 }
 0x268   :  { %v796_v21 = vmul.f32 %v4764_v54, %v795_v22 }
 0x26a   :  { %v797_v61 = vmul.f32 0.5, %v796_v21  ;;  %365 = vadd.xlane.f32.xlu0 %v364_v23  ;;  %v541_v49 = vpop.xlane.xlu0 %540  ;;  %v1407_v23 = vor.u32 1.1754944e-38, %v1406_v50 }
 0x26b   :  { %v605_v55 = vmul.f32 %v541_v49, %v5355_v9 }
 0x26c   :  { %v798_v43 = vsub.f32 1.5, %v797_v61  ;;  %v1408_v29 = vsel %vm1405_vm12, %v1407_v23, %v1403_v39  ;;  %v367_v61 = vsel %vm294_vm0, %v6124_v36, 0.0 }
 0x26d   :  { %v637_v22 = vadd.f32 1e-05, %v605_v55  ;;  %4525 = vmatmul.msk.f32.gmra.mxu0 %vm294_vm0, %v1692_v31  ;;  %v1693_v49 = vmul.f32 %v1408_v29, %v5996_v51 }
 0x26e   :  { %v799_v21 = vmul.f32 %v4764_v54, %v798_v43 }
 0x26f   :  { %4765 = vrsqrt.f32 %v637_v22  ;;  %vm810_vm14 = vweird.f32 %v637_v22 }
 0x270   :  { %v803_v58 = vsel %vm802_vm11, %v4764_v54, %v799_v21 }
 0x271   :  { %v988_v2 = vmul.f32 %v803_v58, %v5668_v46  ;;  %v6141_v46 = vld [vmem:[%s9067_s5 + $0x2] ss:$0 sm:$0xff]  ;;  %v255_v58 = vmul.f32 %v5876_v6, %v6005_v20 }
 0x272   :  { %368 = vadd.xlane.f32.xlu0 %v367_v61 }
 0x273   :  { %v1021_v56 = vmul.f32 %v6134_v35, %v988_v2  ;;  %v6150_v61 = vadd.f32 %v5895_v62, %v255_v58 }
 0x275   :  { %v4766_v0 = vpop.eup %4765  ;;  %4526 = vmatmul.msk.f32.gmra.mxu0 %vm294_vm0, %v1693_v49  ;;  %v1054_v54 = vadd.f32 %v6141_v46, %v1021_v56 }
 0x276   :  { %v805_v33 = vmul.f32 %v4766_v0, %v637_v22  ;;  %vm811_vm13 = vweird.f32 %v4766_v0 }
 0x277   :  { %v4495_v50 = vmul.f32 -1.442695, %v1054_v54  ;;  %vm812_vm15 = vmor %vm810_vm14, %vm811_vm13 }
 0x278   :  { %v806_v51 = vmul.f32 %v4766_v0, %v805_v33 }
 0x279   :  { %4767 = vpow2.f32 %v4495_v50 }
 0x27a   :  { %v807_v55 = vmul.f32 0.5, %v806_v51 }
 0x27c   :  { %v808_v31 = vsub.f32 1.5, %v807_v55 }
 0x27e   :  { %v809_v60 = vmul.f32 %v4766_v0, %v808_v31 }
 0x27f   :  { %v4768_v43 = vpop.eup %4767 }
 0x280   :  { %v813_v39 = vsel %vm812_vm15, %v4766_v0, %v809_v60  ;;  %v1182_v21 = vadd.f32 1.0, %v4768_v43  ;;  %v379_v0 = vsel %vm294_vm0, %v6150_v61, 0.0 }
 0x281   :  { %v989_v23 = vmul.f32 %v813_v39, %v5766_v53 }
 0x282   :  { %4769 = vrcp.f32 %v1182_v21  ;;  %v1421_v33 = vand.u32 2147483648, %v1182_v21  ;;  %v1419_v51 = vand.u32 2147483647, %v1182_v21  ;;  %vm1415_vm2 = vweird.f32 %v1182_v21 }
 0x283   :  { %v1022_v29 = vmul.f32 %v6134_v35, %v989_v23  ;;  %v6154_v23 = vpop.f32.mrf.mxu0 }
 0x284   :  { %v1422_v60 = vor.u32 1.1754944e-38, %v1421_v33  ;;  %vm1420_vm4 = vcmp.eq.f32.partialorder %v1419_v51, 8.507059e+37 }
 0x285   :  { %v1055_v2 = vadd.f32 %v6141_v46, %v1022_v29 }
 0x287   :  { %v4496_v49 = vmul.f32 -1.442695, %v1055_v2 }
 0x288   :  { %v4770_v56 = vpop.eup %4769 }
 0x289   :  { %v1411_v22 = vmul.f32 %v4770_v56, %v1182_v21  ;;  %4771 = vpow2.f32 %v4496_v49  ;;  %vm1416_vm1 = vweird.f32 %v4770_v56 }
 0x28a   :  { %vm1417_vm3 = vmor %vm1415_vm2, %vm1416_vm1 }
 0x28b   :  { %380 = vadd.xlane.f32.xlu2 %v379_v0  ;;  %v1412_v53 = vsub.f32 1.0, %v1411_v22 }
 0x28d   :  { %v1413_v50 = vmul.f32 %v4770_v56, %v1412_v53  ;;  %v6157_v53 = vpop.f32.mrf.mxu0 }
 0x28f   :  { %v4772_v55 = vpop.eup %4771  ;;  %v1414_v31 = vadd.f32 %v4770_v56, %v1413_v50 }
 0x290   :  { %v1183_v43 = vadd.f32 1.0, %v4772_v55 }
 0x291   :  { %v1418_v39 = vsel %vm1417_vm3, %v4770_v56, %v1414_v31 }
 0x292   :  { %v1423_v58 = vsel %vm1420_vm4, %v1422_v60, %v1418_v39  ;;  %4773 = vrcp.f32 %v1183_v43  ;;  %v1436_v5 = vand.u32 2147483648, %v1183_v43  ;;  %v1434_v21 = vand.u32 2147483647, %v1183_v43  ;;  %v354_v39 = vpop.xlane.xlu1 %353 }
 0x293   :  { %v1694_v29 = vmul.f32 %v1423_v58, %v1054_v54  ;;  %vm1430_vm6 = vweird.f32 %v1183_v43 }
 0x294   :  { %v1437_v56 = vor.u32 1.1754944e-38, %v1436_v5  ;;  %vm1435_vm8 = vcmp.eq.f32.partialorder %v1434_v21, 8.507059e+37  ;;  %v418_v21 = vmul.f32 %v5355_v9, %v6097_v57 }
 0x295   :  { %4527 = vmatmul.msk.f32.gmra.mxu0 %vm294_vm0, %v1694_v29  ;;  %v6160_v60 = vpop.f32.mrf.mxu0 }
 0x298   :  { %v4774_v49 = vpop.eup %4773 }
 0x299   :  { %v1426_v22 = vmul.f32 %v4774_v49, %v1183_v43  ;;  %vm1431_vm5 = vweird.f32 %v4774_v49 }
 0x29a   :  { %vm1432_vm7 = vmor %vm1430_vm6, %vm1431_vm5 }
 0x29b   :  { %v1427_v0 = vsub.f32 1.0, %v1426_v22 }
 0x29d   :  { %v1428_v50 = vmul.f32 %v4774_v49, %v1427_v0  ;;  %v6163_v22 = vpop.f32.mrf.mxu0  ;;  %v417_v0 = vmul.f32 %v5355_v9, %v354_v39 }
 0x29f   :  { %v1429_v33 = vadd.f32 %v4774_v49, %v1428_v50 }
 0x2a1   :  { %v1433_v51 = vsel %vm1432_vm7, %v4774_v49, %v1429_v33 }
 0x2a2   :  { %v1438_v55 = vsel %vm1435_vm8, %v1437_v56, %v1433_v51 }
 0x2a3   :  { %v1695_v31 = vmul.f32 %v1438_v55, %v1055_v2  ;;  %v6172_v2 = vsub.f32 %v5898_v1, %v417_v0 }
 0x2a5   :  { %v348_v54 = vpop.xlane.xlu2 %347  ;;  %4528 = vmatmul.msk.f32.gmra.mxu0 %vm294_vm0, %v1695_v31  ;;  %v481_v33 = vmul.f32 %v6172_v2, %v6172_v2  ;;  %v6179_v56 = vpop.f32.mrf.mxu0 }
 0x2a6   :  { %v415_v1 = vmul.f32 %v5355_v9, %v348_v54 }
 0x2a7   :  { %v551_v51 = vsel %vm294_vm0, %v481_v33, 0.0  ;;  %v258_v33 = vmul.f32 %v5876_v6, %v6078_v32 }
 0x2ad   :  { %v351_v58 = vpop.xlane.xlu2 %350 }
 0x2ae   :  { %v416_v29 = vmul.f32 %v5355_v9, %v351_v58  ;;  %v6196_v58 = vsub.f32 %v5954_v37, %v415_v1 }
 0x2b0   :  { %v6167_v43 = vsub.f32 %v5976_v44, %v416_v29  ;;  %v6182_v44 = vsub.f32 %v5752_v25, %v418_v21  ;;  %v6200_v29 = vpop.f32.mrf.mxu0  ;;  %v479_v21 = vmul.f32 %v6196_v58, %v6196_v58 }
 0x2b2   :  { %v480_v5 = vmul.f32 %v6167_v43, %v6167_v43  ;;  %v482_v39 = vmul.f32 %v6182_v44, %v6182_v44 }
 0x2b4   :  { %v548_v49 = vsel %vm294_vm0, %v480_v5, 0.0  ;;  %v554_v54 = vsel %vm294_vm0, %v482_v39, 0.0 }
 0x2b5   :  { %v375_v50 = vpop.xlane.xlu2 %374  ;;  %549 = vadd.xlane.f32.xlu2 %v548_v49 }
 0x2b8   :  { %v6217_v39 = vpop.f32.mrf.mxu0 }
 0x2bd   :  { %v6185_v55 = vpop.permute.xlu2 %178  ;;  %552 = vadd.xlane.f32.xlu2 %v551_v51  ;;  %v545_v51 = vsel %vm294_vm0, %v479_v21, 0.0 }
 0x2be   :  { %v249_v31 = vmul.f32 %v5876_v6, %v6185_v55 }
 0x2c0   :  { %v6191_v57 = vadd.f32 %v5895_v62, %v249_v31 }
 0x2c2   :  { %v361_v25 = vsel %vm294_vm0, %v6191_v57, 0.0 }
 0x2c3   :  { %362 = vadd.xlane.f32.xlu1 %v361_v25  ;;  %v424_v25 = vmul.f32 %v5355_v9, %v375_v50 }
 0x2c5   :  { %v6203_v0 = vpop.permute.xlu2 %193  ;;  %555 = vadd.xlane.f32.xlu2 %v554_v54  ;;  %v360_v5 = vpop.xlane.xlu0 %359 }
 0x2c6   :  { %v252_v49 = vmul.f32 %v5876_v6, %v6203_v0  ;;  %v419_v59 = vmul.f32 %v5355_v9, %v360_v5 }
 0x2c8   :  { %v6210_v37 = vadd.f32 %v5895_v62, %v252_v49  ;;  %v6222_v49 = vadd.f32 %v5895_v62, %v258_v33 }
 0x2ca   :  { %v370_v1 = vsel %vm294_vm0, %v6210_v37, 0.0 }
 0x2cb   :  { %546 = vadd.xlane.f32.xlu1 %v545_v51  ;;  %371 = vadd.xlane.f32.xlu0 %v370_v1  ;;  %v6229_v51 = vsub.f32 %v5993_v19, %v424_v25  ;;  %v388_v1 = vsel %vm294_vm0, %v6222_v49, 0.0 }
 0x2cd   :  { %v544_v31 = vpop.xlane.xlu0 %543 }
 0x2ce   :  { %v384_v54 = vpop.xlane.xlu1 %383  ;;  %v606_v8 = vmul.f32 %v544_v31, %v5355_v9  ;;  %v6240_v31 = vpop.f32.mrf.mxu0 }
 0x2cf   :  { %v427_v6 = vmul.f32 %v5355_v9, %v384_v54 }
 0x2d0   :  { %v638_v7 = vadd.f32 1e-05, %v606_v8  ;;  %v425_v8 = vmul.f32 %v5355_v9, %v6038_v3 }
 0x2d1   :  { %v6226_v21 = vsub.f32 %v6062_v12, %v427_v6  ;;  %v488_v12 = vmul.f32 %v6229_v51, %v6229_v51 }
 0x2d2   :  { %4775 = vrsqrt.f32 %v638_v7  ;;  %v6243_v54 = vsub.f32 %v5661_v34, %v425_v8  ;;  %vm820_vm10 = vweird.f32 %v638_v7 }
 0x2d3   :  { %389 = vadd.xlane.f32.xlu1 %v388_v1  ;;  %v491_v50 = vmul.f32 %v6226_v21, %v6226_v21  ;;  %v572_v6 = vsel %vm294_vm0, %v488_v12, 0.0  ;;  %v6256_v12 = vsub.f32 %v6028_v63, %v419_v59 }
 0x2d5   :  { %v581_v62 = vsel %vm294_vm0, %v491_v50, 0.0  ;;  %v387_v33 = vpop.xlane.xlu0 %386 }
 0x2d6   :  { %582 = vadd.xlane.f32.xlu2 %v581_v62  ;;  %v489_v62 = vmul.f32 %v6243_v54, %v6243_v54  ;;  %v6253_v8 = vpop.f32.mrf.mxu0 }
 0x2d8   :  { %v4776_v19 = vpop.eup %4775  ;;  %v575_v5 = vsel %vm294_vm0, %v489_v62, 0.0 }
 0x2d9   :  { %v815_v25 = vmul.f32 %v4776_v19, %v638_v7  ;;  %vm821_vm9 = vweird.f32 %v4776_v19  ;;  %v428_v7 = vmul.f32 %v5355_v9, %v387_v33 }
 0x2da   :  { %vm822_vm11 = vmor %vm820_vm10, %vm821_vm9 }
 0x2db   :  { %v816_v1 = vmul.f32 %v4776_v19, %v815_v25  ;;  %573 = vadd.xlane.f32.xlu1 %v572_v6 }
 0x2dd   :  { %v817_v50 = vmul.f32 0.5, %v816_v1  ;;  %v366_v47 = vpop.xlane.xlu0 %365 }
 0x2de   :  { %v421_v3 = vmul.f32 %v5355_v9, %v366_v47  ;;  %v1856_v1 = vpop.f32.mrf.mxu0 }
 0x2df   :  { %v818_v32 = vsub.f32 1.5, %v817_v50  ;;  %v6269_v50 = vsub.f32 %v6081_v10, %v428_v7 }
 0x2e0   :  { %v6251_v24 = vsub.f32 %v6105_v40, %v421_v3 }
 0x2e1   :  { %v819_v34 = vmul.f32 %v4776_v19, %v818_v32  ;;  %v483_v32 = vmul.f32 %v6256_v12, %v6256_v12  ;;  %v492_v33 = vmul.f32 %v6269_v50, %v6269_v50 }
 0x2e2   :  { %v485_v47 = vmul.f32 %v6251_v24, %v6251_v24 }
 0x2e3   :  { %v823_v25 = vsel %vm822_vm11, %v4776_v19, %v819_v34  ;;  %576 = vadd.xlane.f32.xlu1 %v575_v5  ;;  %v557_v19 = vsel %vm294_vm0, %v483_v32, 0.0 }
 0x2e4   :  { %v990_v6 = vmul.f32 %v823_v25, %v6025_v13  ;;  %v563_v40 = vsel %vm294_vm0, %v485_v47, 0.0  ;;  %v584_v47 = vsel %vm294_vm0, %v492_v33, 0.0 }
 0x2e5   :  { %564 = vadd.xlane.f32.xlu2 %v563_v40  ;;  %v369_v13 = vpop.xlane.xlu0 %368 }
 0x2e6   :  { %v1023_v59 = vmul.f32 %v6134_v35, %v990_v6  ;;  %v422_v62 = vmul.f32 %v5355_v9, %v369_v13  ;;  %v1859_v25 = vpop.f32.mrf.mxu0 }
 0x2e8   :  { %v1056_v63 = vadd.f32 %v6141_v46, %v1023_v59  ;;  %v6276_v5 = vsub.f32 %v6124_v36, %v422_v62 }
 0x2ea   :  { %v4497_v3 = vmul.f32 -1.442695, %v1056_v63  ;;  %v486_v6 = vmul.f32 %v6276_v5, %v6276_v5 }
 0x2eb   :  { %558 = vadd.xlane.f32.xlu1 %v557_v19 }
 0x2ec   :  { %4777 = vpow2.f32 %v4497_v3  ;;  %v566_v40 = vsel %vm294_vm0, %v486_v6, 0.0 }
 0x2ee   :  { %v1862_v59 = vpop.f32.mrf.mxu0 }
 0x2f2   :  { %v4778_v34 = vpop.eup %4777 }
 0x2f3   :  { %585 = vadd.xlane.f32.xlu1 %v584_v47  ;;  %v1184_v10 = vadd.f32 1.0, %v4778_v34 }
 0x2f5   :  { %4779 = vrcp.f32 %v1184_v10  ;;  %v1451_v13 = vand.u32 2147483648, %v1184_v10  ;;  %v1449_v33 = vand.u32 2147483647, %v1184_v10  ;;  %vm1445_vm13 = vweird.f32 %v1184_v10 }
 0x2f7   :  { %vm1450_vm15 = vcmp.eq.f32.partialorder %v1449_v33, 8.507059e+37 }
 0x2fb   :  { %v4780_v7 = vpop.eup %4779  ;;  %567 = vadd.xlane.f32.xlu1 %v566_v40  ;;  %v1452_v40 = vor.u32 1.1754944e-38, %v1451_v13 }
 0x2fc   :  { %v1441_v32 = vmul.f32 %v4780_v7, %v1184_v10  ;;  %vm1446_vm12 = vweird.f32 %v4780_v7  ;;  %v6293_v10 = vld [vmem:[%s9067_s5 + $0x3] ss:$0 sm:$0xff] }
 0x2fd   :  { %vm1447_vm14 = vmor %vm1445_vm13, %vm1446_vm12  ;;  %v1863_v33 = vadd.f32 %v6293_v10, %v1862_v59  ;;  %v1851_v59 = vadd.f32 %v6293_v10, %v6240_v31  ;;  %v1842_v31 = vadd.f32 %v6293_v10, %v6179_v56 }
 0x2fe   :  { %v381_v19 = vpop.xlane.xlu2 %380  ;;  %v1442_v3 = vsub.f32 1.0, %v1441_v32 }
 0x2ff   :  { %v426_v36 = vmul.f32 %v5355_v9, %v381_v19 }
 0x300   :  { %v1443_v62 = vmul.f32 %v4780_v7, %v1442_v3  ;;  %v1865_v3 = vpop.f32.mrf.mxu0 }
 0x301   :  { %v6284_v34 = vsub.f32 %v6150_v61, %v426_v36 }
 0x302   :  { %v1444_v47 = vadd.f32 %v4780_v7, %v1443_v62 }
 0x303   :  { %v490_v6 = vmul.f32 %v6284_v34, %v6284_v34 }
 0x304   :  { %v1448_v20 = vsel %vm1447_vm14, %v4780_v7, %v1444_v47 }
 0x305   :  { %v578_v32 = vsel %vm294_vm0, %v490_v6, 0.0  ;;  %v1453_v18 = vsel %vm1450_vm15, %v1452_v40, %v1448_v20  ;;  %v1860_v6 = vadd.f32 %v6293_v10, %v1859_v25  ;;  %v1857_v40 = vadd.f32 %v6293_v10, %v1856_v1 }
 0x306   :  { %579 = vadd.xlane.f32.xlu0 %v578_v32  ;;  %v1696_v19 = vmul.f32 %v1453_v18, %v1056_v63  ;;  %v1866_v63 = vadd.f32 %v6293_v10, %v1865_v3  ;;  %v1848_v25 = vadd.f32 %v6293_v10, %v6217_v39 }
 0x308   :  { %4529 = vmatmul.msk.f32.gmra.mxu0 %vm294_vm0, %v1696_v19  ;;  %v1868_v52 = vpop.f32.mrf.mxu0 }
 0x309   :  { %v1869_v20 = vadd.f32 %v6293_v10, %v1868_v52  ;;  %v1854_v52 = vadd.f32 %v6293_v10, %v6253_v8  ;;  %v1845_v8 = vadd.f32 %v6293_v10, %v6200_v29  ;;  %v1839_v29 = vadd.f32 %v6293_v10, %v6163_v22 }
 0x312   :  { %v1871_v61 = vpop.f32.mrf.mxu0 }
 0x313   :  { %v1872_v7 = vadd.f32 %v6293_v10, %v1871_v61 }
 0x322   :  { %v1874_v36 = vpop.f32.mrf.mxu0 }
 0x323   :  { %v1875_v13 = vadd.f32 %v6293_v10, %v1874_v36 }
 0x325   :  { %1998 = vmatpush.msra.mxu3 %v1875_v13 }
 0x327   :  { %1999 = vmatpush.msra.mxu3 %v1872_v7 }
 0x328   :  { %v550_v18 = vpop.xlane.xlu2 %549 }
 0x329   :  { %v608_v62 = vmul.f32 %v550_v18, %v5355_v9  ;;  %2000 = vmatpush.msra.mxu3 %v1869_v20 }
 0x32b   :  { %v640_v47 = vadd.f32 1e-05, %v608_v62  ;;  %2001 = vmatpush.msra.mxu3 %v1866_v63 }
 0x32d   :  { %4781 = vrsqrt.f32 %v640_v47  ;;  %2002 = vmatpush.msra.mxu3 %v1863_v33  ;;  %vm840_vm2 = vweird.f32 %v640_v47 }
 0x32f   :  { %2003 = vmatpush.msra.mxu3 %v1860_v6 }
 0x330   :  { %v553_v32 = vpop.xlane.xlu2 %552 }
 0x331   :  { %v609_v19 = vmul.f32 %v553_v32, %v5355_v9  ;;  %2004 = vmatpush.msra.mxu3 %v1857_v40 }
 0x333   :  { %v4782_v3 = vpop.eup %4781  ;;  %v641_v61 = vadd.f32 1e-05, %v609_v19  ;;  %2005 = vmatpush.msra.mxu3 %v1854_v52 }
 0x334   :  { %v835_v36 = vmul.f32 %v4782_v3, %v640_v47  ;;  %vm841_vm1 = vweird.f32 %v4782_v3  ;;  %v1833_v47 = vadd.f32 %v6293_v10, %v6157_v53 }
 0x335   :  { %4783 = vrsqrt.f32 %v641_v61  ;;  %2006 = vmatpush.msra.mxu3 %v1851_v59  ;;  %vm842_vm3 = vmor %vm840_vm2, %vm841_vm1  ;;  %vm850_vm5 = vweird.f32 %v641_v61 }
 0x336   :  { %v836_v1 = vmul.f32 %v4782_v3, %v835_v36  ;;  %v363_v13 = vpop.xlane.xlu1 %362 }
 0x337   :  { %v420_v7 = vmul.f32 %v5355_v9, %v363_v13  ;;  %2007 = vmatpush.msra.mxu3 %v1848_v25 }
 0x338   :  { %v837_v20 = vmul.f32 0.5, %v836_v1  ;;  %v556_v18 = vpop.xlane.xlu2 %555 }
 0x339   :  { %v6316_v63 = vsub.f32 %v6191_v57, %v420_v7  ;;  %v610_v39 = vmul.f32 %v556_v18, %v5355_v9  ;;  %2008 = vmatpush.msra.mxu3 %v1845_v8  ;;  %v1836_v57 = vadd.f32 %v6293_v10, %v6160_v60 }
 0x33a   :  { %v838_v62 = vsub.f32 1.5, %v837_v20 }
 0x33b   :  { %v4784_v33 = vpop.eup %4783  ;;  %v6321_v6 = vadd.f32 1e-05, %v610_v39  ;;  %2009 = vmatpush.msra.mxu3 %v1842_v31  ;;  %v484_v40 = vmul.f32 %v6316_v63, %v6316_v63 }
 0x33c   :  { %v839_v32 = vmul.f32 %v4782_v3, %v838_v62  ;;  %v845_v56 = vmul.f32 %v4784_v33, %v641_v61  ;;  %vm851_vm4 = vweird.f32 %v4784_v33 }
 0x33d   :  { %4785 = vrsqrt.f32 %v6321_v6  ;;  %2010 = vmatpush.msra.mxu3 %v1839_v29  ;;  %v560_v52 = vsel %vm294_vm0, %v484_v40, 0.0  ;;  %vm852_vm6 = vmor %vm850_vm5, %vm851_vm4  ;;  %vm860_vm8 = vweird.f32 %v6321_v6 }
 0x33e   :  { %v843_v19 = vsel %vm842_vm3, %v4782_v3, %v839_v32  ;;  %v846_v22 = vmul.f32 %v4784_v33, %v845_v56  ;;  %v547_v59 = vpop.xlane.xlu1 %546  ;;  %561 = vadd.xlane.f32.xlu0 %v560_v52  ;;  %v372_v36 = vpop.xlane.xlu0 %371  ;;  %v1830_v3 = vadd.f32 %v6293_v10, %v6154_v23 }
 0x33f   :  { %v607_v25 = vmul.f32 %v547_v59, %v5355_v9  ;;  %v423_v1 = vmul.f32 %v5355_v9, %v372_v36  ;;  %2011 = vmatpush.msra.mxu3 %v1836_v57  ;;  %v992_v60 = vmul.f32 %v843_v19, %v6167_v43 }
 0x340   :  { %v847_v13 = vmul.f32 0.5, %v846_v22 }
 0x341   :  { %v639_v8 = vadd.f32 1e-05, %v607_v25  ;;  %v6335_v7 = vsub.f32 %v6210_v37, %v423_v1  ;;  %2012 = vmatpush.msra.mxu3 %v1833_v47  ;;  %v1025_v39 = vmul.f32 %v6134_v35, %v992_v60 }
 0x342   :  { %v848_v20 = vsub.f32 1.5, %v847_v13 }
 0x343   :  { %v4786_v18 = vpop.eup %4785  ;;  %4787 = vrsqrt.f32 %v639_v8  ;;  %2013 = vmatpush.msra.mxu3 %v1830_v3  ;;  %v487_v31 = vmul.f32 %v6335_v7, %v6335_v7  ;;  %v6346_v32 = vadd.f32 %v6141_v46, %v1025_v39  ;;  %vm830_vm11 = vweird.f32 %v639_v8 }
 0x344   :  { %v849_v53 = vmul.f32 %v4784_v33, %v848_v20  ;;  %v855_v43 = vmul.f32 %v4786_v18, %v6321_v6  ;;  %vm861_vm7 = vweird.f32 %v4786_v18 }
 0x345   :  { %v569_v37 = vsel %vm294_vm0, %v487_v31, 0.0  ;;  %v4499_v59 = vmul.f32 -1.442695, %v6346_v32  ;;  %vm862_vm9 = vmor %vm860_vm8, %vm861_vm7 }
 0x346   :  { %v853_v62 = vsel %vm852_vm6, %v4784_v33, %v849_v53  ;;  %v856_v29 = vmul.f32 %v4786_v18, %v855_v43  ;;  %v390_v23 = vpop.xlane.xlu1 %389  ;;  %570 = vadd.xlane.f32.xlu2 %v569_v37 }
 0x347   :  { %v429_v10 = vmul.f32 %v5355_v9, %v390_v23  ;;  %v993_v61 = vmul.f32 %v853_v62, %v6172_v2  ;;  %4789 = vpow2.f32 %v4499_v59 }
 0x348   :  { %v857_v40 = vmul.f32 0.5, %v856_v29 }
 0x349   :  { %v4788_v56 = vpop.eup %4787  ;;  %v6350_v57 = vsub.f32 %v6222_v49, %v429_v10  ;;  %v583_v25 = vpop.xlane.xlu2 %582  ;;  %v1026_v47 = vmul.f32 %v6134_v35, %v993_v61 }
 0x34a   :  { %v858_v52 = vsub.f32 1.5, %v857_v40  ;;  %v825_v19 = vmul.f32 %v4788_v56, %v639_v8  ;;  %vm831_vm10 = vweird.f32 %v4788_v56  ;;  %v619_v3 = vmul.f32 %v583_v25, %v5355_v9 }
 0x34b   :  { %v493_v33 = vmul.f32 %v6350_v57, %v6350_v57  ;;  %v6361_v53 = vadd.f32 %v6141_v46, %v1026_v47  ;;  %vm832_vm12 = vmor %vm830_vm11, %vm831_vm10 }
 0x34c   :  { %v826_v22 = vmul.f32 %v4788_v56, %v825_v19  ;;  %v859_v36 = vmul.f32 %v4786_v18, %v858_v52  ;;  %v6364_v37 = vadd.f32 1e-05, %v619_v3 }
 0x34d   :  { %v587_v1 = vsel %vm294_vm0, %v493_v33, 0.0  ;;  %v4500_v29 = vmul.f32 -1.442695, %v6361_v53  ;;  %v4790_v23 = vpop.eup %4789 }
 0x34e   :  { %v827_v60 = vmul.f32 0.5, %v826_v22  ;;  %v574_v2 = vpop.xlane.xlu1 %573  ;;  %588 = vadd.xlane.f32.xlu0 %v587_v1  ;;  %v863_v20 = vsel %vm862_vm9, %v4786_v18, %v859_v36  ;;  %vm950_vm4 = vweird.f32 %v6364_v37 }
 0x34f   :  { %v616_v49 = vmul.f32 %v574_v2, %v5355_v9  ;;  %v994_v39 = vmul.f32 %v863_v20, %v6182_v44 }
 0x350   :  { %v828_v13 = vsub.f32 1.5, %v827_v60 }
 0x351   :  { %v648_v31 = vadd.f32 1e-05, %v616_v49  ;;  %v1027_v8 = vmul.f32 %v6134_v35, %v994_v39 }
 0x352   :  { %v829_v43 = vmul.f32 %v4788_v56, %v828_v13 }
 0x353   :  { %4791 = vrsqrt.f32 %v648_v31  ;;  %v6379_v22 = vadd.f32 %v6141_v46, %v1027_v8  ;;  %vm920_vm14 = vweird.f32 %v648_v31 }
 0x354   :  { %v833_v6 = vsel %vm832_vm12, %v4788_v56, %v829_v43  ;;  %4793 = vrsqrt.f32 %v6364_v37  ;;  %v6375_v56 = vadd.f32 1.0, %v4790_v23 }
 0x355   :  { %v991_v62 = vmul.f32 %v833_v6, %v6196_v58  ;;  %4795 = vpow2.f32 %v4500_v29  ;;  %v4501_v2 = vmul.f32 -1.442695, %v6379_v22 }
 0x356   :  { %v577_v10 = vpop.xlane.xlu1 %576  ;;  %vm1475_vm11 = vweird.f32 %v6375_v56 }
 0x357   :  { %v617_v18 = vmul.f32 %v577_v10, %v5355_v9  ;;  %v1024_v40 = vmul.f32 %v6134_v35, %v991_v62 }
 0x359   :  { %v4792_v61 = vpop.eup %4791  ;;  %v649_v52 = vadd.f32 1e-05, %v617_v18  ;;  %v6373_v44 = vadd.f32 %v6141_v46, %v1024_v40 }
 0x35a   :  { %v915_v58 = vmul.f32 %v4792_v61, %v648_v31  ;;  %v6382_v59 = vpop.eup %4793  ;;  %vm921_vm13 = vweird.f32 %v4792_v61 }
 0x35b   :  { %4797 = vrsqrt.f32 %v649_v52  ;;  %v4498_v33 = vmul.f32 -1.442695, %v6373_v44  ;;  %v4796_v1 = vpop.eup %4795  ;;  %v945_v3 = vmul.f32 %v6382_v59, %v6364_v37  ;;  %vm922_vm15 = vmor %vm920_vm14, %vm921_vm13  ;;  %vm930_vm2 = vweird.f32 %v649_v52 }
 0x35c   :  { %v916_v19 = vmul.f32 %v4792_v61, %v915_v58  ;;  %4799 = vrcp.f32 %v6375_v56  ;;  %v6390_v39 = vadd.f32 1.0, %v4796_v1  ;;  %vm951_vm8 = vweird.f32 %v6382_v59 }
 0x35d   :  { %4801 = vpow2.f32 %v4498_v33  ;;  %v946_v18 = vmul.f32 %v6382_v59, %v945_v3 }
 0x35e   :  { %v917_v36 = vmul.f32 0.5, %v916_v19  ;;  %v559_v25 = vpop.xlane.xlu1 %558 }
 0x35f   :  { %v611_v47 = vmul.f32 %v559_v25, %v5355_v9  ;;  %v947_v1 = vmul.f32 0.5, %v946_v18 }
 0x360   :  { %v918_v60 = vsub.f32 1.5, %v917_v36 }
 0x361   :  { %v4798_v49 = vpop.eup %4797  ;;  %v6386_v13 = vadd.f32 1e-05, %v611_v47  ;;  %v948_v18 = vsub.f32 1.5, %v947_v1 }
 0x362   :  { %v919_v20 = vmul.f32 %v4792_v61, %v918_v60  ;;  %v925_v43 = vmul.f32 %v4798_v49, %v649_v52  ;;  %v6392_v6 = vpop.eup %4799  ;;  %vm931_vm1 = vweird.f32 %v4798_v49 }
 0x363   :  { %4803 = vrsqrt.f32 %v6386_v13  ;;  %v4802_v62 = vpop.eup %4801  ;;  %v1471_v19 = vmul.f32 %v6392_v6, %v6375_v56  ;;  %vm932_vm3 = vmor %vm930_vm2, %vm931_vm1  ;;  %vm870_vm5 = vweird.f32 %v6386_v13  ;;  %vm1476_vm13 = vweird.f32 %v6392_v6 }
 0x364   :  { %v923_v29 = vsel %vm922_vm15, %v4792_v61, %v919_v20  ;;  %v926_v23 = vmul.f32 %v4798_v49, %v925_v43  ;;  %4805 = vpow2.f32 %v4501_v2  ;;  %v6396_v10 = vadd.f32 1.0, %v4802_v62  ;;  %vm6451_vm15 = vmor %vm950_vm4, %vm951_vm8 }
 0x365   :  { %v1000_v31 = vmul.f32 %v923_v29, %v6229_v51  ;;  %4807 = vrcp.f32 %v6390_v39  ;;  %v1472_v2 = vsub.f32 1.0, %v1471_v19  ;;  %vm6469_vm1 = vmor %vm1475_vm11, %vm1476_vm13 }
 0x366   :  { %v927_v40 = vmul.f32 0.5, %v926_v23  ;;  %v586_v8 = vpop.xlane.xlu1 %585  ;;  %4809 = vrcp.f32 %v6396_v10  ;;  %vm1460_vm10 = vweird.f32 %v6396_v10 }
 0x367   :  { %v620_v58 = vmul.f32 %v586_v8, %v5355_v9  ;;  %v1033_v51 = vmul.f32 %v6134_v35, %v1000_v31  ;;  %v1473_v8 = vmul.f32 %v6392_v6, %v1472_v2 }
 0x368   :  { %v928_v61 = vsub.f32 1.5, %v927_v40 }
 0x369   :  { %v4804_v33 = vpop.eup %4803  ;;  %v6404_v36 = vadd.f32 1e-05, %v620_v58  ;;  %v6412_v62 = vadd.f32 %v6141_v46, %v1033_v51  ;;  %v1464_v51 = vand.u32 2147483647, %v6396_v10 }
 0x36a   :  { %v4806_v25 = vpop.eup %4805  ;;  %v929_v47 = vmul.f32 %v4798_v49, %v928_v61  ;;  %v865_v60 = vmul.f32 %v4804_v33, %v6386_v13  ;;  %vm871_vm6 = vweird.f32 %v4804_v33 }
 0x36b   :  { %4811 = vrsqrt.f32 %v6404_v36  ;;  %v6409_v3 = vpop.eup %4807  ;;  %v6415_v31 = vadd.f32 1.0, %v4806_v25  ;;  %v4507_v58 = vmul.f32 -1.442695, %v6412_v62  ;;  %v1466_v25 = vand.u32 2147483648, %v6396_v10  ;;  %vm872_vm9 = vmor %vm870_vm5, %vm871_vm6 }
 0x36c   :  { %v933_v20 = vsel %vm932_vm3, %v4798_v49, %v929_v47  ;;  %v866_v43 = vmul.f32 %v4804_v33, %v865_v60  ;;  %v4810_v29 = vpop.eup %4809  ;;  %v1486_v49 = vmul.f32 %v6409_v3, %v6390_v39  ;;  %vm1465_vm14 = vcmp.eq.f32.partialorder %v1464_v51, 8.507059e+37 }
 0x36d   :  { %v1001_v23 = vmul.f32 %v933_v20, %v6243_v54  ;;  %v1456_v40 = vmul.f32 %v4810_v29, %v6396_v10  ;;  %4813 = vrcp.f32 %v6415_v31  ;;  %vm1461_vm7 = vweird.f32 %v4810_v29 }
 0x36e   :  { %v867_v52 = vmul.f32 0.5, %v866_v43  ;;  %4815 = vpow2.f32 %v4507_v58  ;;  %v949_v20 = vmul.f32 %v6382_v59, %v948_v18  ;;  %vm1462_vm12 = vmor %vm1460_vm10, %vm1461_vm7  ;;  %v1467_v18 = vor.u32 1.1754944e-38, %v1466_v25 }
 0x36f   :  { %v1457_v54 = vsub.f32 1.0, %v1456_v40  ;;  %v1034_v1 = vmul.f32 %v6134_v35, %v1001_v23  ;;  %v1481_v25 = vand.u32 2147483648, %v6375_v56  ;;  %v1479_v51 = vand.u32 2147483647, %v6375_v56 }
 0x370   :  { %v868_v19 = vsub.f32 1.5, %v867_v52  ;;  %vm1491_vm3 = vweird.f32 %v6409_v3  ;;  %vm1490_vm5 = vweird.f32 %v6390_v39  ;;  %vm960_vm6 = vweird.f32 %v6404_v36 }
 0x371   :  { %v6425_v61 = vpop.eup %4811  ;;  %v1458_v2 = vmul.f32 %v4810_v29, %v1457_v54  ;;  %v6440_v40 = vadd.f32 %v6141_v46, %v1034_v1  ;;  %vm1480_vm2 = vcmp.eq.f32.partialorder %v1479_v51, 8.507059e+37  ;;  %vm6500_vm7 = vmor %vm1490_vm5, %vm1491_vm3 }
 0x372   :  { %v869_v47 = vmul.f32 %v4804_v33, %v868_v19  ;;  %v955_v60 = vmul.f32 %v6425_v61, %v6404_v36  ;;  %v1487_v19 = vsub.f32 1.0, %v1486_v49  ;;  %vm961_vm4 = vweird.f32 %v6425_v61 }
 0x373   :  { %v1459_v52 = vadd.f32 %v4810_v29, %v1458_v2  ;;  %v6444_v13 = vpop.eup %4813  ;;  %v4508_v49 = vmul.f32 -1.442695, %v6440_v40  ;;  %vm6506_vm8 = vmor %vm960_vm6, %vm961_vm4 }
 0x374   :  { %v873_v43 = vsel %vm872_vm9, %v4804_v33, %v869_v47  ;;  %v956_v23 = vmul.f32 %v6425_v61, %v955_v60  ;;  %v1474_v33 = vadd.f32 %v6392_v6, %v1473_v8  ;;  %v4816_v47 = vpop.eup %4815  ;;  %v1501_v56 = vmul.f32 %v6444_v13, %v6415_v31 }
 0x375   :  { %v995_v58 = vmul.f32 %v873_v43, %v6256_v12  ;;  %v1463_v10 = vsel %vm1462_vm12, %v4810_v29, %v1459_v52  ;;  %v953_v29 = vsel %vm6451_vm15, %v6382_v59, %v949_v20  ;;  %v6463_v37 = vadd.f32 1.0, %v4816_v47 }
 0x376   :  { %v957_v54 = vmul.f32 0.5, %v956_v23  ;;  %v1468_v12 = vsel %vm1465_vm14, %v1467_v18, %v1463_v10  ;;  %v1488_v23 = vmul.f32 %v6409_v3, %v1487_v19  ;;  %4817 = vpow2.f32 %v4508_v49  ;;  %v565_v49 = vpop.xlane.xlu2 %564 }
 0x377   :  { %v1028_v60 = vmul.f32 %v6134_v35, %v995_v58  ;;  %v1697_v8 = vmul.f32 %v1468_v12, %v6373_v44  ;;  %v1478_v52 = vsel %vm6469_vm1, %v6392_v6, %v1474_v33  ;;  %v1003_v58 = vmul.f32 %v953_v29, %v6226_v21 }
 0x378   :  { %v958_v44 = vsub.f32 1.5, %v957_v54  ;;  %v1482_v18 = vor.u32 1.1754944e-38, %v1481_v25  ;;  %4819 = vrcp.f32 %v6463_v37  ;;  %v1496_v54 = vand.u32 2147483648, %v6390_v39 }
 0x379   :  { %v580_v2 = vpop.xlane.xlu0 %579  ;;  %v6475_v59 = vadd.f32 %v6141_v46, %v1028_v60  ;;  %4530 = vmatmul.msk.f32.gmra.mxu0 %vm294_vm0, %v1697_v8  ;;  %v1489_v47 = vadd.f32 %v6409_v3, %v1488_v23  ;;  %v1502_v21 = vsub.f32 1.0, %v1501_v56  ;;  %v1494_v12 = vand.u32 2147483647, %v6390_v39 }
 0x37a   :  { %v618_v20 = vmul.f32 %v580_v2, %v5355_v9  ;;  %v1483_v10 = vsel %vm1480_vm2, %v1482_v18, %v1478_v52  ;;  %v959_v33 = vmul.f32 %v6425_v61, %v958_v44  ;;  %v1036_v25 = vmul.f32 %v6134_v35, %v1003_v58 }
 0x37b   :  { %v4502_v6 = vmul.f32 -1.442695, %v6475_v59  ;;  %v1698_v60 = vmul.f32 %v1483_v10, %v6346_v32  ;;  %v1493_v35 = vsel %vm6500_vm7, %v6409_v3, %v1489_v47  ;;  %v1497_v32 = vor.u32 1.1754944e-38, %v1496_v54 }
 0x37c   :  { %v6486_v19 = vadd.f32 1e-05, %v618_v20  ;;  %v4818_v1 = vpop.eup %4817  ;;  %v963_v39 = vsel %vm6506_vm8, %v6425_v61, %v959_v33  ;;  %v1503_v43 = vmul.f32 %v6444_v13, %v1502_v21  ;;  %v613_v23 = vmul.f32 %v565_v49, %v5355_v9 }
 0x37d   :  { %v6504_v8 = vadd.f32 1.0, %v4818_v1  ;;  %vm1495_vm9 = vcmp.eq.f32.partialorder %v1494_v12, 8.507059e+37  ;;  %v6522_v44 = vadd.f32 %v6141_v46, %v1036_v25  ;;  %vm1506_vm10 = vweird.f32 %v6444_v13 }
 0x37e   :  { %4821 = vrsqrt.f32 %v6486_v19  ;;  %v4820_v51 = vpop.eup %4819  ;;  %v1498_v20 = vsel %vm1495_vm9, %v1497_v32, %v1493_v35  ;;  %v1509_v61 = vand.u32 2147483647, %v6415_v31  ;;  %v1004_v58 = vmul.f32 %v963_v39, %v6269_v50  ;;  %v6557_v35 = vld [vmem:[%s9067_s5 + $0x1] ss:$0 sm:$0xff] }
 0x37f   :  { %4823 = vpow2.f32 %v4502_v6  ;;  %v1591_v36 = vmul.f32 %v4820_v51, %v6463_v37  ;;  %v1599_v54 = vand.u32 2147483647, %v6463_v37  ;;  %v1601_v10 = vand.u32 2147483648, %v6463_v37 }
 0x380   :  { %4825 = vrcp.f32 %v6504_v8  ;;  %vm1596_vm11 = vweird.f32 %v4820_v51  ;;  %v1504_v46 = vadd.f32 %v6444_v13, %v1503_v43  ;;  %v1699_v21 = vmul.f32 %v1498_v20, %v6361_v53 }
 0x381   :  { %4531 = vmatmul.msk.f32.gmra.mxu0 %vm294_vm0, %v1698_v60  ;;  %v1592_v52 = vsub.f32 1.0, %v1591_v36  ;;  %vm1505_vm12 = vweird.f32 %v6415_v31  ;;  %v1511_v1 = vand.u32 2147483648, %v6415_v31  ;;  %vm1595_vm13 = vweird.f32 %v6463_v37 }
 0x382   :  { %vm6539_vm14 = vmor %vm1505_vm12, %vm1506_vm10  ;;  %v4510_v25 = vmul.f32 -1.442695, %v6522_v44  ;;  %vm1600_vm1 = vcmp.eq.f32.partialorder %v1599_v54, 8.507059e+37  ;;  %v1602_v53 = vor.u32 1.1754944e-38, %v1601_v10  ;;  %vm6545_vm2 = vcmp.eq.f32.partialorder %v1509_v61, 8.507059e+37 }
 0x383   :  { %v1593_v47 = vmul.f32 %v4820_v51, %v1592_v52  ;;  %vm1597_vm15 = vmor %vm1595_vm13, %vm1596_vm11  ;;  %v1508_v29 = vsel %vm6539_vm14, %v6444_v13, %v1504_v46  ;;  %v1037_v39 = vmul.f32 %v6557_v35, %v1004_v58  ;;  %v1512_v43 = vor.u32 1.1754944e-38, %v1511_v1  ;;  %v568_v1 = vpop.xlane.xlu1 %567 }
 0x384   :  { %v4822_v3 = vpop.eup %4821  ;;  %vm940_vm4 = vweird.f32 %v6486_v19  ;;  %v1614_v61 = vand.u32 2147483647, %v6504_v8  ;;  %v6575_v54 = vadd.f32 1e-05, %v613_v23  ;;  %vm1610_vm7 = vweird.f32 %v6504_v8 }
 0x385   :  { %v4824_v56 = vpop.eup %4823  ;;  %v935_v18 = vmul.f32 %v4822_v3, %v6486_v19  ;;  %v1594_v50 = vadd.f32 %v4820_v51, %v1593_v47  ;;  %vm941_vm3 = vweird.f32 %v4822_v3  ;;  %v1513_v52 = vsel %vm6545_vm2, %v1512_v43, %v1508_v29 }
 0x386   :  { %v6531_v6 = vadd.f32 1.0, %v4824_v56  ;;  %v4826_v49 = vpop.eup %4825  ;;  %v1616_v56 = vand.u32 2147483648, %v6504_v8  ;;  %vm942_vm5 = vmor %vm940_vm4, %vm941_vm3  ;;  %vm1615_vm9 = vcmp.eq.f32.partialorder %v1614_v61, 8.507059e+37  ;;  %v614_v31 = vmul.f32 %v568_v1, %v5355_v9 }
 0x387   :  { %v936_v33 = vmul.f32 %v4822_v3, %v935_v18  ;;  %v1598_v37 = vsel %vm1597_vm15, %v4820_v51, %v1594_v50  ;;  %v1606_v2 = vmul.f32 %v4826_v49, %v6504_v8  ;;  %vm1611_vm6 = vweird.f32 %v4826_v49 }
 0x388   :  { %4827 = vrcp.f32 %v6531_v6  ;;  %v1603_v36 = vsel %vm1600_vm1, %v1602_v53, %v1598_v37  ;;  %vm1612_vm8 = vmor %vm1610_vm7, %vm1611_vm6  ;;  %v1617_v50 = vor.u32 1.1754944e-38, %v1616_v56  ;;  %v1524_v8 = vand.u32 2147483647, %v6531_v6 }
 0x389   :  { %v937_v60 = vmul.f32 0.5, %v936_v33  ;;  %4532 = vmatmul.msk.f32.gmra.mxu0 %vm294_vm0, %v1699_v21  ;;  %v1706_v51 = vmul.f32 %v1603_v36, %v6412_v62  ;;  %v1607_v20 = vsub.f32 1.0, %v1606_v2  ;;  %4829 = vpow2.f32 %v4510_v25  ;;  %v6570_v62 = vld [vmem:[%s9067_s5 + $0x2] ss:$0 sm:$0xff] }
 0x38a   :  { %v6573_v19 = vadd.f32 %v6570_v62, %v1037_v39  ;;  %v1700_v33 = vmul.f32 %v1513_v52, %v6379_v22  ;;  %4831 = vrsqrt.f32 %v6575_v54  ;;  %vm1520_vm11 = vweird.f32 %v6531_v6 }
 0x38b   :  { %v938_v32 = vsub.f32 1.5, %v937_v60  ;;  %4539 = vmatmul.msk.f32.vlgmr.msra.gmra.mxu1 %vm294_vm0, %v1706_v51  ;;  %v1608_v58 = vmul.f32 %v4826_v49, %v1607_v20  ;;  %vm1525_vm13 = vcmp.eq.f32.partialorder %v1524_v8, 8.507059e+37  ;;  %v6597_v43 = vadd.f32 1e-05, %v614_v31 }
 0x38c   :  { %vm890_vm2 = vweird.f32 %v6575_v54 }
 0x38d   :  { %v939_v13 = vmul.f32 %v4822_v3, %v938_v32  ;;  %v1609_v21 = vadd.f32 %v4826_v49, %v1608_v58 }
 0x38e   :  { %v4828_v18 = vpop.eup %4827 }
 0x38f   :  { %v943_v10 = vsel %vm942_vm5, %v4822_v3, %v939_v13  ;;  %v1516_v47 = vmul.f32 %v4828_v18, %v6531_v6  ;;  %v4830_v25 = vpop.eup %4829  ;;  %v1613_v23 = vsel %vm1612_vm8, %v4826_v49, %v1609_v21  ;;  %v1526_v3 = vand.u32 2147483648, %v6531_v6 }
 0x390   :  { %v1002_v46 = vmul.f32 %v943_v10, %v6284_v34  ;;  %v4511_v34 = vmul.f32 -1.442695, %v6573_v19  ;;  %v1618_v53 = vsel %vm1615_vm9, %v1617_v50, %v1613_v23  ;;  %vm1521_vm10 = vweird.f32 %v4828_v18  ;;  %v4832_v20 = vpop.eup %4831 }
 0x391   :  { %v1517_v12 = vsub.f32 1.0, %v1516_v47  ;;  %4533 = vmatmul.msk.f32.gmra.mxu0 %vm294_vm0, %v1700_v33  ;;  %v1707_v37 = vmul.f32 %v1618_v53, %v6440_v40  ;;  %vm1522_vm12 = vmor %vm1520_vm11, %vm1521_vm10  ;;  %v1527_v2 = vor.u32 1.1754944e-38, %v1526_v3  ;;  %v6595_v32 = vadd.f32 1.0, %v4830_v25 }
 0x392   :  { %v1035_v60 = vmul.f32 %v6557_v35, %v1002_v46  ;;  %4833 = vpow2.f32 %v4511_v34  ;;  %v885_v13 = vmul.f32 %v4832_v20, %v6575_v54  ;;  %vm891_vm15 = vweird.f32 %v4832_v20 }
 0x393   :  { %v1518_v22 = vmul.f32 %v4828_v18, %v1517_v12  ;;  %4540 = vmatmul.msk.f32.gmra.mxu1 %vm294_vm0, %v1707_v37  ;;  %vm6618_vm5 = vmor %vm890_vm2, %vm891_vm15  ;;  %vm1640_vm7 = vweird.f32 %v6595_v32  ;;  %vm900_vm11 = vweird.f32 %v6597_v43 }
 0x394   :  { %v6590_v29 = vadd.f32 %v6570_v62, %v1035_v60  ;;  %v886_v58 = vmul.f32 %v4832_v20, %v885_v13 }
 0x395   :  { %v1519_v49 = vadd.f32 %v4828_v18, %v1518_v22 }
 0x396   :  { %v4509_v39 = vmul.f32 -1.442695, %v6590_v29  ;;  %v887_v47 = vmul.f32 0.5, %v886_v58 }
 0x397   :  { %v1523_v36 = vsel %vm1522_vm12, %v4828_v18, %v1519_v49 }
 0x398   :  { %v1528_v40 = vsel %vm1525_vm13, %v1527_v2, %v1523_v36  ;;  %4835 = vpow2.f32 %v4509_v39  ;;  %v4834_v6 = vpop.eup %4833  ;;  %v888_v12 = vsub.f32 1.5, %v887_v47 }
 0x399   :  { %v1701_v51 = vmul.f32 %v1528_v40, %v6475_v59  ;;  %4837 = vrcp.f32 %v6595_v32  ;;  %v6604_v56 = vadd.f32 1.0, %v4834_v6 }
 0x39a   :  { %4839 = vrsqrt.f32 %v6597_v43  ;;  %v889_v8 = vmul.f32 %v4832_v20, %v888_v12 }
 0x39b   :  { %4534 = vmatmul.msk.f32.gmra.mxu0 %vm294_vm0, %v1701_v51 }
 0x39c   :  { %v893_v51 = vsel %vm6618_vm5, %v4832_v20, %v889_v8 }
 0x39d   :  { %v997_v47 = vmul.f32 %v893_v51, %v6251_v24 }
 0x39e   :  { %v4836_v52 = vpop.eup %4835 }
 0x39f   :  { %v1196_v61 = vadd.f32 1.0, %v4836_v52  ;;  %v4838_v18 = vpop.eup %4837 }
 0x3a0   :  { %v6606_v10 = vpop.eup %4839  ;;  %v1636_v59 = vmul.f32 %v4838_v18, %v6595_v32  ;;  %vm1641_vm4 = vweird.f32 %v4838_v18 }
 0x3a1   :  { %4841 = vrcp.f32 %v1196_v61  ;;  %v895_v46 = vmul.f32 %v6606_v10, %v6597_v43  ;;  %v1631_v3 = vand.u32 2147483648, %v1196_v61  ;;  %v1629_v53 = vand.u32 2147483647, %v1196_v61  ;;  %vm1642_vm8 = vmor %vm1640_vm7, %vm1641_vm4 }
 0x3a2   :  { %4843 = vrcp.f32 %v6604_v56  ;;  %v1637_v21 = vsub.f32 1.0, %v1636_v59  ;;  %vm1625_vm1 = vweird.f32 %v1196_v61  ;;  %v1644_v59 = vand.u32 2147483647, %v6595_v32 }
 0x3a3   :  { %v896_v25 = vmul.f32 %v6606_v10, %v895_v46  ;;  %v1632_v49 = vor.u32 1.1754944e-38, %v1631_v3  ;;  %vm1630_vm6 = vcmp.eq.f32.partialorder %v1629_v53, 8.507059e+37  ;;  %vm901_vm9 = vweird.f32 %v6606_v10 }
 0x3a4   :  { %v1638_v60 = vmul.f32 %v4838_v18, %v1637_v21  ;;  %vm1645_vm10 = vcmp.eq.f32.partialorder %v1644_v59, 8.507059e+37  ;;  %vm6636_vm12 = vmor %vm900_vm11, %vm901_vm9 }
 0x3a5   :  { %v897_v31 = vmul.f32 0.5, %v896_v25 }
 0x3a6   :  { %v1639_v36 = vadd.f32 %v4838_v18, %v1638_v60  ;;  %v1659_v60 = vand.u32 2147483647, %v6604_v56 }
 0x3a7   :  { %v4842_v33 = vpop.eup %4841  ;;  %v898_v6 = vsub.f32 1.5, %v897_v31 }
 0x3a8   :  { %v1621_v1 = vmul.f32 %v4842_v33, %v1196_v61  ;;  %v6612_v50 = vpop.eup %4843  ;;  %vm1626_vm14 = vweird.f32 %v4842_v33  ;;  %v1646_v61 = vand.u32 2147483648, %v6595_v32  ;;  %v1643_v20 = vsel %vm1642_vm8, %v4838_v18, %v1639_v36 }
 0x3a9   :  { %v1651_v22 = vmul.f32 %v6612_v50, %v6604_v56  ;;  %vm1627_vm3 = vmor %vm1625_vm1, %vm1626_vm14  ;;  %v899_v21 = vmul.f32 %v6606_v10, %v898_v6  ;;  %vm1656_vm13 = vweird.f32 %v6612_v50  ;;  %v1030_v18 = vmul.f32 %v6557_v35, %v997_v47 }
 0x3aa   :  { %v1622_v23 = vsub.f32 1.0, %v1621_v1  ;;  %v1647_v1 = vor.u32 1.1754944e-38, %v1646_v61  ;;  %vm1655_vm14 = vweird.f32 %v6604_v56  ;;  %vm1660_vm1 = vcmp.eq.f32.partialorder %v1659_v60, 8.507059e+37 }
 0x3ab   :  { %v1652_v40 = vsub.f32 1.0, %v1651_v22  ;;  %v903_v12 = vsel %vm6636_vm12, %v6606_v10, %v899_v21  ;;  %vm1657_vm15 = vmor %vm1655_vm14, %vm1656_vm13  ;;  %v6654_v10 = vadd.f32 %v6570_v62, %v1030_v18 }
 0x3ac   :  { %v1623_v34 = vmul.f32 %v4842_v33, %v1622_v23  ;;  %v1661_v23 = vand.u32 2147483648, %v6604_v56  ;;  %v998_v8 = vmul.f32 %v903_v12, %v6276_v5 }
 0x3ad   :  { %v4504_v56 = vmul.f32 -1.442695, %v6654_v10 }
 0x3ae   :  { %v1624_v37 = vadd.f32 %v4842_v33, %v1623_v34  ;;  %v1031_v36 = vmul.f32 %v6557_v35, %v998_v8 }
 0x3b0   :  { %v1628_v39 = vsel %vm1627_vm3, %v4842_v33, %v1624_v37  ;;  %v1653_v33 = vmul.f32 %v6612_v50, %v1652_v40  ;;  %v1662_v37 = vor.u32 1.1754944e-38, %v1661_v23  ;;  %v6663_v61 = vadd.f32 %v6570_v62, %v1031_v36 }
 0x3b1   :  { %v562_v13 = vpop.xlane.xlu0 %561  ;;  %v1633_v52 = vsel %vm1630_vm6, %v1632_v49, %v1628_v39 }
 0x3b2   :  { %v612_v54 = vmul.f32 %v562_v13, %v5355_v9  ;;  %v1708_v58 = vmul.f32 %v1633_v52, %v6590_v29  ;;  %v1648_v29 = vsel %vm1645_vm10, %v1647_v1, %v1643_v20  ;;  %v1654_v24 = vadd.f32 %v6612_v50, %v1653_v33 }
 0x3b3   :  { %v1709_v3 = vmul.f32 %v1648_v29, %v6522_v44  ;;  %v4505_v47 = vmul.f32 -1.442695, %v6663_v61 }
 0x3b4   :  { %v644_v46 = vadd.f32 1e-05, %v612_v54  ;;  %4541 = vmatmul.msk.f32.gmra.mxu1 %vm294_vm0, %v1708_v58  ;;  %v1658_v22 = vsel %vm1657_vm15, %v6612_v50, %v1654_v24 }
 0x3b5   :  { %v1663_v49 = vsel %vm1660_vm1, %v1662_v37, %v1658_v22 }
 0x3b6   :  { %4845 = vrsqrt.f32 %v644_v46  ;;  %v1710_v50 = vmul.f32 %v1663_v49, %v6573_v19  ;;  %vm880_vm3 = vweird.f32 %v644_v46  ;;  %v1928_v49 = vld [vmem:[%s9066_s4 + $0x30] sm:$0xff] }
 0x3b7   :  { %1950 = vmatpush.msrb.mxu1 %v1928_v49 }
 0x3b9   :  { %v571_v25 = vpop.xlane.xlu2 %570 }
 0x3ba   :  { %v615_v43 = vmul.f32 %v571_v25, %v5355_v9 }
 0x3bc   :  { %v4846_v34 = vpop.eup %4845  ;;  %v647_v53 = vadd.f32 1e-05, %v615_v43  ;;  %4542 = vmatmul.msk.f32.gmra.mxu1 %vm294_vm0, %v1709_v3 }
 0x3bd   :  { %v875_v31 = vmul.f32 %v4846_v34, %v644_v46  ;;  %vm881_vm2 = vweird.f32 %v4846_v34 }
 0x3be   :  { %4847 = vrsqrt.f32 %v647_v53  ;;  %vm882_vm4 = vmor %vm880_vm3, %vm881_vm2  ;;  %vm910_vm6 = vweird.f32 %v647_v53 }
 0x3bf   :  { %v876_v44 = vmul.f32 %v4846_v34, %v875_v31  ;;  %4849 = vpow2.f32 %v4504_v56 }
 0x3c1   :  { %v877_v2 = vmul.f32 0.5, %v876_v44  ;;  %v589_v39 = vpop.xlane.xlu0 %588 }
 0x3c2   :  { %v621_v40 = vmul.f32 %v589_v39, %v5355_v9 }
 0x3c3   :  { %v878_v51 = vsub.f32 1.5, %v877_v2 }
 0x3c4   :  { %v4848_v6 = vpop.eup %4847  ;;  %v653_v5 = vadd.f32 1e-05, %v621_v40  ;;  %4543 = vmatmul.msk.f32.gmra.mxu1 %vm294_vm0, %v1710_v50 }
 0x3c5   :  { %v879_v13 = vmul.f32 %v4846_v34, %v878_v51  ;;  %v905_v52 = vmul.f32 %v4848_v6, %v647_v53  ;;  %v4850_v20 = vpop.eup %4849  ;;  %vm911_vm5 = vweird.f32 %v4848_v6 }
 0x3c6   :  { %4851 = vrsqrt.f32 %v653_v5  ;;  %vm912_vm7 = vmor %vm910_vm6, %vm911_vm5  ;;  %v6672_v12 = vadd.f32 1.0, %v4850_v20  ;;  %vm970_vm9 = vweird.f32 %v653_v5 }
 0x3c7   :  { %v883_v54 = vsel %vm882_vm4, %v4846_v34, %v879_v13  ;;  %v906_v58 = vmul.f32 %v4848_v6, %v905_v52  ;;  %4853 = vpow2.f32 %v4505_v47 }
 0x3c8   :  { %v996_v59 = vmul.f32 %v883_v54, %v6316_v63  ;;  %v1925_v54 = vld [vmem:[%s9066_s4 + $0x18] sm:$0xff]  ;;  %vm1550_vm1 = vweird.f32 %v6672_v12 }
 0x3c9   :  { %v907_v19 = vmul.f32 0.5, %v906_v58 }
 0x3ca   :  { %v1029_v33 = vmul.f32 %v6557_v35, %v996_v59 }
 0x3cb   :  { %v908_v21 = vsub.f32 1.5, %v907_v19 }
 0x3cc   :  { %v4852_v1 = vpop.eup %4851  ;;  %v6669_v46 = vadd.f32 %v6570_v62, %v1029_v33 }
 0x3cd   :  { %v909_v29 = vmul.f32 %v4848_v6, %v908_v21  ;;  %v965_v32 = vmul.f32 %v4852_v1, %v653_v5  ;;  %v4854_v3 = vpop.eup %4853  ;;  %vm971_vm8 = vweird.f32 %v4852_v1 }
 0x3ce   :  { %v4503_v24 = vmul.f32 -1.442695, %v6669_v46  ;;  %vm972_vm10 = vmor %vm970_vm9, %vm971_vm8  ;;  %v6680_v8 = vadd.f32 1.0, %v4854_v3  ;;  %v1554_v3 = vand.u32 2147483647, %v6672_v12 }
 0x3cf   :  { %v913_v63 = vsel %vm912_vm7, %v4848_v6, %v909_v29  ;;  %v966_v18 = vmul.f32 %v4852_v1, %v965_v32 }
 0x3d0   :  { %v999_v25 = vmul.f32 %v913_v63, %v6335_v7  ;;  %4855 = vpow2.f32 %v4503_v24  ;;  %vm1555_vm3 = vcmp.eq.f32.partialorder %v1554_v3, 8.507059e+37  ;;  %vm1565_vm5 = vweird.f32 %v6680_v8 }
 0x3d1   :  { %v967_v23 = vmul.f32 0.5, %v966_v18  ;;  %4857 = vrcp.f32 %v6672_v12 }
 0x3d2   :  { %v1032_v43 = vmul.f32 %v6557_v35, %v999_v25 }
 0x3d3   :  { %v968_v60 = vsub.f32 1.5, %v967_v23  ;;  %v1556_v23 = vand.u32 2147483648, %v6672_v12 }
 0x3d4   :  { %v6678_v34 = vadd.f32 %v6570_v62, %v1032_v43 }
 0x3d5   :  { %v969_v53 = vmul.f32 %v4852_v1, %v968_v60 }
 0x3d6   :  { %v4856_v22 = vpop.eup %4855  ;;  %v4506_v7 = vmul.f32 -1.442695, %v6678_v34 }
 0x3d7   :  { %v973_v31 = vsel %vm972_vm10, %v4852_v1, %v969_v53  ;;  %v1190_v37 = vadd.f32 1.0, %v4856_v22  ;;  %v4858_v56 = vpop.eup %4857 }
 0x3d8   :  { %v1005_v44 = vmul.f32 %v973_v31, %v6350_v57  ;;  %4859 = vpow2.f32 %v4506_v7  ;;  %v1546_v39 = vmul.f32 %v4858_v56, %v6672_v12  ;;  %vm1551_vm15 = vweird.f32 %v4858_v56  ;;  %v63_v7 = vld [vmem:[%s9065_s3 + $0x8] sm:$0xff] }
 0x3d9   :  { %4861 = vrcp.f32 %v1190_v37  ;;  %v1541_v58 = vand.u32 2147483648, %v1190_v37  ;;  %v1539_v47 = vand.u32 2147483647, %v1190_v37  ;;  %vm1535_vm12 = vweird.f32 %v1190_v37  ;;  %vm1552_vm2 = vmor %vm1550_vm1, %vm1551_vm15  ;;  %1981 = vmatpush.msra.mxu2 %v63_v7 }
 0x3da   :  { %4863 = vrcp.f32 %v6680_v8  ;;  %v1038_v2 = vmul.f32 %v6557_v35, %v1005_v44  ;;  %v1547_v13 = vsub.f32 1.0, %v1546_v39  ;;  %v1927_v35 = vld [vmem:[%s9066_s4 + $0x28] sm:$0xff]  ;;  %v1557_v31 = vor.u32 1.1754944e-38, %v1556_v23 }
 0x3db   :  { %1951 = vmatpush.msrb.mxu1 %v1927_v35  ;;  %v1542_v1 = vor.u32 1.1754944e-38, %v1541_v58  ;;  %vm1540_vm14 = vcmp.eq.f32.partialorder %v1539_v47, 8.507059e+37  ;;  %v24_v47 = vld [vmem:[%s9062_s0] sm:$0xff]  ;;  %vm1931_vm1 = vcmask 261120  }
 0x3dc   :  { %v6691_v36 = vadd.f32 %v6570_v62, %v1038_v2  ;;  %v1926_v62 = vld [vmem:[%s9066_s4 + $0x20] sm:$0xff]  ;;  %v1548_v20 = vmul.f32 %v4858_v56, %v1547_v13  ;;  %v1571_v2 = vand.u32 2147483648, %v6680_v8 }
 0x3dd   :  { %1952 = vmatpush.msrb.mxu1 %v1926_v62 }
 0x3de   :  { %v4860_v40 = vpop.eup %4859  ;;  %v4512_v57 = vmul.f32 -1.442695, %v6691_v36  ;;  %v1549_v63 = vadd.f32 %v4858_v56, %v1548_v20 }
 0x3df   :  { %v4862_v50 = vpop.eup %4861  ;;  %v6694_v51 = vadd.f32 1.0, %v4860_v40  ;;  %1953 = vmatpush.msrb.mxu1 %v1925_v54  ;;  %v1569_v40 = vand.u32 2147483647, %v6680_v8 }
 0x3e0   :  { %v6696_v6 = vpop.eup %4863  ;;  %v1531_v5 = vmul.f32 %v4862_v50, %v1190_v37  ;;  %4865 = vpow2.f32 %v4512_v57  ;;  %vm1536_vm11 = vweird.f32 %v4862_v50  ;;  %v1553_v53 = vsel %vm1552_vm2, %v4858_v56, %v1549_v63 }
 0x3e1   :  { %v1561_v59 = vmul.f32 %v6696_v6, %v6680_v8  ;;  %4867 = vrcp.f32 %v6694_v51  ;;  %vm1537_vm13 = vmor %vm1535_vm12, %vm1536_vm11  ;;  %v1558_v37 = vsel %vm1555_vm3, %v1557_v31, %v1553_v53  ;;  %vm1566_vm4 = vweird.f32 %v6696_v6 }
 0x3e2   :  { %v1532_v52 = vsub.f32 1.0, %v1531_v5  ;;  %v1703_v39 = vmul.f32 %v1558_v37, %v6654_v10  ;;  %vm1567_vm6 = vmor %vm1565_vm5, %vm1566_vm4  ;;  %vm1570_vm8 = vcmp.eq.f32.partialorder %v1569_v40, 8.507059e+37  ;;  %v4659_v40 = vld [vmem:[%s9067_s5 + $0x4] ss:$0 sm:$0xff]  ;;  %vm2114_vm2 = vcmask 523264  }
 0x3e3   :  { %v1562_v29 = vsub.f32 1.0, %v1561_v59 }
 0x3e4   :  { %v1533_v19 = vmul.f32 %v4862_v50, %v1532_v52  ;;  %v1572_v52 = vor.u32 1.1754944e-38, %v1571_v2  ;;  %v28_v2 = vld [vmem:[%s9063_s1 + $0x10] sm:$0xff] }
 0x3e5   :  { %v1563_v60 = vmul.f32 %v6696_v6, %v1562_v29 }
 0x3e6   :  { %v4866_v33 = vpop.eup %4865  ;;  %v1534_v21 = vadd.f32 %v4862_v50, %v1533_v19  ;;  %v1586_v19 = vand.u32 2147483648, %v6694_v51 }
 0x3e7   :  { %v1199_v32 = vadd.f32 1.0, %v4866_v33  ;;  %v6710_v18 = vpop.eup %4867  ;;  %v1564_v44 = vadd.f32 %v6696_v6, %v1563_v60 }
 0x3e8   :  { %v1538_v24 = vsel %vm1537_vm13, %v4862_v50, %v1534_v21  ;;  %v1576_v22 = vmul.f32 %v6710_v18, %v6694_v51  ;;  %vm1581_vm12 = vweird.f32 %v6710_v18  ;;  %vm1580_vm13 = vweird.f32 %v6694_v51 }
 0x3e9   :  { %v1543_v25 = vsel %vm1540_vm14, %v1542_v1, %v1538_v24  ;;  %4869 = vrcp.f32 %v1199_v32  ;;  %v1568_v50 = vsel %vm1567_vm6, %v6696_v6, %v1564_v44  ;;  %v1676_v5 = vand.u32 2147483648, %v1199_v32  ;;  %vm1582_vm14 = vmor %vm1580_vm13, %vm1581_vm12 }
 0x3ea   :  { %v1702_v43 = vmul.f32 %v1543_v25, %v6669_v46  ;;  %v62_v46 = vld [vmem:[%s9065_s3] sm:$0xff]  ;;  %v1577_v56 = vsub.f32 1.0, %v1576_v22  ;;  %v1674_v35 = vand.u32 2147483647, %v1199_v32  ;;  %vm1670_vm9 = vweird.f32 %v1199_v32 }
 0x3eb   :  { %1982 = vmatpush.msra.mxu2 %v62_v46  ;;  %v1573_v58 = vsel %vm1570_vm8, %v1572_v52, %v1568_v50  ;;  %v1677_v10 = vor.u32 1.1754944e-38, %v1676_v5  ;;  %v1584_v21 = vand.u32 2147483647, %v6694_v51  ;;  %v1587_v29 = vor.u32 1.1754944e-38, %v1586_v19  ;;  %v1877_v51 = vpop.f32.mrf.mxu0 }
 0x3ec   :  { %4535 = vmatmul.msk.f32.gmra.mxu0 %vm294_vm0, %v1702_v43  ;;  %v1578_v62 = vmul.f32 %v6710_v18, %v1577_v56  ;;  %vm1675_vm11 = vcmp.eq.f32.partialorder %v1674_v35, 8.507059e+37  ;;  %v1704_v20 = vmul.f32 %v1573_v58, %v6663_v61  ;;  %4547 = vmatmul.msk.f32.vlgmr.msra.gmra.mxu2 %vm294_vm0, %v24_v47  ;;  %v25_v61 = vld [vmem:[%s9062_s0 + $0x8] sm:$0xff] }
 0x3ed   :  { %vm1585_vm15 = vcmp.eq.f32.partialorder %v1584_v21, 8.507059e+37  ;;  %v27_v21 = vld [vmem:[%s9063_s1 + $0x8] sm:$0xff] }
 0x3ee   :  { %v1579_v8 = vadd.f32 %v6710_v18, %v1578_v62 }
 0x3ef   :  { %v4870_v12 = vpop.eup %4869 }
 0x3f0   :  { %v1666_v49 = vmul.f32 %v4870_v12, %v1199_v32  ;;  %vm1671_vm7 = vweird.f32 %v4870_v12  ;;  %v1583_v1 = vsel %vm1582_vm14, %v6710_v18, %v1579_v8 }
 0x3f1   :  { %vm1672_vm10 = vmor %vm1670_vm9, %vm1671_vm7  ;;  %v1588_v32 = vsel %vm1585_vm15, %v1587_v29, %v1583_v1  ;;  %v29_v1 = vld [vmem:[%s9063_s1 + $0x18] sm:$0xff]  ;;  %v6786_v29 = vld [vmem:[%s9066_s4 + $0xa8] ss:$0 sm:$0xff] }
 0x3f2   :  { %v1667_v57 = vsub.f32 1.0, %v1666_v49 }
 0x3f4   :  { %4536 = vmatmul.msk.f32.gmra.mxu0 %vm294_vm0, %v1703_v39  ;;  %v1668_v13 = vmul.f32 %v4870_v12, %v1667_v57  ;;  %4548 = vmatmul.msk.f32.gmra.mxu2 %vm294_vm0, %v25_v61  ;;  %v6793_v61 = vld [vmem:[%s9067_s5 + $0xe] ss:$0 sm:$0xff] }
 0x3f6   :  { %v1669_v54 = vadd.f32 %v4870_v12, %v1668_v13  ;;  %v1880_v24 = vpop.f32.mrf.mxu0 }
 0x3f8   :  { %v1673_v59 = vsel %vm1672_vm10, %v4870_v12, %v1669_v54  ;;  %v26_v12 = vld [vmem:[%s9063_s1] sm:$0xff] }
 0x3f9   :  { %v1678_v6 = vsel %vm1675_vm11, %v1677_v10, %v1673_v59  ;;  %2014 = vmatmul.f32.vlgmr.msra.gmra.mxu3 %v26_v12 }
 0x3fa   :  { %v1711_v33 = vmul.f32 %v1678_v6, %v6691_v36  ;;  %v1705_v36 = vmul.f32 %v1588_v32, %v6678_v34  ;;  %v2442_v32 = vmul.f32 %v6786_v29, %v5275_v28  ;;  %v2463_v28 = vmul.f32 %v6786_v29, %v6185_v55  ;;  %v2048_v55 = vld [vmem:[%s9066_s4 + $0x58] sm:$0xff] }
 0x3fc   :  { %4537 = vmatmul.msk.f32.gmra.mxu0 %vm294_vm0, %v1704_v20  ;;  %4544 = vmatmul.msk.f32.gmra.mxu1 %vm294_vm0, %v1711_v33 }
 0x3fe   :  { %v1883_v63 = vpop.f32.mrf.mxu0 }
 0x401   :  { %2017 = vmatmul.f32.gmra.mxu3 %v28_v2 }
 0x404   :  { %4538 = vmatmul.msk.f32.gmra.mxu0 %vm294_vm0, %v1705_v36  ;;  %4545 = vmatmul.msk.f32.vlgmr.msrb.gmra.mxu1 %vm1931_vm1, %v62_v46  ;;  %v6796_v36 = vadd.f32 %v6793_v61, %v2442_v32 }
 0x406   :  { %v1886_v25 = vpop.f32.mrf.mxu0 }
 0x408   :  { %v1907_v18 = vpop.f32.mrf.mxu1 }
 0x40c   :  { %4546 = vmatmul.msk.f32.gmra.mxu1 %vm1931_vm1, %v63_v7  ;;  %v5121_v7 = vld [vmem:[%s9067_s5 + $0x3] ss:$0 sm:$0xff] }
 0x40d   :  { %v1908_v35 = vadd.f32 %v5121_v7, %v1907_v18  ;;  %v1887_v19 = vadd.f32 %v5121_v7, %v1886_v25  ;;  %v1884_v47 = vadd.f32 %v5121_v7, %v1883_v63  ;;  %v1881_v20 = vadd.f32 %v5121_v7, %v1880_v24 }
 0x40e   :  { %v1889_v43 = vpop.f32.mrf.mxu0  ;;  %v1878_v33 = vadd.f32 %v5121_v7, %v1877_v51  ;;  %v2462_v51 = vmul.f32 %v6786_v29, %v6016_v30  ;;  %v2511_v24 = vsel %vm294_vm0, %v6796_v36, 0.0  ;;  %v6807_v25 = vadd.f32 %v6793_v61, %v2463_v28 }
 0x40f   :  { %v1890_v6 = vadd.f32 %v5121_v7, %v1889_v43  ;;  %v2049_v43 = vld [vmem:[%s9066_s4 + $0x60] sm:$0xff] }
 0x410   :  { %v1910_v23 = vpop.f32.mrf.mxu1  ;;  %v2495_v63 = vadd.f32 %v6793_v61, %v2462_v51  ;;  %v2574_v30 = vsel %vm294_vm0, %v6807_v25, 0.0  ;;  %2070 = vmatpush.msra.mxu1 %v2049_v43 }
 0x411   :  { %v1911_v50 = vadd.f32 %v5121_v7, %v1910_v23  ;;  %v2464_v23 = vmul.f32 %v6786_v29, %v5880_v15  ;;  %v2465_v15 = vmul.f32 %v6786_v29, %v6109_v4  ;;  %v2452_v4 = vmul.f32 %v6786_v29, %v5379_v48  ;;  %v2046_v48 = vld [vmem:[%s9066_s4 + $0x48] sm:$0xff] }
 0x412   :  { %v2571_v18 = vsel %vm294_vm0, %v2495_v63, 0.0  ;;  %2071 = vmatpush.msra.mxu1 %v2048_v55 }
 0x418   :  { %v1892_v60 = vpop.f32.mrf.mxu0 }
 0x419   :  { %v1893_v8 = vadd.f32 %v5121_v7, %v1892_v60 }
 0x431   :  { %v1913_v3 = vpop.f32.mrf.mxu1 }
 0x432   :  { %v1914_v39 = vadd.f32 %v5121_v7, %v1913_v3  ;;  %v6820_v3 = vadd.f32 %v6793_v61, %v2464_v23 }
 0x434   :  { %v2577_v60 = vsel %vm294_vm0, %v6820_v3, 0.0 }
 0x439   :  { %v1916_v53 = vpop.f32.mrf.mxu1 }
 0x43a   :  { %v1917_v56 = vadd.f32 %v5121_v7, %v1916_v53  ;;  %v6827_v53 = vadd.f32 %v6793_v61, %v2465_v15 }
 0x441   :  { %v1919_v34 = vpop.f32.mrf.mxu1 }
 0x442   :  { %v1920_v49 = vadd.f32 %v5121_v7, %v1919_v34  ;;  %v2580_v34 = vsel %vm294_vm0, %v6827_v53, 0.0 }
 0x469   :  { %v1895_v22 = vpop.f32.mrf.mxu0 }
 0x46a   :  { %v1896_v59 = vadd.f32 %v5121_v7, %v1895_v22  ;;  %v2466_v22 = vmul.f32 %v6786_v29, %v6203_v0 }
 0x471   :  { %v1898_v31 = vpop.f32.mrf.mxu0 }
 0x472   :  { %v1899_v58 = vadd.f32 %v5121_v7, %v1898_v31  ;;  %v6834_v31 = vadd.f32 %v6793_v61, %v2466_v22 }
 0x474   :  { %v2583_v12 = vsel %vm294_vm0, %v6834_v31, 0.0 }
 0x479   :  { %v1901_v46 = vpop.f32.mrf.mxu0  ;;  %v1922_v37 = vpop.f32.mrf.mxu1 }
 0x47a   :  { %v1923_v44 = vadd.f32 %v5121_v7, %v1922_v37  ;;  %v1902_v52 = vadd.f32 %v5121_v7, %v1901_v46  ;;  %v6841_v46 = vadd.f32 %v6793_v61, %v2452_v4  ;;  %v2047_v37 = vld [vmem:[%s9066_s4 + $0x50] sm:$0xff] }
 0x47b   :  { %2097 = vmatpush.msrb.mxu1 %v2047_v37 }
 0x47c   :  { %2021 = vmatpush.msrb.mxu2 %v1923_v44  ;;  %v2541_v0 = vsel %vm294_vm0, %v6841_v46, 0.0  ;;  %v1984_v44 = vpop.f32.mrf.mxu2  ;;  %v2015_v2 = vpop.f32.mrf.mxu3 }
 0x47d   :  { %2098 = vmatpush.msrb.mxu1 %v2046_v48  ;;  %v2461_v48 = vmul.f32 %v6786_v29, %v5695_v11 }
 0x47e   :  { %2022 = vmatpush.msrb.mxu2 %v1920_v49  ;;  %v2044_v49 = vld [vmem:[%s9066_s4 + $0x38] sm:$0xff] }
 0x480   :  { %2023 = vmatpush.msrb.mxu2 %v1917_v56 }
 0x481   :  { %v1955_v57 = vpop.f32.mrf.mxu1  ;;  %v1904_v13 = vpop.f32.mrf.mxu0 }
 0x482   :  { %v6769_v5 = vadd.f32 %v4659_v40, %v1955_v57  ;;  %2024 = vmatpush.msrb.mxu2 %v1914_v39  ;;  %v1905_v62 = vadd.f32 %v5121_v7, %v1904_v13  ;;  %v2045_v7 = vld [vmem:[%s9066_s4 + $0x40] sm:$0xff] }
 0x483   :  { %2099 = vmatpush.msrb.mxu1 %v2045_v7 }
 0x484   :  { %2025 = vmatpush.msrb.mxu2 %v1911_v50  ;;  %1992 = vrot.lane.b32.xlu0 %v6769_v5, %s5160_s12  ;;  %v1987_v56 = vpop.f32.mrf.mxu2 }
 0x485   :  { %2100 = vmatpush.msrb.mxu1 %v2044_v49 }
 0x486   :  { %2026 = vmatpush.msrb.mxu2 %v1908_v35  ;;  %v2018_v35 = vpop.f32.mrf.mxu3 }
 0x488   :  { %2027 = vmatpush.msrb.mxu2 %v1905_v62 }
 0x489   :  { %v1958_v54 = vpop.f32.mrf.mxu1 }
 0x48a   :  { %v6773_v10 = vadd.f32 %v4659_v40, %v1958_v54  ;;  %2028 = vmatpush.msrb.mxu2 %v1902_v52 }
 0x48c   :  { %1994 = vrot.lane.b32.xlu1 %v6773_v10, %s5160_s12  ;;  %2029 = vmatpush.msrb.mxu2 %v1899_v58 }
 0x48e   :  { %2030 = vmatpush.msrb.mxu2 %v1896_v59  ;;  %v1985_v59 = vadd.f32 %v1984_v44, %v6769_v5  ;;  %v4661_v5 = vld [vmem:[%s9067_s5 + $0x5] ss:$0 sm:$0xff] }
 0x490   :  { %2031 = vmatpush.msrb.mxu2 %v1893_v8 }
 0x492   :  { %2032 = vmatpush.msrb.mxu2 %v1890_v6 }
 0x494   :  { %2033 = vmatpush.msrb.mxu2 %v1887_v19 }
 0x496   :  { %2034 = vmatpush.msrb.mxu2 %v1884_v47 }
 0x498   :  { %2035 = vmatpush.msrb.mxu2 %v1881_v20  ;;  %v1988_v20 = vadd.f32 %v1987_v56, %v6773_v10 }
 0x49a   :  { %2036 = vmatpush.msrb.mxu2 %v1878_v33 }
 0x49b   :  { %2037 = vmatmul.f32.vlgmr.msrb.gmra.mxu2 %v27_v21 }
 0x4a3   :  { %2040 = vmatmul.f32.gmra.mxu2 %v29_v1 }
 0x4b6   :  { %2512 = vadd.xlane.f32.xlu1 %v2511_v24 }
 0x4be   :  { %2572 = vadd.xlane.f32.xlu1 %v2571_v18 }
 0x4c6   :  { %2575 = vadd.xlane.f32.xlu1 %v2574_v30  ;;  %v5161_v30 = vmov 64.0  }
 0x4c7   :  { %4871 = vrcp.f32 %v5161_v30 }
 0x4cd   :  { %v4872_v43 = vpop.eup %4871 }
 0x4ce   :  { %2578 = vadd.xlane.f32.xlu1 %v2577_v60  ;;  %v2122_v55 = vmul.f32 64.0, %v4872_v43  ;;  %vm2126_vm3 = vweird.f32 %v4872_v43 }
 0x4d0   :  { %v2123_v15 = vsub.f32 1.0, %v2122_v55 }
 0x4d2   :  { %v2124_v60 = vmul.f32 %v4872_v43, %v2123_v15 }
 0x4d4   :  { %v2125_v22 = vadd.f32 %v4872_v43, %v2124_v60 }
 0x4d6   :  { %2581 = vadd.xlane.f32.xlu1 %v2580_v34  ;;  %v6876_v34 = vsel %vm2126_vm3, %v4872_v43, %v2125_v22 }
 0x4d7   :  { %9140 = vst [vmem:[#allocation20_spill] sm:$0xff] %v6876_v34 }
 0x4de   :  { %2584 = vadd.xlane.f32.xlu1 %v2583_v12 }
 0x4e6   :  { %2542 = vadd.xlane.f32.xlu1 %v2541_v0 }
 0x4f6   :  { %v1993_v39 = vpop.permute.xlu0 %1992 }
 0x4f7   :  { %v2016_v40 = vadd.f32 %v2015_v2, %v1993_v39  ;;  %v2494_v2 = vadd.f32 %v6793_v61, %v2461_v48  ;;  %v2218_v48 = vld [vmem:[%s9066_s4 + $0x98] sm:$0xff] }
 0x4f9   :  { %v2568_v11 = vsel %vm294_vm0, %v2494_v2, 0.0 }
 0x4fe   :  { %v1995_v13 = vpop.permute.xlu1 %1994 }
 0x4ff   :  { %v2019_v62 = vadd.f32 %v2018_v35, %v1995_v13 }
 0x51e   :  { %v2038_v57 = vpop.f32.mrf.mxu2 }
 0x51f   :  { %v2039_v50 = vadd.f32 %v2038_v57, %v2016_v40  ;;  %v2441_v40 = vmul.f32 %v6786_v29, %v5250_v17  ;;  %v2447_v57 = vmul.f32 %v6786_v29, %v5293_v38  ;;  %v2448_v17 = vmul.f32 %v6786_v29, %v5300_v42 }
 0x520   :  { %v2449_v42 = vmul.f32 %v6786_v29, %v5298_v41  ;;  %v2450_v41 = vmul.f32 %v6786_v29, %v5307_v45 }
 0x521   :  { %4549 = vmatmul.msk.f32.vlgmr.msra.gmra.mxu1 %vm294_vm0, %v2039_v50  ;;  %v6899_v13 = vadd.f32 %v6793_v61, %v2447_v57  ;;  %v6902_v35 = vadd.f32 %v6793_v61, %v2441_v40 }
 0x523   :  { %v2526_v38 = vsel %vm294_vm0, %v6899_v13, 0.0 }
 0x526   :  { %v2041_v52 = vpop.f32.mrf.mxu2 }
 0x527   :  { %v2042_v54 = vadd.f32 %v2041_v52, %v2019_v62  ;;  %v2443_v62 = vmul.f32 %v6786_v29, %v5248_v16  ;;  %v2508_v52 = vsel %vm294_vm0, %v6902_v35, 0.0  ;;  %v2444_v16 = vmul.f32 %v6786_v29, %v5273_v27 }
 0x528   :  { %v2445_v27 = vmul.f32 %v6786_v29, %v5241_v14  ;;  %v2446_v14 = vmul.f32 %v6786_v29, %v5271_v26 }
 0x529   :  { %v6858_v58 = vpop.xlane.xlu1 %2512  ;;  %4550 = vmatmul.msk.f32.gmra.mxu1 %vm294_vm0, %v2042_v54  ;;  %v6913_v54 = vadd.f32 %v6793_v61, %v2448_v17 }
 0x531   :  { %v2573_v8 = vpop.xlane.xlu1 %2572  ;;  %4551 = vmatmul.msk.f32.vlgmr.msrb.gmra.mxu1 %vm1931_vm1, %v1985_v59  ;;  %v6916_v59 = vadd.f32 %v6793_v61, %v2443_v62 }
 0x532   :  { %v2625_v6 = vmul.f32 %v2573_v8, %v5355_v9  ;;  %v2529_v8 = vsel %vm294_vm0, %v6913_v54, 0.0 }
 0x534   :  { %v6864_v19 = vsub.f32 %v2495_v63, %v2625_v6  ;;  %v2514_v6 = vsel %vm294_vm0, %v6916_v59, 0.0 }
 0x536   :  { %v2689_v47 = vmul.f32 %v6864_v19, %v6864_v19 }
 0x538   :  { %v2763_v33 = vsel %vm294_vm0, %v2689_v47, 0.0  ;;  %v6927_v47 = vadd.f32 %v6793_v61, %v2449_v42 }
 0x539   :  { %2764 = vadd.xlane.f32.xlu1 %v2763_v33  ;;  %4552 = vmatmul.msk.f32.gmra.mxu1 %vm1931_vm1, %v1988_v20  ;;  %v6930_v20 = vadd.f32 %v6793_v61, %v2444_v16 }
 0x53a   :  { %v2532_v33 = vsel %vm294_vm0, %v6927_v47, 0.0 }
 0x59e   :  { %v2073_v21 = vpop.f32.mrf.mxu1 }
 0x5a6   :  { %v2076_v1 = vpop.f32.mrf.mxu1 }
 0x5ae   :  { %v2102_v32 = vpop.f32.mrf.mxu1 }
 0x5af   :  { %v2103_v51 = vadd.f32 %v2102_v32, %v2073_v21  ;;  %v2517_v21 = vsel %vm294_vm0, %v6930_v20, 0.0  ;;  %v9141_v32 = vld [vmem:[#allocation5_spill] sm:$0xff] }
 0x5b0   :  { %v2451_v45 = vmul.f32 %v6786_v29, %v9141_v32 }
 0x5b1   :  { %v2110_v24 = vadd.f32 %v4661_v5, %v2103_v51 }
 0x5b3   :  { %v2115_v63 = vsel %vm2114_vm2, %v2110_v24, 0.0 }
 0x5b4   :  { %2116 = vadd.xlane.f32.xlu2 %v2115_v63  ;;  %v6955_v63 = vadd.f32 %v6793_v61, %v2451_v45 }
 0x5b6   :  { %v2105_v28 = vpop.f32.mrf.mxu1  ;;  %v2538_v26 = vsel %vm294_vm0, %v6955_v63, 0.0 }
 0x5b7   :  { %v2106_v10 = vadd.f32 %v2105_v28, %v2076_v1  ;;  %v6941_v1 = vadd.f32 %v6793_v61, %v2450_v41  ;;  %v6958_v28 = vadd.f32 %v6793_v61, %v2446_v14  ;;  %v9142_v14 = vld [vmem:[#allocation11_spill] sm:$0xff] }
 0x5b8   :  { %v2468_v32 = vmul.f32 %v6786_v29, %v9142_v14 }
 0x5b9   :  { %v2111_v18 = vadd.f32 %v4661_v5, %v2106_v10  ;;  %v6944_v5 = vadd.f32 %v6793_v61, %v2445_v27  ;;  %v2535_v51 = vsel %vm294_vm0, %v6941_v1, 0.0  ;;  %v2523_v10 = vsel %vm294_vm0, %v6958_v28, 0.0 }
 0x5ba   :  { %v2605_v27 = vmul.f32 %v6858_v58, %v5355_v9 }
 0x5bb   :  { %v2118_v23 = vsel %vm2114_vm2, %v2111_v18, 0.0 }
 0x5bc   :  { %2119 = vadd.xlane.f32.xlu2 %v2118_v23 }
 0x627   :  { %v2117_v4 = vpop.xlane.xlu2 %2116 }
 0x628   :  { %v2128_v12 = vmul.f32 %v6876_v34, %v2117_v4 }
 0x62a   :  { %v6879_v0 = vsub.f32 %v2110_v24, %v2128_v12  ;;  %v2520_v24 = vsel %vm294_vm0, %v6944_v5, 0.0 }
 0x62c   :  { %v2132_v37 = vmul.f32 %v6879_v0, %v6879_v0 }
 0x62e   :  { %v2134_v7 = vsel %vm2114_vm2, %v2132_v37, 0.0  ;;  %v2219_v37 = vld [vmem:[%s9066_s4 + $0xa0] sm:$0xff] }
 0x62f   :  { %2135 = vadd.xlane.f32.xlu0 %v2134_v7  ;;  %v2120_v44 = vpop.xlane.xlu2 %2119  ;;  %2236 = vmatpush.msrb.mxu3 %v2219_v37  ;;  %v7029_v37 = vadd.f32 %v6793_v61, %v2468_v32 }
 0x630   :  { %v2129_v49 = vmul.f32 %v6876_v34, %v2120_v44 }
 0x631   :  { %2237 = vmatpush.msrb.mxu3 %v2218_v48 }
 0x632   :  { %v6887_v56 = vsub.f32 %v2111_v18, %v2129_v49  ;;  %v2217_v49 = vld [vmem:[%s9066_s4 + $0x90] sm:$0xff] }
 0x633   :  { %2238 = vmatpush.msrb.mxu3 %v2217_v49 }
 0x634   :  { %v2133_v39 = vmul.f32 %v6887_v56, %v6887_v56 }
 0x636   :  { %v2137_v50 = vsel %vm2114_vm2, %v2133_v39, 0.0 }
 0x637   :  { %2569 = vadd.xlane.f32.xlu0 %v2568_v11  ;;  %2138 = vadd.xlane.f32.xlu2 %v2137_v50 }
 0x63f   :  { %2527 = vadd.xlane.f32.xlu0 %v2526_v38  ;;  %2509 = vadd.xlane.f32.xlu2 %v2508_v52  ;;  %v6986_v52 = vpop.xlane.xlu1 %2575 }
 0x647   :  { %2530 = vadd.xlane.f32.xlu0 %v2529_v8  ;;  %2515 = vadd.xlane.f32.xlu2 %v2514_v6  ;;  %v2216_v8 = vld [vmem:[%s9066_s4 + $0x88] sm:$0xff]  ;;  %v2215_v6 = vld [vmem:[%s9066_s4 + $0x80] sm:$0xff] }
 0x648   :  { %2239 = vmatpush.msrb.mxu3 %v2216_v8 }
 0x64a   :  { %2240 = vmatpush.msrb.mxu3 %v2215_v6 }
 0x64f   :  { %2533 = vadd.xlane.f32.xlu0 %v2532_v33  ;;  %2518 = vadd.xlane.f32.xlu2 %v2517_v21  ;;  %v4662_v21 = vld [vmem:[%s9067_s5 + $0x6] ss:$0 sm:$0xff] }
 0x657   :  { %2536 = vadd.xlane.f32.xlu0 %v2535_v51  ;;  %2521 = vadd.xlane.f32.xlu2 %v2520_v24  ;;  %v2214_v51 = vld [vmem:[%s9066_s4 + $0x78] sm:$0xff] }
 0x658   :  { %2241 = vmatpush.msrb.mxu3 %v2214_v51 }
 0x65f   :  { %2539 = vadd.xlane.f32.xlu0 %v2538_v26  ;;  %2524 = vadd.xlane.f32.xlu2 %v2523_v10 }
 0x6a2   :  { %v2136_v18 = vpop.xlane.xlu0 %2135 }
 0x6a3   :  { %v2140_v23 = vmul.f32 %v2136_v18, %v6876_v34  ;;  %v4663_v18 = vld [vmem:[%s9067_s5 + $0x7] ss:$0 sm:$0xff] }
 0x6a5   :  { %v2142_v30 = vadd.f32 1e-05, %v2140_v23  ;;  %v7022_v23 = vsub.f32 %v6796_v36, %v2605_v27  ;;  %v2212_v36 = vld [vmem:[%s9066_s4 + $0x68] sm:$0xff] }
 0x6a7   :  { %4873 = vrsqrt.f32 %v2142_v30  ;;  %vm2150_vm5 = vweird.f32 %v2142_v30 }
 0x6aa   :  { %v2570_v43 = vpop.xlane.xlu0 %2569  ;;  %v2139_v55 = vpop.xlane.xlu2 %2138 }
 0x6ab   :  { %v2624_v15 = vmul.f32 %v2570_v43, %v5355_v9  ;;  %v2141_v60 = vmul.f32 %v2139_v55, %v6876_v34 }
 0x6ad   :  { %v4874_v22 = vpop.eup %4873  ;;  %v6967_v4 = vsub.f32 %v2494_v2, %v2624_v15  ;;  %v6969_v12 = vadd.f32 1e-05, %v2141_v60 }
 0x6ae   :  { %v2145_v7 = vmul.f32 %v4874_v22, %v2142_v30  ;;  %vm2151_vm4 = vweird.f32 %v4874_v22 }
 0x6af   :  { %4875 = vrsqrt.f32 %v6969_v12  ;;  %v2688_v44 = vmul.f32 %v6967_v4, %v6967_v4  ;;  %vm2152_vm6 = vmor %vm2150_vm5, %vm2151_vm4  ;;  %vm2160_vm8 = vweird.f32 %v6969_v12 }
 0x6b0   :  { %v2146_v2 = vmul.f32 %v4874_v22, %v2145_v7 }
 0x6b1   :  { %v2760_v39 = vsel %vm294_vm0, %v2688_v44, 0.0 }
 0x6b2   :  { %v2147_v40 = vmul.f32 0.5, %v2146_v2  ;;  %2761 = vadd.xlane.f32.xlu0 %v2760_v39  ;;  %v2528_v57 = vpop.xlane.xlu0 %2527  ;;  %v2510_v11 = vpop.xlane.xlu2 %2509  ;;  %v2669_v2 = vmul.f32 %v7022_v23, %v7022_v23 }
 0x6b3   :  { %v2610_v50 = vmul.f32 %v2528_v57, %v5355_v9  ;;  %v2604_v62 = vmul.f32 %v2510_v11, %v5355_v9  ;;  %v2579_v39 = vpop.xlane.xlu1 %2578  ;;  %v9143_v57 = vld [vmem:[#allocation6_spill] sm:$0xff] }
 0x6b4   :  { %v2148_v17 = vsub.f32 1.5, %v2147_v40  ;;  %v2454_v11 = vmul.f32 %v6786_v29, %v9143_v57 }
 0x6b5   :  { %v4876_v38 = vpop.eup %4875  ;;  %v6989_v16 = vsub.f32 %v6899_v13, %v2610_v50  ;;  %v6992_v42 = vsub.f32 %v6902_v35, %v2604_v62  ;;  %v9144_v62 = vld [vmem:[#allocation17_spill] sm:$0xff] }
 0x6b6   :  { %v2149_v41 = vmul.f32 %v4874_v22, %v2148_v17  ;;  %v2155_v33 = vmul.f32 %v4876_v38, %v6969_v12  ;;  %vm2161_vm7 = vweird.f32 %v4876_v38  ;;  %v2589_v12 = vsel %vm294_vm0, %v7029_v37, 0.0 }
 0x6b7   :  { %v2674_v13 = vmul.f32 %v6989_v16, %v6989_v16  ;;  %v2668_v35 = vmul.f32 %v6992_v42, %v6992_v42  ;;  %vm2162_vm9 = vmor %vm2160_vm8, %vm2161_vm7  ;;  %v2469_v17 = vmul.f32 %v6786_v29, %v9144_v62 }
 0x6b8   :  { %v2153_v58 = vsel %vm2152_vm6, %v4874_v22, %v2149_v41  ;;  %v2156_v45 = vmul.f32 %v4876_v38, %v2155_v33 }
 0x6b9   :  { %v2164_v24 = vmul.f32 %v2153_v58, %v6879_v0  ;;  %v2718_v26 = vsel %vm294_vm0, %v2674_v13, 0.0  ;;  %v2700_v10 = vsel %vm294_vm0, %v2668_v35, 0.0  ;;  %v2213_v0 = vld [vmem:[%s9066_s4 + $0x70] sm:$0xff]  ;;  %v7061_v35 = vadd.f32 %v6793_v61, %v2454_v11 }
 0x6ba   :  { %v2157_v30 = vmul.f32 0.5, %v2156_v45  ;;  %2719 = vadd.xlane.f32.xlu0 %v2718_v26  ;;  %v2531_v43 = vpop.xlane.xlu0 %2530  ;;  %2701 = vadd.xlane.f32.xlu2 %v2700_v10  ;;  %v2516_v55 = vpop.xlane.xlu2 %2515  ;;  %v7065_v14 = vadd.f32 %v6793_v61, %v2469_v17  ;;  %v9145_v26 = vld [vmem:[#allocation8_spill] sm:$0xff] }
 0x6bb   :  { %v2611_v15 = vmul.f32 %v2531_v43, %v5355_v9  ;;  %v2167_v60 = vmul.f32 %v4662_v21, %v2164_v24  ;;  %2242 = vmatpush.msrb.mxu3 %v2213_v0  ;;  %v2606_v49 = vmul.f32 %v2516_v55, %v5355_v9  ;;  %v2455_v10 = vmul.f32 %v6786_v29, %v9145_v26  ;;  %v9148_v26 = vld [vmem:[#allocation13_spill] sm:$0xff] }
 0x6bc   :  { %v2158_v22 = vsub.f32 1.5, %v2157_v30  ;;  %v2592_v43 = vsel %vm294_vm0, %v7065_v14, 0.0 }
 0x6bd   :  { %v7035_v48 = vsub.f32 %v6913_v54, %v2611_v15  ;;  %v7037_v7 = vadd.f32 %v4663_v18, %v2167_v60  ;;  %2243 = vmatpush.msrb.mxu3 %v2212_v36  ;;  %v7055_v27 = vsub.f32 %v6916_v59, %v2606_v49 }
 0x6be   :  { %v2159_v44 = vmul.f32 %v4876_v38, %v2158_v22 }
 0x6bf   :  { %v2675_v40 = vmul.f32 %v7035_v48, %v7035_v48  ;;  %v4553_v54 = vmul.f32 -1.442695, %v7037_v7  ;;  %v2670_v58 = vmul.f32 %v7055_v27, %v7055_v27 }
 0x6c0   :  { %v2163_v50 = vsel %vm2162_vm9, %v4876_v38, %v2159_v44  ;;  %v2703_v38 = vsel %vm294_vm0, %v2669_v2, 0.0  ;;  %v7091_v44 = vadd.f32 %v6793_v61, %v2455_v10  ;;  %v2471_v10 = vmul.f32 %v6786_v29, %v9148_v26 }
 0x6c1   :  { %v2165_v8 = vmul.f32 %v2163_v50, %v6887_v56  ;;  %v2721_v6 = vsel %vm294_vm0, %v2675_v40, 0.0  ;;  %4877 = vpow2.f32 %v4553_v54  ;;  %v2627_v56 = vmul.f32 %v2579_v39, %v5355_v9 }
 0x6c2   :  { %2590 = vadd.xlane.f32.xlu0 %v2589_v12  ;;  %2722 = vadd.xlane.f32.xlu1 %v2721_v6  ;;  %v7057_v41 = vpop.xlane.xlu0 %2533  ;;  %v2519_v33 = vpop.xlane.xlu2 %2518  ;;  %v2706_v15 = vsel %vm294_vm0, %v2670_v58, 0.0  ;;  %v2550_v50 = vsel %vm294_vm0, %v7091_v44, 0.0 }
 0x6c3   :  { %2704 = vadd.xlane.f32.xlu2 %v2703_v38  ;;  %v2168_v13 = vmul.f32 %v4662_v21, %v2165_v8  ;;  %v2607_v59 = vmul.f32 %v2519_v33, %v5355_v9  ;;  %v2547_v21 = vsel %vm294_vm0, %v7061_v35, 0.0  ;;  %v7078_v30 = vsub.f32 %v6820_v3, %v2627_v56 }
 0x6c5   :  { %v7067_v32 = vadd.f32 %v4663_v18, %v2168_v13  ;;  %v2582_v18 = vpop.xlane.xlu1 %2581  ;;  %v7083_v55 = vsub.f32 %v6930_v20, %v2607_v59  ;;  %v2691_v36 = vmul.f32 %v7078_v30, %v7078_v30 }
 0x6c6   :  { %v2628_v22 = vmul.f32 %v2582_v18, %v5355_v9 }
 0x6c7   :  { %v4878_v45 = vpop.eup %4877  ;;  %v4554_v51 = vmul.f32 -1.442695, %v7067_v32  ;;  %v2671_v49 = vmul.f32 %v7083_v55, %v7083_v55  ;;  %v2769_v11 = vsel %vm294_vm0, %v2691_v36, 0.0 }
 0x6c8   :  { %v2178_v24 = vadd.f32 1.0, %v4878_v45  ;;  %v7097_v40 = vsub.f32 %v6827_v53, %v2628_v22 }
 0x6c9   :  { %4879 = vpow2.f32 %v4554_v51  ;;  %v2709_v53 = vsel %vm294_vm0, %v2671_v49, 0.0 }
 0x6ca   :  { %2548 = vadd.xlane.f32.xlu0 %v2547_v21  ;;  %2593 = vadd.xlane.f32.xlu1 %v2592_v43  ;;  %v2537_v0 = vpop.xlane.xlu0 %2536  ;;  %v2522_v60 = vpop.xlane.xlu2 %2521  ;;  %4881 = vrcp.f32 %v2178_v24  ;;  %9146 = vst [vmem:[#allocation5_spill] sm:$0xff] %v7097_v40  ;;  %v2692_v6 = vmul.f32 %v7097_v40, %v7097_v40  ;;  %v2189_v38 = vand.u32 2147483647, %v2178_v24  ;;  %v2191_v33 = vand.u32 2147483648, %v2178_v24 }
 0x6cb   :  { %2707 = vadd.xlane.f32.xlu2 %v2706_v15  ;;  %v2613_v3 = vmul.f32 %v2537_v0, %v5355_v9  ;;  %v2608_v20 = vmul.f32 %v2522_v60, %v5355_v9  ;;  %vm2185_vm11 = vweird.f32 %v2178_v24 }
 0x6cc   :  { %v2772_v18 = vsel %vm294_vm0, %v2692_v6, 0.0  ;;  %vm2190_vm13 = vcmp.eq.f32.partialorder %v2189_v38, 8.507059e+37  ;;  %v2192_v43 = vor.u32 1.1754944e-38, %v2191_v33  ;;  %v9151_v6 = vld [vmem:[#allocation19_spill] sm:$0xff] }
 0x6cd   :  { %v7102_v57 = vsub.f32 %v6941_v1, %v2613_v3  ;;  %v7108_v62 = vsub.f32 %v6944_v5, %v2608_v20  ;;  %v7117_v59 = vpop.xlane.xlu1 %2584  ;;  %v2472_v38 = vmul.f32 %v6786_v29, %v9151_v6  ;;  %v9157_v6 = vld [vmem:[#allocation12_spill] sm:$0xff] }
 0x6cf   :  { %v4880_v2 = vpop.eup %4879  ;;  %9147 = vst [vmem:[#allocation11_spill] sm:$0xff] %v7102_v57  ;;  %v2677_v5 = vmul.f32 %v7102_v57, %v7102_v57  ;;  %v2672_v45 = vmul.f32 %v7108_v62, %v7108_v62  ;;  %v7164_v26 = vadd.f32 %v6793_v61, %v2472_v38 }
 0x6d0   :  { %v4882_v39 = vpop.eup %4881  ;;  %v7099_v54 = vadd.f32 1.0, %v4880_v2 }
 0x6d1   :  { %v2181_v12 = vmul.f32 %v4882_v39, %v2178_v24  ;;  %vm2186_vm10 = vweird.f32 %v4882_v39  ;;  %v2727_v15 = vsel %vm294_vm0, %v2677_v5, 0.0  ;;  %v2712_v24 = vsel %vm294_vm0, %v2672_v45, 0.0  ;;  %v9152_v5 = vld [vmem:[#allocation16_spill] sm:$0xff] }
 0x6d2   :  { %2770 = vadd.xlane.f32.xlu0 %v2769_v11  ;;  %2551 = vadd.xlane.f32.xlu1 %v2550_v50  ;;  %v2540_v17 = vpop.xlane.xlu0 %2539  ;;  %4883 = vrcp.f32 %v7099_v54  ;;  %v2525_v8 = vpop.xlane.xlu2 %2524  ;;  %vm2187_vm12 = vmor %vm2185_vm11, %vm2186_vm10  ;;  %v2206_v2 = vand.u32 2147483648, %v7099_v54  ;;  %v2204_v11 = vand.u32 2147483647, %v7099_v54  ;;  %vm2200_vm15 = vweird.f32 %v7099_v54 }
 0x6d3   :  { %2710 = vadd.xlane.f32.xlu2 %v2709_v53  ;;  %v2182_v1 = vsub.f32 1.0, %v2181_v12  ;;  %v2614_v13 = vmul.f32 %v2540_v17, %v5355_v9  ;;  %v2609_v58 = vmul.f32 %v2525_v8, %v5355_v9 }
 0x6d4   :  { %vm2205_vm4 = vcmp.eq.f32.partialorder %v2204_v11, 8.507059e+37 }
 0x6d5   :  { %v2183_v56 = vmul.f32 %v4882_v39, %v2182_v1  ;;  %v7126_v0 = vsub.f32 %v6955_v63, %v2614_v13  ;;  %v7131_v3 = vsub.f32 %v6958_v28, %v2609_v58  ;;  %v7136_v63 = vadd.f32 %v6793_v61, %v2471_v10  ;;  %v7148_v53 = vpop.xlane.xlu1 %2542 }
 0x6d6   :  { %v2207_v1 = vor.u32 1.1754944e-38, %v2206_v2 }
 0x6d7   :  { %v2184_v51 = vadd.f32 %v4882_v39, %v2183_v56  ;;  %9149 = vst [vmem:[#allocation6_spill] sm:$0xff] %v7126_v0  ;;  %v2678_v28 = vmul.f32 %v7126_v0, %v7126_v0  ;;  %v2673_v50 = vmul.f32 %v7131_v3, %v7131_v3  ;;  %v2598_v8 = vsel %vm294_vm0, %v7136_v63, 0.0 }
 0x6d8   :  { %v4884_v21 = vpop.eup %4883 }
 0x6d9   :  { %v2188_v60 = vsel %vm2187_vm12, %v4882_v39, %v2184_v51  ;;  %v2196_v22 = vmul.f32 %v4884_v21, %v7099_v54  ;;  %vm2201_vm14 = vweird.f32 %v4884_v21  ;;  %v2730_v33 = vsel %vm294_vm0, %v2678_v28, 0.0 }
 0x6da   :  { %2773 = vadd.xlane.f32.xlu1 %v2772_v18  ;;  %2728 = vadd.xlane.f32.xlu0 %v2727_v15  ;;  %v2193_v36 = vsel %vm2190_vm13, %v2192_v43, %v2188_v60  ;;  %vm2202_vm3 = vmor %vm2200_vm15, %vm2201_vm14  ;;  %v2467_v54 = vmul.f32 %v6786_v29, %v9152_v5  ;;  %v2715_v56 = vsel %vm294_vm0, %v2673_v50, 0.0  ;;  %v9153_v18 = vld [vmem:[#allocation14_spill] sm:$0xff]  ;;  %v9154_v60 = vld [vmem:[#allocation7_spill] sm:$0xff] }
 0x6db   :  { %2713 = vadd.xlane.f32.xlu2 %v2712_v24  ;;  %v2210_v20 = vmul.f32 %v2193_v36, %v7037_v7  ;;  %v2197_v49 = vsub.f32 1.0, %v2196_v22  ;;  %v9150_v7 = vld [vmem:[#allocation10_spill] sm:$0xff]  ;;  %v2458_v43 = vmul.f32 %v6786_v29, %v9153_v18  ;;  %v2453_v22 = vmul.f32 %v6786_v29, %v9154_v60 }
 0x6dc   :  { %v2457_v17 = vmul.f32 %v6786_v29, %v9150_v7 }
 0x6dd   :  { %4555 = vmatmul.msk.f32.vlgmr.msrb.gmra.mxu3 %vm2114_vm2, %v2210_v20  ;;  %v2198_v39 = vmul.f32 %v4884_v21, %v2197_v49  ;;  %v2765_v10 = vpop.xlane.xlu1 %2764  ;;  %v7181_v20 = vadd.f32 %v6793_v61, %v2458_v43  ;;  %v2626_v49 = vmul.f32 %v6986_v52, %v5355_v9  ;;  %v7186_v2 = vadd.f32 %v6793_v61, %v2453_v22 }
 0x6de   :  { %v7161_v51 = vadd.f32 %v6793_v61, %v2457_v17  ;;  %v2817_v36 = vmul.f32 %v2765_v10, %v5355_v9  ;;  %v2612_v17 = vmul.f32 %v7057_v41, %v5355_v9 }
 0x6df   :  { %v2199_v12 = vadd.f32 %v4884_v21, %v2198_v39  ;;  %v9155_v39 = vld [vmem:[#allocation15_spill] sm:$0xff]  ;;  %v2559_v50 = vsel %vm294_vm0, %v7181_v20, 0.0  ;;  %v2544_v7 = vsel %vm294_vm0, %v7186_v2, 0.0 }
 0x6e0   :  { %v2556_v15 = vsel %vm294_vm0, %v7161_v51, 0.0  ;;  %v2849_v28 = vadd.f32 1e-05, %v2817_v36  ;;  %v2459_v11 = vmul.f32 %v6786_v29, %v9155_v39  ;;  %v2629_v36 = vmul.f32 %v7117_v59, %v5355_v9 }
 0x6e1   :  { %v2203_v13 = vsel %vm2202_vm3, %v4884_v21, %v2199_v12  ;;  %v7167_v21 = vadd.f32 %v6793_v61, %v2467_v54  ;;  %v7193_v12 = vsub.f32 %v6807_v25, %v2626_v49  ;;  %v2460_v25 = vmul.f32 %v6786_v29, %v9157_v6 }
 0x6e2   :  { %2599 = vadd.xlane.f32.xlu0 %v2598_v8  ;;  %2731 = vadd.xlane.f32.xlu1 %v2730_v33  ;;  %v2208_v58 = vsel %vm2205_vm4, %v2207_v1, %v2203_v13  ;;  %4885 = vrsqrt.f32 %v2849_v28  ;;  %v7198_v52 = vadd.f32 %v6793_v61, %v2459_v11  ;;  %v7209_v33 = vsub.f32 %v6927_v47, %v2612_v17 }
 0x6e3   :  { %2716 = vadd.xlane.f32.xlu2 %v2715_v56  ;;  %v2211_v45 = vmul.f32 %v2208_v58, %v7067_v32  ;;  %v2601_v32 = vsel %vm294_vm0, %v7164_v26, 0.0  ;;  %v2586_v24 = vsel %vm294_vm0, %v7167_v21, 0.0  ;;  %9156 = vst [vmem:[#allocation17_spill] sm:$0xff] %v7193_v12  ;;  %v2690_v8 = vmul.f32 %v7193_v12, %v7193_v12 }
 0x6e4   :  { %v2562_v38 = vsel %vm294_vm0, %v7198_v52, 0.0  ;;  %9158 = vst [vmem:[#allocation8_spill] sm:$0xff] %v7209_v33  ;;  %v7213_v41 = vadd.f32 %v6793_v61, %v2460_v25  ;;  %v2676_v54 = vmul.f32 %v7209_v33, %v7209_v33  ;;  %vm3076_vm6 = vweird.f32 %v2849_v28 }
 0x6e5   :  { %4556 = vmatmul.msk.f32.gmra.mxu3 %vm2114_vm2, %v2211_v45  ;;  %v2766_v13 = vsel %vm294_vm0, %v2690_v8, 0.0  ;;  %v9159_v45 = vld [vmem:[#allocation18_spill] sm:$0xff]  ;;  %v7235_v11 = vsub.f32 %v6834_v31, %v2629_v36 }
 0x6e6   :  { %v2565_v58 = vsel %vm294_vm0, %v7213_v41, 0.0  ;;  %v2470_v10 = vmul.f32 %v6786_v29, %v9159_v45  ;;  %v2724_v47 = vsel %vm294_vm0, %v2676_v54, 0.0  ;;  %v7252_v31 = vld [vmem:[%s9067_s5 + $0x10] ss:$0 sm:$0xff] }
 0x6e7   :  { %9161 = vst [vmem:[#allocation13_spill] sm:$0xff] %v7235_v11  ;;  %v2693_v59 = vmul.f32 %v7235_v11, %v7235_v11 }
 0x6e8   :  { %v4886_v1 = vpop.eup %4885  ;;  %v7223_v43 = vadd.f32 %v6793_v61, %v2470_v10 }
 0x6e9   :  { %v3071_v5 = vmul.f32 %v4886_v1, %v2849_v28  ;;  %vm3077_vm5 = vweird.f32 %v4886_v1  ;;  %v2775_v17 = vsel %vm294_vm0, %v2693_v59, 0.0 }
 0x6ea   :  { %2557 = vadd.xlane.f32.xlu0 %v2556_v15  ;;  %2602 = vadd.xlane.f32.xlu1 %v2601_v32  ;;  %v9160_v32 = vld [vmem:[#allocation9_spill] sm:$0xff]  ;;  %v2595_v22 = vsel %vm294_vm0, %v7223_v43, 0.0  ;;  %vm3078_vm7 = vmor %vm3076_vm6, %vm3077_vm5 }
 0x6eb   :  { %2587 = vadd.xlane.f32.xlu2 %v2586_v24  ;;  %v3072_v56 = vmul.f32 %v4886_v1, %v3071_v5  ;;  %v2456_v60 = vmul.f32 %v6786_v29, %v9160_v32 }
 0x6ed   :  { %v3073_v18 = vmul.f32 0.5, %v3072_v56  ;;  %v7232_v49 = vadd.f32 %v6793_v61, %v2456_v60  ;;  %v2615_v61 = vmul.f32 %v7148_v53, %v5355_v9 }
 0x6ef   :  { %v3074_v15 = vsub.f32 1.5, %v3073_v18  ;;  %v2553_v29 = vsel %vm294_vm0, %v7232_v49, 0.0 }
 0x6f1   :  { %v3075_v24 = vmul.f32 %v4886_v1, %v3074_v15 }
 0x6f2   :  { %2560 = vadd.xlane.f32.xlu1 %v2559_v50 }
 0x6f3   :  { %2545 = vadd.xlane.f32.xlu2 %v2544_v7  ;;  %v3079_v39 = vsel %vm3078_vm7, %v4886_v1, %v3075_v24  ;;  %v7243_v7 = vld [vmem:[%s9067_s5 + $0xf] ss:$0 sm:$0xff] }
 0x6f4   :  { %v3201_v50 = vmul.f32 %v3079_v39, %v6864_v19  ;;  %v7256_v19 = vsub.f32 %v6841_v46, %v2615_v61 }
 0x6f6   :  { %v3234_v28 = vmul.f32 %v7243_v7, %v3201_v50  ;;  %9162 = vst [vmem:[#allocation10_spill] sm:$0xff] %v7256_v19  ;;  %v2679_v53 = vmul.f32 %v7256_v19, %v7256_v19 }
 0x6f8   :  { %v7260_v8 = vadd.f32 %v7252_v31, %v3234_v28  ;;  %v2733_v6 = vsel %vm294_vm0, %v2679_v53, 0.0 }
 0x6fa   :  { %2563 = vadd.xlane.f32.xlu1 %v2562_v38  ;;  %v4582_v1 = vmul.f32 -1.442695, %v7260_v8 }
 0x6fb   :  { %2767 = vadd.xlane.f32.xlu2 %v2766_v13 }
 0x6fc   :  { %4887 = vpow2.f32 %v4582_v1 }
 0x702   :  { %2566 = vadd.xlane.f32.xlu1 %v2565_v58  ;;  %v4888_v13 = vpop.eup %4887 }
 0x703   :  { %2725 = vadd.xlane.f32.xlu2 %v2724_v47  ;;  %v7267_v5 = vadd.f32 1.0, %v4888_v13 }
 0x705   :  { %vm3726_vm15 = vweird.f32 %v7267_v5 }
 0x70b   :  { %2596 = vadd.xlane.f32.xlu2 %v2595_v22 }
 0x713   :  { %2554 = vadd.xlane.f32.xlu2 %v2553_v29 }
 0x71b   :  { %2776 = vadd.xlane.f32.xlu2 %v2775_v17 }
 0x723   :  { %2734 = vadd.xlane.f32.xlu2 %v2733_v6 }
 0x725   :  { %v2762_v25 = vpop.xlane.xlu0 %2761 }
 0x726   :  { %v2816_v38 = vmul.f32 %v2762_v25, %v5355_v9 }
 0x728   :  { %v2848_v46 = vadd.f32 1e-05, %v2816_v38 }
 0x72a   :  { %4889 = vrsqrt.f32 %v2848_v46  ;;  %vm3066_vm9 = vweird.f32 %v2848_v46 }
 0x72b   :  { %4891 = vrcp.f32 %v7267_v5 }
 0x72d   :  { %v2720_v54 = vpop.xlane.xlu0 %2719  ;;  %v2702_v56 = vpop.xlane.xlu2 %2701 }
 0x72e   :  { %v2802_v58 = vmul.f32 %v2720_v54, %v5355_v9  ;;  %v2796_v45 = vmul.f32 %v2702_v56, %v5355_v9 }
 0x730   :  { %v4890_v10 = vpop.eup %4889  ;;  %v2828_v47 = vadd.f32 1e-05, %v2796_v45  ;;  %v7272_v15 = vadd.f32 1e-05, %v2802_v58 }
 0x731   :  { %v3061_v18 = vmul.f32 %v4890_v10, %v2848_v46  ;;  %v7277_v36 = vpop.eup %4891  ;;  %vm3067_vm8 = vweird.f32 %v4890_v10 }
 0x732   :  { %4893 = vrsqrt.f32 %v2828_v47  ;;  %v3722_v1 = vmul.f32 %v7277_v36, %v7267_v5  ;;  %vm3068_vm10 = vmor %vm3066_vm9, %vm3067_vm8  ;;  %vm2866_vm12 = vweird.f32 %v2828_v47  ;;  %vm3727_vm14 = vweird.f32 %v7277_v36 }
 0x733   :  { %v3062_v32 = vmul.f32 %v4890_v10, %v3061_v18  ;;  %4895 = vrsqrt.f32 %v7272_v15  ;;  %vm7326_vm3 = vmor %vm3726_vm15, %vm3727_vm14  ;;  %vm2926_vm6 = vweird.f32 %v7272_v15 }
 0x734   :  { %v3723_v46 = vsub.f32 1.0, %v3722_v1 }
 0x735   :  { %v3063_v60 = vmul.f32 0.5, %v3062_v32  ;;  %v2723_v22 = vpop.xlane.xlu1 %2722  ;;  %v7275_v24 = vpop.xlane.xlu0 %2590 }
 0x736   :  { %v2803_v39 = vmul.f32 %v2723_v22, %v5355_v9  ;;  %v2705_v29 = vpop.xlane.xlu2 %2704 }
 0x737   :  { %v3064_v50 = vsub.f32 1.5, %v3063_v60  ;;  %v2797_v61 = vmul.f32 %v2705_v29, %v5355_v9 }
 0x738   :  { %v7281_v59 = vadd.f32 1e-05, %v2803_v39  ;;  %v4894_v28 = vpop.eup %4893 }
 0x739   :  { %v3065_v17 = vmul.f32 %v4890_v10, %v3064_v50  ;;  %v7283_v53 = vadd.f32 1e-05, %v2797_v61  ;;  %v2861_v6 = vmul.f32 %v4894_v28, %v2828_v47  ;;  %v7288_v25 = vpop.eup %4895  ;;  %vm2867_vm11 = vweird.f32 %v4894_v28 }
 0x73a   :  { %4897 = vrsqrt.f32 %v7281_v59  ;;  %v2921_v18 = vmul.f32 %v7288_v25, %v7272_v15  ;;  %v3724_v61 = vmul.f32 %v7277_v36, %v3723_v46  ;;  %vm2868_vm13 = vmor %vm2866_vm12, %vm2867_vm11  ;;  %vm2927_vm5 = vweird.f32 %v7288_v25 }
 0x73b   :  { %v3069_v38 = vsel %vm3068_vm10, %v4890_v10, %v3065_v17  ;;  %4899 = vrsqrt.f32 %v7283_v53  ;;  %v2862_v54 = vmul.f32 %v4894_v28, %v2861_v6  ;;  %vm2936_vm7 = vweird.f32 %v7281_v59  ;;  %vm7372_vm8 = vmor %vm2926_vm6, %vm2927_vm5 }
 0x73c   :  { %v3200_v13 = vmul.f32 %v3069_v38, %v6967_v4  ;;  %v2922_v1 = vmul.f32 %v7288_v25, %v2921_v18  ;;  %v3725_v18 = vadd.f32 %v7277_v36, %v3724_v61  ;;  %vm2876_vm11 = vweird.f32 %v7283_v53 }
 0x73d   :  { %v2594_v56 = vpop.xlane.xlu1 %2593  ;;  %v2549_v58 = vpop.xlane.xlu0 %2548  ;;  %v2863_v32 = vmul.f32 0.5, %v2862_v54 }
 0x73e   :  { %v3233_v45 = vmul.f32 %v7243_v7, %v3200_v13  ;;  %v2708_v60 = vpop.xlane.xlu2 %2707  ;;  %v2923_v47 = vmul.f32 0.5, %v2922_v1 }
 0x73f   :  { %v2798_v22 = vmul.f32 %v2708_v60, %v5355_v9  ;;  %v2864_v29 = vsub.f32 1.5, %v2863_v32 }
 0x740   :  { %v7296_v39 = vpop.eup %4897  ;;  %v7299_v10 = vadd.f32 %v7252_v31, %v3233_v45 }
 0x741   :  { %v7301_v4 = vpop.eup %4899  ;;  %v7303_v50 = vadd.f32 1e-05, %v2798_v22  ;;  %v2865_v6 = vmul.f32 %v4894_v28, %v2864_v29  ;;  %v2931_v38 = vmul.f32 %v7296_v39, %v7281_v59  ;;  %v3730_v22 = vand.u32 2147483647, %v7267_v5 }
 0x742   :  { %v4581_v17 = vmul.f32 -1.442695, %v7299_v10  ;;  %v2871_v13 = vmul.f32 %v7301_v4, %v7283_v53  ;;  %v3732_v29 = vand.u32 2147483648, %v7267_v5  ;;  %v2631_v5 = vmul.f32 %v7275_v24, %v5355_v9 }
 0x743   :  { %4901 = vrsqrt.f32 %v7303_v50  ;;  %v2869_v54 = vsel %vm2868_vm13, %v4894_v28, %v2865_v6  ;;  %v2932_v28 = vmul.f32 %v7296_v39, %v2931_v38  ;;  %v3729_v38 = vsel %vm7326_vm3, %v7277_v36, %v3725_v18 }
 0x744   :  { %4903 = vpow2.f32 %v4581_v17  ;;  %v3180_v45 = vmul.f32 %v2869_v54, %v6992_v42  ;;  %v2872_v42 = vmul.f32 %v7301_v4, %v2871_v13  ;;  %vm3731_vm4 = vcmp.eq.f32.partialorder %v3730_v22, 8.507059e+37 }
 0x745   :  { %v7314_v46 = vpop.xlane.xlu1 %2551  ;;  %v2771_v32 = vpop.xlane.xlu0 %2770  ;;  %v3733_v19 = vor.u32 1.1754944e-38, %v3732_v29  ;;  %v2933_v0 = vmul.f32 0.5, %v2932_v28  ;;  %v2617_v18 = vmul.f32 %v2549_v58, %v5355_v9  ;;  %vm2937_vm9 = vweird.f32 %v7296_v39 }
 0x746   :  { %v2711_v60 = vpop.xlane.xlu2 %2710  ;;  %v3213_v17 = vmul.f32 %v7243_v7, %v3180_v45  ;;  %v2819_v61 = vmul.f32 %v2771_v32, %v5355_v9  ;;  %v2924_v32 = vsub.f32 1.5, %v2923_v47  ;;  %v2873_v33 = vmul.f32 0.5, %v2872_v42  ;;  %vm7411_vm12 = vmor %vm2936_vm7, %vm2937_vm9 }
 0x747   :  { %v2799_v6 = vmul.f32 %v2711_v60, %v5355_v9  ;;  %v2632_v60 = vmul.f32 %v2594_v56, %v5355_v9  ;;  %v3734_v36 = vsel %vm3731_vm4, %v3733_v19, %v3729_v38  ;;  %v7353_v56 = vsub.f32 %v7029_v37, %v2631_v5  ;;  %v3918_v5 = vld [vmem:[%s9066_s4 + $0xb0] sm:$0xff] }
 0x748   :  { %v7333_v34 = vadd.f32 %v7252_v31, %v3213_v17  ;;  %v2925_v22 = vmul.f32 %v7288_v25, %v2924_v32  ;;  %v2934_v42 = vsub.f32 1.5, %v2933_v0  ;;  %v7363_v37 = vmul.f32 %v3734_v36, %v7260_v8 }
 0x749   :  { %v7330_v1 = vpop.eup %4901  ;;  %v7337_v45 = vadd.f32 1e-05, %v2799_v6  ;;  %v7348_v6 = vadd.f32 1e-05, %v2819_v61  ;;  %9165 = vst [vmem:[#allocation19_spill] sm:$0xff] %v7353_v56  ;;  %v7359_v29 = vsub.f32 %v7065_v14, %v2632_v60  ;;  %v2874_v61 = vsub.f32 1.5, %v2873_v33 }
 0x74a   :  { %v4904_v13 = vpop.eup %4903  ;;  %v4561_v17 = vmul.f32 -1.442695, %v7333_v34  ;;  %v2881_v24 = vmul.f32 %v7330_v1, %v7303_v50  ;;  %v3919_v14 = vld [vmem:[%s9066_s4 + $0xb8] sm:$0xff]  ;;  %v7377_v33 = vsub.f32 %v7061_v35, %v2617_v18  ;;  %v2695_v38 = vmul.f32 %v7353_v56, %v7353_v56 }
 0x74b   :  { %v7343_v11 = vadd.f32 1.0, %v4904_v13  ;;  %4905 = vrsqrt.f32 %v7337_v45  ;;  %9166 = vst [vmem:[#allocation16_spill] sm:$0xff] %v7359_v29  ;;  %4639 = vmatpush.msra.mxu3 %v3919_v14  ;;  %4032 = vmatpush.msra.mxu2 %v3919_v14  ;;  %v2929_v35 = vsel %vm7372_vm8, %v7288_v25, %v2925_v22  ;;  %v2696_v60 = vmul.f32 %v7359_v29, %v7359_v29 }
 0x74c   :  { %v2882_v58 = vmul.f32 %v7330_v1, %v2881_v24  ;;  %9169 = vst [vmem:[#allocation14_spill] sm:$0xff] %v7377_v33  ;;  %v2935_v24 = vmul.f32 %v7296_v39, %v2934_v42  ;;  %v2875_v36 = vmul.f32 %v7301_v4, %v2874_v61  ;;  %vm2877_vm10 = vweird.f32 %v7301_v4 }
 0x74d   :  { %4907 = vrcp.f32 %v7343_v11  ;;  %v2774_v47 = vpop.xlane.xlu1 %2773  ;;  %v2729_v19 = vpop.xlane.xlu0 %2728  ;;  %4640 = vmatpush.msra.mxu3 %v3918_v5  ;;  %4033 = vmatpush.msra.mxu2 %v3918_v5  ;;  %v2618_v42 = vmul.f32 %v7314_v46, %v5355_v9  ;;  %v7426_v14 = vmul.f32 %v2929_v35, %v6989_v16  ;;  %vm7430_vm13 = vmor %vm2876_vm11, %vm2877_vm10  ;;  %vm2886_vm14 = vweird.f32 %v7303_v50 }
 0x74e   :  { %4909 = vpow2.f32 %v4561_v17  ;;  %v2714_v28 = vpop.xlane.xlu2 %2713  ;;  %v2820_v8 = vmul.f32 %v2774_v47, %v5355_v9  ;;  %v2805_v32 = vmul.f32 %v2729_v19, %v5355_v9  ;;  %v2883_v47 = vmul.f32 0.5, %v2882_v58 }
 0x74f   :  { %v2800_v54 = vmul.f32 %v2714_v28, %v5355_v9  ;;  %4911 = vrsqrt.f32 %v7348_v6  ;;  %v2681_v5 = vmul.f32 %v7377_v33, %v7377_v33  ;;  %v2939_v16 = vsel %vm7411_vm12, %v7296_v39, %v2935_v24 }
 0x750   :  { %v7418_v53 = vadd.f32 1e-05, %v2820_v8  ;;  %v7435_v46 = vadd.f32 1e-05, %v2805_v32  ;;  %v2879_v35 = vsel %vm7430_vm13, %v7301_v4, %v2875_v36  ;;  %v2884_v32 = vsub.f32 1.5, %v2883_v47 }
 0x751   :  { %v7380_v15 = vadd.f32 1e-05, %v2800_v54  ;;  %v7387_v13 = vpop.eup %4905  ;;  %v7421_v54 = vsel %vm294_vm0, %v2695_v38, 0.0  ;;  %vm2887_vm15 = vweird.f32 %v7330_v1  ;;  %v7467_v24 = vsel %vm294_vm0, %v2681_v5, 0.0 }
 0x752   :  { %v2891_v18 = vmul.f32 %v7387_v13, %v7337_v45  ;;  %v3715_v47 = vand.u32 2147483647, %v7343_v11  ;;  %vm2896_vm4 = vweird.f32 %v7337_v45  ;;  %vm3711_vm5 = vweird.f32 %v7343_v11  ;;  %vm7495_vm6 = vmor %vm2886_vm14, %vm2887_vm15 }
 0x753   :  { %v7396_v17 = vpop.eup %4907  ;;  %4913 = vrsqrt.f32 %v7380_v15  ;;  %vm2897_vm7 = vweird.f32 %v7387_v13  ;;  %vm2906_vm11 = vweird.f32 %v7380_v15 }
 0x754   :  { %v4910_v25 = vpop.eup %4909  ;;  %v3707_v22 = vmul.f32 %v7396_v17, %v7343_v11  ;;  %v2892_v61 = vmul.f32 %v7387_v13, %v2891_v18  ;;  %v7448_v18 = vsel %vm294_vm0, %v2696_v60, 0.0  ;;  %4915 = vrsqrt.f32 %v7418_v53  ;;  %vm7544_vm10 = vmor %vm2896_vm4, %vm2897_vm7 }
 0x755   :  { %v2732_v19 = vpop.xlane.xlu1 %2731  ;;  %v7423_v58 = vpop.eup %4911  ;;  %v7439_v38 = vadd.f32 1.0, %v4910_v25  ;;  %v7453_v25 = vsub.f32 %v7091_v44, %v2618_v42  ;;  %v7462_v60 = vmul.f32 %v2939_v16, %v7035_v48  ;;  %4917 = vrsqrt.f32 %v7435_v46 }
 0x756   :  { %v2717_v0 = vpop.xlane.xlu2 %2716  ;;  %v3708_v8 = vsub.f32 1.0, %v3707_v22  ;;  %v2893_v29 = vmul.f32 0.5, %v2892_v61  ;;  %v2806_v22 = vmul.f32 %v2732_v19, %v5355_v9  ;;  %v3091_v28 = vmul.f32 %v7423_v58, %v7348_v6 }
 0x757   :  { %v2801_v56 = vmul.f32 %v2717_v0, %v5355_v9  ;;  %9174 = vst [vmem:[#allocation7_spill] sm:$0xff] %v7453_v25  ;;  %4919 = vrcp.f32 %v7439_v38  ;;  %v3181_v44 = vmul.f32 %v2879_v35, %v7022_v23  ;;  %v2885_v42 = vmul.f32 %v7330_v1, %v2884_v32  ;;  %v2600_v32 = vpop.xlane.xlu0 %2599 }
 0x758   :  { %v3709_v39 = vmul.f32 %v7396_v17, %v3708_v8  ;;  %v2894_v48 = vsub.f32 1.5, %v2893_v29  ;;  %v7475_v61 = vadd.f32 1e-05, %v2806_v22  ;;  %v3092_v59 = vmul.f32 %v7423_v58, %v3091_v28  ;;  %v7503_v22 = vld [vmem:[%s9067_s5 + $0x8] ss:$0 sm:$0xff] }
 0x759   :  { %v7459_v4 = vpop.eup %4913  ;;  %v7477_v19 = vadd.f32 1e-05, %v2801_v56  ;;  %vm3712_vm3 = vweird.f32 %v7396_v17  ;;  %v3717_v56 = vand.u32 2147483648, %v7343_v11  ;;  %v3214_v28 = vmul.f32 %v7243_v7, %v3181_v44 }
 0x75a   :  { %v2901_v36 = vmul.f32 %v7459_v4, %v7380_v15  ;;  %v3710_v23 = vadd.f32 %v7396_v17, %v3709_v39  ;;  %v7489_v29 = vpop.eup %4915  ;;  %v7508_v39 = vmul.f32 %v7453_v25, %v7453_v25  ;;  %vm7522_vm8 = vmor %vm3711_vm5, %vm3712_vm3  ;;  %v7528_v40 = vmul.f32 0.5, %v3092_v59 }
 0x75b   :  { %4921 = vrsqrt.f32 %v7477_v19  ;;  %v7510_v50 = vpop.eup %4917  ;;  %vm3716_vm9 = vcmp.eq.f32.partialorder %v3715_v47, 8.507059e+37  ;;  %v3718_v16 = vor.u32 1.1754944e-38, %v3717_v56  ;;  %vm2907_vm12 = vweird.f32 %v7459_v4 }
 0x75c   :  { %v2902_v0 = vmul.f32 %v7459_v4, %v2901_v36  ;;  %v2889_v36 = vsel %vm7495_vm6, %v7330_v1, %v2885_v42  ;;  %4923 = vrsqrt.f32 %v7475_v61  ;;  %v3714_v42 = vsel %vm7522_vm8, %v7396_v17, %v3710_v23  ;;  %vm7583_vm13 = vmor %vm2906_vm11, %vm2907_vm12 }
 0x75d   :  { %v7481_v8 = vpop.xlane.xlu1 %2602  ;;  %v7526_v25 = vpop.eup %4919  ;;  %v3182_v12 = vmul.f32 %v2889_v36, %v7055_v27  ;;  %v2951_v17 = vmul.f32 %v7510_v50, %v7435_v46  ;;  %vm2916_vm14 = vweird.f32 %v7477_v19  ;;  %vm3411_vm4 = vweird.f32 %v7439_v38 }
 0x75e   :  { %v2588_v5 = vpop.xlane.xlu2 %2587  ;;  %v2903_v35 = vmul.f32 0.5, %v2902_v0  ;;  %v2895_v0 = vmul.f32 %v7387_v13, %v2894_v48  ;;  %v3101_v48 = vmul.f32 %v7489_v29, %v7418_v53  ;;  %v3407_v23 = vmul.f32 %v7526_v25, %v7439_v38 }
 0x75f   :  { %v2630_v33 = vmul.f32 %v2588_v5, %v5355_v9  ;;  %v2634_v5 = vmul.f32 %v2600_v32, %v5355_v9  ;;  %v2952_v59 = vmul.f32 %v7510_v50, %v2951_v17  ;;  %vm3412_vm15 = vweird.f32 %v7526_v25 }
 0x760   :  { %v2245_v57 = vpop.f32.mrf.mxu3  ;;  %v2904_v1 = vsub.f32 1.5, %v2903_v35  ;;  %v2899_v27 = vsel %vm7544_vm10, %v7387_v13, %v2895_v0  ;;  %v3102_v13 = vmul.f32 %v7489_v29, %v3101_v48  ;;  %v3408_v48 = vsub.f32 1.0, %v3407_v23  ;;  %vm3413_vm5 = vmor %vm3411_vm4, %vm3412_vm15 }
 0x761   :  { %v7537_v11 = vsub.f32 %v7167_v21, %v2630_v33  ;;  %v7552_v47 = vadd.f32 %v7503_v22, %v2245_v57  ;;  %v7554_v21 = vpop.eup %4921  ;;  %v3719_v33 = vsel %vm3716_vm9, %v3718_v16, %v3714_v42  ;;  %v7572_v0 = vsub.f32 %v7136_v63, %v2634_v5 }
 0x762   :  { %v2905_v35 = vmul.f32 %v7459_v4, %v2904_v1  ;;  %v2911_v57 = vmul.f32 %v7554_v21, %v7477_v19  ;;  %v7568_v36 = vpop.eup %4923  ;;  %v3906_v44 = vmul.f32 %v3719_v33, %v7299_v10  ;;  %v3183_v1 = vmul.f32 %v2899_v27, %v7083_v55 }
 0x763   :  { %9179 = vst [vmem:[#allocation15_spill] sm:$0xff] %v7537_v11  ;;  %v2694_v45 = vmul.f32 %v7537_v11, %v7537_v11  ;;  %v2253_v42 = vsel %vm1931_vm1, %v7552_v47, 0.0  ;;  %v2961_v15 = vmul.f32 %v7568_v36, %v7475_v61  ;;  %v3409_v33 = vmul.f32 %v7526_v25, %v3408_v48 }
 0x764   :  { %v2912_v56 = vmul.f32 %v7554_v21, %v2911_v57  ;;  %2254 = vadd.xlane.f32.xlu1 %v2253_v42  ;;  %4613 = vmatmul.msk.f32.vlgmr.msra.gmra.mxu3 %vm294_vm0, %v3906_v44  ;;  %v2909_v5 = vsel %vm7583_vm13, %v7459_v4, %v2905_v35  ;;  %vm2917_vm3 = vweird.f32 %v7554_v21  ;;  %v2698_v4 = vmul.f32 %v7572_v0, %v7572_v0 }
 0x765   :  { %v2561_v32 = vpop.xlane.xlu1 %2560  ;;  %v2778_v11 = vsel %vm294_vm0, %v2694_v45, 0.0  ;;  %v3417_v45 = vand.u32 2147483648, %v7439_v38  ;;  %v7607_v35 = vadd.f32 %v7252_v31, %v3214_v28  ;;  %v3410_v57 = vadd.f32 %v7526_v25, %v3409_v33  ;;  %vm7622_vm7 = vmor %vm2916_vm14, %vm2917_vm3 }
 0x766   :  { %v2546_v16 = vpop.xlane.xlu2 %2545  ;;  %v2621_v10 = vmul.f32 %v2561_v32, %v5355_v9  ;;  %2779 = vadd.xlane.f32.xlu0 %v2778_v11  ;;  %v2913_v17 = vmul.f32 0.5, %v2912_v56  ;;  %v3415_v11 = vand.u32 2147483647, %v7439_v38  ;;  %v3184_v56 = vmul.f32 %v2909_v5, %v7108_v62 }
 0x767   :  { %v2616_v55 = vmul.f32 %v2546_v16, %v5355_v9  ;;  %v3418_v44 = vor.u32 1.1754944e-38, %v3417_v45  ;;  %v4562_v16 = vmul.f32 -1.442695, %v7607_v35  ;;  %vm3096_vm6 = vweird.f32 %v7348_v6 }
 0x768   :  { %v2914_v23 = vsub.f32 1.5, %v2913_v17  ;;  %vm3416_vm8 = vcmp.eq.f32.partialorder %v3415_v11, 8.507059e+37  ;;  %v2790_v38 = vsel %vm294_vm0, %v2698_v4, 0.0  ;;  %v3215_v63 = vmul.f32 %v7243_v7, %v3182_v12  ;;  %v2558_v17 = vpop.xlane.xlu0 %2557 }
 0x769   :  { %v7598_v27 = vsub.f32 %v7186_v2, %v2616_v55  ;;  %v7611_v2 = vsub.f32 %v7181_v20, %v2621_v10  ;;  %v3414_v20 = vsel %vm3413_vm5, %v7526_v25, %v3410_v57  ;;  %vm3097_vm9 = vweird.f32 %v7423_v58 }
 0x76a   :  { %v2915_v32 = vmul.f32 %v7554_v21, %v2914_v23  ;;  %v3419_v55 = vsel %vm3416_vm8, %v3418_v44, %v3414_v20  ;;  %v3103_v5 = vmul.f32 0.5, %v3102_v13  ;;  %4925 = vpow2.f32 %v4562_v16  ;;  %vm7673_vm12 = vmor %vm3096_vm6, %vm3097_vm9 }
 0x76b   :  { %v2680_v42 = vmul.f32 %v7598_v27, %v7598_v27  ;;  %v3886_v25 = vmul.f32 %v3419_v55, %v7333_v34  ;;  %v2953_v12 = vmul.f32 0.5, %v2952_v59  ;;  %v7643_v11 = vadd.f32 %v7252_v31, %v3215_v63 }
 0x76c   :  { %v2919_v10 = vsel %vm7622_vm7, %v7554_v21, %v2915_v32  ;;  %2791 = vadd.xlane.f32.xlu1 %v2790_v38  ;;  %4614 = vmatmul.msk.f32.gmra.mxu3 %vm294_vm0, %v7363_v37  ;;  %v2962_v21 = vmul.f32 %v7568_v36, %v2961_v15  ;;  %v2685_v34 = vmul.f32 %v7611_v2, %v7611_v2  ;;  %v9186_v59 = vsub.f32 1.5, %v7528_v40 }
 0x76d   :  { %v2736_v19 = vsel %vm294_vm0, %v2680_v42, 0.0  ;;  %v3185_v13 = vmul.f32 %v2919_v10, %v7131_v3  ;;  %4593 = vmatmul.msk.f32.vlgmr.msra.gmra.mxu2 %vm294_vm0, %v3886_v25  ;;  %v3216_v37 = vmul.f32 %v7243_v7, %v3183_v1  ;;  %vm3106_vm10 = vweird.f32 %v7418_v53  ;;  %v2564_v32 = vpop.xlane.xlu1 %2563 }
 0x76e   :  { %v2768_v28 = vpop.xlane.xlu2 %2767  ;;  %2782 = vadd.xlane.f32.xlu0 %v7421_v54  ;;  %2737 = vadd.xlane.f32.xlu2 %v2736_v19  ;;  %v3217_v54 = vmul.f32 %v7243_v7, %v3184_v56  ;;  %v3095_v15 = vmul.f32 %v7423_v58, %v9186_v59  ;;  %v4563_v45 = vmul.f32 -1.442695, %v7643_v11  ;;  %v3104_v3 = vsub.f32 1.5, %v3103_v5 }
 0x76f   :  { %v2818_v48 = vmul.f32 %v2768_v28, %v5355_v9  ;;  %v2620_v23 = vmul.f32 %v2558_v17, %v5355_v9  ;;  %v7659_v4 = vadd.f32 %v7252_v31, %v3216_v37  ;;  %vm3107_vm11 = vweird.f32 %v7489_v29 }
 0x770   :  { %v7662_v1 = vadd.f32 %v7252_v31, %v3217_v54  ;;  %v2954_v40 = vsub.f32 1.5, %v2953_v12  ;;  %v2963_v56 = vmul.f32 0.5, %v2962_v21  ;;  %v4926_v57 = vpop.eup %4925  ;;  %v2751_v44 = vsel %vm294_vm0, %v2685_v34, 0.0  ;;  %vm7715_vm14 = vmor %vm3106_vm10, %vm3107_vm11 }
 0x771   :  { %v7640_v33 = vadd.f32 1e-05, %v2818_v48  ;;  %v4564_v16 = vmul.f32 -1.442695, %v7659_v4  ;;  %v3218_v20 = vmul.f32 %v7243_v7, %v3185_v13  ;;  %vm2957_vm13 = vweird.f32 %v7510_v50  ;;  %v2248_v48 = vpop.f32.mrf.mxu3 }
 0x772   :  { %v4565_v62 = vmul.f32 -1.442695, %v7662_v1  ;;  %v2635_v28 = vmul.f32 %v7481_v8, %v5355_v9  ;;  %v7680_v63 = vadd.f32 1.0, %v4926_v57  ;;  %v3099_v55 = vsel %vm7673_vm12, %v7423_v58, %v3095_v15 }
 0x773   :  { %4927 = vrsqrt.f32 %v7640_v33  ;;  %v7687_v6 = vmul.f32 %v7489_v29, %v3104_v3  ;;  %v7690_v19 = vsub.f32 %v7161_v51, %v2620_v23  ;;  %v7696_v5 = vmul.f32 %v7510_v50, %v2954_v40 }
 0x774   :  { %4929 = vpow2.f32 %v4563_v45  ;;  %2752 = vadd.xlane.f32.xlu1 %v2751_v44  ;;  %v2964_v25 = vsub.f32 1.5, %v2963_v56  ;;  %v3219_v58 = vmul.f32 %v7243_v7, %v7426_v14  ;;  %v2622_v51 = vmul.f32 %v2564_v32, %v5355_v9 }
 0x775   :  { %4931 = vpow2.f32 %v4564_v16  ;;  %v7709_v17 = vmul.f32 %v3099_v55, %v7078_v30  ;;  %vm2956_vm15 = vweird.f32 %v7435_v46  ;;  %v7721_v14 = vsub.f32 %v7164_v26, %v2635_v28  ;;  %v9211_v30 = vld [vmem:[#allocation8_spill] sm:$0xff] }
 0x776   :  { %v2726_v42 = vpop.xlane.xlu2 %2725  ;;  %2785 = vadd.xlane.f32.xlu0 %v7448_v18  ;;  %4933 = vrcp.f32 %v7680_v63  ;;  %2740 = vadd.xlane.f32.xlu2 %v7467_v24  ;;  %v7706_v18 = vadd.f32 %v7252_v31, %v3218_v20  ;;  %v7724_v13 = vadd.f32 %v7503_v22, %v2248_v48  ;;  %vm7728_vm3 = vmor %vm2956_vm15, %vm2957_vm13  ;;  %v2684_v26 = vmul.f32 %v7690_v19, %v7690_v19  ;;  %v2567_v20 = vpop.xlane.xlu1 %2566 }
 0x777   :  { %v2804_v10 = vmul.f32 %v2726_v42, %v5355_v9  ;;  %4935 = vpow2.f32 %v4565_v62  ;;  %9191 = vst [vmem:[#allocation12_spill] sm:$0xff] %v7721_v14  ;;  %v7748_v37 = vmul.f32 %v7568_v36, %v2964_v25  ;;  %v7751_v54 = vadd.f32 %v7252_v31, %v3219_v58 }
 0x778   :  { %v7754_v15 = vsub.f32 %v7198_v52, %v2622_v51  ;;  %v4566_v3 = vmul.f32 -1.442695, %v7706_v18  ;;  %v3220_v23 = vmul.f32 %v7243_v7, %v7462_v60  ;;  %v2742_v56 = vsel %vm294_vm0, %v7508_v39, 0.0 }
 0x779   :  { %v7693_v8 = vpop.eup %4927  ;;  %v7703_v12 = vadd.f32 1e-05, %v2804_v10  ;;  %v2256_v52 = vsel %vm1931_vm1, %v7724_v13, 0.0  ;;  %v3430_v62 = vand.u32 2147483647, %v7680_v63  ;;  %v7771_v60 = vsel %vm294_vm0, %v2684_v26, 0.0 }
 0x77a   :  { %v4930_v21 = vpop.eup %4929  ;;  %v3081_v53 = vmul.f32 %v7693_v8, %v7640_v33  ;;  %v3432_v39 = vand.u32 2147483648, %v7680_v63  ;;  %v4567_v28 = vmul.f32 -1.442695, %v7751_v54  ;;  %v7783_v48 = vmul.f32 %v7721_v14, %v7721_v14 }
 0x77b   :  { %4937 = vrsqrt.f32 %v7703_v12  ;;  %v7735_v34 = vadd.f32 1.0, %v4930_v21  ;;  %v4932_v59 = vpop.eup %4931  ;;  %v7786_v25 = vadd.f32 %v7252_v31, %v3220_v23  ;;  %vm3426_vm4 = vweird.f32 %v7680_v63 }
 0x77c   :  { %v4934_v40 = vpop.eup %4933  ;;  %v7763_v32 = vadd.f32 1.0, %v4932_v59  ;;  %v3082_v42 = vmul.f32 %v7693_v8, %v3081_v53  ;;  %vm7798_vm6 = vcmp.eq.f32.partialorder %v3430_v62, 8.507059e+37  ;;  %vm3087_vm7 = vweird.f32 %v7693_v8 }
 0x77d   :  { %4939 = vrcp.f32 %v7735_v34  ;;  %v4936_v44 = vpop.eup %4935  ;;  %v3422_v16 = vmul.f32 %v4934_v40, %v7680_v63  ;;  %vm3427_vm5 = vweird.f32 %v4934_v40  ;;  %vm3441_vm10 = vweird.f32 %v7735_v34 }
 0x77e   :  { %v2597_v45 = vpop.xlane.xlu2 %2596  ;;  %2743 = vadd.xlane.f32.xlu2 %v2742_v56  ;;  %4941 = vrcp.f32 %v7763_v32  ;;  %v7794_v51 = vadd.f32 1.0, %v4936_v44  ;;  %v3083_v53 = vmul.f32 0.5, %v3082_v42  ;;  %v4568_v42 = vmul.f32 -1.442695, %v7786_v25  ;;  %vm3428_vm8 = vmor %vm3426_vm4, %vm3427_vm5 }
 0x77f   :  { %v2633_v57 = vmul.f32 %v2597_v45, %v5355_v9  ;;  %v3423_v55 = vsub.f32 1.0, %v3422_v16  ;;  %4943 = vpow2.f32 %v4566_v3  ;;  %v3433_v3 = vor.u32 1.1754944e-38, %v3432_v39 }
 0x780   :  { %4945 = vpow2.f32 %v4567_v28  ;;  %v3447_v39 = vand.u32 2147483648, %v7735_v34  ;;  %vm2967_vm13 = vweird.f32 %v7568_v36  ;;  %vm2966_vm4 = vweird.f32 %v7475_v61 }
 0x781   :  { %v7775_v38 = vsub.f32 %v7223_v43, %v2633_v57  ;;  %v7779_v10 = vpop.eup %4937  ;;  %v7790_v43 = vmul.f32 %v2567_v20, %v5355_v9  ;;  %v3424_v26 = vmul.f32 %v4934_v40, %v3423_v55  ;;  %4947 = vrcp.f32 %v7794_v51 }
 0x782   :  { %v2941_v59 = vmul.f32 %v7779_v10, %v7703_v12  ;;  %v3445_v20 = vand.u32 2147483647, %v7735_v34  ;;  %4949 = vpow2.f32 %v4568_v42  ;;  %vm3456_vm5 = vweird.f32 %v7763_v32 }
 0x783   :  { %v2697_v58 = vmul.f32 %v7775_v38, %v7775_v38  ;;  %v4940_v21 = vpop.eup %4939  ;;  %v3425_v56 = vadd.f32 %v4934_v40, %v3424_v26  ;;  %v9206_v61 = vsel %vm7715_vm14, %v7489_v29, %v7687_v6 }
 0x784   :  { %v3437_v23 = vmul.f32 %v4940_v21, %v7735_v34  ;;  %v7806_v16 = vpop.eup %4941  ;;  %v2942_v22 = vmul.f32 %v7779_v10, %v2941_v59  ;;  %vm3442_vm9 = vweird.f32 %v4940_v21  ;;  %vm3446_vm11 = vcmp.eq.f32.partialorder %v3445_v20, 8.507059e+37 }
 0x785   :  { %v2787_v57 = vsel %vm294_vm0, %v2697_v58, 0.0  ;;  %v4944_v55 = vpop.eup %4943  ;;  %v3084_v58 = vsub.f32 1.5, %v3083_v53  ;;  %v3429_v26 = vsel %vm3428_vm8, %v4934_v40, %v3425_v56  ;;  %v3452_v46 = vmul.f32 %v7806_v16, %v7763_v32  ;;  %vm3443_vm12 = vmor %vm3441_vm10, %vm3442_vm9 }
 0x786   :  { %v2555_v44 = vpop.xlane.xlu2 %2554  ;;  %v3438_v62 = vsub.f32 1.0, %v3437_v23  ;;  %2788 = vadd.xlane.f32.xlu0 %v2787_v57  ;;  %v3434_v63 = vsel %vm7798_vm6, %v3433_v3, %v3429_v26  ;;  %2257 = vadd.xlane.f32.xlu2 %v2256_v52  ;;  %v3236_v40 = vmul.f32 %v7243_v7, %v7709_v17  ;;  %v4946_v59 = vpop.eup %4945  ;;  %v7828_v3 = vadd.f32 1.0, %v4944_v55 }
 0x787   :  { %v2619_v28 = vmul.f32 %v2555_v44, %v5355_v9  ;;  %v3887_v57 = vmul.f32 %v3434_v63, %v7607_v35  ;;  %v3453_v53 = vsub.f32 1.0, %v3452_v46  ;;  %v7830_v52 = vpop.eup %4947  ;;  %v3448_v35 = vor.u32 1.1754944e-38, %v3447_v39 }
 0x788   :  { %v3439_v14 = vmul.f32 %v4940_v21, %v3438_v62  ;;  %v3085_v7 = vmul.f32 %v7693_v8, %v3084_v58  ;;  %v3467_v46 = vmul.f32 %v7830_v52, %v7794_v51  ;;  %vm3457_vm15 = vweird.f32 %v7806_v16 }
 0x789   :  { %v7820_v23 = vsub.f32 %v7232_v49, %v2619_v28  ;;  %4594 = vmatmul.msk.f32.gmra.mxu2 %vm294_vm0, %v3887_v57  ;;  %v2943_v49 = vmul.f32 0.5, %v2942_v22  ;;  %v3454_v34 = vmul.f32 %v7806_v16, %v3453_v53  ;;  %4951 = vrcp.f32 %v7828_v3  ;;  %vm7852_vm8 = vmor %vm3456_vm5, %vm3457_vm15 }
 0x78a   :  { %v3440_v56 = vadd.f32 %v4940_v21, %v3439_v14  ;;  %v3462_v14 = vand.u32 2147483648, %v7763_v32  ;;  %v3468_v42 = vsub.f32 1.0, %v3467_v46  ;;  %v3460_v58 = vand.u32 2147483647, %v7763_v32 }
 0x78b   :  { %v2683_v45 = vmul.f32 %v7820_v23, %v7820_v23  ;;  %v3455_v62 = vadd.f32 %v7806_v16, %v3454_v34  ;;  %v2944_v28 = vsub.f32 1.5, %v2943_v49  ;;  %vm3086_vm6 = vweird.f32 %v7640_v33  ;;  %v9200_v49 = vld [vmem:[#allocation17_spill] sm:$0xff] }
 0x78c   :  { %v3444_v17 = vsel %vm3443_vm12, %v4940_v21, %v3440_v56  ;;  %v7846_v21 = vadd.f32 1.0, %v4946_v59  ;;  %v2686_v57 = vmul.f32 %v7754_v15, %v7754_v15  ;;  %v7862_v53 = vadd.f32 %v7252_v31, %v3236_v40  ;;  %vm7866_vm9 = vmor %vm3086_vm6, %vm3087_vm7 }
 0x78d   :  { %v3449_v44 = vsel %vm3446_vm11, %v3448_v35, %v3444_v17  ;;  %v2745_v22 = vsel %vm294_vm0, %v2683_v45, 0.0  ;;  %v7872_v33 = vsub.f32 %v7213_v41, %v7790_v43  ;;  %v3469_v59 = vmul.f32 %v7830_v52, %v3468_v42  ;;  %vm7914_vm6 = vmor %vm2966_vm4, %vm2967_vm13 }
 0x78e   :  { %v2777_v20 = vpop.xlane.xlu2 %2776  ;;  %2746 = vadd.xlane.f32.xlu0 %v2745_v22  ;;  %v3888_v55 = vmul.f32 %v3449_v44, %v7643_v11  ;;  %2749 = vadd.xlane.f32.xlu2 %v7771_v60  ;;  %v4950_v11 = vpop.eup %4949  ;;  %v3459_v60 = vsel %vm7852_vm8, %v7806_v16, %v3455_v62  ;;  %v2793_v31 = vsel %vm294_vm0, %v7783_v48, 0.0  ;;  %v3089_v40 = vsel %vm7866_vm9, %v7693_v8, %v3085_v7 }
 0x78f   :  { %v2821_v39 = vmul.f32 %v2777_v20, %v5355_v9  ;;  %vm2947_vm7 = vweird.f32 %v7779_v10  ;;  %v3463_v56 = vor.u32 1.1754944e-38, %v3462_v14  ;;  %4953 = vrcp.f32 %v7846_v21  ;;  %v7890_v16 = vpop.eup %4951 }
 0x790   :  { %v2945_v41 = vmul.f32 %v7779_v10, %v2944_v28  ;;  %vm3461_vm10 = vcmp.eq.f32.partialorder %v3460_v58, 8.507059e+37  ;;  %v7888_v43 = vadd.f32 1.0, %v4950_v11  ;;  %vm2946_vm11 = vweird.f32 %v7703_v12  ;;  %v9205_v28 = vld [vmem:[#allocation5_spill] sm:$0xff]  ;;  %v9207_v58 = vld [vmem:[#allocation11_spill] sm:$0xff] }
 0x791   :  { %v7857_v63 = vadd.f32 1e-05, %v2821_v39  ;;  %4595 = vmatmul.msk.f32.gmra.mxu2 %vm294_vm0, %v3888_v55  ;;  %v3464_v48 = vsel %vm3461_vm10, %v3463_v56, %v3459_v60  ;;  %v2754_v8 = vsel %vm294_vm0, %v2686_v57, 0.0  ;;  %v4584_v45 = vmul.f32 -1.442695, %v7862_v53  ;;  %vm7902_vm15 = vmor %vm2946_vm11, %vm2947_vm7  ;;  %v9212_v60 = vld [vmem:[#allocation6_spill] sm:$0xff] }
 0x792   :  { %v3202_v35 = vmul.f32 %v3089_v40, %v9200_v49  ;;  %v3470_v34 = vadd.f32 %v7830_v52, %v3469_v59  ;;  %vm3472_vm12 = vweird.f32 %v7830_v52  ;;  %v3482_v7 = vmul.f32 %v7890_v16, %v7828_v3 }
 0x793   :  { %4955 = vrsqrt.f32 %v7857_v63  ;;  %vm3471_vm5 = vweird.f32 %v7794_v51  ;;  %v3477_v12 = vand.u32 2147483648, %v7794_v51  ;;  %v2949_v62 = vsel %vm7902_vm15, %v7779_v10, %v2945_v41 }
 0x794   :  { %4957 = vrcp.f32 %v7888_v43  ;;  %v3889_v22 = vmul.f32 %v3464_v48, %v7659_v4  ;;  %v3475_v20 = vand.u32 2147483647, %v7794_v51  ;;  %v3483_v42 = vsub.f32 1.0, %v3482_v7  ;;  %vm7939_vm13 = vmor %vm3471_vm5, %vm3472_vm12 }
 0x795   :  { %v7923_v39 = vpop.eup %4953  ;;  %v3204_v55 = vmul.f32 %v9206_v61, %v9205_v28  ;;  %v9208_v10 = vsel %vm7728_vm3, %v7510_v50, %v7696_v5  ;;  %4959 = vpow2.f32 %v4584_v45  ;;  %v2969_v29 = vsel %vm7914_vm6, %v7568_v36, %v7748_v37  ;;  %v7965_v37 = vld [vmem:[%s9067_s5 + $0xf] ss:$0 sm:$0xff] }
 0x796   :  { %v2735_v17 = vpop.xlane.xlu2 %2734  ;;  %2794 = vadd.xlane.f32.xlu0 %v2793_v31  ;;  %v3189_v26 = vmul.f32 %v9208_v10, %v9207_v58  ;;  %2755 = vadd.xlane.f32.xlu2 %v2754_v8  ;;  %v3474_v50 = vsel %vm7939_vm13, %v7830_v52, %v3470_v34  ;;  %v3484_v6 = vmul.f32 %v7890_v16, %v3483_v42  ;;  %v3478_v11 = vor.u32 1.1754944e-38, %v3477_v12 }
 0x797   :  { %v2807_v46 = vmul.f32 %v2735_v17, %v5355_v9  ;;  %v2687_v5 = vmul.f32 %v7872_v33, %v7872_v33  ;;  %v3188_v57 = vmul.f32 %v2949_v62, %v9211_v30  ;;  %vm3476_vm14 = vcmp.eq.f32.partialorder %v3475_v20, 8.507059e+37 }
 0x798   :  { %v3497_v36 = vmul.f32 %v7923_v39, %v7846_v21  ;;  %v3235_v52 = vmul.f32 %v7965_v37, %v3202_v35  ;;  %v3190_v59 = vmul.f32 %v2969_v29, %v9212_v60  ;;  %v3479_v31 = vsel %vm3476_vm14, %v3478_v11, %v3474_v50  ;;  %v7983_v35 = vld [vmem:[%s9067_s5 + $0x10] ss:$0 sm:$0xff] }
 0x799   :  { %v7943_v51 = vadd.f32 1e-05, %v2807_v46  ;;  %v7945_v24 = vpop.eup %4955  ;;  %4596 = vmatmul.msk.f32.gmra.mxu2 %vm294_vm0, %v3889_v22  ;;  %v3222_v56 = vmul.f32 %v7965_v37, %v3189_v26  ;;  %v3485_v41 = vadd.f32 %v7890_v16, %v3484_v6  ;;  %vm3487_vm3 = vweird.f32 %v7890_v16 }
 0x79a   :  { %v7968_v32 = vpop.eup %4957  ;;  %v3111_v40 = vmul.f32 %v7945_v24, %v7857_v63  ;;  %v2757_v48 = vsel %vm294_vm0, %v2687_v5, 0.0  ;;  %v3237_v8 = vmul.f32 %v7965_v37, %v3204_v55  ;;  %vm3486_vm4 = vweird.f32 %v7828_v3 }
 0x79b   :  { %4961 = vrsqrt.f32 %v7943_v51  ;;  %v4960_v45 = vpop.eup %4959  ;;  %v3492_v49 = vand.u32 2147483648, %v7828_v3  ;;  %v7986_v34 = vadd.f32 %v7983_v35, %v3235_v52  ;;  %v3221_v7 = vmul.f32 %v7965_v37, %v3188_v57  ;;  %vm7998_vm8 = vmor %vm3486_vm4, %vm3487_vm3 }
 0x79c   :  { %v3890_v17 = vmul.f32 %v3479_v31, %v7662_v1  ;;  %v3490_v14 = vand.u32 2147483647, %v7828_v3  ;;  %v3498_v12 = vsub.f32 1.0, %v3497_v36  ;;  %v3512_v46 = vmul.f32 %v7968_v32, %v7888_v43 }
 0x79d   :  { %v3112_v62 = vmul.f32 %v7945_v24, %v3111_v40  ;;  %v4583_v20 = vmul.f32 -1.442695, %v7986_v34  ;;  %v8004_v1 = vadd.f32 %v7983_v35, %v3221_v7  ;;  %v8007_v3 = vadd.f32 %v7983_v35, %v3222_v56 }
 0x79e   :  { %2758 = vadd.xlane.f32.xlu0 %v2757_v48  ;;  %v3489_v42 = vsel %vm7998_vm8, %v7890_v16, %v3485_v41  ;;  %v8014_v61 = vadd.f32 1.0, %v4960_v45  ;;  %v8017_v55 = vadd.f32 %v7983_v35, %v3237_v8  ;;  %v3493_v58 = vor.u32 1.1754944e-38, %v3492_v49 }
 0x79f   :  { %4963 = vpow2.f32 %v4583_v20  ;;  %v4569_v10 = vmul.f32 -1.442695, %v8004_v1  ;;  %v3223_v26 = vmul.f32 %v7965_v37, %v3190_v59  ;;  %vm3491_vm9 = vcmp.eq.f32.partialorder %v3490_v14, 8.507059e+37 }
 0x7a0   :  { %v3499_v4 = vmul.f32 %v7923_v39, %v3498_v12  ;;  %v3513_v16 = vsub.f32 1.0, %v3512_v46  ;;  %v3113_v29 = vmul.f32 0.5, %v3112_v62  ;;  %v3494_v50 = vsel %vm3491_vm9, %v3493_v58, %v3489_v42 }
 0x7a1   :  { %v7993_v44 = vpop.eup %4961  ;;  %4597 = vmatmul.msk.f32.gmra.mxu2 %vm294_vm0, %v3890_v17  ;;  %4965 = vpow2.f32 %v4569_v10  ;;  %v4570_v5 = vmul.f32 -1.442695, %v8007_v3  ;;  %v4585_v30 = vmul.f32 -1.442695, %v8017_v55  ;;  %vm3502_vm7 = vweird.f32 %v7923_v39 }
 0x7a2   :  { %v2971_v28 = vmul.f32 %v7993_v44, %v7943_v51  ;;  %4967 = vrcp.f32 %v8014_v61  ;;  %v3507_v57 = vand.u32 2147483648, %v7846_v21  ;;  %v8030_v11 = vadd.f32 %v7983_v35, %v3223_v26 }
 0x7a3   :  { %v3891_v36 = vmul.f32 %v3494_v50, %v7706_v18  ;;  %v3500_v52 = vadd.f32 %v7923_v39, %v3499_v4  ;;  %v3514_v60 = vmul.f32 %v7968_v32, %v3513_v16  ;;  %4969 = vpow2.f32 %v4570_v5 }
 0x7a4   :  { %v2972_v6 = vmul.f32 %v7993_v44, %v2971_v28  ;;  %v3114_v31 = vsub.f32 1.5, %v3113_v29  ;;  %4971 = vpow2.f32 %v4585_v30  ;;  %vm3501_vm10 = vweird.f32 %v7846_v21 }
 0x7a5   :  { %v4964_v59 = vpop.eup %4963  ;;  %v3505_v56 = vand.u32 2147483647, %v7846_v21  ;;  %v4571_v48 = vmul.f32 -1.442695, %v8030_v11  ;;  %vm8042_vm11 = vmor %vm3501_vm10, %vm3502_vm7  ;;  %v3508_v45 = vor.u32 1.1754944e-38, %v3507_v57  ;;  %v3522_v49 = vand.u32 2147483648, %v7888_v43 }
 0x7a6   :  { %v2973_v40 = vmul.f32 0.5, %v2972_v6  ;;  %v8037_v41 = vadd.f32 1.0, %v4964_v59  ;;  %v3504_v21 = vsel %vm8042_vm11, %v7923_v39, %v3500_v52  ;;  %v3515_v17 = vadd.f32 %v7968_v32, %v3514_v60  ;;  %v9221_v57 = vld [vmem:[#allocation13_spill] sm:$0xff] }
 0x7a7   :  { %v4966_v8 = vpop.eup %4965  ;;  %vm3517_vm12 = vweird.f32 %v7968_v32  ;;  %v3115_v14 = vmul.f32 %v7945_v24, %v3114_v31  ;;  %vm3117_vm15 = vweird.f32 %v7945_v24  ;;  %vm3506_vm5 = vcmp.eq.f32.partialorder %v3505_v56, 8.507059e+37 }
 0x7a8   :  { %v8047_v7 = vpop.eup %4967  ;;  %4973 = vrcp.f32 %v8037_v41  ;;  %v2974_v12 = vsub.f32 1.5, %v2973_v40  ;;  %v8058_v46 = vadd.f32 1.0, %v4966_v8  ;;  %vm3516_vm6 = vweird.f32 %v7888_v43 }
 0x7a9   :  { %4598 = vmatmul.msk.f32.gmra.mxu2 %vm294_vm0, %v3891_v36  ;;  %v4970_v62 = vpop.eup %4969  ;;  %v3520_v22 = vand.u32 2147483647, %v7888_v43  ;;  %4975 = vpow2.f32 %v4571_v48  ;;  %vm3116_vm13 = vweird.f32 %v7857_v63  ;;  %v3509_v20 = vsel %vm3506_vm5, %v3508_v45, %v3504_v21  ;;  %vm8063_vm14 = vmor %vm3516_vm6, %vm3517_vm12 }
 0x7aa   :  { %v4972_v39 = vpop.eup %4971  ;;  %4977 = vrcp.f32 %v8058_v46  ;;  %v3752_v28 = vmul.f32 %v8047_v7, %v8014_v61  ;;  %vm8070_vm3 = vmor %vm3116_vm13, %vm3117_vm15  ;;  %v3519_v43 = vsel %vm8063_vm14, %v7968_v32, %v3515_v17  ;;  %v8077_v10 = vadd.f32 1.0, %v4970_v62 }
 0x7ab   :  { %v8079_v63 = vadd.f32 1.0, %v4972_v39  ;;  %v3119_v26 = vsel %vm8070_vm3, %v7945_v24, %v3115_v14  ;;  %v2975_v4 = vmul.f32 %v7993_v44, %v2974_v12  ;;  %vm2977_vm4 = vweird.f32 %v7993_v44 }
 0x7ac   :  { %v3523_v16 = vor.u32 1.1754944e-38, %v3522_v49  ;;  %v3892_v50 = vmul.f32 %v3509_v20, %v7751_v54  ;;  %vm3521_vm8 = vcmp.eq.f32.partialorder %v3520_v22, 8.507059e+37  ;;  %4979 = vrcp.f32 %v8077_v10  ;;  %v9224_v49 = vld [vmem:[#allocation10_spill] sm:$0xff] }
 0x7ad   :  { %vm2976_vm9 = vweird.f32 %v7943_v51  ;;  %v3753_v5 = vsub.f32 1.0, %v3752_v28  ;;  %v3205_v24 = vmul.f32 %v3119_v26, %v9221_v57  ;;  %v3745_v54 = vand.u32 2147483647, %v8037_v41 }
 0x7ae   :  { %v4974_v29 = vpop.eup %4973  ;;  %v3524_v32 = vsel %vm3521_vm8, %v3523_v16, %v3519_v43  ;;  %vm8091_vm7 = vmor %vm2976_vm9, %vm2977_vm4  ;;  %v3760_v52 = vand.u32 2147483647, %v8014_v61  ;;  %4981 = vrcp.f32 %v8079_v63  ;;  %v3747_v31 = vand.u32 2147483648, %v8037_v41 }
 0x7af   :  { %v3737_v6 = vmul.f32 %v4974_v29, %v8037_v41  ;;  %v4976_v30 = vpop.eup %4975  ;;  %v2979_v60 = vsel %vm8091_vm7, %v7993_v44, %v2975_v4  ;;  %vm3756_vm10 = vweird.f32 %v8014_v61  ;;  %v3762_v40 = vand.u32 2147483648, %v8014_v61 }
 0x7b0   :  { %v4978_v51 = vpop.eup %4977  ;;  %v3893_v56 = vmul.f32 %v3524_v32, %v7786_v25  ;;  %vm3741_vm11 = vweird.f32 %v8037_v41  ;;  %vm3757_vm12 = vweird.f32 %v8047_v7  ;;  %vm3742_vm15 = vweird.f32 %v4974_v29 }
 0x7b1   :  { %4599 = vmatmul.msk.f32.gmra.mxu2 %vm294_vm0, %v3892_v50  ;;  %v3738_v59 = vsub.f32 1.0, %v3737_v6  ;;  %v3527_v48 = vmul.f32 %v4978_v51, %v8058_v46  ;;  %v3754_v18 = vmul.f32 %v8047_v7, %v3753_v5  ;;  %v8110_v44 = vadd.f32 1.0, %v4976_v30  ;;  %vm3743_vm13 = vmor %vm3741_vm11, %vm3742_vm15 }
 0x7b2   :  { %v8112_v45 = vpop.eup %4979  ;;  %v3191_v21 = vmul.f32 %v2979_v60, %v9224_v49  ;;  %vm8115_vm5 = vcmp.eq.f32.partialorder %v3745_v54, 8.507059e+37  ;;  %v3537_v14 = vand.u32 2147483648, %v8058_v46  ;;  %v3748_v62 = vor.u32 1.1754944e-38, %v3747_v31  ;;  %vm8149_vm9 = vmor %vm3756_vm10, %vm3757_vm12 }
 0x7b3   :  { %v3739_v8 = vmul.f32 %v4974_v29, %v3738_v59  ;;  %v3528_v25 = vsub.f32 1.0, %v3527_v48  ;;  %vm8120_vm6 = vcmp.eq.f32.partialorder %v3760_v52, 8.507059e+37  ;;  %v3542_v39 = vmul.f32 %v8112_v45, %v8077_v10 }
 0x7b4   :  { %v3238_v20 = vmul.f32 %v7965_v37, %v3205_v24  ;;  %v8127_v42 = vpop.eup %4981  ;;  %vm3532_vm14 = vweird.f32 %v4978_v51  ;;  %v3535_v58 = vand.u32 2147483647, %v8058_v46  ;;  %4983 = vrcp.f32 %v8110_v44 }
 0x7b5   :  { %v3740_v12 = vadd.f32 %v4974_v29, %v3739_v8  ;;  %v3529_v28 = vmul.f32 %v4978_v51, %v3528_v25  ;;  %v3755_v26 = vadd.f32 %v8047_v7, %v3754_v18  ;;  %v3543_v4 = vsub.f32 1.0, %v3542_v39 }
 0x7b6   :  { %v3767_v16 = vmul.f32 %v8127_v42, %v8079_v63  ;;  %vm3531_vm3 = vweird.f32 %v8058_v46  ;;  %v3538_v32 = vor.u32 1.1754944e-38, %v3537_v14  ;;  %v8143_v30 = vadd.f32 %v7983_v35, %v3238_v20 }
 0x7b7   :  { %v3744_v43 = vsel %vm3743_vm13, %v4974_v29, %v3740_v12  ;;  %v3530_v41 = vadd.f32 %v4978_v51, %v3529_v28  ;;  %vm3533_vm4 = vmor %vm3531_vm3, %vm3532_vm14  ;;  %v3544_v29 = vmul.f32 %v8112_v45, %v3543_v4  ;;  %vm3536_vm8 = vcmp.eq.f32.partialorder %v3535_v58, 8.507059e+37 }
 0x7b8   :  { %v3749_v50 = vsel %vm8115_vm5, %v3748_v62, %v3744_v43  ;;  %v3768_v5 = vsub.f32 1.0, %v3767_v16  ;;  %v3763_v46 = vor.u32 1.1754944e-38, %v3762_v40  ;;  %v3759_v54 = vsel %vm8149_vm9, %v8047_v7, %v3755_v26 }
 0x7b9   :  { %4600 = vmatmul.msk.f32.gmra.mxu2 %vm294_vm0, %v3893_v56  ;;  %v3908_v6 = vmul.f32 %v3749_v50, %v7986_v34  ;;  %v3534_v57 = vsel %vm3533_vm4, %v4978_v51, %v3530_v41  ;;  %v3224_v34 = vmul.f32 %v7965_v37, %v3191_v21  ;;  %v4586_v51 = vmul.f32 -1.442695, %v8143_v30 }
 0x7ba   :  { %v3539_v36 = vsel %vm3536_vm8, %v3538_v32, %v3534_v57  ;;  %v3769_v52 = vmul.f32 %v8127_v42, %v3768_v5  ;;  %v4984_v60 = vpop.eup %4983  ;;  %v3545_v59 = vadd.f32 %v8112_v45, %v3544_v29  ;;  %vm3547_vm7 = vweird.f32 %v8112_v45 }
 0x7bb   :  { %4615 = vmatmul.msk.f32.gmra.mxu3 %vm294_vm0, %v3908_v6  ;;  %v3894_v61 = vmul.f32 %v3539_v36, %v8004_v1  ;;  %v8164_v31 = vadd.f32 %v7983_v35, %v3224_v34  ;;  %vm3546_vm10 = vweird.f32 %v8077_v10  ;;  %v3550_v40 = vand.u32 2147483647, %v8077_v10 }
 0x7bc   :  { %v3552_v7 = vand.u32 2147483648, %v8077_v10  ;;  %v3557_v56 = vmul.f32 %v4984_v60, %v8110_v44  ;;  %v3764_v48 = vsel %vm8120_vm6, %v3763_v46, %v3759_v54  ;;  %4985 = vpow2.f32 %v4586_v51  ;;  %vm8173_vm11 = vmor %vm3546_vm10, %vm3547_vm7 }
 0x7bd   :  { %v4572_v1 = vmul.f32 -1.442695, %v8164_v31  ;;  %v3770_v18 = vadd.f32 %v8127_v42, %v3769_v52  ;;  %vm3772_vm12 = vweird.f32 %v8127_v42  ;;  %v5162_v21 = vmov 32.0  }
 0x7be   :  { %v3558_v49 = vsub.f32 1.0, %v3557_v56  ;;  %4987 = vrcp.f32 %v5162_v21  ;;  %v3549_v10 = vsel %vm8173_vm11, %v8112_v45, %v3545_v59  ;;  %vm3771_vm15 = vweird.f32 %v8079_v63 }
 0x7bf   :  { %v3777_v17 = vand.u32 2147483648, %v8079_v63  ;;  %4989 = vpow2.f32 %v4572_v1  ;;  %v3909_v25 = vmul.f32 %v3764_v48, %v7862_v53  ;;  %v3553_v14 = vor.u32 1.1754944e-38, %v3552_v7  ;;  %vm8187_vm6 = vmor %vm3771_vm15, %vm3772_vm12 }
 0x7c0   :  { %v3775_v12 = vand.u32 2147483647, %v8079_v63  ;;  %v3559_v62 = vmul.f32 %v4984_v60, %v3558_v49  ;;  %vm3551_vm5 = vcmp.eq.f32.partialorder %v3550_v40, 8.507059e+37  ;;  %v3774_v45 = vsel %vm8187_vm6, %v8127_v42, %v3770_v18 }
 0x7c1   :  { %4601 = vmatmul.msk.f32.gmra.mxu2 %vm294_vm0, %v3894_v61  ;;  %v3554_v39 = vsel %vm3551_vm5, %v3553_v14, %v3549_v10  ;;  %v3778_v28 = vor.u32 1.1754944e-38, %v3777_v17  ;;  %vm3562_vm13 = vweird.f32 %v4984_v60  ;;  %vm3561_vm3 = vweird.f32 %v8110_v44 }
 0x7c2   :  { %v4986_v20 = vpop.eup %4985  ;;  %v3560_v58 = vadd.f32 %v4984_v60, %v3559_v62  ;;  %vm3776_vm14 = vcmp.eq.f32.partialorder %v3775_v12, 8.507059e+37  ;;  %v3567_v63 = vand.u32 2147483648, %v8110_v44  ;;  %v3895_v4 = vmul.f32 %v3554_v39, %v8007_v3  ;;  %vm3563_vm4 = vmor %vm3561_vm3, %vm3562_vm13 }
 0x7c3   :  { %4616 = vmatmul.msk.f32.gmra.mxu3 %vm294_vm0, %v3909_v25  ;;  %v3399_v43 = vadd.f32 1.0, %v4986_v20  ;;  %v3779_v16 = vsel %vm3776_vm14, %v3778_v28, %v3774_v45  ;;  %v3565_v50 = vand.u32 2147483647, %v8110_v44 }
 0x7c4   :  { %v4988_v53 = vpop.eup %4987  ;;  %v3564_v42 = vsel %vm3563_vm4, %v4984_v60, %v3560_v58  ;;  %v3910_v29 = vmul.f32 %v3779_v16, %v8017_v55  ;;  %v3568_v5 = vor.u32 1.1754944e-38, %v3567_v63 }
 0x7c5   :  { %v4990_v26 = vpop.eup %4989  ;;  %v2260_v41 = vmul.f32 32.0, %v4988_v53  ;;  %4991 = vrcp.f32 %v3399_v43  ;;  %vm3566_vm8 = vcmp.eq.f32.partialorder %v3565_v50, 8.507059e+37  ;;  %v3792_v52 = vand.u32 2147483648, %v3399_v43 }
 0x7c6   :  { %v3385_v32 = vadd.f32 1.0, %v4990_v26  ;;  %v3569_v57 = vsel %vm3566_vm8, %v3568_v5, %v3564_v42  ;;  %vm2264_vm9 = vweird.f32 %v4988_v53  ;;  %v3790_v60 = vand.u32 2147483647, %v3399_v43 }
 0x7c7   :  { %v2261_v6 = vsub.f32 1.0, %v2260_v41  ;;  %v3896_v44 = vmul.f32 %v3569_v57, %v8030_v11  ;;  %vm3786_vm10 = vweird.f32 %v3399_v43  ;;  %v3793_v11 = vor.u32 1.1754944e-38, %v3792_v52 }
 0x7c8   :  { %4993 = vrcp.f32 %v3385_v32  ;;  %v3582_v40 = vand.u32 2147483648, %v3385_v32  ;;  %v3580_v48 = vand.u32 2147483647, %v3385_v32  ;;  %vm3791_vm15 = vcmp.eq.f32.partialorder %v3790_v60, 8.507059e+37 }
 0x7c9   :  { %4602 = vmatmul.msk.f32.gmra.mxu2 %vm294_vm0, %v3895_v4  ;;  %v2262_v3 = vmul.f32 %v4988_v53, %v2261_v6  ;;  %vm3576_vm5 = vweird.f32 %v3385_v32 }
 0x7ca   :  { %v3583_v17 = vor.u32 1.1754944e-38, %v3582_v40  ;;  %vm3581_vm13 = vcmp.eq.f32.partialorder %v3580_v48, 8.507059e+37 }
 0x7cb   :  { %4617 = vmatmul.msk.f32.gmra.mxu3 %vm294_vm0, %v3910_v29  ;;  %v4992_v24 = vpop.eup %4991  ;;  %v2263_v54 = vadd.f32 %v4988_v53, %v2262_v3 }
 0x7cc   :  { %v3782_v46 = vmul.f32 %v4992_v24, %v3399_v43  ;;  %vm3787_vm7 = vweird.f32 %v4992_v24 }
 0x7cd   :  { %v8204_v7 = vsel %vm2264_vm9, %v4988_v53, %v2263_v54  ;;  %vm3788_vm11 = vmor %vm3786_vm10, %vm3787_vm7 }
 0x7ce   :  { %v4994_v34 = vpop.eup %4993  ;;  %v3783_v36 = vsub.f32 1.0, %v3782_v46 }
 0x7cf   :  { %v3572_v51 = vmul.f32 %v4994_v34, %v3385_v32  ;;  %vm3577_vm12 = vweird.f32 %v4994_v34 }
 0x7d0   :  { %v3784_v55 = vmul.f32 %v4992_v24, %v3783_v36  ;;  %vm3578_vm6 = vmor %vm3576_vm5, %vm3577_vm12 }
 0x7d1   :  { %4603 = vmatmul.msk.f32.gmra.mxu2 %vm294_vm0, %v3896_v44  ;;  %v3573_v61 = vsub.f32 1.0, %v3572_v51 }
 0x7d2   :  { %v3785_v59 = vadd.f32 %v4992_v24, %v3784_v55 }
 0x7d3   :  { %v3574_v56 = vmul.f32 %v4994_v34, %v3573_v61 }
 0x7d4   :  { %v3789_v1 = vsel %vm3788_vm11, %v4992_v24, %v3785_v59 }
 0x7d5   :  { %v3794_v18 = vsel %vm3791_vm15, %v3793_v11, %v3789_v1  ;;  %v3575_v49 = vadd.f32 %v4994_v34, %v3574_v56 }
 0x7d6   :  { %v3911_v10 = vmul.f32 %v3794_v18, %v8143_v30 }
 0x7d7   :  { %v2255_v8 = vpop.xlane.xlu1 %2254  ;;  %v3579_v25 = vsel %vm3578_vm6, %v4994_v34, %v3575_v49 }
 0x7d8   :  { %v2266_v21 = vmul.f32 %v8204_v7, %v2255_v8  ;;  %4618 = vmatmul.msk.f32.gmra.mxu3 %vm294_vm0, %v3911_v10  ;;  %v3584_v12 = vsel %vm3581_vm13, %v3583_v17, %v3579_v25 }
 0x7d9   :  { %v2780_v62 = vpop.xlane.xlu0 %2779  ;;  %v3897_v22 = vmul.f32 %v3584_v12, %v8164_v31 }
 0x7da   :  { %v8209_v14 = vsub.f32 %v7552_v47, %v2266_v21  ;;  %v2822_v45 = vmul.f32 %v2780_v62, %v5355_v9 }
 0x7db   :  { %4604 = vmatmul.msk.f32.gmra.mxu2 %vm294_vm0, %v3897_v22 }
 0x7dc   :  { %v2270_v39 = vmul.f32 %v8209_v14, %v8209_v14  ;;  %v8218_v28 = vadd.f32 1e-05, %v2822_v45 }
 0x7de   :  { %v2272_v30 = vsel %vm1931_vm1, %v2270_v39, 0.0  ;;  %4995 = vrsqrt.f32 %v8218_v28  ;;  %vm3126_vm3 = vweird.f32 %v8218_v28 }
 0x7df   :  { %2273 = vadd.xlane.f32.xlu1 %v2272_v30  ;;  %v2792_v47 = vpop.xlane.xlu1 %2791 }
 0x7e0   :  { %v2826_v63 = vmul.f32 %v2792_v47, %v5355_v9 }
 0x7e1   :  { %v2738_v20 = vpop.xlane.xlu2 %2737  ;;  %v2783_v58 = vpop.xlane.xlu0 %2782 }
 0x7e2   :  { %v2808_v53 = vmul.f32 %v2738_v20, %v5355_v9  ;;  %v2823_v43 = vmul.f32 %v2783_v58, %v5355_v9  ;;  %v8228_v16 = vadd.f32 1e-05, %v2826_v63 }
 0x7e4   :  { %v8224_v26 = vadd.f32 1e-05, %v2808_v53  ;;  %v8226_v4 = vpop.eup %4995  ;;  %v8230_v41 = vadd.f32 1e-05, %v2823_v43  ;;  %vm3166_vm8 = vweird.f32 %v8228_v16 }
 0x7e5   :  { %v3121_v32 = vmul.f32 %v8226_v4, %v8218_v28  ;;  %vm3127_vm14 = vweird.f32 %v8226_v4 }
 0x7e6   :  { %4997 = vrsqrt.f32 %v8224_v26  ;;  %vm8297_vm4 = vmor %vm3126_vm3, %vm3127_vm14  ;;  %vm2986_vm9 = vweird.f32 %v8224_v26  ;;  %vm3136_vm5 = vweird.f32 %v8230_v41 }
 0x7e7   :  { %v2753_v50 = vpop.xlane.xlu1 %2752  ;;  %4999 = vrsqrt.f32 %v8228_v16  ;;  %v3122_v3 = vmul.f32 %v8226_v4, %v3121_v32 }
 0x7e8   :  { %v2813_v6 = vmul.f32 %v2753_v50, %v5355_v9  ;;  %5001 = vrsqrt.f32 %v8230_v41 }
 0x7e9   :  { %v2741_v31 = vpop.xlane.xlu2 %2740  ;;  %v2786_v42 = vpop.xlane.xlu0 %2785  ;;  %v3123_v55 = vmul.f32 0.5, %v3122_v3 }
 0x7ea   :  { %v2809_v5 = vmul.f32 %v2741_v31, %v5355_v9  ;;  %v2824_v57 = vmul.f32 %v2786_v42, %v5355_v9  ;;  %v8241_v24 = vadd.f32 1e-05, %v2813_v6 }
 0x7eb   :  { %v3124_v8 = vsub.f32 1.5, %v3123_v55 }
 0x7ec   :  { %v8243_v44 = vadd.f32 1e-05, %v2809_v5  ;;  %v8245_v46 = vpop.eup %4997  ;;  %v8249_v54 = vadd.f32 1e-05, %v2824_v57  ;;  %5003 = vrsqrt.f32 %v8241_v24  ;;  %vm3036_vm6 = vweird.f32 %v8241_v24 }
 0x7ed   :  { %v8247_v36 = vpop.eup %4999  ;;  %v2981_v61 = vmul.f32 %v8245_v46, %v8224_v26  ;;  %v3125_v22 = vmul.f32 %v8226_v4, %v3124_v8  ;;  %vm2987_vm7 = vweird.f32 %v8245_v46 }
 0x7ee   :  { %v8252_v51 = vpop.eup %5001  ;;  %5005 = vrsqrt.f32 %v8243_v44  ;;  %v3161_v11 = vmul.f32 %v8247_v36, %v8228_v16  ;;  %vm3167_vm10 = vweird.f32 %v8247_v36  ;;  %vm8341_vm12 = vmor %vm2986_vm9, %vm2987_vm7  ;;  %vm2996_vm9 = vweird.f32 %v8243_v44 }
 0x7ef   :  { %v3131_v56 = vmul.f32 %v8252_v51, %v8230_v41  ;;  %5007 = vrsqrt.f32 %v8249_v54  ;;  %v2982_v18 = vmul.f32 %v8245_v46, %v2981_v61  ;;  %v3129_v6 = vsel %vm8297_vm4, %v8226_v4, %v3125_v22  ;;  %vm8351_vm15 = vmor %vm3166_vm8, %vm3167_vm10 }
 0x7f0   :  { %v3162_v12 = vmul.f32 %v8247_v36, %v3161_v11  ;;  %vm3137_vm11 = vweird.f32 %v8252_v51  ;;  %vm3146_vm7 = vweird.f32 %v8249_v54 }
 0x7f1   :  { %v2744_v29 = vpop.xlane.xlu2 %2743  ;;  %v3132_v62 = vmul.f32 %v8252_v51, %v3131_v56  ;;  %v2983_v20 = vmul.f32 0.5, %v2982_v18  ;;  %vm8360_vm13 = vmor %vm3136_vm5, %vm3137_vm11 }
 0x7f2   :  { %v2810_v52 = vmul.f32 %v2744_v29, %v5355_v9  ;;  %v8273_v21 = vpop.eup %5003  ;;  %v3163_v63 = vmul.f32 0.5, %v3162_v12 }
 0x7f3   :  { %v3031_v47 = vmul.f32 %v8273_v21, %v8241_v24  ;;  %v3133_v43 = vmul.f32 0.5, %v3132_v62  ;;  %v2984_v29 = vsub.f32 1.5, %v2983_v20  ;;  %vm3037_vm14 = vweird.f32 %v8273_v21 }
 0x7f4   :  { %v8265_v48 = vadd.f32 1e-05, %v2810_v52  ;;  %v8277_v25 = vpop.eup %5005  ;;  %v3164_v52 = vsub.f32 1.5, %v3163_v63  ;;  %vm8401_vm4 = vmor %vm3036_vm6, %vm3037_vm14 }
 0x7f5   :  { %v8286_v45 = vpop.eup %5007  ;;  %v2991_v53 = vmul.f32 %v8277_v25, %v8243_v44  ;;  %v3032_v5 = vmul.f32 %v8273_v21, %v3031_v47  ;;  %v3134_v55 = vsub.f32 1.5, %v3133_v43  ;;  %v2985_v56 = vmul.f32 %v8245_v46, %v2984_v29 }
 0x7f6   :  { %5009 = vrsqrt.f32 %v8265_v48  ;;  %v3141_v42 = vmul.f32 %v8286_v45, %v8249_v54  ;;  %vm2997_vm3 = vweird.f32 %v8277_v25  ;;  %vm3147_vm8 = vweird.f32 %v8286_v45 }
 0x7f7   :  { %v2992_v28 = vmul.f32 %v8277_v25, %v2991_v53  ;;  %v3033_v8 = vmul.f32 0.5, %v3032_v5  ;;  %v3135_v22 = vmul.f32 %v8252_v51, %v3134_v55  ;;  %v2989_v26 = vsel %vm8341_vm12, %v8245_v46, %v2985_v56  ;;  %vm8412_vm10 = vmor %vm2996_vm9, %vm2997_vm3 }
 0x7f8   :  { %vm3006_vm11 = vweird.f32 %v8265_v48  ;;  %vm8426_vm12 = vmor %vm3146_vm7, %vm3147_vm8 }
 0x7f9   :  { %v2789_v34 = vpop.xlane.xlu0 %2788  ;;  %v2258_v60 = vpop.xlane.xlu2 %2257  ;;  %v3034_v63 = vsub.f32 1.5, %v3033_v8  ;;  %v3139_v29 = vsel %vm8360_vm13, %v8252_v51, %v3135_v22 }
 0x7fa   :  { %v2825_v59 = vmul.f32 %v2789_v34, %v5355_v9  ;;  %v2267_v40 = vmul.f32 %v8204_v7, %v2258_v60  ;;  %v9237_v60 = vld [vmem:[#allocation15_spill] sm:$0xff] }
 0x7fb   :  { %v3206_v61 = vmul.f32 %v3129_v6, %v9237_v60  ;;  %v3035_v60 = vmul.f32 %v8273_v21, %v3034_v63 }
 0x7fc   :  { %v8268_v1 = vsub.f32 %v7724_v13, %v2267_v40  ;;  %v8271_v49 = vadd.f32 1e-05, %v2825_v59  ;;  %v8303_v32 = vpop.eup %5009  ;;  %v3142_v59 = vmul.f32 %v8286_v45, %v3141_v42 }
 0x7fd   :  { %v3001_v40 = vmul.f32 %v8303_v32, %v8265_v48  ;;  %v3239_v53 = vmul.f32 %v7965_v37, %v3206_v61  ;;  %v3039_v44 = vsel %vm8401_vm4, %v8273_v21, %v3035_v60 }
 0x7fe   :  { %v2271_v17 = vmul.f32 %v8268_v1, %v8268_v1  ;;  %5011 = vrsqrt.f32 %v8271_v49  ;;  %vm3156_vm5 = vweird.f32 %v8271_v49 }
 0x7ff   :  { %v3002_v20 = vmul.f32 %v8303_v32, %v3001_v40  ;;  %v8368_v41 = vadd.f32 %v7983_v35, %v3239_v53 }
 0x800   :  { %v2275_v39 = vsel %vm1931_vm1, %v2271_v17, 0.0  ;;  %v2993_v17 = vmul.f32 0.5, %v2992_v28 }
 0x801   :  { %v2747_v10 = vpop.xlane.xlu0 %2746  ;;  %v2750_v30 = vpop.xlane.xlu2 %2749  ;;  %2276 = vadd.xlane.f32.xlu2 %v2275_v39  ;;  %v4587_v55 = vmul.f32 -1.442695, %v8368_v41 }
 0x802   :  { %v2811_v13 = vmul.f32 %v2747_v10, %v5355_v9  ;;  %v2812_v31 = vmul.f32 %v2750_v30, %v5355_v9  ;;  %v3143_v30 = vmul.f32 0.5, %v3142_v59  ;;  %v2994_v50 = vsub.f32 1.5, %v2993_v17 }
 0x804   :  { %v8291_v58 = vadd.f32 1e-05, %v2811_v13  ;;  %v8312_v57 = vadd.f32 1e-05, %v2812_v31  ;;  %v8314_v34 = vpop.eup %5011  ;;  %v3165_v13 = vmul.f32 %v8247_v36, %v3164_v52  ;;  %v3003_v52 = vmul.f32 0.5, %v3002_v20 }
 0x805   :  { %v3151_v12 = vmul.f32 %v8314_v34, %v8271_v49  ;;  %v2995_v61 = vmul.f32 %v8277_v25, %v2994_v50  ;;  %vm3157_vm6 = vweird.f32 %v8314_v34 }
 0x806   :  { %5013 = vrsqrt.f32 %v8291_v58  ;;  %v3169_v46 = vsel %vm8351_vm15, %v8247_v36, %v3165_v13  ;;  %v3192_v36 = vmul.f32 %v2989_v26, %v7598_v27  ;;  %vm3007_vm15 = vweird.f32 %v8303_v32  ;;  %vm8472_vm14 = vmor %vm3156_vm5, %vm3157_vm6 }
 0x807   :  { %5015 = vrsqrt.f32 %v8312_v57  ;;  %v3152_v16 = vmul.f32 %v8314_v34, %v3151_v12  ;;  %v3004_v12 = vsub.f32 1.5, %v3003_v52  ;;  %v3210_v13 = vmul.f32 %v3169_v46, %v7572_v0  ;;  %v9252_v52 = vld [vmem:[#allocation16_spill] sm:$0xff]  ;;  %vm8458_vm13 = vmor %vm3006_vm11, %vm3007_vm15 }
 0x808   :  { %v3225_v24 = vmul.f32 %v7965_v37, %v3192_v36  ;;  %v2999_v0 = vsel %vm8412_vm10, %v8277_v25, %v2995_v61  ;;  %vm3016_vm3 = vweird.f32 %v8291_v58  ;;  %vm3026_vm8 = vweird.f32 %v8312_v57 }
 0x809   :  { %v2795_v3 = vpop.xlane.xlu0 %2794  ;;  %v2756_v11 = vpop.xlane.xlu2 %2755  ;;  %v3153_v59 = vmul.f32 0.5, %v3152_v16  ;;  %v3005_v43 = vmul.f32 %v8303_v32, %v3004_v12  ;;  %v9251_v16 = vld [vmem:[#allocation14_spill] sm:$0xff] }
 0x80a   :  { %v2827_v4 = vmul.f32 %v2795_v3, %v5355_v9  ;;  %v2814_v10 = vmul.f32 %v2756_v11, %v5355_v9  ;;  %v3144_v3 = vsub.f32 1.5, %v3143_v30  ;;  %v9244_v11 = vld [vmem:[#allocation19_spill] sm:$0xff]  ;;  %v8433_v26 = vadd.f32 %v7983_v35, %v3225_v24 }
 0x80b   :  { %v3207_v56 = vmul.f32 %v3139_v29, %v9244_v11  ;;  %v3154_v54 = vsub.f32 1.5, %v3153_v59  ;;  %v3197_v59 = vmul.f32 %v3039_v44, %v7611_v2 }
 0x80c   :  { %v8324_v18 = vadd.f32 1e-05, %v2827_v4  ;;  %v8331_v62 = vpop.eup %5013  ;;  %v8346_v47 = vadd.f32 1e-05, %v2814_v10  ;;  %v3145_v17 = vmul.f32 %v8286_v45, %v3144_v3  ;;  %v4573_v29 = vmul.f32 -1.442695, %v8433_v26 }
 0x80d   :  { %v3011_v42 = vmul.f32 %v8331_v62, %v8291_v58  ;;  %v8378_v28 = vpop.eup %5015  ;;  %v3240_v63 = vmul.f32 %v7965_v37, %v3207_v56  ;;  %v3243_v56 = vmul.f32 %v7965_v37, %v3210_v13  ;;  %vm3017_vm4 = vweird.f32 %v8331_v62  ;;  %v9257_v10 = vld [vmem:[#allocation7_spill] sm:$0xff] }
 0x80e   :  { %5017 = vrsqrt.f32 %v8324_v18  ;;  %v3021_v8 = vmul.f32 %v8378_v28, %v8312_v57  ;;  %v3149_v25 = vsel %vm8426_vm12, %v8286_v45, %v3145_v17  ;;  %vm8502_vm9 = vmor %vm3016_vm3, %vm3017_vm4  ;;  %vm3027_vm7 = vweird.f32 %v8378_v28 }
 0x80f   :  { %5019 = vrsqrt.f32 %v8346_v47  ;;  %v3012_v40 = vmul.f32 %v8331_v62, %v3011_v42  ;;  %v3193_v42 = vmul.f32 %v2999_v0, %v9251_v16  ;;  %v8453_v3 = vadd.f32 %v7983_v35, %v3240_v63 }
 0x810   :  { %5021 = vpow2.f32 %v4587_v55  ;;  %v3022_v53 = vmul.f32 %v8378_v28, %v3021_v8  ;;  %v3208_v55 = vmul.f32 %v3149_v25, %v9252_v52  ;;  %v8495_v44 = vadd.f32 %v7983_v35, %v3243_v56 }
 0x811   :  { %v2759_v6 = vpop.xlane.xlu0 %2758  ;;  %v3013_v30 = vmul.f32 0.5, %v3012_v40  ;;  %v3009_v40 = vsel %vm8458_vm13, %v8303_v32, %v3005_v43  ;;  %v4588_v49 = vmul.f32 -1.442695, %v8453_v3  ;;  %vm3176_vm10 = vweird.f32 %v8324_v18 }
 0x812   :  { %v2815_v5 = vmul.f32 %v2759_v6, %v5355_v9  ;;  %v3023_v60 = vmul.f32 0.5, %v3022_v53  ;;  %v3194_v17 = vmul.f32 %v3009_v40, %v9257_v10  ;;  %v3241_v22 = vmul.f32 %v7965_v37, %v3208_v55 }
 0x813   :  { %v3014_v45 = vsub.f32 1.5, %v3013_v30  ;;  %vm3046_vm15 = vweird.f32 %v8346_v47  ;;  %v3230_v48 = vmul.f32 %v7965_v37, %v3197_v59 }
 0x814   :  { %v8382_v4 = vpop.eup %5017  ;;  %v8387_v51 = vadd.f32 1e-05, %v2815_v5  ;;  %v3155_v5 = vmul.f32 %v8314_v34, %v3154_v54  ;;  %v3024_v12 = vsub.f32 1.5, %v3023_v60  ;;  %v8509_v53 = vadd.f32 %v7983_v35, %v3241_v22  ;;  %v8582_v22 = vld [vmem:[%s9067_s5 + $0x10] ss:$0 sm:$0xff] }
 0x815   :  { %v3171_v27 = vmul.f32 %v8382_v4, %v8324_v18  ;;  %v8418_v39 = vpop.eup %5019  ;;  %v8483_v8 = vmul.f32 %v8331_v62, %v3014_v45  ;;  %vm3177_vm11 = vweird.f32 %v8382_v4  ;;  %v3227_v45 = vmul.f32 %v7965_v37, %v3194_v17 }
 0x816   :  { %5023 = vrsqrt.f32 %v8387_v51  ;;  %v5022_v21 = vpop.eup %5021  ;;  %v3041_v6 = vmul.f32 %v8418_v39, %v8346_v47  ;;  %v3159_v32 = vsel %vm8472_vm14, %v8314_v34, %v3155_v5  ;;  %vm3047_vm12 = vweird.f32 %v8418_v39  ;;  %vm8541_vm14 = vmor %vm3026_vm8, %vm3027_vm7 }
 0x817   :  { %v3172_v31 = vmul.f32 %v8382_v4, %v3171_v27  ;;  %v8447_v46 = vadd.f32 1.0, %v5022_v21  ;;  %v3226_v27 = vmul.f32 %v7965_v37, %v3193_v42  ;;  %v3209_v54 = vmul.f32 %v3159_v32, %v7775_v38  ;;  %vm8557_vm4 = vmor %vm3176_vm10, %vm3177_vm11 }
 0x818   :  { %v3042_v2 = vmul.f32 %v8418_v39, %v3041_v6  ;;  %v3019_v38 = vsel %vm8502_vm9, %v8331_v62, %v8483_v8  ;;  %v3025_v21 = vmul.f32 %v8378_v28, %v3024_v12  ;;  %v4589_v43 = vmul.f32 -1.442695, %v8509_v53  ;;  %vm8594_vm7 = vmor %vm3046_vm15, %vm3047_vm12 }
 0x819   :  { %v3173_v61 = vmul.f32 0.5, %v3172_v31  ;;  %5025 = vrcp.f32 %v8447_v46  ;;  %v8492_v34 = vadd.f32 %v7983_v35, %v3226_v27  ;;  %v4591_v6 = vmul.f32 -1.442695, %v8495_v44 }
 0x81a   :  { %5027 = vpow2.f32 %v4573_v29  ;;  %v3043_v20 = vmul.f32 0.5, %v3042_v2  ;;  %v3807_v5 = vand.u32 2147483648, %v8447_v46  ;;  %vm3056_vm5 = vweird.f32 %v8387_v51 }
 0x81b   :  { %v3174_v13 = vsub.f32 1.5, %v3173_v61  ;;  %5029 = vpow2.f32 %v4588_v49  ;;  %v4574_v31 = vmul.f32 -1.442695, %v8492_v34  ;;  %v3805_v36 = vand.u32 2147483647, %v8447_v46 }
 0x81c   :  { %v8442_v50 = vpop.eup %5023  ;;  %v3044_v29 = vsub.f32 1.5, %v3043_v20  ;;  %vm3801_vm13 = vweird.f32 %v8447_v46  ;;  %v8535_v61 = vadd.f32 %v7983_v35, %v3227_v45  ;;  %v3808_v2 = vor.u32 1.1754944e-38, %v3807_v5  ;;  %v9266_v20 = vld [vmem:[#allocation12_spill] sm:$0xff] }
 0x81d   :  { %v3051_v11 = vmul.f32 %v8442_v50, %v8387_v51  ;;  %v3175_v25 = vmul.f32 %v8382_v4, %v3174_v13  ;;  %5031 = vpow2.f32 %v4574_v31  ;;  %vm3806_vm8 = vcmp.eq.f32.partialorder %v3805_v36, 8.507059e+37 }
 0x81e   :  { %v8550_v35 = vmul.f32 %v8418_v39, %v3044_v29  ;;  %v4575_v59 = vmul.f32 -1.442695, %v8535_v61  ;;  %v3195_v49 = vmul.f32 %v3019_v38, %v7820_v23  ;;  %vm3057_vm9 = vweird.f32 %v8442_v50 }
 0x81f   :  { %v3052_v24 = vmul.f32 %v8442_v50, %v3051_v11  ;;  %v5026_v0 = vpop.eup %5025  ;;  %v3179_v18 = vsel %vm8557_vm4, %v8382_v4, %v3175_v25  ;;  %v8585_v23 = vadd.f32 %v8582_v22, %v3230_v48  ;;  %vm8616_vm10 = vmor %vm3056_vm5, %vm3057_vm9 }
 0x820   :  { %v3797_v58 = vmul.f32 %v5026_v0, %v8447_v46  ;;  %v5028_v63 = vpop.eup %5027  ;;  %vm3802_vm6 = vweird.f32 %v5026_v0  ;;  %v3029_v46 = vsel %vm8541_vm14, %v8378_v28, %v3025_v21  ;;  %v8565_v28 = vld [vmem:[%s9067_s5 + $0xf] ss:$0 sm:$0xff]  ;;  %v8603_v38 = vmul.f32 %v3179_v18, %v9266_v20 }
 0x821   :  { %v3053_v16 = vmul.f32 0.5, %v3052_v24  ;;  %v8523_v62 = vadd.f32 1.0, %v5028_v63  ;;  %v5030_v52 = vpop.eup %5029  ;;  %vm3803_vm3 = vmor %vm3801_vm13, %vm3802_vm6  ;;  %v3242_v32 = vmul.f32 %v8565_v28, %v3209_v54  ;;  %v8588_v24 = vmul.f32 %v3029_v46, %v7690_v19 }
 0x822   :  { %v3798_v42 = vsub.f32 1.0, %v3797_v58  ;;  %v8532_v60 = vadd.f32 1.0, %v5030_v52  ;;  %v3049_v19 = vsel %vm8594_vm7, %v8418_v39, %v8550_v35 }
 0x823   :  { %5033 = vrcp.f32 %v8523_v62  ;;  %v3054_v11 = vsub.f32 1.5, %v3053_v16  ;;  %v5032_v8 = vpop.eup %5031  ;;  %v8600_v54 = vadd.f32 %v8582_v22, %v3242_v32  ;;  %v3595_v47 = vand.u32 2147483647, %v8523_v62 }
 0x824   :  { %v3799_v55 = vmul.f32 %v5026_v0, %v3798_v42  ;;  %5035 = vpow2.f32 %v4589_v43  ;;  %v8577_v13 = vadd.f32 1.0, %v5032_v8  ;;  %v3228_v43 = vmul.f32 %v8565_v28, %v3195_v49 }
 0x825   :  { %5037 = vpow2.f32 %v4591_v6  ;;  %v8574_v17 = vmul.f32 %v8442_v50, %v3054_v11  ;;  %v4590_v25 = vmul.f32 -1.442695, %v8600_v54  ;;  %v3597_v42 = vand.u32 2147483648, %v8523_v62 }
 0x826   :  { %v3800_v56 = vadd.f32 %v5026_v0, %v3799_v55  ;;  %5039 = vrcp.f32 %v8532_v60  ;;  %v4578_v6 = vmul.f32 -1.442695, %v8585_v23  ;;  %vm3591_vm12 = vweird.f32 %v8523_v62 }
 0x827   :  { %5041 = vpow2.f32 %v4575_v59  ;;  %v3059_v16 = vsel %vm8616_vm10, %v8442_v50, %v8574_v17  ;;  %v8636_v52 = vadd.f32 %v8582_v22, %v3228_v43  ;;  %vm3596_vm15 = vcmp.eq.f32.partialorder %v3595_v47, 8.507059e+37 }
 0x828   :  { %v3804_v37 = vsel %vm3803_vm3, %v5026_v0, %v3800_v56  ;;  %5043 = vrcp.f32 %v8577_v13  ;;  %v3820_v40 = vand.u32 2147483647, %v8532_v60  ;;  %v3822_v11 = vand.u32 2147483648, %v8532_v60 }
 0x829   :  { %v3809_v27 = vsel %vm3806_vm8, %v3808_v2, %v3804_v37  ;;  %v5034_v10 = vpop.eup %5033  ;;  %v3598_v48 = vor.u32 1.1754944e-38, %v3597_v42  ;;  %v4576_v37 = vmul.f32 -1.442695, %v8636_v52  ;;  %vm3816_vm13 = vweird.f32 %v8532_v60 }
 0x82a   :  { %v3912_v12 = vmul.f32 %v3809_v27, %v8368_v41  ;;  %v5036_v4 = vpop.eup %5035  ;;  %v3587_v0 = vmul.f32 %v5034_v10, %v8523_v62  ;;  %vm3592_vm11 = vweird.f32 %v5034_v10  ;;  %vm3821_vm3 = vcmp.eq.f32.partialorder %v3820_v40, 8.507059e+37 }
 0x82b   :  { %v5038_v30 = vpop.eup %5037  ;;  %v8620_v21 = vadd.f32 1.0, %v5036_v4  ;;  %vm3593_vm5 = vmor %vm3591_vm12, %vm3592_vm11  ;;  %v3823_v18 = vor.u32 1.1754944e-38, %v3822_v11  ;;  %v3612_v4 = vand.u32 2147483648, %v8577_v13  ;;  %v3610_v20 = vand.u32 2147483647, %v8577_v13 }
 0x82c   :  { %4619 = vmatmul.msk.f32.gmra.mxu3 %vm294_vm0, %v3912_v12  ;;  %v5040_v58 = vpop.eup %5039  ;;  %v3588_v63 = vsub.f32 1.0, %v3587_v0  ;;  %v8632_v5 = vadd.f32 1.0, %v5038_v30  ;;  %vm3606_vm8 = vweird.f32 %v8577_v13 }
 0x82d   :  { %v3812_v51 = vmul.f32 %v5040_v58, %v8532_v60  ;;  %5045 = vrcp.f32 %v8620_v21  ;;  %v5042_v55 = vpop.eup %5041  ;;  %vm3817_vm6 = vweird.f32 %v5040_v58  ;;  %v3837_v42 = vand.u32 2147483648, %v8620_v21 }
 0x82e   :  { %v3589_v29 = vmul.f32 %v5034_v10, %v3588_v63  ;;  %5047 = vpow2.f32 %v4590_v25  ;;  %v5044_v56 = vpop.eup %5043  ;;  %v8640_v2 = vadd.f32 1.0, %v5042_v55  ;;  %vm3818_vm14 = vmor %vm3816_vm13, %vm3817_vm6  ;;  %v3835_v63 = vand.u32 2147483647, %v8620_v21 }
 0x82f   :  { %v3813_v45 = vsub.f32 1.0, %v3812_v51  ;;  %v3602_v57 = vmul.f32 %v5044_v56, %v8577_v13  ;;  %5049 = vrcp.f32 %v8632_v5  ;;  %vm3607_vm4 = vweird.f32 %v5044_v56 }
 0x830   :  { %v3590_v36 = vadd.f32 %v5034_v10, %v3589_v29  ;;  %5051 = vrcp.f32 %v8640_v2  ;;  %vm3608_vm9 = vmor %vm3606_vm8, %vm3607_vm4  ;;  %v3613_v29 = vor.u32 1.1754944e-38, %v3612_v4  ;;  %vm3611_vm12 = vcmp.eq.f32.partialorder %v3610_v20, 8.507059e+37 }
 0x831   :  { %v3814_v46 = vmul.f32 %v5040_v58, %v3813_v45  ;;  %v3603_v27 = vsub.f32 1.0, %v3602_v57  ;;  %5053 = vpow2.f32 %v4576_v37  ;;  %v3627_v57 = vand.u32 2147483648, %v8640_v2 }
 0x832   :  { %v3594_v62 = vsel %vm3593_vm5, %v5034_v10, %v3590_v36  ;;  %5055 = vpow2.f32 %v4578_v6  ;;  %vm3836_vm5 = vcmp.eq.f32.partialorder %v3835_v63, 8.507059e+37  ;;  %v3229_v37 = vmul.f32 %v8565_v28, %v8588_v24 }
 0x833   :  { %v3599_v59 = vsel %vm3596_vm15, %v3598_v48, %v3594_v62  ;;  %v3815_v32 = vadd.f32 %v5040_v58, %v3814_v46  ;;  %v5046_v8 = vpop.eup %5045  ;;  %v3604_v60 = vmul.f32 %v5044_v56, %v3603_v27  ;;  %vm3831_vm15 = vweird.f32 %v8620_v21 }
 0x834   :  { %v3898_v49 = vmul.f32 %v3599_v59, %v8433_v26  ;;  %v5048_v10 = vpop.eup %5047  ;;  %v3827_v0 = vmul.f32 %v5046_v8, %v8620_v21  ;;  %vm3832_vm11 = vweird.f32 %v5046_v8  ;;  %v3838_v48 = vor.u32 1.1754944e-38, %v3837_v42 }
 0x835   :  { %v3819_v12 = vsel %vm3818_vm14, %v5040_v58, %v3815_v32  ;;  %v8654_v25 = vadd.f32 1.0, %v5048_v10  ;;  %v8656_v58 = vpop.eup %5049  ;;  %v3605_v43 = vadd.f32 %v5044_v56, %v3604_v60  ;;  %vm3833_vm6 = vmor %vm3831_vm15, %vm3832_vm11  ;;  %v3625_v62 = vand.u32 2147483647, %v8640_v2 }
 0x836   :  { %4605 = vmatmul.msk.f32.gmra.mxu2 %vm294_vm0, %v3898_v49  ;;  %v3824_v30 = vsel %vm3821_vm3, %v3823_v18, %v3819_v12  ;;  %v3828_v47 = vsub.f32 1.0, %v3827_v0  ;;  %v5052_v51 = vpop.eup %5051  ;;  %v3857_v6 = vmul.f32 %v8656_v58, %v8632_v5  ;;  %v3199_v24 = vmul.f32 %v3059_v16, %v7872_v33 }
 0x837   :  { %v3913_v26 = vmul.f32 %v3824_v30, %v8453_v3  ;;  %5057 = vrcp.f32 %v8654_v25  ;;  %v3609_v3 = vsel %vm3608_vm9, %v5044_v56, %v3605_v43  ;;  %v3617_v55 = vmul.f32 %v5052_v51, %v8640_v2  ;;  %v5054_v36 = vpop.eup %5053 }
 0x838   :  { %v3829_v45 = vmul.f32 %v5046_v8, %v3828_v47  ;;  %v3614_v13 = vsel %vm3611_vm12, %v3613_v29, %v3609_v3  ;;  %v8669_v21 = vadd.f32 1.0, %v5054_v36  ;;  %v5056_v59 = vpop.eup %5055  ;;  %vm3622_vm13 = vweird.f32 %v5052_v51 }
 0x839   :  { %4620 = vmatmul.msk.f32.gmra.mxu3 %vm294_vm0, %v3913_v26  ;;  %v3899_v11 = vmul.f32 %v3614_v13, %v8492_v34  ;;  %v3618_v46 = vsub.f32 1.0, %v3617_v55  ;;  %v3198_v34 = vmul.f32 %v3049_v19, %v7754_v15  ;;  %v3858_v41 = vsub.f32 1.0, %v3857_v6 }
 0x83a   :  { %v3830_v40 = vadd.f32 %v5046_v8, %v3829_v45  ;;  %5059 = vrcp.f32 %v8669_v21  ;;  %vm3621_vm7 = vweird.f32 %v8640_v2  ;;  %vm3626_vm14 = vcmp.eq.f32.partialorder %v3625_v62, 8.507059e+37 }
 0x83b   :  { %v3619_v49 = vmul.f32 %v5052_v51, %v3618_v46  ;;  %vm3862_vm3 = vweird.f32 %v8656_v58  ;;  %vm3623_vm4 = vmor %vm3621_vm7, %vm3622_vm13  ;;  %v3628_v35 = vor.u32 1.1754944e-38, %v3627_v57  ;;  %v3865_v50 = vand.u32 2147483647, %v8632_v5 }
 0x83c   :  { %v3834_v56 = vsel %vm3833_vm6, %v5046_v8, %v3830_v40  ;;  %v3867_v33 = vand.u32 2147483648, %v8632_v5  ;;  %v3850_v31 = vand.u32 2147483647, %v8654_v25  ;;  %v3852_v16 = vand.u32 2147483648, %v8654_v25 }
 0x83d   :  { %v3839_v32 = vsel %vm3836_vm5, %v3838_v48, %v3834_v56  ;;  %v5058_v8 = vpop.eup %5057  ;;  %v3620_v39 = vadd.f32 %v5052_v51, %v3619_v49  ;;  %vm3861_vm10 = vweird.f32 %v8632_v5  ;;  %v3859_v27 = vmul.f32 %v8656_v58, %v3858_v41  ;;  %v8738_v48 = vpop.f32.mrf.mxu2 }
 0x83e   :  { %4606 = vmatmul.msk.f32.gmra.mxu2 %vm294_vm0, %v3899_v11  ;;  %v3914_v18 = vmul.f32 %v3839_v32, %v8509_v53  ;;  %v3842_v15 = vmul.f32 %v5058_v8, %v8654_v25  ;;  %v8695_v53 = vadd.f32 %v8582_v22, %v3229_v37  ;;  %v3244_v12 = vmul.f32 %v8565_v28, %v8603_v38  ;;  %vm8733_vm6 = vmor %vm3861_vm10, %vm3862_vm3 }
 0x83f   :  { %v3624_v17 = vsel %vm3623_vm4, %v5052_v51, %v3620_v39  ;;  %vm3847_vm8 = vweird.f32 %v5058_v8  ;;  %v8705_v30 = vadd.f32 1.0, %v5056_v59  ;;  %v3231_v26 = vmul.f32 %v8565_v28, %v3198_v34 }
 0x840   :  { %v3843_v19 = vsub.f32 1.0, %v3842_v15  ;;  %v3629_v2 = vsel %vm3626_vm14, %v3628_v35, %v3624_v17  ;;  %v4577_v10 = vmul.f32 -1.442695, %v8695_v53  ;;  %v5060_v60 = vpop.eup %5059  ;;  %v8708_v20 = vadd.f32 %v8582_v22, %v3244_v12 }
 0x841   :  { %4621 = vmatmul.msk.f32.gmra.mxu3 %vm294_vm0, %v3914_v18  ;;  %v3900_v4 = vmul.f32 %v3629_v2, %v8535_v61  ;;  %v3232_v47 = vmul.f32 %v8565_v28, %v3199_v24  ;;  %vm3846_vm9 = vweird.f32 %v8654_v25  ;;  %vm3851_vm11 = vcmp.eq.f32.partialorder %v3850_v31, 8.507059e+37 }
 0x842   :  { %v3844_v0 = vmul.f32 %v5058_v8, %v3843_v19  ;;  %5061 = vpow2.f32 %v4577_v10  ;;  %v3632_v61 = vmul.f32 %v5060_v60, %v8669_v21  ;;  %vm3848_vm12 = vmor %vm3846_vm9, %vm3847_vm8  ;;  %v3853_v38 = vor.u32 1.1754944e-38, %v3852_v16 }
 0x843   :  { %v3860_v43 = vadd.f32 %v8656_v58, %v3859_v27  ;;  %v4592_v42 = vmul.f32 -1.442695, %v8708_v20  ;;  %5063 = vrcp.f32 %v8705_v30  ;;  %v8719_v28 = vadd.f32 %v8582_v22, %v3231_v26 }
 0x844   :  { %v3845_v63 = vadd.f32 %v5058_v8, %v3844_v0  ;;  %v3633_v29 = vsub.f32 1.0, %v3632_v61  ;;  %v8722_v45 = vadd.f32 %v8582_v22, %v3232_v47  ;;  %v3640_v3 = vand.u32 2147483647, %v8669_v21 }
 0x845   :  { %v3642_v55 = vand.u32 2147483648, %v8669_v21  ;;  %5065 = vpow2.f32 %v4592_v42  ;;  %vm3637_vm15 = vweird.f32 %v5060_v60  ;;  %v4579_v40 = vmul.f32 -1.442695, %v8719_v28  ;;  %v8761_v19 = vpop.f32.mrf.mxu2 }
 0x846   :  { %4607 = vmatmul.msk.f32.gmra.mxu2 %vm294_vm0, %v3900_v4  ;;  %v3849_v51 = vsel %vm3848_vm12, %v5058_v8, %v3845_v63  ;;  %v3634_v13 = vmul.f32 %v5060_v60, %v3633_v29  ;;  %vm3636_vm5 = vweird.f32 %v8669_v21  ;;  %v4580_v11 = vmul.f32 -1.442695, %v8722_v45 }
 0x847   :  { %v3854_v25 = vsel %vm3851_vm11, %v3853_v38, %v3849_v51  ;;  %v3864_v46 = vsel %vm8733_vm6, %v8656_v58, %v3860_v43  ;;  %5067 = vpow2.f32 %v4579_v40  ;;  %vm3638_vm13 = vmor %vm3636_vm5, %vm3637_vm15  ;;  %v3643_v5 = vor.u32 1.1754944e-38, %v3642_v55 }
 0x848   :  { %v3915_v36 = vmul.f32 %v3854_v25, %v8600_v54  ;;  %v5062_v6 = vpop.eup %5061  ;;  %v3635_v54 = vadd.f32 %v5060_v60, %v3634_v13  ;;  %v3868_v57 = vor.u32 1.1754944e-38, %v3867_v33  ;;  %5069 = vpow2.f32 %v4580_v11 }
 0x849   :  { %v3390_v62 = vadd.f32 1.0, %v5062_v6  ;;  %v8744_v56 = vpop.eup %5063  ;;  %vm3641_vm7 = vcmp.eq.f32.partialorder %v3640_v3, 8.507059e+37  ;;  %vm3866_vm14 = vcmp.eq.f32.partialorder %v3865_v50, 8.507059e+37  ;;  %vm3666_vm12 = vweird.f32 %v8705_v30 }
 0x84a   :  { %4622 = vmatmul.msk.f32.gmra.mxu3 %vm294_vm0, %v3915_v36  ;;  %v3639_v21 = vsel %vm3638_vm13, %v5060_v60, %v3635_v54  ;;  %v3869_v32 = vsel %vm3866_vm14, %v3868_v57, %v3864_v46  ;;  %v3662_v24 = vmul.f32 %v8744_v56, %v8705_v30  ;;  %vm3667_vm10 = vweird.f32 %v8744_v56 }
 0x84b   :  { %5071 = vrcp.f32 %v3390_v62  ;;  %v5066_v59 = vpop.eup %5065  ;;  %v3644_v34 = vsel %vm3641_vm7, %v3643_v5, %v3639_v21  ;;  %v3916_v39 = vmul.f32 %v3869_v32, %v8495_v44  ;;  %v3655_v16 = vand.u32 2147483647, %v3390_v62  ;;  %vm8780_vm5 = vmor %vm3666_vm12, %vm3667_vm10 }
 0x84c   :  { %v3901_v58 = vmul.f32 %v3644_v34, %v8636_v52  ;;  %v3405_v8 = vadd.f32 1.0, %v5066_v59  ;;  %v3663_v17 = vsub.f32 1.0, %v3662_v24  ;;  %v3657_v44 = vand.u32 2147483648, %v3390_v62 }
 0x84d   :  { %v5068_v41 = vpop.eup %5067  ;;  %vm3651_vm4 = vweird.f32 %v3390_v62  ;;  %vm3656_vm8 = vcmp.eq.f32.partialorder %v3655_v16, 8.507059e+37  ;;  %v3672_v36 = vand.u32 2147483648, %v8705_v30  ;;  %v3670_v11 = vand.u32 2147483647, %v8705_v30  ;;  %v8785_v54 = vpop.f32.mrf.mxu2 }
 0x84e   :  { %4608 = vmatmul.msk.f32.gmra.mxu2 %vm294_vm0, %v3901_v58  ;;  %5073 = vrcp.f32 %v3405_v8  ;;  %v5070_v15 = vpop.eup %5069  ;;  %v8755_v35 = vadd.f32 1.0, %v5068_v41  ;;  %v3664_v4 = vmul.f32 %v8744_v56, %v3663_v17  ;;  %v3658_v47 = vor.u32 1.1754944e-38, %v3657_v44 }
 0x84f   :  { %v8758_v52 = vadd.f32 1.0, %v5070_v15  ;;  %v3880_v61 = vand.u32 2147483647, %v3405_v8  ;;  %v3882_v38 = vand.u32 2147483648, %v3405_v8  ;;  %vm3876_vm15 = vweird.f32 %v3405_v8 }
 0x850   :  { %v3665_v25 = vadd.f32 %v8744_v56, %v3664_v4  ;;  %v3673_v59 = vor.u32 1.1754944e-38, %v3672_v36  ;;  %vm3671_vm7 = vcmp.eq.f32.partialorder %v3670_v11, 8.507059e+37  ;;  %v3685_v24 = vand.u32 2147483647, %v8755_v35  ;;  %v4669_v4 = vld [vmem:[%s9067_s5 + $0xa] ss:$0 sm:$0xff] }
 0x851   :  { %v5072_v50 = vpop.eup %5071  ;;  %vm3881_vm13 = vcmp.eq.f32.partialorder %v3880_v61, 8.507059e+37  ;;  %v3883_v46 = vor.u32 1.1754944e-38, %v3882_v38  ;;  %v3702_v17 = vand.u32 2147483648, %v8758_v52  ;;  %v3700_v44 = vand.u32 2147483647, %v8758_v52 }
 0x852   :  { %v2274_v37 = vpop.xlane.xlu1 %2273  ;;  %4623 = vmatmul.msk.f32.gmra.mxu3 %vm294_vm0, %v3916_v39  ;;  %v3647_v33 = vmul.f32 %v5072_v50, %v3390_v62  ;;  %vm3652_vm3 = vweird.f32 %v5072_v50 }
 0x853   :  { %v2278_v49 = vmul.f32 %v2274_v37, %v8204_v7  ;;  %vm3653_vm9 = vmor %vm3651_vm4, %vm3652_vm3  ;;  %vm3681_vm3 = vweird.f32 %v8755_v35 }
 0x854   :  { %v3648_v31 = vsub.f32 1.0, %v3647_v33  ;;  %v5074_v2 = vpop.eup %5073 }
 0x855   :  { %v8750_v18 = vadd.f32 1e-05, %v2278_v49  ;;  %v3872_v12 = vmul.f32 %v5074_v2, %v3405_v8  ;;  %vm3877_vm11 = vweird.f32 %v5074_v2  ;;  %v3687_v8 = vand.u32 2147483648, %v8755_v35  ;;  %v8803_v15 = vpop.f32.mrf.mxu2 }
 0x856   :  { %v3649_v10 = vmul.f32 %v5072_v50, %v3648_v31  ;;  %vm3878_vm6 = vmor %vm3876_vm15, %vm3877_vm11  ;;  %vm3686_vm11 = vcmp.eq.f32.partialorder %v3685_v24, 8.507059e+37  ;;  %v4668_v31 = vld [vmem:[%s9067_s5 + $0x9] ss:$0 sm:$0xff]  ;;  %vm3696_vm15 = vweird.f32 %v8758_v52 }
 0x857   :  { %5075 = vrsqrt.f32 %v8750_v18  ;;  %v3873_v63 = vsub.f32 1.0, %v3872_v12 }
 0x858   :  { %5077 = vrcp.f32 %v8755_v35  ;;  %v3650_v26 = vadd.f32 %v5072_v50, %v3649_v10  ;;  %v3703_v10 = vor.u32 1.1754944e-38, %v3702_v17 }
 0x859   :  { %5079 = vrcp.f32 %v8758_v52  ;;  %v3874_v29 = vmul.f32 %v5074_v2, %v3873_v63 }
 0x85a   :  { %v3654_v51 = vsel %vm3653_vm9, %v5072_v50, %v3650_v26  ;;  %v3688_v50 = vor.u32 1.1754944e-38, %v3687_v8 }
 0x85b   :  { %v3659_v55 = vsel %vm3656_vm8, %v3658_v47, %v3654_v51  ;;  %v3875_v6 = vadd.f32 %v5074_v2, %v3874_v29  ;;  %vm2288_vm8 = vweird.f32 %v8750_v18 }
 0x85c   :  { %v3902_v40 = vmul.f32 %v3659_v55, %v8695_v53  ;;  %v3669_v53 = vsel %vm8780_vm5, %v8744_v56, %v3665_v25 }
 0x85d   :  { %v8764_v27 = vpop.eup %5075  ;;  %v3879_v5 = vsel %vm3878_vm6, %v5074_v2, %v3875_v6  ;;  %v3674_v34 = vsel %vm3671_vm7, %v3673_v59, %v3669_v53  ;;  %vm3701_vm6 = vcmp.eq.f32.partialorder %v3700_v44, 8.507059e+37 }
 0x85e   :  { %v2283_v0 = vmul.f32 %v8764_v27, %v8750_v18  ;;  %v5078_v60 = vpop.eup %5077  ;;  %4609 = vmatmul.msk.f32.gmra.mxu2 %vm294_vm0, %v3902_v40  ;;  %v3884_v37 = vsel %vm3881_vm13, %v3883_v46, %v3879_v5  ;;  %v3903_v56 = vmul.f32 %v3674_v34, %v8585_v23  ;;  %vm2289_vm4 = vweird.f32 %v8764_v27 }
 0x85f   :  { %v3677_v42 = vmul.f32 %v5078_v60, %v8755_v35  ;;  %v8773_v3 = vpop.eup %5079  ;;  %v3917_v30 = vmul.f32 %v3884_v37, %v8708_v20  ;;  %vm3682_vm14 = vweird.f32 %v5078_v60  ;;  %vm2290_vm9 = vmor %vm2288_vm8, %vm2289_vm4 }
 0x860   :  { %v2284_v43 = vmul.f32 %v8764_v27, %v2283_v0  ;;  %v3692_v21 = vmul.f32 %v8773_v3, %v8758_v52  ;;  %vm3683_vm10 = vmor %vm3681_vm3, %vm3682_vm14  ;;  %vm3697_vm12 = vweird.f32 %v8773_v3 }
 0x861   :  { %v3678_v13 = vsub.f32 1.0, %v3677_v42  ;;  %4624 = vmatmul.msk.f32.gmra.mxu3 %vm294_vm0, %v3917_v30  ;;  %vm3698_vm5 = vmor %vm3696_vm15, %vm3697_vm12 }
 0x862   :  { %v2285_v62 = vmul.f32 0.5, %v2284_v43  ;;  %v3693_v58 = vsub.f32 1.0, %v3692_v21  ;;  %v8832_v43 = vpop.f32.mrf.mxu3 }
 0x863   :  { %v3679_v57 = vmul.f32 %v5078_v60, %v3678_v13 }
 0x864   :  { %v2286_v32 = vsub.f32 1.5, %v2285_v62  ;;  %v3694_v39 = vmul.f32 %v8773_v3, %v3693_v58 }
 0x865   :  { %v3680_v49 = vadd.f32 %v5078_v60, %v3679_v57 }
 0x866   :  { %v2287_v41 = vmul.f32 %v8764_v27, %v2286_v32  ;;  %4610 = vmatmul.msk.f32.gmra.mxu2 %vm294_vm0, %v3903_v56  ;;  %v3695_v33 = vadd.f32 %v8773_v3, %v3694_v39 }
 0x867   :  { %v3684_v20 = vsel %vm3683_vm10, %v5078_v60, %v3680_v49 }
 0x868   :  { %v2291_v23 = vsel %vm2290_vm9, %v8764_v27, %v2287_v41  ;;  %v3689_v35 = vsel %vm3686_vm11, %v3688_v50, %v3684_v20  ;;  %v3699_v2 = vsel %vm3698_vm5, %v8773_v3, %v3695_v33 }
 0x869   :  { %v2302_v16 = vmul.f32 %v2291_v23, %v8209_v14  ;;  %v3904_v18 = vmul.f32 %v3689_v35, %v8719_v28  ;;  %v8823_v28 = vpop.f32.mrf.mxu2  ;;  %v3704_v0 = vsel %vm3701_vm6, %v3703_v10, %v3699_v2 }
 0x86a   :  { %v3905_v26 = vmul.f32 %v3704_v0, %v8722_v45  ;;  %v8837_v40 = vpop.f32.mrf.mxu3 }
 0x86b   :  { %v2305_v14 = vmul.f32 %v4668_v31, %v2302_v16 }
 0x86d   :  { %v8825_v52 = vadd.f32 %v4669_v4, %v2305_v14 }
 0x86e   :  { %4611 = vmatmul.msk.f32.gmra.mxu2 %vm294_vm0, %v3904_v18 }
 0x86f   :  { %v4557_v47 = vmul.f32 -1.442695, %v8825_v52 }
 0x871   :  { %v8830_v63 = vpop.f32.mrf.mxu2 }
 0x872   :  { %v8841_v62 = vpop.f32.mrf.mxu3 }
 0x874   :  { %v2277_v27 = vpop.xlane.xlu2 %2276 }
 0x875   :  { %v2279_v12 = vmul.f32 %v2277_v27, %v8204_v7 }
 0x876   :  { %4612 = vmatmul.msk.f32.gmra.mxu2 %vm294_vm0, %v3905_v26 }
 0x877   :  { %v2281_v60 = vadd.f32 1e-05, %v2279_v12 }
 0x879   :  { %5081 = vrsqrt.f32 %v2281_v60  ;;  %vm2298_vm7 = vweird.f32 %v2281_v60  ;;  %v8834_v45 = vpop.f32.mrf.mxu2 }
 0x87a   :  { %5083 = vpow2.f32 %v4557_v47  ;;  %v8845_v59 = vpop.f32.mrf.mxu3 }
 0x87f   :  { %v5082_v7 = vpop.eup %5081 }
 0x880   :  { %v2293_v61 = vmul.f32 %v5082_v7, %v2281_v60  ;;  %vm2299_vm13 = vweird.f32 %v5082_v7  ;;  %v5084_v29 = vpop.eup %5083 }
 0x881   :  { %vm2300_vm14 = vmor %vm2298_vm7, %vm2299_vm13  ;;  %v2316_v3 = vadd.f32 1.0, %v5084_v29  ;;  %v8839_v46 = vpop.f32.mrf.mxu2 }
 0x882   :  { %v2294_v38 = vmul.f32 %v5082_v7, %v2293_v61  ;;  %v8849_v35 = vpop.f32.mrf.mxu3 }
 0x883   :  { %5085 = vrcp.f32 %v2316_v3  ;;  %v2329_v49 = vand.u32 2147483648, %v2316_v3  ;;  %vm2323_vm4 = vweird.f32 %v2316_v3  ;;  %v2327_v58 = vand.u32 2147483647, %v2316_v3 }
 0x884   :  { %v2295_v42 = vmul.f32 0.5, %v2294_v38 }
 0x885   :  { %v2330_v50 = vor.u32 1.1754944e-38, %v2329_v49  ;;  %vm2328_vm9 = vcmp.eq.f32.partialorder %v2327_v58, 8.507059e+37  ;;  %v8885_v58 = vld [vmem:[%s9067_s5 + $0x11] ss:$0 sm:$0xff] }
 0x886   :  { %v2296_v51 = vsub.f32 1.5, %v2295_v42 }
 0x888   :  { %v2297_v25 = vmul.f32 %v5082_v7, %v2296_v51 }
 0x889   :  { %v5086_v11 = vpop.eup %5085  ;;  %v8843_v37 = vpop.f32.mrf.mxu2 }
 0x88a   :  { %v2301_v55 = vsel %vm2300_vm14, %v5082_v7, %v2297_v25  ;;  %v2319_v5 = vmul.f32 %v5086_v11, %v2316_v3  ;;  %vm2324_vm3 = vweird.f32 %v5086_v11  ;;  %v4110_v12 = vpop.f32.mrf.mxu3  ;;  %v2352_v3 = vld [vmem:[%s9067_s5 + $0xd] sm:$0x1] }
 0x88b   :  { %v2303_v36 = vmul.f32 %v2301_v55, %v8268_v1  ;;  %vm2325_vm10 = vmor %vm2323_vm4, %vm2324_vm3 }
 0x88c   :  { %v2320_v21 = vsub.f32 1.0, %v2319_v5 }
 0x88d   :  { %v2306_v13 = vmul.f32 %v4668_v31, %v2303_v36 }
 0x88e   :  { %v2321_v1 = vmul.f32 %v5086_v11, %v2320_v21 }
 0x88f   :  { %v2309_v6 = vadd.f32 %v4669_v4, %v2306_v13 }
 0x890   :  { %v2322_v34 = vadd.f32 %v5086_v11, %v2321_v1 }
 0x891   :  { %v4558_v22 = vmul.f32 -1.442695, %v2309_v6  ;;  %v8847_v56 = vpop.f32.mrf.mxu2 }
 0x892   :  { %v2326_v41 = vsel %vm2325_vm10, %v5086_v11, %v2322_v34 }
 0x893   :  { %5087 = vpow2.f32 %v4558_v22  ;;  %v2331_v33 = vsel %vm2328_vm9, %v2330_v50, %v2326_v41 }
 0x894   :  { %v2348_v18 = vmul.f32 %v2331_v33, %v8825_v52  ;;  %v4132_v33 = vld [vmem:[%s9066_s4 + $0xc8] sm:$0xff] }
 0x896   :  { %v2353_v10 = vsel %vm1931_vm1, %v2348_v18, 0.0 }
 0x899   :  { %v5088_v53 = vpop.eup %5087  ;;  %v8853_v27 = vpop.f32.mrf.mxu2 }
 0x89a   :  { %v2317_v57 = vadd.f32 1.0, %v5088_v53 }
 0x89c   :  { %5089 = vrcp.f32 %v2317_v57  ;;  %v2344_v24 = vand.u32 2147483648, %v2317_v57  ;;  %v2342_v39 = vand.u32 2147483647, %v2317_v57  ;;  %vm2338_vm11 = vweird.f32 %v2317_v57 }
 0x89e   :  { %v2345_v17 = vor.u32 1.1754944e-38, %v2344_v24  ;;  %vm2343_vm15 = vcmp.eq.f32.partialorder %v2342_v39, 8.507059e+37  ;;  %v4133_v39 = vld [vmem:[%s9066_s4 + $0xd0] sm:$0xff] }
 0x8a1   :  { %v8856_v0 = vpop.f32.mrf.mxu2 }
 0x8a2   :  { %v5090_v30 = vpop.eup %5089 }
 0x8a3   :  { %v2334_v32 = vmul.f32 %v5090_v30, %v2317_v57  ;;  %vm2339_vm8 = vweird.f32 %v5090_v30 }
 0x8a4   :  { %vm2340_vm12 = vmor %vm2338_vm11, %vm2339_vm8 }
 0x8a5   :  { %v2335_v8 = vsub.f32 1.0, %v2334_v32 }
 0x8a7   :  { %v2336_v20 = vmul.f32 %v5090_v30, %v2335_v8 }
 0x8a9   :  { %v2337_v23 = vadd.f32 %v5090_v30, %v2336_v20  ;;  %v4134_v20 = vld [vmem:[%s9066_s4 + $0xd8] sm:$0xff] }
 0x8aa   :  { %4155 = vmatpush.msra.mxu1 %v4134_v20 }
 0x8ab   :  { %v2341_v31 = vsel %vm2340_vm12, %v5090_v30, %v2337_v23 }
 0x8ac   :  { %v2346_v16 = vsel %vm2343_vm15, %v2345_v17, %v2341_v31  ;;  %4156 = vmatpush.msra.mxu1 %v4133_v39 }
 0x8ad   :  { %v2349_v44 = vmul.f32 %v2346_v16, %v2309_v6 }
 0x8ae   :  { %4157 = vmatpush.msra.mxu1 %v4132_v33 }
 0x8af   :  { %v2354_v2 = vsel %vm1931_vm1, %v2349_v44, 0.0  ;;  %v4113_v26 = vpop.f32.mrf.mxu3 }
 0x8b0   :  { %v2355_v4 = vadd.f32 %v2354_v2, %v2353_v10 }
 0x8b2   :  { %v2356_v14 = vrot.slane %v2355_v4, 4 }
 0x8b4   :  { %v2357_v60 = vadd.f32 %v2356_v14, %v2355_v4 }
 0x8b6   :  { %v2358_v47 = vrot.slane %v2357_v60, 2 }
 0x8b8   :  { %v2359_v61 = vadd.f32 %v2358_v47, %v2357_v60  ;;  %v4114_v60 = vadd.f32 %v8885_v58, %v4113_v26 }
 0x8b9   :  { %v8858_v7 = vpop.f32.mrf.mxu2 }
 0x8ba   :  { %v2360_v52 = vrot.slane %v2359_v61, 1 }
 0x8bc   :  { %v4116_v38 = vpop.f32.mrf.mxu3  ;;  %v2361_v42 = vadd.f32 %v2360_v52, %v2359_v61  ;;  %v4111_v52 = vadd.f32 %v8885_v58, %v4110_v12  ;;  %v4099_v12 = vadd.f32 %v8885_v58, %v8837_v40 }
 0x8bd   :  { %v4117_v4 = vadd.f32 %v8885_v58, %v4116_v38 }
 0x8be   :  { %v2362_v29 = vmul.f32 %v2361_v42, %v5355_v9  ;;  %v4108_v42 = vadd.f32 %v8885_v58, %v8849_v35  ;;  %v4096_v35 = vadd.f32 %v8885_v58, %v8832_v43 }
 0x8c0   :  { %v2363_v55 = vmul.f32 %v2362_v29, %v2352_v3  ;;  %v4105_v29 = vadd.f32 %v8885_v58, %v8845_v59 }
 0x8c1   :  { %v8860_v51 = vpop.f32.mrf.mxu2 }
 0x8c2   :  { %v2364_v13 = vperm.slane %v2363_v55, 0 }
 0x8c4   :  { %v4119_v25 = vpop.f32.mrf.mxu3  ;;  %v8868_v22 = vsub.f32 %v2349_v44, %v2364_v13  ;;  %v8874_v57 = vsub.f32 %v2348_v18, %v2364_v13  ;;  %v4131_v18 = vld [vmem:[%s9066_s4 + $0xc0] sm:$0xff] }
 0x8c5   :  { %v4120_v2 = vadd.f32 %v8885_v58, %v4119_v25  ;;  %4158 = vmatpush.msra.mxu1 %v4131_v18 }
 0x8c6   :  { %v2368_v5 = vmul.f32 %v8868_v22, %v8868_v22  ;;  %v2367_v1 = vmul.f32 %v8874_v57, %v8874_v57 }
 0x8c8   :  { %v2370_v21 = vsel %vm1931_vm1, %v2368_v5, 0.0  ;;  %v2369_v30 = vsel %vm1931_vm1, %v2367_v1, 0.0 }
 0x8c9   :  { %v8866_v36 = vpop.f32.mrf.mxu2  ;;  %v2371_v34 = vadd.f32 %v2370_v21, %v2369_v30 }
 0x8cb   :  { %v2372_v49 = vrot.slane %v2371_v34, 4 }
 0x8cd   :  { %v4122_v6 = vpop.f32.mrf.mxu3  ;;  %v2373_v8 = vadd.f32 %v2372_v49, %v2371_v34 }
 0x8ce   :  { %v4123_v16 = vadd.f32 %v8885_v58, %v4122_v6 }
 0x8cf   :  { %v2374_v50 = vrot.slane %v2373_v8, 2 }
 0x8d1   :  { %v8870_v11 = vpop.f32.mrf.mxu2  ;;  %v2375_v17 = vadd.f32 %v2374_v50, %v2373_v8 }
 0x8d3   :  { %v2376_v44 = vrot.slane %v2375_v17, 1 }
 0x8d5   :  { %v4125_v53 = vpop.f32.mrf.mxu3  ;;  %v2377_v10 = vadd.f32 %v2376_v44, %v2375_v17 }
 0x8d6   :  { %v4126_v23 = vadd.f32 %v8885_v58, %v4125_v53  ;;  %v4671_v53 = vld [vmem:[%s9067_s5 + $0xc] ss:$0 sm:$0xff] }
 0x8d7   :  { %v2378_v14 = vmul.f32 %v2377_v10, %v5355_v9  ;;  %v4102_v9 = vadd.f32 %v8885_v58, %v8841_v62  ;;  %v4670_v62 = vld [vmem:[%s9067_s5 + $0xb] ss:$0 sm:$0xff] }
 0x8d8   :  { %v2380_v43 = vmul.f32 %v4670_v62, %v8874_v57  ;;  %v2381_v21 = vmul.f32 %v4670_v62, %v8868_v22  ;;  %v5126_v57 = vld [vmem:[%s9063_s1 + $0x8] sm:$0xff]  ;;  %v5127_v22 = vld [vmem:[%s9063_s1 + $0x18] sm:$0xff]  ;;  %v4072_v62 = vadd.f32 %v8885_v58, %v8858_v7  ;;  %v5128_v7 = vld [vmem:[%s9062_s0] sm:$0xff] }
 0x8d9   :  { %v2382_v47 = vadd.f32 1e-05, %v2378_v14 }
 0x8db   :  { %5091 = vrsqrt.f32 %v2382_v47  ;;  %vm2389_vm6 = vweird.f32 %v2382_v47 }
 0x8e1   :  { %v8880_v32 = vpop.f32.mrf.mxu2  ;;  %v5092_v38 = vpop.eup %5091 }
 0x8e2   :  { %v2384_v25 = vmul.f32 %v5092_v38, %v2382_v47  ;;  %vm2390_vm5 = vweird.f32 %v5092_v38  ;;  %v4084_v30 = vadd.f32 %v8885_v58, %v8880_v32 }
 0x8e3   :  { %vm2391_vm13 = vmor %vm2389_vm6, %vm2390_vm5 }
 0x8e4   :  { %v4128_v24 = vpop.f32.mrf.mxu3  ;;  %v2385_v3 = vmul.f32 %v5092_v38, %v2384_v25 }
 0x8e5   :  { %v4129_v41 = vadd.f32 %v8885_v58, %v4128_v24 }
 0x8e6   :  { %v2386_v59 = vmul.f32 0.5, %v2385_v3 }
 0x8e7   :  { %4220 = vmatpush.msrb.mxu3 %v4129_v41 }
 0x8e8   :  { %v2387_v13 = vsub.f32 1.5, %v2386_v59  ;;  %v4075_v59 = vadd.f32 %v8885_v58, %v8860_v51  ;;  %v4060_v51 = vadd.f32 %v8885_v58, %v8843_v37  ;;  %v4048_v37 = vadd.f32 %v8885_v58, %v8823_v28 }
 0x8e9   :  { %v4086_v31 = vpop.f32.mrf.mxu2  ;;  %4221 = vmatpush.msrb.mxu3 %v4126_v23  ;;  %v4036_v28 = vadd.f32 %v8885_v58, %v8738_v48  ;;  %v4245_v48 = vld [vmem:[%s9066_s4 + $0xf0] sm:$0xff] }
 0x8ea   :  { %v2388_v40 = vmul.f32 %v5092_v38, %v2387_v13  ;;  %v4087_v5 = vadd.f32 %v8885_v58, %v4086_v31  ;;  %v4069_v13 = vadd.f32 %v8885_v58, %v8856_v0  ;;  %v4057_v0 = vadd.f32 %v8885_v58, %v8839_v46 }
 0x8eb   :  { %4222 = vmatpush.msrb.mxu3 %v4123_v16  ;;  %v4045_v46 = vadd.f32 %v8885_v58, %v8803_v15  ;;  %v5131_v15 = vld [vmem:[%s9063_s1 + $0x10] sm:$0xff] }
 0x8ec   :  { %v2392_v1 = vsel %vm2391_vm13, %v5092_v38, %v2388_v40  ;;  %v5130_v40 = vld [vmem:[%s9063_s1] sm:$0xff] }
 0x8ed   :  { %4223 = vmatpush.msrb.mxu3 %v4120_v2  ;;  %v2393_v34 = vmul.f32 %v2392_v1, %v2380_v43  ;;  %v2394_v49 = vmul.f32 %v2392_v1, %v2381_v21  ;;  %v4247_v43 = vld [vmem:[%s9066_s4 + $0x100] sm:$0xff] }
 0x8ef   :  { %4224 = vmatpush.msrb.mxu3 %v4117_v4  ;;  %v2396_v8 = vadd.f32 %v4671_v53, %v2393_v34  ;;  %v2397_v24 = vadd.f32 %v4671_v53, %v2394_v49  ;;  %v4672_v53 = vld [vmem:[%s9067_s5 + $0x12] ss:$0 sm:$0xff] }
 0x8f1   :  { %v4089_v61 = vpop.f32.mrf.mxu2  ;;  %4225 = vmatpush.msrb.mxu3 %v4114_v60  ;;  %v4559_v41 = vmul.f32 -1.442695, %v2396_v8  ;;  %v4560_v20 = vmul.f32 -1.442695, %v2397_v24 }
 0x8f2   :  { %v4090_v6 = vadd.f32 %v8885_v58, %v4089_v61 }
 0x8f3   :  { %4226 = vmatpush.msrb.mxu3 %v4111_v52  ;;  %5093 = vpow2.f32 %v4559_v41 }
 0x8f4   :  { %5095 = vpow2.f32 %v4560_v20 }
 0x8f5   :  { %4227 = vmatpush.msrb.mxu3 %v4108_v42 }
 0x8f7   :  { %4228 = vmatpush.msrb.mxu3 %v4105_v29 }
 0x8f9   :  { %v4092_v26 = vpop.f32.mrf.mxu2  ;;  %4229 = vmatpush.msrb.mxu3 %v4102_v9  ;;  %v5094_v32 = vpop.eup %5093 }
 0x8fa   :  { %v4093_v55 = vadd.f32 %v8885_v58, %v4092_v26  ;;  %v5096_v39 = vpop.eup %5095  ;;  %v2404_v50 = vadd.f32 1.0, %v5094_v32 }
 0x8fb   :  { %4230 = vmatpush.msrb.mxu3 %v4099_v12  ;;  %v2405_v23 = vadd.f32 1.0, %v5096_v39 }
 0x8fc   :  { %5097 = vrcp.f32 %v2404_v50  ;;  %v2417_v44 = vand.u32 2147483648, %v2404_v50  ;;  %v2415_v4 = vand.u32 2147483647, %v2404_v50  ;;  %vm2411_vm3 = vweird.f32 %v2404_v50 }
 0x8fd   :  { %4231 = vmatpush.msrb.mxu3 %v4096_v35  ;;  %5099 = vrcp.f32 %v2405_v23  ;;  %v2432_v14 = vand.u32 2147483648, %v2405_v23  ;;  %v2430_v47 = vand.u32 2147483647, %v2405_v23  ;;  %vm2426_vm10 = vweird.f32 %v2405_v23 }
 0x8fe   :  { %v2418_v52 = vor.u32 1.1754944e-38, %v2417_v44  ;;  %vm2416_vm8 = vcmp.eq.f32.partialorder %v2415_v4, 8.507059e+37  ;;  %v4081_v35 = vadd.f32 %v8885_v58, %v8870_v11  ;;  %v4066_v11 = vadd.f32 %v8885_v58, %v8853_v27 }
 0x8ff   :  { %4232 = vmatpush.msrb.mxu3 %v4093_v55  ;;  %v2433_v38 = vor.u32 1.1754944e-38, %v2432_v14  ;;  %vm2431_vm11 = vcmp.eq.f32.partialorder %v2430_v47, 8.507059e+37  ;;  %v4078_v55 = vadd.f32 %v8885_v58, %v8866_v36  ;;  %v4063_v36 = vadd.f32 %v8885_v58, %v8847_v56 }
 0x900   :  { %v4054_v27 = vadd.f32 %v8885_v58, %v8834_v45  ;;  %v4051_v56 = vadd.f32 %v8885_v58, %v8830_v63  ;;  %v4042_v45 = vadd.f32 %v8885_v58, %v8785_v54  ;;  %v4039_v63 = vadd.f32 %v8885_v58, %v8761_v19  ;;  %v4246_v19 = vld [vmem:[%s9066_s4 + $0xf8] sm:$0xff]  ;;  %v4244_v54 = vld [vmem:[%s9066_s4 + $0xe8] sm:$0xff]  ;;  %v4243_v58 = vld [vmem:[%s9066_s4 + $0xe0] sm:$0xff] }
 0x901   :  { %4233 = vmatpush.msrb.mxu3 %v4090_v6  ;;  %v5129_v6 = vld [vmem:[%s9062_s0 + $0x8] sm:$0xff] }
 0x902   :  { %v5098_v33 = vpop.eup %5097 }
 0x903   :  { %4234 = vmatpush.msrb.mxu3 %v4087_v5  ;;  %v5100_v17 = vpop.eup %5099  ;;  %v2407_v31 = vmul.f32 %v5098_v33, %v2404_v50  ;;  %vm2412_vm7 = vweird.f32 %v5098_v33  ;;  %v4248_v5 = vld [vmem:[%s9066_s4 + $0x108] sm:$0xff] }
 0x904   :  { %v2422_v16 = vmul.f32 %v5100_v17, %v2405_v23  ;;  %vm2427_vm14 = vweird.f32 %v5100_v17  ;;  %vm2413_vm4 = vmor %vm2411_vm3, %vm2412_vm7 }
 0x905   :  { %4235 = vmatpush.msrb.mxu3 %v4084_v30  ;;  %v2408_v18 = vsub.f32 1.0, %v2407_v31  ;;  %vm2428_vm9 = vmor %vm2426_vm10, %vm2427_vm14 }
 0x906   :  { %4236 = vmatmul.f32.vlgmr.msrb.gmra.mxu3 %v5126_v57  ;;  %v2423_v2 = vsub.f32 1.0, %v2422_v16 }
 0x907   :  { %v2409_v10 = vmul.f32 %v5098_v33, %v2408_v18  ;;  %4296 = vmatpush.msra.mxu3 %v4246_v19  ;;  %v4673_v18 = vld [vmem:[%s9067_s5 + $0x13] ss:$0 sm:$0xff]  ;;  %v4404_v19 = vld [vmem:[%s9066_s4 + $0x118] sm:$0xff] }
 0x908   :  { %v2424_v60 = vmul.f32 %v5100_v17, %v2423_v2 }
 0x909   :  { %v2410_v61 = vadd.f32 %v5098_v33, %v2409_v10  ;;  %4297 = vmatpush.msra.mxu3 %v4245_v48 }
 0x90a   :  { %v2425_v42 = vadd.f32 %v5100_v17, %v2424_v60 }
 0x90b   :  { %v2414_v29 = vsel %vm2413_vm4, %v5098_v33, %v2410_v61  ;;  %4298 = vmatpush.msra.mxu3 %v4244_v54 }
 0x90c   :  { %v2419_v9 = vsel %vm2416_vm8, %v2418_v52, %v2414_v29  ;;  %v2429_v26 = vsel %vm2428_vm9, %v5100_v17, %v2425_v42  ;;  %v9273_v29 = vld [vmem:[#allocation20_spill] sm:$0xff] }
 0x90d   :  { %v2436_v25 = vmul.f32 %v2419_v9, %v2396_v8  ;;  %v2434_v12 = vsel %vm2431_vm11, %v2433_v38, %v2429_v26  ;;  %4299 = vmatpush.msra.mxu3 %v4243_v58  ;;  %v4403_v58 = vld [vmem:[%s9066_s4 + $0x110] sm:$0xff] }
 0x90e   :  { %4239 = vmatmul.f32.gmra.mxu3 %v5127_v22  ;;  %v2437_v3 = vmul.f32 %v2434_v12, %v2397_v24 }
 0x90f   :  { %4625 = vmatmul.msk.f32.vlgmr.msra.gmra.mxu1 %vm1931_vm1, %v2436_v25 }
 0x910   :  { %4180 = vmatpush.msrb.mxu1 %v2437_v3 }
 0x912   :  { %4181 = vmatpush.msrb.mxu1 %v2436_v25 }
 0x914   :  { %4197 = vmatpush.msra.mxu1 %v4081_v35 }
 0x916   :  { %4198 = vmatpush.msra.mxu1 %v4078_v55 }
 0x917   :  { %4626 = vmatmul.msk.f32.gmra.mxu1 %vm1931_vm1, %v2437_v3 }
 0x918   :  { %4199 = vmatpush.msra.mxu1 %v4075_v59 }
 0x91a   :  { %4200 = vmatpush.msra.mxu1 %v4072_v62 }
 0x91c   :  { %4201 = vmatpush.msra.mxu1 %v4069_v13 }
 0x91e   :  { %4202 = vmatpush.msra.mxu1 %v4066_v11 }
 0x91f   :  { %4627 = vmatmul.msk.f32.vlgmr.msrb.gmra.mxu1 %vm294_vm0, %v5128_v7 }
 0x920   :  { %4203 = vmatpush.msra.mxu1 %v4063_v36  ;;  %v4410_v36 = vld [vmem:[%s9066_s4 + $0x148] sm:$0xff] }
 0x922   :  { %4204 = vmatpush.msra.mxu1 %v4060_v51  ;;  %v4409_v51 = vld [vmem:[%s9066_s4 + $0x140] sm:$0xff] }
 0x924   :  { %4205 = vmatpush.msra.mxu1 %v4057_v0 }
 0x926   :  { %4206 = vmatpush.msra.mxu1 %v4054_v27  ;;  %v4408_v27 = vld [vmem:[%s9066_s4 + $0x138] sm:$0xff] }
 0x927   :  { %4628 = vmatmul.msk.f32.gmra.mxu1 %vm294_vm0, %v5129_v6 }
 0x928   :  { %4207 = vmatpush.msra.mxu1 %v4051_v56 }
 0x92a   :  { %4208 = vmatpush.msra.mxu1 %v4048_v37 }
 0x92c   :  { %4209 = vmatpush.msra.mxu1 %v4045_v46  ;;  %v4407_v46 = vld [vmem:[%s9066_s4 + $0x130] sm:$0xff] }
 0x92e   :  { %4210 = vmatpush.msra.mxu1 %v4042_v45 }
 0x930   :  { %4211 = vmatpush.msra.mxu1 %v4039_v63  ;;  %v4406_v63 = vld [vmem:[%s9066_s4 + $0x128] sm:$0xff] }
 0x932   :  { %4212 = vmatpush.msra.mxu1 %v4036_v28 }
 0x933   :  { %4213 = vmatmul.f32.vlgmr.msra.gmra.mxu1 %v5130_v40  ;;  %v4405_v40 = vld [vmem:[%s9066_s4 + $0x120] sm:$0xff] }
 0x934   :  { %4269 = vmatpush.msrb.mxu1 %v4248_v5  ;;  %v4674_v5 = vld [vmem:[%s9067_s5 + $0x14] ss:$0 sm:$0xff] }
 0x936   :  { %4270 = vmatpush.msrb.mxu1 %v4247_v43 }
 0x938   :  { %4427 = vmatpush.msra.mxu1 %v4410_v36 }
 0x93a   :  { %4428 = vmatpush.msra.mxu1 %v4409_v51 }
 0x93b   :  { %4216 = vmatmul.f32.gmra.mxu1 %v5131_v15 }
 0x93c   :  { %4429 = vmatpush.msra.mxu1 %v4408_v27 }
 0x93e   :  { %4430 = vmatpush.msra.mxu1 %v4407_v46 }
 0x940   :  { %4431 = vmatpush.msra.mxu1 %v4406_v63 }
 0x942   :  { %4432 = vmatpush.msra.mxu1 %v4405_v40  ;;  %v5163_v40 = vmov 512.0  }
 0x944   :  { %4433 = vmatpush.msra.mxu1 %v4404_v19 }
 0x946   :  { %4434 = vmatpush.msra.mxu1 %v4403_v58 }
 0x989   :  { %v4237_v20 = vpop.f32.mrf.mxu3 }
 0x98c   :  { %v4160_v21 = vpop.f32.mrf.mxu1 }
 0x98d   :  { %v4161_v1 = vadd.f32 %v4672_v53, %v4160_v21  ;;  %v4675_v21 = vld [vmem:[%s9067_s5 + $0x15] ss:$0 sm:$0xff] }
 0x98f   :  { %4191 = vrot.lane.b32.xlu0 %v4161_v1, %s5160_s12 }
 0x991   :  { %v4240_v33 = vpop.f32.mrf.mxu3 }
 0x994   :  { %v4163_v30 = vpop.f32.mrf.mxu1 }
 0x995   :  { %v4164_v34 = vadd.f32 %v4672_v53, %v4163_v30 }
 0x997   :  { %4193 = vrot.lane.b32.xlu1 %v4164_v34, %s5160_s12 }
 0x99c   :  { %v4183_v49 = vpop.f32.mrf.mxu1 }
 0x99d   :  { %v4184_v8 = vadd.f32 %v4183_v49, %v4161_v1 }
 0x99f   :  { %4631 = vmatmul.msk.f32.vlgmr.msra.gmra.mxu3 %vm1931_vm1, %v4184_v8 }
 0x9a4   :  { %v4186_v24 = vpop.f32.mrf.mxu1 }
 0x9a5   :  { %v4187_v57 = vadd.f32 %v4186_v24, %v4164_v34 }
 0x9a7   :  { %4632 = vmatmul.msk.f32.gmra.mxu3 %vm1931_vm1, %v4187_v57 }
 0x9b0   :  { %v4214_v41 = vpop.f32.mrf.mxu1 }
 0x9b8   :  { %v4217_v50 = vpop.f32.mrf.mxu1 }
 0xa01   :  { %v4192_v22 = vpop.permute.xlu0 %4191 }
 0xa02   :  { %v4215_v32 = vadd.f32 %v4214_v41, %v4192_v22 }
 0xa04   :  { %v4238_v39 = vadd.f32 %v4237_v20, %v4215_v32 }
 0xa06   :  { %4629 = vmatmul.msk.f32.vlgmr.msrb.gmra.mxu1 %vm294_vm0, %v4238_v39 }
 0xa09   :  { %v4194_v23 = vpop.permute.xlu1 %4193 }
 0xa0a   :  { %v4218_v17 = vadd.f32 %v4217_v50, %v4194_v23 }
 0xa0c   :  { %v4241_v31 = vadd.f32 %v4240_v33, %v4218_v17 }
 0xa0e   :  { %4630 = vmatmul.msk.f32.gmra.mxu1 %vm294_vm0, %v4241_v31 }
 0xa22   :  { %v4301_v16 = vpop.f32.mrf.mxu3 }
 0xa2a   :  { %v4304_v14 = vpop.f32.mrf.mxu3 }
 0xa83   :  { %v4272_v44 = vpop.f32.mrf.mxu1 }
 0xa84   :  { %v4302_v2 = vadd.f32 %v4301_v16, %v4272_v44 }
 0xa86   :  { %v4309_v10 = vadd.f32 %v4673_v18, %v4302_v2 }
 0xa88   :  { %v4313_v4 = vsel %vm2114_vm2, %v4309_v10, 0.0 }
 0xa89   :  { %4314 = vadd.xlane.f32.xlu2 %v4313_v4 }
 0xa8b   :  { %v4275_v60 = vpop.f32.mrf.mxu1 }
 0xa8c   :  { %v4305_v47 = vadd.f32 %v4304_v14, %v4275_v60 }
 0xa8e   :  { %v4310_v61 = vadd.f32 %v4673_v18, %v4305_v47 }
 0xa90   :  { %v4316_v52 = vsel %vm2114_vm2, %v4310_v61, 0.0 }
 0xa91   :  { %4317 = vadd.xlane.f32.xlu2 %v4316_v52 }
 0xafc   :  { %v4315_v42 = vpop.xlane.xlu2 %4314 }
 0xafd   :  { %v4319_v38 = vmul.f32 %v4315_v42, %v9273_v29 }
 0xaff   :  { %v4321_v9 = vsub.f32 %v4309_v10, %v4319_v38 }
 0xb01   :  { %v4323_v26 = vmul.f32 %v4321_v9, %v4321_v9 }
 0xb03   :  { %v4325_v25 = vsel %vm2114_vm2, %v4323_v26, 0.0 }
 0xb04   :  { %4326 = vadd.xlane.f32.xlu0 %v4325_v25  ;;  %v4318_v12 = vpop.xlane.xlu2 %4317 }
 0xb05   :  { %v4320_v3 = vmul.f32 %v4318_v12, %v9273_v29 }
 0xb07   :  { %v4322_v35 = vsub.f32 %v4310_v61, %v4320_v3 }
 0xb09   :  { %v4324_v55 = vmul.f32 %v4322_v35, %v4322_v35 }
 0xb0b   :  { %v4328_v59 = vsel %vm2114_vm2, %v4324_v55, 0.0 }
 0xb0c   :  { %4329 = vadd.xlane.f32.xlu2 %v4328_v59 }
 0xb77   :  { %v4327_v62 = vpop.xlane.xlu0 %4326 }
 0xb78   :  { %v4331_v13 = vmul.f32 %v4327_v62, %v9273_v29 }
 0xb7a   :  { %v4333_v11 = vadd.f32 1e-05, %v4331_v13  ;;  %v4676_v13 = vld [vmem:[%s9067_s5 + $0x16] ss:$0 sm:$0xff]  ;;  %s5164_s5 = smov [#allocation2]  }
 0xb7b   :  { %s4470_s11 = sshll.u32 %s5164_s5, 4  ;;  %s4471_s11 = int_to_ptr.vmem [resolvable:$true] %s4470_s11 }
 0xb7c   :  { %5101 = vrsqrt.f32 %v4333_v11  ;;  %vm4341_vm12 = vweird.f32 %v4333_v11 }
 0xb7f   :  { %v4330_v7 = vpop.xlane.xlu2 %4329 }
 0xb80   :  { %v4332_v0 = vmul.f32 %v4330_v7, %v9273_v29 }
 0xb82   :  { %v5102_v56 = vpop.eup %5101  ;;  %v4334_v6 = vadd.f32 1e-05, %v4332_v0 }
 0xb83   :  { %v4336_v37 = vmul.f32 %v5102_v56, %v4333_v11  ;;  %vm4342_vm0 = vweird.f32 %v5102_v56 }
 0xb84   :  { %5103 = vrsqrt.f32 %v4334_v6  ;;  %vm4343_vm15 = vmor %vm4341_vm12, %vm4342_vm0  ;;  %vm4351_vm6 = vweird.f32 %v4334_v6 }
 0xb85   :  { %v4337_v45 = vmul.f32 %v5102_v56, %v4336_v37 }
 0xb87   :  { %v4338_v28 = vmul.f32 0.5, %v4337_v45 }
 0xb89   :  { %v4339_v15 = vsub.f32 1.5, %v4338_v28 }
 0xb8a   :  { %v5104_v48 = vpop.eup %5103 }
 0xb8b   :  { %v4340_v54 = vmul.f32 %v5102_v56, %v4339_v15  ;;  %v4346_v43 = vmul.f32 %v5104_v48, %v4334_v6  ;;  %vm4352_vm5 = vweird.f32 %v5104_v48 }
 0xb8c   :  { %vm4353_vm13 = vmor %vm4351_vm6, %vm4352_vm5 }
 0xb8d   :  { %v4344_v53 = vsel %vm4343_vm15, %v5102_v56, %v4340_v54  ;;  %v4347_v30 = vmul.f32 %v5104_v48, %v4346_v43 }
 0xb8e   :  { %v4355_v1 = vmul.f32 %v4344_v53, %v4321_v9 }
 0xb8f   :  { %v4348_v49 = vmul.f32 0.5, %v4347_v30 }
 0xb90   :  { %v4358_v34 = vmul.f32 %v4674_v5, %v4355_v1 }
 0xb91   :  { %v4349_v24 = vsub.f32 1.5, %v4348_v49 }
 0xb92   :  { %v4361_v8 = vadd.f32 %v4675_v21, %v4358_v34 }
 0xb93   :  { %v4350_v41 = vmul.f32 %v5104_v48, %v4349_v24 }
 0xb94   :  { %v4633_v57 = vmul.f32 -1.442695, %v4361_v8 }
 0xb95   :  { %v4354_v20 = vsel %vm4353_vm13, %v5104_v48, %v4350_v41 }
 0xb96   :  { %5105 = vpow2.f32 %v4633_v57  ;;  %v4356_v22 = vmul.f32 %v4354_v20, %v4322_v35 }
 0xb98   :  { %v4359_v32 = vmul.f32 %v4674_v5, %v4356_v22 }
 0xb9a   :  { %v4362_v39 = vadd.f32 %v4675_v21, %v4359_v32 }
 0xb9c   :  { %v5106_v50 = vpop.eup %5105  ;;  %v4634_v33 = vmul.f32 -1.442695, %v4362_v39 }
 0xb9d   :  { %v4369_v23 = vadd.f32 1.0, %v5106_v50 }
 0xb9f   :  { %5107 = vrcp.f32 %v4369_v23  ;;  %v4382_v2 = vand.u32 2147483648, %v4369_v23  ;;  %v4380_v4 = vand.u32 2147483647, %v4369_v23  ;;  %vm4376_vm14 = vweird.f32 %v4369_v23 }
 0xba0   :  { %5109 = vpow2.f32 %v4634_v33 }
 0xba1   :  { %v4383_v60 = vor.u32 1.1754944e-38, %v4382_v2  ;;  %vm4381_vm4 = vcmp.eq.f32.partialorder %v4380_v4, 8.507059e+37 }
 0xba5   :  { %v5108_v17 = vpop.eup %5107 }
 0xba6   :  { %v5110_v31 = vpop.eup %5109  ;;  %v4372_v16 = vmul.f32 %v5108_v17, %v4369_v23  ;;  %vm4377_vm7 = vweird.f32 %v5108_v17 }
 0xba7   :  { %v4370_v18 = vadd.f32 1.0, %v5110_v31  ;;  %vm4378_vm3 = vmor %vm4376_vm14, %vm4377_vm7 }
 0xba8   :  { %v4373_v44 = vsub.f32 1.0, %v4372_v16 }
 0xba9   :  { %5111 = vrcp.f32 %v4370_v18  ;;  %v4397_v9 = vand.u32 2147483648, %v4370_v18  ;;  %v4395_v25 = vand.u32 2147483647, %v4370_v18  ;;  %vm4391_vm8 = vweird.f32 %v4370_v18 }
 0xbaa   :  { %v4374_v10 = vmul.f32 %v5108_v17, %v4373_v44  ;;  %5113 = vrcp.f32 %v5163_v40 }
 0xbab   :  { %v4398_v3 = vor.u32 1.1754944e-38, %v4397_v9  ;;  %vm4396_vm11 = vcmp.eq.f32.partialorder %v4395_v25, 8.507059e+37 }
 0xbac   :  { %v4375_v14 = vadd.f32 %v5108_v17, %v4374_v10 }
 0xbae   :  { %v4379_v47 = vsel %vm4378_vm3, %v5108_v17, %v4375_v14 }
 0xbaf   :  { %v5112_v61 = vpop.eup %5111  ;;  %v4384_v52 = vsel %vm4381_vm4, %v4383_v60, %v4379_v47 }
 0xbb0   :  { %v4401_v42 = vmul.f32 %v4384_v52, %v4361_v8  ;;  %v4387_v29 = vmul.f32 %v5112_v61, %v4370_v18  ;;  %vm4392_vm10 = vweird.f32 %v5112_v61  ;;  %v5114_v15 = vpop.eup %5113 }
 0xbb1   :  { %vm4393_vm9 = vmor %vm4391_vm8, %vm4392_vm10  ;;  %v4456_v19 = vmul.f32 512.0, %v5114_v15 }
 0xbb2   :  { %4635 = vmatmul.msk.f32.vlgmr.msra.gmra.mxu1 %vm2114_vm2, %v4401_v42  ;;  %v4388_v38 = vsub.f32 1.0, %v4387_v29 }
 0xbb3   :  { %v4457_v48 = vsub.f32 1.0, %v4456_v19 }
 0xbb4   :  { %v4389_v26 = vmul.f32 %v5112_v61, %v4388_v38 }
 0xbb5   :  { %v4458_v54 = vmul.f32 %v5114_v15, %v4457_v48 }
 0xbb6   :  { %v4390_v12 = vadd.f32 %v5112_v61, %v4389_v26 }
 0xbb7   :  { %v4459_v58 = vadd.f32 %v5114_v15, %v4458_v54 }
 0xbb8   :  { %v4394_v35 = vsel %vm4393_vm9, %v5112_v61, %v4390_v12 }
 0xbb9   :  { %v4399_v55 = vsel %vm4396_vm11, %v4398_v3, %v4394_v35 }
 0xbba   :  { %v4402_v59 = vmul.f32 %v4399_v55, %v4362_v39 }
 0xbbc   :  { %4636 = vmatmul.msk.f32.gmra.mxu1 %vm2114_vm2, %v4402_v59  ;;  %vm4460_vm2 = vweird.f32 %v5114_v15 }
 0xbbd   :  { %v4461_v5 = vsel %vm4460_vm2, %v5114_v15, %v4459_v58 }
 0xc2f   :  { %v4436_v62 = vpop.f32.mrf.mxu1 }
 0xc30   :  { %v4437_v11 = vadd.f32 %v4676_v13, %v4436_v62 }
 0xc32   :  { %v4442_v7 = vsel %vm1931_vm1, %v4437_v11, 0.0 }
 0xc39   :  { %v4439_v36 = vpop.f32.mrf.mxu1 }
 0xc3a   :  { %v4440_v51 = vadd.f32 %v4676_v13, %v4439_v36 }
 0xc3c   :  { %v4443_v0 = vsel %vm1931_vm1, %v4440_v51, 0.0  ;;  %vm4463_vm1 = vcmask 0  }
 0xc3d   :  { %v4444_v27 = vadd.f32 %v4443_v0, %v4442_v7 }
 0xc3f   :  { %4445 = vadd.xlane.f32.xlu1 %v4444_v27 }
 0xcb2   :  { %v4446_v56 = vpop.xlane.xlu1 %4445 }
 0xcb3   :  { %v4447_v37 = vrot.slane %v4446_v56, 4 }
 0xcb5   :  { %v4448_v6 = vadd.f32 %v4447_v37, %v4446_v56 }
 0xcb7   :  { %v4449_v46 = vrot.slane %v4448_v6, 2 }
 0xcb9   :  { %v4450_v45 = vadd.f32 %v4449_v46, %v4448_v6 }
 0xcbb   :  { %v4451_v63 = vrot.slane %v4450_v45, 1 }
 0xcbd   :  { %v4452_v28 = vadd.f32 %v4451_v63, %v4450_v45 }
 0xcbf   :  { %4641 = vpush %v4452_v28 }
 0xcf0   :  { %s4642_s16 = spop %4641 }
 0xcf1   :  { %v4454_v43 = vstv %s4642_s16 }
 0xcf2   :  { %v4462_v53 = vmul.f32 %v4461_v5, %v4454_v43 }
 0xcf4   :  { %4464 = vst.msk [vmem:[#allocation2] sm:$0x1] %vm4463_vm1, %v4462_v53 }
 0xcf5   :  { %4475 = dma.vmem_to_hbm [thread:$0]  %s4471_s11, 16, %s4473_s15, [#allocation3]  }
 0xcf6   :  { %5156 = dma.done.wait [#allocation3], 16  }
 0xcf7   :  { %5157 = vsyncadd [#allocation3], 4294967280 }
 0xcf8   :  { %4480 = vsyncpa [#allocation3], 1 }

</bundles_post_ra>
